<compile_context>
chip_gen: v7x
topology: tpu7x:2x2x1
jax: 0.10.0
libtpu: 0.0.40
codegen_flags: <defaults>
</compile_context>

<pallas_src>
import functools
import math

import jax
import jax.numpy as jnp
from jax.experimental import pallas as pl
from jax.experimental.pallas import tpu as pltpu

_EPS = 1e-5


def _ln_noaffine(x):
    mu = jnp.mean(x, axis=-1, keepdims=True)
    var = jnp.mean((x - mu) ** 2, axis=-1, keepdims=True)
    return (x - mu) * jax.lax.rsqrt(var + _EPS)


def _vmem_limit_bytes():
    try:
        cap = int(pltpu.get_tpu_info().vmem_capacity_bytes)
    except Exception:
        cap = 64 << 20
    return int(min(max(cap - (16 << 20), 32 << 20), 100 << 20))


def _pick_tile(total, unit_bytes, budget_bytes):
    """Largest tile dividing `total`, <= budget, and (multiple of 8 or == total)."""
    t = min(total, max(1, budget_bytes // max(1, unit_bytes)))
    for cand in range(t, 0, -1):
        if total % cand == 0 and (cand == total or cand % 8 == 0):
            return cand
    return total


# --------------------------------------------------------------------------------------
# Kernel 1: pair -> softmaxed attention for ALL layers at once.
#   sym_hat = LN_noaffine(sym) is layer-independent; the per-layer LN affine is folded
#   into w_all/b_all, so one matmul produces every layer's logits.
# --------------------------------------------------------------------------------------
def pair2att_kernel(sym_ref, wall_ref, ball_ref, att_ref, *, n_layers, n_heads, seq_len,
                    rows_i):
    NL, H, L, TI = n_layers, n_heads, seq_len, rows_i
    sym_hat = _ln_noaffine(sym_ref[0])                                       # (TI*L, Dp) f32
    logits = jnp.dot(sym_hat.astype(jnp.bfloat16), wall_ref[...],
                     preferred_element_type=jnp.float32) + ball_ref[...]     # (TI*L, NL*H)
    logits = jnp.transpose(logits).reshape(NL, H, TI, L)                     # L_j lane-dense
    mx = jnp.max(logits, axis=-1, keepdims=True)
    ex = jnp.exp(logits - mx)
    att_ref[0] = ex / jnp.sum(ex, axis=-1, keepdims=True)                    # exact divide


def _pair2att_all_layers(sym_flat, w_all, b_all, *, n_layers, n_heads, seq_len, d_pair,
                         vmem_limit):
    B = sym_flat.shape[0]
    L, H, NL = seq_len, n_heads, n_layers
    ti = _pick_tile(L, 4 * L * d_pair, 8 << 20)        # i-rows per tile (sym tile <=~8MiB)
    n_tiles = L // ti
    kernel = functools.partial(pair2att_kernel, n_layers=NL, n_heads=H, seq_len=L,
                               rows_i=ti)
    return pl.pallas_call(
        kernel,
        out_shape=jax.ShapeDtypeStruct((B, NL, H, L, L), jnp.float32),
        grid_spec=pltpu.PrefetchScalarGridSpec(
            num_scalar_prefetch=0,
            grid=(B, n_tiles),
            in_specs=[
                pl.BlockSpec((1, ti * L, d_pair), lambda b, t: (b, t, 0)),
                pl.BlockSpec(w_all.shape, lambda b, t: (0, 0)),
                pl.BlockSpec(b_all.shape, lambda b, t: (0, 0)),
            ],
            out_specs=pl.BlockSpec((1, NL, H, ti, L), lambda b, t: (b, 0, 0, t, 0)),
        ),
        compiler_params=pltpu.CompilerParams(
            dimension_semantics=("parallel", "parallel"),
            vmem_limit_bytes=vmem_limit),
        cost_estimate=pl.CostEstimate(
            flops=2 * B * L * L * d_pair * NL * H,
            transcendentals=B * NL * H * L * L,
            bytes_accessed=B * L * L * (d_pair + NL * H) * 4),
    )(sym_flat, w_all, b_all)


# --------------------------------------------------------------------------------------
# Kernel 2: one MSA-update layer, tiled over sequence depth N.
#   msa block (1, L, TN, D); attention (H, L, L) fed per layer (index_map ignores N-tile).
# --------------------------------------------------------------------------------------
def msa_layer_kernel(msa_ref, att_ref, wv_ref, bv_ref, w1_ref, b1_ref, w2_ref, b2_ref,
                     out_ref, *, n_heads):
    H = n_heads
    m = msa_ref[0]                                      # (L, TN, D) f32
    L, TN, D = m.shape
    dh = D // H
    m2 = m.reshape(L * TN, D)

    # msa2value (LayerNorm affine pre-folded into wv/bv); bf16 MXU operands, f32 accum.
    v = jnp.dot(_ln_noaffine(m2).astype(jnp.bfloat16), wv_ref[...],
                preferred_element_type=jnp.float32) + bv_ref[...]            # (L*TN, D)

    # Attention apply: single relayout -> one batched MXU contraction -> relayout back.
    v = jnp.transpose(v.reshape(L, TN, H, dh), (2, 0, 1, 3)).reshape(H, L, TN * dh)
    att = att_ref[0, 0]                                                      # (H, L, L) f32
    upd = jnp.einsum('hij,hjd->hid', att.astype(jnp.bfloat16),
                     v.astype(jnp.bfloat16),
                     preferred_element_type=jnp.float32)                     # (H, L, TN*dh)
    upd = jnp.transpose(upd.reshape(H, L, TN, dh), (1, 2, 0, 3)).reshape(L * TN, D)

    # Residual + feed-forward (LN affine folded into w1/b1) + residual.
    x = m2 + upd
    h1 = jnp.maximum(jnp.dot(_ln_noaffine(x).astype(jnp.bfloat16), w1_ref[...],
                             preferred_element_type=jnp.float32) + b1_ref[...], 0.0)
    y = jnp.dot(h1.astype(jnp.bfloat16), w2_ref[...],
                preferred_element_type=jnp.float32) + b2_ref[...]
    out_ref[0] = (y + x).reshape(L, TN, D)


def _msa_layer_forward(msa_lnd, att_all, layer_idx, wv, bv, w1, b1, w2, b2, *,
                       n_heads, tn, vmem_limit):
    B, L, N, D = msa_lnd.shape
    H = att_all.shape[2]
    n_tiles = N // tn

    kernel = functools.partial(msa_layer_kernel, n_heads=n_heads)

    def wspec(a):
        return pl.BlockSpec(a.shape, lambda b, t: (0, 0))

    flops = B * (6 * L * N * D * D + 2 * L * L * N * D)
    bytes_accessed = 2 * B * L * N * D * 4 + B * H * L * L * 4 + 3 * D * D * 2 + 3 * D * 4

    return pl.pallas_call(
        kernel,
        out_shape=jax.ShapeDtypeStruct((B, L, N, D), jnp.float32),
        grid_spec=pltpu.PrefetchScalarGridSpec(
            num_scalar_prefetch=0,
            grid=(B, n_tiles),
            in_specs=[
                pl.BlockSpec((1, L, tn, D), lambda b, t: (b, 0, t, 0)),
                pl.BlockSpec((1, 1, H, L, L),
                             lambda b, t, li=layer_idx: (b, li, 0, 0, 0)),
                wspec(wv), wspec(bv), wspec(w1), wspec(b1), wspec(w2), wspec(b2),
            ],
            out_specs=pl.BlockSpec((1, L, tn, D), lambda b, t: (b, 0, t, 0)),
        ),
        compiler_params=pltpu.CompilerParams(
            dimension_semantics=("parallel", "parallel"),
            vmem_limit_bytes=vmem_limit),
        cost_estimate=pl.CostEstimate(flops=flops, transcendentals=2 * B * L * N,
                                      bytes_accessed=bytes_accessed),
        input_output_aliases={0: 0},                    # update msa in place in HBM
    )(msa_lnd, att_all, wv, bv, w1, b1, w2, b2)


# --------------------------------------------------------------------------------------
# Full module forward
# --------------------------------------------------------------------------------------
def msa_update_with_pair(msa, pair, layer_params, *, n_heads):
    B, N, L, D = msa.shape
    Dp = pair.shape[-1]
    n_layers = len(layer_params)
    vmem_limit = _vmem_limit_bytes()

    # Layer-independent pair path: symmetrize once; per-layer LN affine folded into the
    # pair->heads projection so one kernel produces every layer's attention maps.
    sym_flat = (0.5 * (pair + jnp.transpose(pair, (0, 2, 1, 3)))).reshape(B, L * L, Dp)
    w_all = jnp.concatenate(
        [p["ln_pair_g"].reshape(-1, 1) * p["w_pair"] for p in layer_params],
        axis=1).astype(jnp.bfloat16)                                   # (Dp, n_layers*H)
    b_all = jnp.concatenate(
        [p["b_pair"] + p["ln_pair_b"] @ p["w_pair"] for p in layer_params], axis=1)
    att_all = _pair2att_all_layers(sym_flat, w_all, b_all, n_layers=n_layers,
                                   n_heads=n_heads, seq_len=L, d_pair=Dp,
                                   vmem_limit=vmem_limit)              # (B, NL, H, L, L)

    # MSA path, position-major (B, L, N, D), N-tiled.
    x = jnp.transpose(msa, (0, 2, 1, 3))
    tn = _pick_tile(N, 4 * L * D, 4 << 20)
    for li, p in enumerate(layer_params):
        wv = (p["ln_msa_g"].reshape(-1, 1) * p["w_val"]).astype(jnp.bfloat16)
        bv = p["b_val"] + p["ln_msa_b"] @ p["w_val"]
        w1 = (p["ln_ff_g"].reshape(-1, 1) * p["w_ff1"]).astype(jnp.bfloat16)
        b1 = p["b_ff1"] + p["ln_ff_b"] @ p["w_ff1"]
        w2 = p["w_ff2"].astype(jnp.bfloat16)
        b2 = p["b_ff2"]
        x = _msa_layer_forward(x, att_all, li, wv, bv, w1, b1, w2, b2,
                               n_heads=n_heads, tn=tn, vmem_limit=vmem_limit)
    return jnp.transpose(x, (0, 2, 1, 3))


# ---------------- deterministic parameter init (synthetic, no checkpoint) ----------------
def init_layer_params(key, d_msa, d_pair, n_heads):
    ks = jax.random.split(key, 12)
    nrm = lambda k, shape, s: s * jax.random.normal(k, shape, jnp.float32)
    return {
        "ln_pair_g": 1.0 + 0.1 * nrm(ks[0], (1, d_pair), 1.0),
        "ln_pair_b": 0.1 * nrm(ks[1], (1, d_pair), 1.0),
        "w_pair":    nrm(ks[2], (d_pair, n_heads), 1.0 / math.sqrt(d_pair)),
        "b_pair":    0.1 * nrm(ks[3], (1, n_heads), 1.0),
        "ln_msa_g":  1.0 + 0.1 * nrm(ks[4], (1, d_msa), 1.0),
        "ln_msa_b":  0.1 * nrm(ks[5], (1, d_msa), 1.0),
        "w_val":     nrm(ks[6], (d_msa, d_msa), 1.0 / math.sqrt(d_msa)),
        "b_val":     0.1 * nrm(ks[7], (1, d_msa), 1.0),
        "ln_ff_g":   1.0 + 0.1 * nrm(ks[8], (1, d_msa), 1.0),
        "ln_ff_b":   0.1 * nrm(ks[9], (1, d_msa), 1.0),
        "w_ff1":     nrm(ks[10], (d_msa, d_msa), 1.0 / math.sqrt(d_msa)),
        "b_ff1":     jnp.zeros((1, d_msa), jnp.float32),
        "w_ff2":     nrm(ks[11], (d_msa, d_msa), 1.0 / math.sqrt(d_msa)),
        "b_ff2":     jnp.zeros((1, d_msa), jnp.float32),
    }


# ---------------- pure-JAX f32 reference (exact PyTorch-spec math) ----------------
def _ln_ref(x, g, b):
    mu = jnp.mean(x, -1, keepdims=True)
    var = jnp.mean((x - mu) ** 2, -1, keepdims=True)
    return (x - mu) * jax.lax.rsqrt(var + _EPS) * g + b


def reference_layer(msa, pair, p, H):
    B, N, L, D = msa.shape
    dh = D // H
    value = _ln_ref(msa, p["ln_msa_g"], p["ln_msa_b"]) @ p["w_val"] + p["b_val"]
    value = value.reshape(B, N, L, H, dh).transpose(0, 1, 3, 2, 4)            # b n h j d
    sym = 0.5 * (pair + jnp.transpose(pair, (0, 2, 1, 3)))
    logits = _ln_ref(sym, p["ln_pair_g"], p["ln_pair_b"]) @ p["w_pair"] + p["b_pair"]
    att = jax.nn.softmax(jnp.transpose(logits, (0, 3, 1, 2)), axis=-1)        # b h i j
    upd = jnp.einsum('bhij,bnhjd->bnhid', att, value)
    upd = jnp.transpose(upd, (0, 1, 3, 2, 4)).reshape(B, N, L, D)
    x = msa + upd
    h1 = jnp.maximum(_ln_ref(x, p["ln_ff_g"], p["ln_ff_b"]) @ p["w_ff1"] + p["b_ff1"], 0.0)
    return h1 @ p["w_ff2"] + p["b_ff2"] + x


if __name__ == "__main__":
    B, N, L = 2, 4, 8                    # batch, MSA depth, sequence length
    d_msa, d_pair, n_heads = 32, 16, 4   # small demo; production d_msa>=128 is lane-dense
    n_encoder_layers = 4

    key = jax.random.PRNGKey(0)
    k_msa, k_pair, k_par = jax.random.split(key, 3)
    msa = jax.random.normal(k_msa, (B, N, L, d_msa), jnp.float32)
    pair = jax.random.normal(k_pair, (B, L, L, d_pair), jnp.float32)
    layer_keys = jax.random.split(k_par, n_encoder_layers)
    params = [init_layer_params(k, d_msa, d_pair, n_heads) for k in layer_keys]

    fwd = jax.jit(functools.partial(msa_update_with_pair, n_heads=n_heads))
    out = jax.block_until_ready(fwd(msa, pair, params))

    # Sanity check against the exact f32 reference; tolerance accounts for bf16 MXU
    # operands (f32 accumulation) over 4 residual layers.
    ref = msa
    for p in params:
        ref = reference_layer(ref, pair, p, n_heads)
    err = jnp.abs(out - ref)
    tol = 5e-2 + 2e-2 * jnp.abs(ref)
    assert bool(jnp.all(err <= tol)), f"mismatch vs reference: max_err={float(jnp.max(err))}"

    print("KERNEL_OK")
</pallas_src>

<mosaic_0001>
module attributes {stable_mosaic.version = 11 : i64} {
  func.func @pair2att_kernel(%arg0: i32, %arg1: i32, %arg2: memref<1x64x16xf32, #tpu.memory_space<vmem>>, %arg3: memref<16x16xbf16, #tpu.memory_space<vmem>>, %arg4: memref<1x16xf32, #tpu.memory_space<vmem>>, %arg5: memref<1x4x4x8x8xf32, #tpu.memory_space<vmem>>) attributes {dimension_semantics = [#tpu.dimension_semantics<parallel>, #tpu.dimension_semantics<parallel>], iteration_bounds = array<i64: 2, 1>, scalar_prefetch = 0 : i64, scratch_operands = 0 : i64, tpu.core_type = #tpu.core_type<tc>, window_params = [{transform_indices = @transform_0, window_bounds = array<i64: 1, 64, 16>}, {pipeline_mode = #tpu.pipeline_mode<synchronous>, transform_indices = @transform_1, window_bounds = array<i64: 16, 16>}, {pipeline_mode = #tpu.pipeline_mode<synchronous>, transform_indices = @transform_2, window_bounds = array<i64: 1, 16>}, {transform_indices = @transform_3, window_bounds = array<i64: 1, 4, 4, 8, 8>}]} {
    %c0 = arith.constant 0 : index
    %c0_0 = arith.constant 0 : index
    %c0_1 = arith.constant 0 : index
    %0 = vector.load %arg2[%c0, %c0_0, %c0_1] : memref<1x64x16xf32, #tpu.memory_space<vmem>>, vector<1x64x16xf32>
    %1 = vector.shape_cast %0 : vector<1x64x16xf32> to vector<64x16xf32>
    %cst = arith.constant dense<0.000000e+00> : vector<64xf32>
    %2 = vector.multi_reduction <add>, %1, %cst [1] : vector<64x16xf32> to vector<64xf32>
    %3 = vector.shape_cast %2 : vector<64xf32> to vector<64x1xf32>
    %cst_2 = arith.constant 1.600000e+01 : f32
    %4 = vector.broadcast %cst_2 : f32 to vector<64x1xf32>
    %5 = arith.divf %3, %4 : vector<64x1xf32>
    %6 = vector.broadcast %5 : vector<64x1xf32> to vector<64x16xf32>
    %7 = arith.subf %1, %6 : vector<64x16xf32>
    %8 = arith.mulf %7, %7 : vector<64x16xf32>
    %cst_3 = arith.constant dense<0.000000e+00> : vector<64xf32>
    %9 = vector.multi_reduction <add>, %8, %cst_3 [1] : vector<64x16xf32> to vector<64xf32>
    %10 = vector.shape_cast %9 : vector<64xf32> to vector<64x1xf32>
    %cst_4 = arith.constant 1.600000e+01 : f32
    %11 = vector.broadcast %cst_4 : f32 to vector<64x1xf32>
    %12 = arith.divf %10, %11 : vector<64x1xf32>
    %13 = vector.broadcast %5 : vector<64x1xf32> to vector<64x16xf32>
    %14 = arith.subf %1, %13 : vector<64x16xf32>
    %cst_5 = arith.constant 9.99999974E-6 : f32
    %15 = vector.broadcast %cst_5 : f32 to vector<64x1xf32>
    %16 = arith.addf %12, %15 : vector<64x1xf32>
    %17 = math.rsqrt %16 : vector<64x1xf32>
    %18 = vector.broadcast %17 : vector<64x1xf32> to vector<64x16xf32>
    %19 = arith.mulf %14, %18 : vector<64x16xf32>
    %20 = arith.truncf %19 : vector<64x16xf32> to vector<64x16xbf16>
    %c0_6 = arith.constant 0 : index
    %c0_7 = arith.constant 0 : index
    %21 = vector.load %arg3[%c0_6, %c0_7] : memref<16x16xbf16, #tpu.memory_space<vmem>>, vector<16x16xbf16>
    %cst_8 = arith.constant dense<0.000000e+00> : vector<64x16xf32>
    %22 = tpu.matmul %20, %21, %cst_8 {dimension_numbers = #tpu.dot_dimension_numbers<[1], [0], [0], [1], [0, 0, 1, 1], [], []>} : vector<64x16xbf16>, vector<16x16xbf16>, vector<64x16xf32> -> vector<64x16xf32>
    %c0_9 = arith.constant 0 : index
    %c0_10 = arith.constant 0 : index
    %23 = vector.load %arg4[%c0_9, %c0_10] : memref<1x16xf32, #tpu.memory_space<vmem>>, vector<1x16xf32>
    %24 = vector.broadcast %23 : vector<1x16xf32> to vector<64x16xf32>
    %25 = arith.addf %22, %24 : vector<64x16xf32>
    %26 = tpu.transpose %25, [1, 0] : vector<64x16xf32> -> vector<16x64xf32>
    %27 = vector.shape_cast %26 : vector<16x64xf32> to vector<4x4x8x8xf32>
    %cst_11 = arith.constant dense<0xFF800000> : vector<4x4x8xf32>
    %28 = vector.multi_reduction <maximumf>, %27, %cst_11 [3] : vector<4x4x8x8xf32> to vector<4x4x8xf32>
    %29 = vector.shape_cast %28 : vector<4x4x8xf32> to vector<4x4x8x1xf32>
    %30 = vector.broadcast %29 : vector<4x4x8x1xf32> to vector<4x4x8x8xf32>
    %31 = arith.subf %27, %30 : vector<4x4x8x8xf32>
    %32 = math.exp %31 : vector<4x4x8x8xf32>
    %cst_12 = arith.constant dense<0.000000e+00> : vector<4x4x8xf32>
    %33 = vector.multi_reduction <add>, %32, %cst_12 [3] : vector<4x4x8x8xf32> to vector<4x4x8xf32>
    %34 = vector.shape_cast %33 : vector<4x4x8xf32> to vector<4x4x8x1xf32>
    %35 = vector.broadcast %34 : vector<4x4x8x1xf32> to vector<4x4x8x8xf32>
    %36 = arith.divf %32, %35 : vector<4x4x8x8xf32>
    %c0_13 = arith.constant 0 : index
    %c0_14 = arith.constant 0 : index
    %c0_15 = arith.constant 0 : index
    %c0_16 = arith.constant 0 : index
    %c0_17 = arith.constant 0 : index
    %37 = vector.load %arg5[%c0_13, %c0_14, %c0_15, %c0_16, %c0_17] : memref<1x4x4x8x8xf32, #tpu.memory_space<vmem>>, vector<1x4x4x8x8xf32>
    %38 = vector.shape_cast %37 : vector<1x4x4x8x8xf32> to vector<4x4x8x8xf32>
    %39 = vector.shape_cast %36 : vector<4x4x8x8xf32> to vector<1x4x4x8x8xf32>
    tpu.vector_store %arg5[%c0_13, %c0_14, %c0_15, %c0_16, %c0_17], %39 {strides = array<i32>} : memref<1x4x4x8x8xf32, #tpu.memory_space<vmem>>, vector<1x4x4x8x8xf32>,
    return
  }
  func.func @transform_0(%arg0: i32, %arg1: i32) -> (i32, i32, i32) {
    %c0_i32 = arith.constant 0 : i32
    %c0_i32_0 = arith.constant 0 : i32
    return %arg0, %arg1, %c0_i32 : i32, i32, i32
  }
  func.func @transform_1(%arg0: i32, %arg1: i32) -> (i32, i32) {
    %c0_i32 = arith.constant 0 : i32
    %c0_i32_0 = arith.constant 0 : i32
    %c0_i32_1 = arith.constant 0 : i32
    return %c0_i32, %c0_i32_0 : i32, i32
  }
  func.func @transform_2(%arg0: i32, %arg1: i32) -> (i32, i32) {
    %c0_i32 = arith.constant 0 : i32
    %c0_i32_0 = arith.constant 0 : i32
    %c0_i32_1 = arith.constant 0 : i32
    return %c0_i32, %c0_i32_0 : i32, i32
  }
  func.func @transform_3(%arg0: i32, %arg1: i32) -> (i32, i32, i32, i32, i32) {
    %c0_i32 = arith.constant 0 : i32
    %c0_i32_0 = arith.constant 0 : i32
    %c0_i32_1 = arith.constant 0 : i32
    %c0_i32_2 = arith.constant 0 : i32
    return %arg0, %c0_i32, %c0_i32_0, %arg1, %c0_i32_1 : i32, i32, i32, i32, i32
  }
}

module attributes {stable_mosaic.version = 11 : i64} {
  func.func @msa_layer_kernel(%arg0: i32, %arg1: i32, %arg2: memref<1x8x4x32xf32, #tpu.memory_space<vmem>>, %arg3: memref<1x1x4x8x8xf32, #tpu.memory_space<vmem>>, %arg4: memref<32x32xbf16, #tpu.memory_space<vmem>>, %arg5: memref<1x32xf32, #tpu.memory_space<vmem>>, %arg6: memref<32x32xbf16, #tpu.memory_space<vmem>>, %arg7: memref<1x32xf32, #tpu.memory_space<vmem>>, %arg8: memref<32x32xbf16, #tpu.memory_space<vmem>>, %arg9: memref<1x32xf32, #tpu.memory_space<vmem>>, %arg10: memref<1x8x4x32xf32, #tpu.memory_space<vmem>>) attributes {dimension_semantics = [#tpu.dimension_semantics<parallel>, #tpu.dimension_semantics<parallel>], iteration_bounds = array<i64: 2, 1>, scalar_prefetch = 0 : i64, scratch_operands = 0 : i64, tpu.core_type = #tpu.core_type<tc>, window_params = [{transform_indices = @transform_0, window_bounds = array<i64: 1, 8, 4, 32>}, {transform_indices = @transform_1, window_bounds = array<i64: 1, 1, 4, 8, 8>}, {pipeline_mode = #tpu.pipeline_mode<synchronous>, transform_indices = @transform_2, window_bounds = array<i64: 32, 32>}, {pipeline_mode = #tpu.pipeline_mode<synchronous>, transform_indices = @transform_3, window_bounds = array<i64: 1, 32>}, {pipeline_mode = #tpu.pipeline_mode<synchronous>, transform_indices = @transform_4, window_bounds = array<i64: 32, 32>}, {pipeline_mode = #tpu.pipeline_mode<synchronous>, transform_indices = @transform_5, window_bounds = array<i64: 1, 32>}, {pipeline_mode = #tpu.pipeline_mode<synchronous>, transform_indices = @transform_6, window_bounds = array<i64: 32, 32>}, {pipeline_mode = #tpu.pipeline_mode<synchronous>, transform_indices = @transform_7, window_bounds = array<i64: 1, 32>}, {transform_indices = @transform_8, window_bounds = array<i64: 1, 8, 4, 32>}]} {
    %c0 = arith.constant 0 : index
    %c0_0 = arith.constant 0 : index
    %c0_1 = arith.constant 0 : index
    %c0_2 = arith.constant 0 : index
    %0 = vector.load %arg2[%c0, %c0_0, %c0_1, %c0_2] : memref<1x8x4x32xf32, #tpu.memory_space<vmem>>, vector<1x8x4x32xf32>
    %1 = vector.shape_cast %0 : vector<1x8x4x32xf32> to vector<8x4x32xf32>
    %2 = vector.shape_cast %1 : vector<8x4x32xf32> to vector<32x32xf32>
    %cst = arith.constant dense<0.000000e+00> : vector<32xf32>
    %3 = vector.multi_reduction <add>, %2, %cst [1] : vector<32x32xf32> to vector<32xf32>
    %4 = vector.shape_cast %3 : vector<32xf32> to vector<32x1xf32>
    %cst_3 = arith.constant 3.200000e+01 : f32
    %5 = vector.broadcast %cst_3 : f32 to vector<32x1xf32>
    %6 = arith.divf %4, %5 : vector<32x1xf32>
    %7 = vector.broadcast %6 : vector<32x1xf32> to vector<32x32xf32>
    %8 = arith.subf %2, %7 : vector<32x32xf32>
    %9 = arith.mulf %8, %8 : vector<32x32xf32>
    %cst_4 = arith.constant dense<0.000000e+00> : vector<32xf32>
    %10 = vector.multi_reduction <add>, %9, %cst_4 [1] : vector<32x32xf32> to vector<32xf32>
    %11 = vector.shape_cast %10 : vector<32xf32> to vector<32x1xf32>
    %cst_5 = arith.constant 3.200000e+01 : f32
    %12 = vector.broadcast %cst_5 : f32 to vector<32x1xf32>
    %13 = arith.divf %11, %12 : vector<32x1xf32>
    %14 = vector.broadcast %6 : vector<32x1xf32> to vector<32x32xf32>
    %15 = arith.subf %2, %14 : vector<32x32xf32>
    %cst_6 = arith.constant 9.99999974E-6 : f32
    %16 = vector.broadcast %cst_6 : f32 to vector<32x1xf32>
    %17 = arith.addf %13, %16 : vector<32x1xf32>
    %18 = math.rsqrt %17 : vector<32x1xf32>
    %19 = vector.broadcast %18 : vector<32x1xf32> to vector<32x32xf32>
    %20 = arith.mulf %15, %19 : vector<32x32xf32>
    %21 = arith.truncf %20 : vector<32x32xf32> to vector<32x32xbf16>
    %c0_7 = arith.constant 0 : index
    %c0_8 = arith.constant 0 : index
    %22 = vector.load %arg4[%c0_7, %c0_8] : memref<32x32xbf16, #tpu.memory_space<vmem>>, vector<32x32xbf16>
    %cst_9 = arith.constant dense<0.000000e+00> : vector<32x32xf32>
    %23 = tpu.matmul %21, %22, %cst_9 {dimension_numbers = #tpu.dot_dimension_numbers<[1], [0], [0], [1], [0, 0, 1, 1], [], []>} : vector<32x32xbf16>, vector<32x32xbf16>, vector<32x32xf32> -> vector<32x32xf32>
    %c0_10 = arith.constant 0 : index
    %c0_11 = arith.constant 0 : index
    %24 = vector.load %arg5[%c0_10, %c0_11] : memref<1x32xf32, #tpu.memory_space<vmem>>, vector<1x32xf32>
    %25 = vector.broadcast %24 : vector<1x32xf32> to vector<32x32xf32>
    %26 = arith.addf %23, %25 : vector<32x32xf32>
    %27 = vector.shape_cast %26 : vector<32x32xf32> to vector<8x4x4x8xf32>
    %28 = tpu.transpose %27, [2, 0, 1, 3] : vector<8x4x4x8xf32> -> vector<4x8x4x8xf32>
    %29 = vector.shape_cast %28 : vector<4x8x4x8xf32> to vector<4x8x32xf32>
    %c0_12 = arith.constant 0 : index
    %c0_13 = arith.constant 0 : index
    %c0_14 = arith.constant 0 : index
    %c0_15 = arith.constant 0 : index
    %c0_16 = arith.constant 0 : index
    %30 = vector.load %arg3[%c0_12, %c0_13, %c0_14, %c0_15, %c0_16] : memref<1x1x4x8x8xf32, #tpu.memory_space<vmem>>, vector<1x1x4x8x8xf32>
    %31 = vector.shape_cast %30 : vector<1x1x4x8x8xf32> to vector<4x8x8xf32>
    %32 = arith.truncf %31 : vector<4x8x8xf32> to vector<4x8x8xbf16>
    %33 = arith.truncf %29 : vector<4x8x32xf32> to vector<4x8x32xbf16>
    "tpu.trace_start"() <{level = 10 : i32, message = "hij,hjd->hid"}> : () -> ()
    %cst_17 = arith.constant dense<0.000000e+00> : vector<4x8x32xf32>
    %34 = tpu.matmul %32, %33, %cst_17 {dimension_numbers = #tpu.dot_dimension_numbers<[2], [1], [1], [2], [0, 0, 0, 1, 1, 2], [0], [0]>} : vector<4x8x8xbf16>, vector<4x8x32xbf16>, vector<4x8x32xf32> -> vector<4x8x32xf32>
    "tpu.trace_stop"() : () -> ()
    %35 = vector.shape_cast %34 : vector<4x8x32xf32> to vector<4x8x4x8xf32>
    %36 = tpu.transpose %35, [1, 2, 0, 3] : vector<4x8x4x8xf32> -> vector<8x4x4x8xf32>
    %37 = vector.shape_cast %36 : vector<8x4x4x8xf32> to vector<32x32xf32>
    %38 = arith.addf %2, %37 : vector<32x32xf32>
    %cst_18 = arith.constant dense<0.000000e+00> : vector<32xf32>
    %39 = vector.multi_reduction <add>, %38, %cst_18 [1] : vector<32x32xf32> to vector<32xf32>
    %40 = vector.shape_cast %39 : vector<32xf32> to vector<32x1xf32>
    %cst_19 = arith.constant 3.200000e+01 : f32
    %41 = vector.broadcast %cst_19 : f32 to vector<32x1xf32>
    %42 = arith.divf %40, %41 : vector<32x1xf32>
    %43 = vector.broadcast %42 : vector<32x1xf32> to vector<32x32xf32>
    %44 = arith.subf %38, %43 : vector<32x32xf32>
    %45 = arith.mulf %44, %44 : vector<32x32xf32>
    %cst_20 = arith.constant dense<0.000000e+00> : vector<32xf32>
    %46 = vector.multi_reduction <add>, %45, %cst_20 [1] : vector<32x32xf32> to vector<32xf32>
    %47 = vector.shape_cast %46 : vector<32xf32> to vector<32x1xf32>
    %cst_21 = arith.constant 3.200000e+01 : f32
    %48 = vector.broadcast %cst_21 : f32 to vector<32x1xf32>
    %49 = arith.divf %47, %48 : vector<32x1xf32>
    %50 = vector.broadcast %42 : vector<32x1xf32> to vector<32x32xf32>
    %51 = arith.subf %38, %50 : vector<32x32xf32>
    %cst_22 = arith.constant 9.99999974E-6 : f32
    %52 = vector.broadcast %cst_22 : f32 to vector<32x1xf32>
    %53 = arith.addf %49, %52 : vector<32x1xf32>
    %54 = math.rsqrt %53 : vector<32x1xf32>
    %55 = vector.broadcast %54 : vector<32x1xf32> to vector<32x32xf32>
    %56 = arith.mulf %51, %55 : vector<32x32xf32>
    %57 = arith.truncf %56 : vector<32x32xf32> to vector<32x32xbf16>
    %c0_23 = arith.constant 0 : index
    %c0_24 = arith.constant 0 : index
    %58 = vector.load %arg6[%c0_23, %c0_24] : memref<32x32xbf16, #tpu.memory_space<vmem>>, vector<32x32xbf16>
    %cst_25 = arith.constant dense<0.000000e+00> : vector<32x32xf32>
    %59 = tpu.matmul %57, %58, %cst_25 {dimension_numbers = #tpu.dot_dimension_numbers<[1], [0], [0], [1], [0, 0, 1, 1], [], []>} : vector<32x32xbf16>, vector<32x32xbf16>, vector<32x32xf32> -> vector<32x32xf32>
    %c0_26 = arith.constant 0 : index
    %c0_27 = arith.constant 0 : index
    %60 = vector.load %arg7[%c0_26, %c0_27] : memref<1x32xf32, #tpu.memory_space<vmem>>, vector<1x32xf32>
    %61 = vector.broadcast %60 : vector<1x32xf32> to vector<32x32xf32>
    %62 = arith.addf %59, %61 : vector<32x32xf32>
    %cst_28 = arith.constant 0.000000e+00 : f32
    %63 = vector.broadcast %cst_28 : f32 to vector<32x32xf32>
    %64 = arith.maximumf %62, %63 : vector<32x32xf32>
    %65 = arith.truncf %64 : vector<32x32xf32> to vector<32x32xbf16>
    %c0_29 = arith.constant 0 : index
    %c0_30 = arith.constant 0 : index
    %66 = vector.load %arg8[%c0_29, %c0_30] : memref<32x32xbf16, #tpu.memory_space<vmem>>, vector<32x32xbf16>
    %cst_31 = arith.constant dense<0.000000e+00> : vector<32x32xf32>
    %67 = tpu.matmul %65, %66, %cst_31 {dimension_numbers = #tpu.dot_dimension_numbers<[1], [0], [0], [1], [0, 0, 1, 1], [], []>} : vector<32x32xbf16>, vector<32x32xbf16>, vector<32x32xf32> -> vector<32x32xf32>
    %c0_32 = arith.constant 0 : index
    %c0_33 = arith.constant 0 : index
    %68 = vector.load %arg9[%c0_32, %c0_33] : memref<1x32xf32, #tpu.memory_space<vmem>>, vector<1x32xf32>
    %69 = vector.broadcast %68 : vector<1x32xf32> to vector<32x32xf32>
    %70 = arith.addf %67, %69 : vector<32x32xf32>
    %71 = arith.addf %70, %38 : vector<32x32xf32>
    %72 = vector.shape_cast %71 : vector<32x32xf32> to vector<8x4x32xf32>
    %c0_34 = arith.constant 0 : index
    %c0_35 = arith.constant 0 : index
    %c0_36 = arith.constant 0 : index
    %c0_37 = arith.constant 0 : index
    %73 = vector.load %arg10[%c0_34, %c0_35, %c0_36, %c0_37] : memref<1x8x4x32xf32, #tpu.memory_space<vmem>>, vector<1x8x4x32xf32>
    %74 = vector.shape_cast %73 : vector<1x8x4x32xf32> to vector<8x4x32xf32>
    %75 = vector.shape_cast %72 : vector<8x4x32xf32> to vector<1x8x4x32xf32>
    tpu.vector_store %arg10[%c0_34, %c0_35, %c0_36, %c0_37], %75 {strides = array<i32>} : memref<1x8x4x32xf32, #tpu.memory_space<vmem>>, vector<1x8x4x32xf32>,
    return
  }
  func.func @transform_0(%arg0: i32, %arg1: i32) -> (i32, i32, i32, i32) {
    %c0_i32 = arith.constant 0 : i32
    %c0_i32_0 = arith.constant 0 : i32
    %c0_i32_1 = arith.constant 0 : i32
    return %arg0, %c0_i32, %arg1, %c0_i32_0 : i32, i32, i32, i32
  }
  func.func @transform_1(%arg0: i32, %arg1: i32) -> (i32, i32, i32, i32, i32) {
    %c0_i32 = arith.constant 0 : i32
    %c0_i32_0 = arith.constant 0 : i32
    %c0_i32_1 = arith.constant 0 : i32
    %c0_i32_2 = arith.constant 0 : i32
    %c0_i32_3 = arith.constant 0 : i32
    return %arg0, %c0_i32, %c0_i32_0, %c0_i32_1, %c0_i32_2 : i32, i32, i32, i32, i32
  }
  func.func @transform_2(%arg0: i32, %arg1: i32) -> (i32, i32) {
    %c0_i32 = arith.constant 0 : i32
    %c0_i32_0 = arith.constant 0 : i32
    %c0_i32_1 = arith.constant 0 : i32
    return %c0_i32, %c0_i32_0 : i32, i32
  }
  func.func @transform_3(%arg0: i32, %arg1: i32) -> (i32, i32) {
    %c0_i32 = arith.constant 0 : i32
    %c0_i32_0 = arith.constant 0 : i32
    %c0_i32_1 = arith.constant 0 : i32
    return %c0_i32, %c0_i32_0 : i32, i32
  }
  func.func @transform_4(%arg0: i32, %arg1: i32) -> (i32, i32) {
    %c0_i32 = arith.constant 0 : i32
    %c0_i32_0 = arith.constant 0 : i32
    %c0_i32_1 = arith.constant 0 : i32
    return %c0_i32, %c0_i32_0 : i32, i32
  }
  func.func @transform_5(%arg0: i32, %arg1: i32) -> (i32, i32) {
    %c0_i32 = arith.constant 0 : i32
    %c0_i32_0 = arith.constant 0 : i32
    %c0_i32_1 = arith.constant 0 : i32
    return %c0_i32, %c0_i32_0 : i32, i32
  }
  func.func @transform_6(%arg0: i32, %arg1: i32) -> (i32, i32) {
    %c0_i32 = arith.constant 0 : i32
    %c0_i32_0 = arith.constant 0 : i32
    %c0_i32_1 = arith.constant 0 : i32
    return %c0_i32, %c0_i32_0 : i32, i32
  }
  func.func @transform_7(%arg0: i32, %arg1: i32) -> (i32, i32) {
    %c0_i32 = arith.constant 0 : i32
    %c0_i32_0 = arith.constant 0 : i32
    %c0_i32_1 = arith.constant 0 : i32
    return %c0_i32, %c0_i32_0 : i32, i32
  }
  func.func @transform_8(%arg0: i32, %arg1: i32) -> (i32, i32, i32, i32) {
    %c0_i32 = arith.constant 0 : i32
    %c0_i32_0 = arith.constant 0 : i32
    %c0_i32_1 = arith.constant 0 : i32
    return %arg0, %c0_i32, %arg1, %c0_i32_0 : i32, i32, i32, i32
  }
}

module attributes {stable_mosaic.version = 11 : i64} {
  func.func @msa_layer_kernel(%arg0: i32, %arg1: i32, %arg2: memref<1x8x4x32xf32, #tpu.memory_space<vmem>>, %arg3: memref<1x1x4x8x8xf32, #tpu.memory_space<vmem>>, %arg4: memref<32x32xbf16, #tpu.memory_space<vmem>>, %arg5: memref<1x32xf32, #tpu.memory_space<vmem>>, %arg6: memref<32x32xbf16, #tpu.memory_space<vmem>>, %arg7: memref<1x32xf32, #tpu.memory_space<vmem>>, %arg8: memref<32x32xbf16, #tpu.memory_space<vmem>>, %arg9: memref<1x32xf32, #tpu.memory_space<vmem>>, %arg10: memref<1x8x4x32xf32, #tpu.memory_space<vmem>>) attributes {dimension_semantics = [#tpu.dimension_semantics<parallel>, #tpu.dimension_semantics<parallel>], iteration_bounds = array<i64: 2, 1>, scalar_prefetch = 0 : i64, scratch_operands = 0 : i64, tpu.core_type = #tpu.core_type<tc>, window_params = [{transform_indices = @transform_0, window_bounds = array<i64: 1, 8, 4, 32>}, {transform_indices = @transform_1, window_bounds = array<i64: 1, 1, 4, 8, 8>}, {pipeline_mode = #tpu.pipeline_mode<synchronous>, transform_indices = @transform_2, window_bounds = array<i64: 32, 32>}, {pipeline_mode = #tpu.pipeline_mode<synchronous>, transform_indices = @transform_3, window_bounds = array<i64: 1, 32>}, {pipeline_mode = #tpu.pipeline_mode<synchronous>, transform_indices = @transform_4, window_bounds = array<i64: 32, 32>}, {pipeline_mode = #tpu.pipeline_mode<synchronous>, transform_indices = @transform_5, window_bounds = array<i64: 1, 32>}, {pipeline_mode = #tpu.pipeline_mode<synchronous>, transform_indices = @transform_6, window_bounds = array<i64: 32, 32>}, {pipeline_mode = #tpu.pipeline_mode<synchronous>, transform_indices = @transform_7, window_bounds = array<i64: 1, 32>}, {transform_indices = @transform_8, window_bounds = array<i64: 1, 8, 4, 32>}]} {
    %c0 = arith.constant 0 : index
    %c0_0 = arith.constant 0 : index
    %c0_1 = arith.constant 0 : index
    %c0_2 = arith.constant 0 : index
    %0 = vector.load %arg2[%c0, %c0_0, %c0_1, %c0_2] : memref<1x8x4x32xf32, #tpu.memory_space<vmem>>, vector<1x8x4x32xf32>
    %1 = vector.shape_cast %0 : vector<1x8x4x32xf32> to vector<8x4x32xf32>
    %2 = vector.shape_cast %1 : vector<8x4x32xf32> to vector<32x32xf32>
    %cst = arith.constant dense<0.000000e+00> : vector<32xf32>
    %3 = vector.multi_reduction <add>, %2, %cst [1] : vector<32x32xf32> to vector<32xf32>
    %4 = vector.shape_cast %3 : vector<32xf32> to vector<32x1xf32>
    %cst_3 = arith.constant 3.200000e+01 : f32
    %5 = vector.broadcast %cst_3 : f32 to vector<32x1xf32>
    %6 = arith.divf %4, %5 : vector<32x1xf32>
    %7 = vector.broadcast %6 : vector<32x1xf32> to vector<32x32xf32>
    %8 = arith.subf %2, %7 : vector<32x32xf32>
    %9 = arith.mulf %8, %8 : vector<32x32xf32>
    %cst_4 = arith.constant dense<0.000000e+00> : vector<32xf32>
    %10 = vector.multi_reduction <add>, %9, %cst_4 [1] : vector<32x32xf32> to vector<32xf32>
    %11 = vector.shape_cast %10 : vector<32xf32> to vector<32x1xf32>
    %cst_5 = arith.constant 3.200000e+01 : f32
    %12 = vector.broadcast %cst_5 : f32 to vector<32x1xf32>
    %13 = arith.divf %11, %12 : vector<32x1xf32>
    %14 = vector.broadcast %6 : vector<32x1xf32> to vector<32x32xf32>
    %15 = arith.subf %2, %14 : vector<32x32xf32>
    %cst_6 = arith.constant 9.99999974E-6 : f32
    %16 = vector.broadcast %cst_6 : f32 to vector<32x1xf32>
    %17 = arith.addf %13, %16 : vector<32x1xf32>
    %18 = math.rsqrt %17 : vector<32x1xf32>
    %19 = vector.broadcast %18 : vector<32x1xf32> to vector<32x32xf32>
    %20 = arith.mulf %15, %19 : vector<32x32xf32>
    %21 = arith.truncf %20 : vector<32x32xf32> to vector<32x32xbf16>
    %c0_7 = arith.constant 0 : index
    %c0_8 = arith.constant 0 : index
    %22 = vector.load %arg4[%c0_7, %c0_8] : memref<32x32xbf16, #tpu.memory_space<vmem>>, vector<32x32xbf16>
    %cst_9 = arith.constant dense<0.000000e+00> : vector<32x32xf32>
    %23 = tpu.matmul %21, %22, %cst_9 {dimension_numbers = #tpu.dot_dimension_numbers<[1], [0], [0], [1], [0, 0, 1, 1], [], []>} : vector<32x32xbf16>, vector<32x32xbf16>, vector<32x32xf32> -> vector<32x32xf32>
    %c0_10 = arith.constant 0 : index
    %c0_11 = arith.constant 0 : index
    %24 = vector.load %arg5[%c0_10, %c0_11] : memref<1x32xf32, #tpu.memory_space<vmem>>, vector<1x32xf32>
    %25 = vector.broadcast %24 : vector<1x32xf32> to vector<32x32xf32>
    %26 = arith.addf %23, %25 : vector<32x32xf32>
    %27 = vector.shape_cast %26 : vector<32x32xf32> to vector<8x4x4x8xf32>
    %28 = tpu.transpose %27, [2, 0, 1, 3] : vector<8x4x4x8xf32> -> vector<4x8x4x8xf32>
    %29 = vector.shape_cast %28 : vector<4x8x4x8xf32> to vector<4x8x32xf32>
    %c0_12 = arith.constant 0 : index
    %c0_13 = arith.constant 0 : index
    %c0_14 = arith.constant 0 : index
    %c0_15 = arith.constant 0 : index
    %c0_16 = arith.constant 0 : index
    %30 = vector.load %arg3[%c0_12, %c0_13, %c0_14, %c0_15, %c0_16] : memref<1x1x4x8x8xf32, #tpu.memory_space<vmem>>, vector<1x1x4x8x8xf32>
    %31 = vector.shape_cast %30 : vector<1x1x4x8x8xf32> to vector<4x8x8xf32>
    %32 = arith.truncf %31 : vector<4x8x8xf32> to vector<4x8x8xbf16>
    %33 = arith.truncf %29 : vector<4x8x32xf32> to vector<4x8x32xbf16>
    "tpu.trace_start"() <{level = 10 : i32, message = "hij,hjd->hid"}> : () -> ()
    %cst_17 = arith.constant dense<0.000000e+00> : vector<4x8x32xf32>
    %34 = tpu.matmul %32, %33, %cst_17 {dimension_numbers = #tpu.dot_dimension_numbers<[2], [1], [1], [2], [0, 0, 0, 1, 1, 2], [0], [0]>} : vector<4x8x8xbf16>, vector<4x8x32xbf16>, vector<4x8x32xf32> -> vector<4x8x32xf32>
    "tpu.trace_stop"() : () -> ()
    %35 = vector.shape_cast %34 : vector<4x8x32xf32> to vector<4x8x4x8xf32>
    %36 = tpu.transpose %35, [1, 2, 0, 3] : vector<4x8x4x8xf32> -> vector<8x4x4x8xf32>
    %37 = vector.shape_cast %36 : vector<8x4x4x8xf32> to vector<32x32xf32>
    %38 = arith.addf %2, %37 : vector<32x32xf32>
    %cst_18 = arith.constant dense<0.000000e+00> : vector<32xf32>
    %39 = vector.multi_reduction <add>, %38, %cst_18 [1] : vector<32x32xf32> to vector<32xf32>
    %40 = vector.shape_cast %39 : vector<32xf32> to vector<32x1xf32>
    %cst_19 = arith.constant 3.200000e+01 : f32
    %41 = vector.broadcast %cst_19 : f32 to vector<32x1xf32>
    %42 = arith.divf %40, %41 : vector<32x1xf32>
    %43 = vector.broadcast %42 : vector<32x1xf32> to vector<32x32xf32>
    %44 = arith.subf %38, %43 : vector<32x32xf32>
    %45 = arith.mulf %44, %44 : vector<32x32xf32>
    %cst_20 = arith.constant dense<0.000000e+00> : vector<32xf32>
    %46 = vector.multi_reduction <add>, %45, %cst_20 [1] : vector<32x32xf32> to vector<32xf32>
    %47 = vector.shape_cast %46 : vector<32xf32> to vector<32x1xf32>
    %cst_21 = arith.constant 3.200000e+01 : f32
    %48 = vector.broadcast %cst_21 : f32 to vector<32x1xf32>
    %49 = arith.divf %47, %48 : vector<32x1xf32>
    %50 = vector.broadcast %42 : vector<32x1xf32> to vector<32x32xf32>
    %51 = arith.subf %38, %50 : vector<32x32xf32>
    %cst_22 = arith.constant 9.99999974E-6 : f32
    %52 = vector.broadcast %cst_22 : f32 to vector<32x1xf32>
    %53 = arith.addf %49, %52 : vector<32x1xf32>
    %54 = math.rsqrt %53 : vector<32x1xf32>
    %55 = vector.broadcast %54 : vector<32x1xf32> to vector<32x32xf32>
    %56 = arith.mulf %51, %55 : vector<32x32xf32>
    %57 = arith.truncf %56 : vector<32x32xf32> to vector<32x32xbf16>
    %c0_23 = arith.constant 0 : index
    %c0_24 = arith.constant 0 : index
    %58 = vector.load %arg6[%c0_23, %c0_24] : memref<32x32xbf16, #tpu.memory_space<vmem>>, vector<32x32xbf16>
    %cst_25 = arith.constant dense<0.000000e+00> : vector<32x32xf32>
    %59 = tpu.matmul %57, %58, %cst_25 {dimension_numbers = #tpu.dot_dimension_numbers<[1], [0], [0], [1], [0, 0, 1, 1], [], []>} : vector<32x32xbf16>, vector<32x32xbf16>, vector<32x32xf32> -> vector<32x32xf32>
    %c0_26 = arith.constant 0 : index
    %c0_27 = arith.constant 0 : index
    %60 = vector.load %arg7[%c0_26, %c0_27] : memref<1x32xf32, #tpu.memory_space<vmem>>, vector<1x32xf32>
    %61 = vector.broadcast %60 : vector<1x32xf32> to vector<32x32xf32>
    %62 = arith.addf %59, %61 : vector<32x32xf32>
    %cst_28 = arith.constant 0.000000e+00 : f32
    %63 = vector.broadcast %cst_28 : f32 to vector<32x32xf32>
    %64 = arith.maximumf %62, %63 : vector<32x32xf32>
    %65 = arith.truncf %64 : vector<32x32xf32> to vector<32x32xbf16>
    %c0_29 = arith.constant 0 : index
    %c0_30 = arith.constant 0 : index
    %66 = vector.load %arg8[%c0_29, %c0_30] : memref<32x32xbf16, #tpu.memory_space<vmem>>, vector<32x32xbf16>
    %cst_31 = arith.constant dense<0.000000e+00> : vector<32x32xf32>
    %67 = tpu.matmul %65, %66, %cst_31 {dimension_numbers = #tpu.dot_dimension_numbers<[1], [0], [0], [1], [0, 0, 1, 1], [], []>} : vector<32x32xbf16>, vector<32x32xbf16>, vector<32x32xf32> -> vector<32x32xf32>
    %c0_32 = arith.constant 0 : index
    %c0_33 = arith.constant 0 : index
    %68 = vector.load %arg9[%c0_32, %c0_33] : memref<1x32xf32, #tpu.memory_space<vmem>>, vector<1x32xf32>
    %69 = vector.broadcast %68 : vector<1x32xf32> to vector<32x32xf32>
    %70 = arith.addf %67, %69 : vector<32x32xf32>
    %71 = arith.addf %70, %38 : vector<32x32xf32>
    %72 = vector.shape_cast %71 : vector<32x32xf32> to vector<8x4x32xf32>
    %c0_34 = arith.constant 0 : index
    %c0_35 = arith.constant 0 : index
    %c0_36 = arith.constant 0 : index
    %c0_37 = arith.constant 0 : index
    %73 = vector.load %arg10[%c0_34, %c0_35, %c0_36, %c0_37] : memref<1x8x4x32xf32, #tpu.memory_space<vmem>>, vector<1x8x4x32xf32>
    %74 = vector.shape_cast %73 : vector<1x8x4x32xf32> to vector<8x4x32xf32>
    %75 = vector.shape_cast %72 : vector<8x4x32xf32> to vector<1x8x4x32xf32>
    tpu.vector_store %arg10[%c0_34, %c0_35, %c0_36, %c0_37], %75 {strides = array<i32>} : memref<1x8x4x32xf32, #tpu.memory_space<vmem>>, vector<1x8x4x32xf32>,
    return
  }
  func.func @transform_0(%arg0: i32, %arg1: i32) -> (i32, i32, i32, i32) {
    %c0_i32 = arith.constant 0 : i32
    %c0_i32_0 = arith.constant 0 : i32
    %c0_i32_1 = arith.constant 0 : i32
    return %arg0, %c0_i32, %arg1, %c0_i32_0 : i32, i32, i32, i32
  }
  func.func @transform_1(%arg0: i32, %arg1: i32) -> (i32, i32, i32, i32, i32) {
    %c2_i32 = arith.constant 2 : i32
    %c0_i32 = arith.constant 0 : i32
    %c0_i32_0 = arith.constant 0 : i32
    %c0_i32_1 = arith.constant 0 : i32
    %c0_i32_2 = arith.constant 0 : i32
    return %arg0, %c2_i32, %c0_i32, %c0_i32_0, %c0_i32_1 : i32, i32, i32, i32, i32
  }
  func.func @transform_2(%arg0: i32, %arg1: i32) -> (i32, i32) {
    %c0_i32 = arith.constant 0 : i32
    %c0_i32_0 = arith.constant 0 : i32
    %c0_i32_1 = arith.constant 0 : i32
    return %c0_i32, %c0_i32_0 : i32, i32
  }
  func.func @transform_3(%arg0: i32, %arg1: i32) -> (i32, i32) {
    %c0_i32 = arith.constant 0 : i32
    %c0_i32_0 = arith.constant 0 : i32
    %c0_i32_1 = arith.constant 0 : i32
    return %c0_i32, %c0_i32_0 : i32, i32
  }
  func.func @transform_4(%arg0: i32, %arg1: i32) -> (i32, i32) {
    %c0_i32 = arith.constant 0 : i32
    %c0_i32_0 = arith.constant 0 : i32
    %c0_i32_1 = arith.constant 0 : i32
    return %c0_i32, %c0_i32_0 : i32, i32
  }
  func.func @transform_5(%arg0: i32, %arg1: i32) -> (i32, i32) {
    %c0_i32 = arith.constant 0 : i32
    %c0_i32_0 = arith.constant 0 : i32
    %c0_i32_1 = arith.constant 0 : i32
    return %c0_i32, %c0_i32_0 : i32, i32
  }
  func.func @transform_6(%arg0: i32, %arg1: i32) -> (i32, i32) {
    %c0_i32 = arith.constant 0 : i32
    %c0_i32_0 = arith.constant 0 : i32
    %c0_i32_1 = arith.constant 0 : i32
    return %c0_i32, %c0_i32_0 : i32, i32
  }
  func.func @transform_7(%arg0: i32, %arg1: i32) -> (i32, i32) {
    %c0_i32 = arith.constant 0 : i32
    %c0_i32_0 = arith.constant 0 : i32
    %c0_i32_1 = arith.constant 0 : i32
    return %c0_i32, %c0_i32_0 : i32, i32
  }
  func.func @transform_8(%arg0: i32, %arg1: i32) -> (i32, i32, i32, i32) {
    %c0_i32 = arith.constant 0 : i32
    %c0_i32_0 = arith.constant 0 : i32
    %c0_i32_1 = arith.constant 0 : i32
    return %arg0, %c0_i32, %arg1, %c0_i32_0 : i32, i32, i32, i32
  }
}

module attributes {stable_mosaic.version = 11 : i64} {
  func.func @msa_layer_kernel(%arg0: i32, %arg1: i32, %arg2: memref<1x8x4x32xf32, #tpu.memory_space<vmem>>, %arg3: memref<1x1x4x8x8xf32, #tpu.memory_space<vmem>>, %arg4: memref<32x32xbf16, #tpu.memory_space<vmem>>, %arg5: memref<1x32xf32, #tpu.memory_space<vmem>>, %arg6: memref<32x32xbf16, #tpu.memory_space<vmem>>, %arg7: memref<1x32xf32, #tpu.memory_space<vmem>>, %arg8: memref<32x32xbf16, #tpu.memory_space<vmem>>, %arg9: memref<1x32xf32, #tpu.memory_space<vmem>>, %arg10: memref<1x8x4x32xf32, #tpu.memory_space<vmem>>) attributes {dimension_semantics = [#tpu.dimension_semantics<parallel>, #tpu.dimension_semantics<parallel>], iteration_bounds = array<i64: 2, 1>, scalar_prefetch = 0 : i64, scratch_operands = 0 : i64, tpu.core_type = #tpu.core_type<tc>, window_params = [{transform_indices = @transform_0, window_bounds = array<i64: 1, 8, 4, 32>}, {transform_indices = @transform_1, window_bounds = array<i64: 1, 1, 4, 8, 8>}, {pipeline_mode = #tpu.pipeline_mode<synchronous>, transform_indices = @transform_2, window_bounds = array<i64: 32, 32>}, {pipeline_mode = #tpu.pipeline_mode<synchronous>, transform_indices = @transform_3, window_bounds = array<i64: 1, 32>}, {pipeline_mode = #tpu.pipeline_mode<synchronous>, transform_indices = @transform_4, window_bounds = array<i64: 32, 32>}, {pipeline_mode = #tpu.pipeline_mode<synchronous>, transform_indices = @transform_5, window_bounds = array<i64: 1, 32>}, {pipeline_mode = #tpu.pipeline_mode<synchronous>, transform_indices = @transform_6, window_bounds = array<i64: 32, 32>}, {pipeline_mode = #tpu.pipeline_mode<synchronous>, transform_indices = @transform_7, window_bounds = array<i64: 1, 32>}, {transform_indices = @transform_8, window_bounds = array<i64: 1, 8, 4, 32>}]} {
    %c0 = arith.constant 0 : index
    %c0_0 = arith.constant 0 : index
    %c0_1 = arith.constant 0 : index
    %c0_2 = arith.constant 0 : index
    %0 = vector.load %arg2[%c0, %c0_0, %c0_1, %c0_2] : memref<1x8x4x32xf32, #tpu.memory_space<vmem>>, vector<1x8x4x32xf32>
    %1 = vector.shape_cast %0 : vector<1x8x4x32xf32> to vector<8x4x32xf32>
    %2 = vector.shape_cast %1 : vector<8x4x32xf32> to vector<32x32xf32>
    %cst = arith.constant dense<0.000000e+00> : vector<32xf32>
    %3 = vector.multi_reduction <add>, %2, %cst [1] : vector<32x32xf32> to vector<32xf32>
    %4 = vector.shape_cast %3 : vector<32xf32> to vector<32x1xf32>
    %cst_3 = arith.constant 3.200000e+01 : f32
    %5 = vector.broadcast %cst_3 : f32 to vector<32x1xf32>
    %6 = arith.divf %4, %5 : vector<32x1xf32>
    %7 = vector.broadcast %6 : vector<32x1xf32> to vector<32x32xf32>
    %8 = arith.subf %2, %7 : vector<32x32xf32>
    %9 = arith.mulf %8, %8 : vector<32x32xf32>
    %cst_4 = arith.constant dense<0.000000e+00> : vector<32xf32>
    %10 = vector.multi_reduction <add>, %9, %cst_4 [1] : vector<32x32xf32> to vector<32xf32>
    %11 = vector.shape_cast %10 : vector<32xf32> to vector<32x1xf32>
    %cst_5 = arith.constant 3.200000e+01 : f32
    %12 = vector.broadcast %cst_5 : f32 to vector<32x1xf32>
    %13 = arith.divf %11, %12 : vector<32x1xf32>
    %14 = vector.broadcast %6 : vector<32x1xf32> to vector<32x32xf32>
    %15 = arith.subf %2, %14 : vector<32x32xf32>
    %cst_6 = arith.constant 9.99999974E-6 : f32
    %16 = vector.broadcast %cst_6 : f32 to vector<32x1xf32>
    %17 = arith.addf %13, %16 : vector<32x1xf32>
    %18 = math.rsqrt %17 : vector<32x1xf32>
    %19 = vector.broadcast %18 : vector<32x1xf32> to vector<32x32xf32>
    %20 = arith.mulf %15, %19 : vector<32x32xf32>
    %21 = arith.truncf %20 : vector<32x32xf32> to vector<32x32xbf16>
    %c0_7 = arith.constant 0 : index
    %c0_8 = arith.constant 0 : index
    %22 = vector.load %arg4[%c0_7, %c0_8] : memref<32x32xbf16, #tpu.memory_space<vmem>>, vector<32x32xbf16>
    %cst_9 = arith.constant dense<0.000000e+00> : vector<32x32xf32>
    %23 = tpu.matmul %21, %22, %cst_9 {dimension_numbers = #tpu.dot_dimension_numbers<[1], [0], [0], [1], [0, 0, 1, 1], [], []>} : vector<32x32xbf16>, vector<32x32xbf16>, vector<32x32xf32> -> vector<32x32xf32>
    %c0_10 = arith.constant 0 : index
    %c0_11 = arith.constant 0 : index
    %24 = vector.load %arg5[%c0_10, %c0_11] : memref<1x32xf32, #tpu.memory_space<vmem>>, vector<1x32xf32>
    %25 = vector.broadcast %24 : vector<1x32xf32> to vector<32x32xf32>
    %26 = arith.addf %23, %25 : vector<32x32xf32>
    %27 = vector.shape_cast %26 : vector<32x32xf32> to vector<8x4x4x8xf32>
    %28 = tpu.transpose %27, [2, 0, 1, 3] : vector<8x4x4x8xf32> -> vector<4x8x4x8xf32>
    %29 = vector.shape_cast %28 : vector<4x8x4x8xf32> to vector<4x8x32xf32>
    %c0_12 = arith.constant 0 : index
    %c0_13 = arith.constant 0 : index
    %c0_14 = arith.constant 0 : index
    %c0_15 = arith.constant 0 : index
    %c0_16 = arith.constant 0 : index
    %30 = vector.load %arg3[%c0_12, %c0_13, %c0_14, %c0_15, %c0_16] : memref<1x1x4x8x8xf32, #tpu.memory_space<vmem>>, vector<1x1x4x8x8xf32>
    %31 = vector.shape_cast %30 : vector<1x1x4x8x8xf32> to vector<4x8x8xf32>
    %32 = arith.truncf %31 : vector<4x8x8xf32> to vector<4x8x8xbf16>
    %33 = arith.truncf %29 : vector<4x8x32xf32> to vector<4x8x32xbf16>
    "tpu.trace_start"() <{level = 10 : i32, message = "hij,hjd->hid"}> : () -> ()
    %cst_17 = arith.constant dense<0.000000e+00> : vector<4x8x32xf32>
    %34 = tpu.matmul %32, %33, %cst_17 {dimension_numbers = #tpu.dot_dimension_numbers<[2], [1], [1], [2], [0, 0, 0, 1, 1, 2], [0], [0]>} : vector<4x8x8xbf16>, vector<4x8x32xbf16>, vector<4x8x32xf32> -> vector<4x8x32xf32>
    "tpu.trace_stop"() : () -> ()
    %35 = vector.shape_cast %34 : vector<4x8x32xf32> to vector<4x8x4x8xf32>
    %36 = tpu.transpose %35, [1, 2, 0, 3] : vector<4x8x4x8xf32> -> vector<8x4x4x8xf32>
    %37 = vector.shape_cast %36 : vector<8x4x4x8xf32> to vector<32x32xf32>
    %38 = arith.addf %2, %37 : vector<32x32xf32>
    %cst_18 = arith.constant dense<0.000000e+00> : vector<32xf32>
    %39 = vector.multi_reduction <add>, %38, %cst_18 [1] : vector<32x32xf32> to vector<32xf32>
    %40 = vector.shape_cast %39 : vector<32xf32> to vector<32x1xf32>
    %cst_19 = arith.constant 3.200000e+01 : f32
    %41 = vector.broadcast %cst_19 : f32 to vector<32x1xf32>
    %42 = arith.divf %40, %41 : vector<32x1xf32>
    %43 = vector.broadcast %42 : vector<32x1xf32> to vector<32x32xf32>
    %44 = arith.subf %38, %43 : vector<32x32xf32>
    %45 = arith.mulf %44, %44 : vector<32x32xf32>
    %cst_20 = arith.constant dense<0.000000e+00> : vector<32xf32>
    %46 = vector.multi_reduction <add>, %45, %cst_20 [1] : vector<32x32xf32> to vector<32xf32>
    %47 = vector.shape_cast %46 : vector<32xf32> to vector<32x1xf32>
    %cst_21 = arith.constant 3.200000e+01 : f32
    %48 = vector.broadcast %cst_21 : f32 to vector<32x1xf32>
    %49 = arith.divf %47, %48 : vector<32x1xf32>
    %50 = vector.broadcast %42 : vector<32x1xf32> to vector<32x32xf32>
    %51 = arith.subf %38, %50 : vector<32x32xf32>
    %cst_22 = arith.constant 9.99999974E-6 : f32
    %52 = vector.broadcast %cst_22 : f32 to vector<32x1xf32>
    %53 = arith.addf %49, %52 : vector<32x1xf32>
    %54 = math.rsqrt %53 : vector<32x1xf32>
    %55 = vector.broadcast %54 : vector<32x1xf32> to vector<32x32xf32>
    %56 = arith.mulf %51, %55 : vector<32x32xf32>
    %57 = arith.truncf %56 : vector<32x32xf32> to vector<32x32xbf16>
    %c0_23 = arith.constant 0 : index
    %c0_24 = arith.constant 0 : index
    %58 = vector.load %arg6[%c0_23, %c0_24] : memref<32x32xbf16, #tpu.memory_space<vmem>>, vector<32x32xbf16>
    %cst_25 = arith.constant dense<0.000000e+00> : vector<32x32xf32>
    %59 = tpu.matmul %57, %58, %cst_25 {dimension_numbers = #tpu.dot_dimension_numbers<[1], [0], [0], [1], [0, 0, 1, 1], [], []>} : vector<32x32xbf16>, vector<32x32xbf16>, vector<32x32xf32> -> vector<32x32xf32>
    %c0_26 = arith.constant 0 : index
    %c0_27 = arith.constant 0 : index
    %60 = vector.load %arg7[%c0_26, %c0_27] : memref<1x32xf32, #tpu.memory_space<vmem>>, vector<1x32xf32>
    %61 = vector.broadcast %60 : vector<1x32xf32> to vector<32x32xf32>
    %62 = arith.addf %59, %61 : vector<32x32xf32>
    %cst_28 = arith.constant 0.000000e+00 : f32
    %63 = vector.broadcast %cst_28 : f32 to vector<32x32xf32>
    %64 = arith.maximumf %62, %63 : vector<32x32xf32>
    %65 = arith.truncf %64 : vector<32x32xf32> to vector<32x32xbf16>
    %c0_29 = arith.constant 0 : index
    %c0_30 = arith.constant 0 : index
    %66 = vector.load %arg8[%c0_29, %c0_30] : memref<32x32xbf16, #tpu.memory_space<vmem>>, vector<32x32xbf16>
    %cst_31 = arith.constant dense<0.000000e+00> : vector<32x32xf32>
    %67 = tpu.matmul %65, %66, %cst_31 {dimension_numbers = #tpu.dot_dimension_numbers<[1], [0], [0], [1], [0, 0, 1, 1], [], []>} : vector<32x32xbf16>, vector<32x32xbf16>, vector<32x32xf32> -> vector<32x32xf32>
    %c0_32 = arith.constant 0 : index
    %c0_33 = arith.constant 0 : index
    %68 = vector.load %arg9[%c0_32, %c0_33] : memref<1x32xf32, #tpu.memory_space<vmem>>, vector<1x32xf32>
    %69 = vector.broadcast %68 : vector<1x32xf32> to vector<32x32xf32>
    %70 = arith.addf %67, %69 : vector<32x32xf32>
    %71 = arith.addf %70, %38 : vector<32x32xf32>
    %72 = vector.shape_cast %71 : vector<32x32xf32> to vector<8x4x32xf32>
    %c0_34 = arith.constant 0 : index
    %c0_35 = arith.constant 0 : index
    %c0_36 = arith.constant 0 : index
    %c0_37 = arith.constant 0 : index
    %73 = vector.load %arg10[%c0_34, %c0_35, %c0_36, %c0_37] : memref<1x8x4x32xf32, #tpu.memory_space<vmem>>, vector<1x8x4x32xf32>
    %74 = vector.shape_cast %73 : vector<1x8x4x32xf32> to vector<8x4x32xf32>
    %75 = vector.shape_cast %72 : vector<8x4x32xf32> to vector<1x8x4x32xf32>
    tpu.vector_store %arg10[%c0_34, %c0_35, %c0_36, %c0_37], %75 {strides = array<i32>} : memref<1x8x4x32xf32, #tpu.memory_space<vmem>>, vector<1x8x4x32xf32>,
    return
  }
  func.func @transform_0(%arg0: i32, %arg1: i32) -> (i32, i32, i32, i32) {
    %c0_i32 = arith.constant 0 : i32
    %c0_i32_0 = arith.constant 0 : i32
    %c0_i32_1 = arith.constant 0 : i32
    return %arg0, %c0_i32, %arg1, %c0_i32_0 : i32, i32, i32, i32
  }
  func.func @transform_1(%arg0: i32, %arg1: i32) -> (i32, i32, i32, i32, i32) {
    %c1_i32 = arith.constant 1 : i32
    %c0_i32 = arith.constant 0 : i32
    %c0_i32_0 = arith.constant 0 : i32
    %c0_i32_1 = arith.constant 0 : i32
    %c0_i32_2 = arith.constant 0 : i32
    return %arg0, %c1_i32, %c0_i32, %c0_i32_0, %c0_i32_1 : i32, i32, i32, i32, i32
  }
  func.func @transform_2(%arg0: i32, %arg1: i32) -> (i32, i32) {
    %c0_i32 = arith.constant 0 : i32
    %c0_i32_0 = arith.constant 0 : i32
    %c0_i32_1 = arith.constant 0 : i32
    return %c0_i32, %c0_i32_0 : i32, i32
  }
  func.func @transform_3(%arg0: i32, %arg1: i32) -> (i32, i32) {
    %c0_i32 = arith.constant 0 : i32
    %c0_i32_0 = arith.constant 0 : i32
    %c0_i32_1 = arith.constant 0 : i32
    return %c0_i32, %c0_i32_0 : i32, i32
  }
  func.func @transform_4(%arg0: i32, %arg1: i32) -> (i32, i32) {
    %c0_i32 = arith.constant 0 : i32
    %c0_i32_0 = arith.constant 0 : i32
    %c0_i32_1 = arith.constant 0 : i32
    return %c0_i32, %c0_i32_0 : i32, i32
  }
  func.func @transform_5(%arg0: i32, %arg1: i32) -> (i32, i32) {
    %c0_i32 = arith.constant 0 : i32
    %c0_i32_0 = arith.constant 0 : i32
    %c0_i32_1 = arith.constant 0 : i32
    return %c0_i32, %c0_i32_0 : i32, i32
  }
  func.func @transform_6(%arg0: i32, %arg1: i32) -> (i32, i32) {
    %c0_i32 = arith.constant 0 : i32
    %c0_i32_0 = arith.constant 0 : i32
    %c0_i32_1 = arith.constant 0 : i32
    return %c0_i32, %c0_i32_0 : i32, i32
  }
  func.func @transform_7(%arg0: i32, %arg1: i32) -> (i32, i32) {
    %c0_i32 = arith.constant 0 : i32
    %c0_i32_0 = arith.constant 0 : i32
    %c0_i32_1 = arith.constant 0 : i32
    return %c0_i32, %c0_i32_0 : i32, i32
  }
  func.func @transform_8(%arg0: i32, %arg1: i32) -> (i32, i32, i32, i32) {
    %c0_i32 = arith.constant 0 : i32
    %c0_i32_0 = arith.constant 0 : i32
    %c0_i32_1 = arith.constant 0 : i32
    return %arg0, %c0_i32, %arg1, %c0_i32_0 : i32, i32, i32, i32
  }
}

module attributes {stable_mosaic.version = 11 : i64} {
  func.func @msa_layer_kernel(%arg0: i32, %arg1: i32, %arg2: memref<1x8x4x32xf32, #tpu.memory_space<vmem>>, %arg3: memref<1x1x4x8x8xf32, #tpu.memory_space<vmem>>, %arg4: memref<32x32xbf16, #tpu.memory_space<vmem>>, %arg5: memref<1x32xf32, #tpu.memory_space<vmem>>, %arg6: memref<32x32xbf16, #tpu.memory_space<vmem>>, %arg7: memref<1x32xf32, #tpu.memory_space<vmem>>, %arg8: memref<32x32xbf16, #tpu.memory_space<vmem>>, %arg9: memref<1x32xf32, #tpu.memory_space<vmem>>, %arg10: memref<1x8x4x32xf32, #tpu.memory_space<vmem>>) attributes {dimension_semantics = [#tpu.dimension_semantics<parallel>, #tpu.dimension_semantics<parallel>], iteration_bounds = array<i64: 2, 1>, scalar_prefetch = 0 : i64, scratch_operands = 0 : i64, tpu.core_type = #tpu.core_type<tc>, window_params = [{transform_indices = @transform_0, window_bounds = array<i64: 1, 8, 4, 32>}, {transform_indices = @transform_1, window_bounds = array<i64: 1, 1, 4, 8, 8>}, {pipeline_mode = #tpu.pipeline_mode<synchronous>, transform_indices = @transform_2, window_bounds = array<i64: 32, 32>}, {pipeline_mode = #tpu.pipeline_mode<synchronous>, transform_indices = @transform_3, window_bounds = array<i64: 1, 32>}, {pipeline_mode = #tpu.pipeline_mode<synchronous>, transform_indices = @transform_4, window_bounds = array<i64: 32, 32>}, {pipeline_mode = #tpu.pipeline_mode<synchronous>, transform_indices = @transform_5, window_bounds = array<i64: 1, 32>}, {pipeline_mode = #tpu.pipeline_mode<synchronous>, transform_indices = @transform_6, window_bounds = array<i64: 32, 32>}, {pipeline_mode = #tpu.pipeline_mode<synchronous>, transform_indices = @transform_7, window_bounds = array<i64: 1, 32>}, {transform_indices = @transform_8, window_bounds = array<i64: 1, 8, 4, 32>}]} {
    %c0 = arith.constant 0 : index
    %c0_0 = arith.constant 0 : index
    %c0_1 = arith.constant 0 : index
    %c0_2 = arith.constant 0 : index
    %0 = vector.load %arg2[%c0, %c0_0, %c0_1, %c0_2] : memref<1x8x4x32xf32, #tpu.memory_space<vmem>>, vector<1x8x4x32xf32>
    %1 = vector.shape_cast %0 : vector<1x8x4x32xf32> to vector<8x4x32xf32>
    %2 = vector.shape_cast %1 : vector<8x4x32xf32> to vector<32x32xf32>
    %cst = arith.constant dense<0.000000e+00> : vector<32xf32>
    %3 = vector.multi_reduction <add>, %2, %cst [1] : vector<32x32xf32> to vector<32xf32>
    %4 = vector.shape_cast %3 : vector<32xf32> to vector<32x1xf32>
    %cst_3 = arith.constant 3.200000e+01 : f32
    %5 = vector.broadcast %cst_3 : f32 to vector<32x1xf32>
    %6 = arith.divf %4, %5 : vector<32x1xf32>
    %7 = vector.broadcast %6 : vector<32x1xf32> to vector<32x32xf32>
    %8 = arith.subf %2, %7 : vector<32x32xf32>
    %9 = arith.mulf %8, %8 : vector<32x32xf32>
    %cst_4 = arith.constant dense<0.000000e+00> : vector<32xf32>
    %10 = vector.multi_reduction <add>, %9, %cst_4 [1] : vector<32x32xf32> to vector<32xf32>
    %11 = vector.shape_cast %10 : vector<32xf32> to vector<32x1xf32>
    %cst_5 = arith.constant 3.200000e+01 : f32
    %12 = vector.broadcast %cst_5 : f32 to vector<32x1xf32>
    %13 = arith.divf %11, %12 : vector<32x1xf32>
    %14 = vector.broadcast %6 : vector<32x1xf32> to vector<32x32xf32>
    %15 = arith.subf %2, %14 : vector<32x32xf32>
    %cst_6 = arith.constant 9.99999974E-6 : f32
    %16 = vector.broadcast %cst_6 : f32 to vector<32x1xf32>
    %17 = arith.addf %13, %16 : vector<32x1xf32>
    %18 = math.rsqrt %17 : vector<32x1xf32>
    %19 = vector.broadcast %18 : vector<32x1xf32> to vector<32x32xf32>
    %20 = arith.mulf %15, %19 : vector<32x32xf32>
    %21 = arith.truncf %20 : vector<32x32xf32> to vector<32x32xbf16>
    %c0_7 = arith.constant 0 : index
    %c0_8 = arith.constant 0 : index
    %22 = vector.load %arg4[%c0_7, %c0_8] : memref<32x32xbf16, #tpu.memory_space<vmem>>, vector<32x32xbf16>
    %cst_9 = arith.constant dense<0.000000e+00> : vector<32x32xf32>
    %23 = tpu.matmul %21, %22, %cst_9 {dimension_numbers = #tpu.dot_dimension_numbers<[1], [0], [0], [1], [0, 0, 1, 1], [], []>} : vector<32x32xbf16>, vector<32x32xbf16>, vector<32x32xf32> -> vector<32x32xf32>
    %c0_10 = arith.constant 0 : index
    %c0_11 = arith.constant 0 : index
    %24 = vector.load %arg5[%c0_10, %c0_11] : memref<1x32xf32, #tpu.memory_space<vmem>>, vector<1x32xf32>
    %25 = vector.broadcast %24 : vector<1x32xf32> to vector<32x32xf32>
    %26 = arith.addf %23, %25 : vector<32x32xf32>
    %27 = vector.shape_cast %26 : vector<32x32xf32> to vector<8x4x4x8xf32>
    %28 = tpu.transpose %27, [2, 0, 1, 3] : vector<8x4x4x8xf32> -> vector<4x8x4x8xf32>
    %29 = vector.shape_cast %28 : vector<4x8x4x8xf32> to vector<4x8x32xf32>
    %c0_12 = arith.constant 0 : index
    %c0_13 = arith.constant 0 : index
    %c0_14 = arith.constant 0 : index
    %c0_15 = arith.constant 0 : index
    %c0_16 = arith.constant 0 : index
    %30 = vector.load %arg3[%c0_12, %c0_13, %c0_14, %c0_15, %c0_16] : memref<1x1x4x8x8xf32, #tpu.memory_space<vmem>>, vector<1x1x4x8x8xf32>
    %31 = vector.shape_cast %30 : vector<1x1x4x8x8xf32> to vector<4x8x8xf32>
    %32 = arith.truncf %31 : vector<4x8x8xf32> to vector<4x8x8xbf16>
    %33 = arith.truncf %29 : vector<4x8x32xf32> to vector<4x8x32xbf16>
    "tpu.trace_start"() <{level = 10 : i32, message = "hij,hjd->hid"}> : () -> ()
    %cst_17 = arith.constant dense<0.000000e+00> : vector<4x8x32xf32>
    %34 = tpu.matmul %32, %33, %cst_17 {dimension_numbers = #tpu.dot_dimension_numbers<[2], [1], [1], [2], [0, 0, 0, 1, 1, 2], [0], [0]>} : vector<4x8x8xbf16>, vector<4x8x32xbf16>, vector<4x8x32xf32> -> vector<4x8x32xf32>
    "tpu.trace_stop"() : () -> ()
    %35 = vector.shape_cast %34 : vector<4x8x32xf32> to vector<4x8x4x8xf32>
    %36 = tpu.transpose %35, [1, 2, 0, 3] : vector<4x8x4x8xf32> -> vector<8x4x4x8xf32>
    %37 = vector.shape_cast %36 : vector<8x4x4x8xf32> to vector<32x32xf32>
    %38 = arith.addf %2, %37 : vector<32x32xf32>
    %cst_18 = arith.constant dense<0.000000e+00> : vector<32xf32>
    %39 = vector.multi_reduction <add>, %38, %cst_18 [1] : vector<32x32xf32> to vector<32xf32>
    %40 = vector.shape_cast %39 : vector<32xf32> to vector<32x1xf32>
    %cst_19 = arith.constant 3.200000e+01 : f32
    %41 = vector.broadcast %cst_19 : f32 to vector<32x1xf32>
    %42 = arith.divf %40, %41 : vector<32x1xf32>
    %43 = vector.broadcast %42 : vector<32x1xf32> to vector<32x32xf32>
    %44 = arith.subf %38, %43 : vector<32x32xf32>
    %45 = arith.mulf %44, %44 : vector<32x32xf32>
    %cst_20 = arith.constant dense<0.000000e+00> : vector<32xf32>
    %46 = vector.multi_reduction <add>, %45, %cst_20 [1] : vector<32x32xf32> to vector<32xf32>
    %47 = vector.shape_cast %46 : vector<32xf32> to vector<32x1xf32>
    %cst_21 = arith.constant 3.200000e+01 : f32
    %48 = vector.broadcast %cst_21 : f32 to vector<32x1xf32>
    %49 = arith.divf %47, %48 : vector<32x1xf32>
    %50 = vector.broadcast %42 : vector<32x1xf32> to vector<32x32xf32>
    %51 = arith.subf %38, %50 : vector<32x32xf32>
    %cst_22 = arith.constant 9.99999974E-6 : f32
    %52 = vector.broadcast %cst_22 : f32 to vector<32x1xf32>
    %53 = arith.addf %49, %52 : vector<32x1xf32>
    %54 = math.rsqrt %53 : vector<32x1xf32>
    %55 = vector.broadcast %54 : vector<32x1xf32> to vector<32x32xf32>
    %56 = arith.mulf %51, %55 : vector<32x32xf32>
    %57 = arith.truncf %56 : vector<32x32xf32> to vector<32x32xbf16>
    %c0_23 = arith.constant 0 : index
    %c0_24 = arith.constant 0 : index
    %58 = vector.load %arg6[%c0_23, %c0_24] : memref<32x32xbf16, #tpu.memory_space<vmem>>, vector<32x32xbf16>
    %cst_25 = arith.constant dense<0.000000e+00> : vector<32x32xf32>
    %59 = tpu.matmul %57, %58, %cst_25 {dimension_numbers = #tpu.dot_dimension_numbers<[1], [0], [0], [1], [0, 0, 1, 1], [], []>} : vector<32x32xbf16>, vector<32x32xbf16>, vector<32x32xf32> -> vector<32x32xf32>
    %c0_26 = arith.constant 0 : index
    %c0_27 = arith.constant 0 : index
    %60 = vector.load %arg7[%c0_26, %c0_27] : memref<1x32xf32, #tpu.memory_space<vmem>>, vector<1x32xf32>
    %61 = vector.broadcast %60 : vector<1x32xf32> to vector<32x32xf32>
    %62 = arith.addf %59, %61 : vector<32x32xf32>
    %cst_28 = arith.constant 0.000000e+00 : f32
    %63 = vector.broadcast %cst_28 : f32 to vector<32x32xf32>
    %64 = arith.maximumf %62, %63 : vector<32x32xf32>
    %65 = arith.truncf %64 : vector<32x32xf32> to vector<32x32xbf16>
    %c0_29 = arith.constant 0 : index
    %c0_30 = arith.constant 0 : index
    %66 = vector.load %arg8[%c0_29, %c0_30] : memref<32x32xbf16, #tpu.memory_space<vmem>>, vector<32x32xbf16>
    %cst_31 = arith.constant dense<0.000000e+00> : vector<32x32xf32>
    %67 = tpu.matmul %65, %66, %cst_31 {dimension_numbers = #tpu.dot_dimension_numbers<[1], [0], [0], [1], [0, 0, 1, 1], [], []>} : vector<32x32xbf16>, vector<32x32xbf16>, vector<32x32xf32> -> vector<32x32xf32>
    %c0_32 = arith.constant 0 : index
    %c0_33 = arith.constant 0 : index
    %68 = vector.load %arg9[%c0_32, %c0_33] : memref<1x32xf32, #tpu.memory_space<vmem>>, vector<1x32xf32>
    %69 = vector.broadcast %68 : vector<1x32xf32> to vector<32x32xf32>
    %70 = arith.addf %67, %69 : vector<32x32xf32>
    %71 = arith.addf %70, %38 : vector<32x32xf32>
    %72 = vector.shape_cast %71 : vector<32x32xf32> to vector<8x4x32xf32>
    %c0_34 = arith.constant 0 : index
    %c0_35 = arith.constant 0 : index
    %c0_36 = arith.constant 0 : index
    %c0_37 = arith.constant 0 : index
    %73 = vector.load %arg10[%c0_34, %c0_35, %c0_36, %c0_37] : memref<1x8x4x32xf32, #tpu.memory_space<vmem>>, vector<1x8x4x32xf32>
    %74 = vector.shape_cast %73 : vector<1x8x4x32xf32> to vector<8x4x32xf32>
    %75 = vector.shape_cast %72 : vector<8x4x32xf32> to vector<1x8x4x32xf32>
    tpu.vector_store %arg10[%c0_34, %c0_35, %c0_36, %c0_37], %75 {strides = array<i32>} : memref<1x8x4x32xf32, #tpu.memory_space<vmem>>, vector<1x8x4x32xf32>,
    return
  }
  func.func @transform_0(%arg0: i32, %arg1: i32) -> (i32, i32, i32, i32) {
    %c0_i32 = arith.constant 0 : i32
    %c0_i32_0 = arith.constant 0 : i32
    %c0_i32_1 = arith.constant 0 : i32
    return %arg0, %c0_i32, %arg1, %c0_i32_0 : i32, i32, i32, i32
  }
  func.func @transform_1(%arg0: i32, %arg1: i32) -> (i32, i32, i32, i32, i32) {
    %c3_i32 = arith.constant 3 : i32
    %c0_i32 = arith.constant 0 : i32
    %c0_i32_0 = arith.constant 0 : i32
    %c0_i32_1 = arith.constant 0 : i32
    %c0_i32_2 = arith.constant 0 : i32
    return %arg0, %c3_i32, %c0_i32, %c0_i32_0, %c0_i32_1 : i32, i32, i32, i32, i32
  }
  func.func @transform_2(%arg0: i32, %arg1: i32) -> (i32, i32) {
    %c0_i32 = arith.constant 0 : i32
    %c0_i32_0 = arith.constant 0 : i32
    %c0_i32_1 = arith.constant 0 : i32
    return %c0_i32, %c0_i32_0 : i32, i32
  }
  func.func @transform_3(%arg0: i32, %arg1: i32) -> (i32, i32) {
    %c0_i32 = arith.constant 0 : i32
    %c0_i32_0 = arith.constant 0 : i32
    %c0_i32_1 = arith.constant 0 : i32
    return %c0_i32, %c0_i32_0 : i32, i32
  }
  func.func @transform_4(%arg0: i32, %arg1: i32) -> (i32, i32) {
    %c0_i32 = arith.constant 0 : i32
    %c0_i32_0 = arith.constant 0 : i32
    %c0_i32_1 = arith.constant 0 : i32
    return %c0_i32, %c0_i32_0 : i32, i32
  }
  func.func @transform_5(%arg0: i32, %arg1: i32) -> (i32, i32) {
    %c0_i32 = arith.constant 0 : i32
    %c0_i32_0 = arith.constant 0 : i32
    %c0_i32_1 = arith.constant 0 : i32
    return %c0_i32, %c0_i32_0 : i32, i32
  }
  func.func @transform_6(%arg0: i32, %arg1: i32) -> (i32, i32) {
    %c0_i32 = arith.constant 0 : i32
    %c0_i32_0 = arith.constant 0 : i32
    %c0_i32_1 = arith.constant 0 : i32
    return %c0_i32, %c0_i32_0 : i32, i32
  }
  func.func @transform_7(%arg0: i32, %arg1: i32) -> (i32, i32) {
    %c0_i32 = arith.constant 0 : i32
    %c0_i32_0 = arith.constant 0 : i32
    %c0_i32_1 = arith.constant 0 : i32
    return %c0_i32, %c0_i32_0 : i32, i32
  }
  func.func @transform_8(%arg0: i32, %arg1: i32) -> (i32, i32, i32, i32) {
    %c0_i32 = arith.constant 0 : i32
    %c0_i32_0 = arith.constant 0 : i32
    %c0_i32_1 = arith.constant 0 : i32
    return %arg0, %c0_i32, %arg1, %c0_i32_0 : i32, i32, i32, i32
  }
}

</mosaic_0001>

<bundles_post_ra>
// kernel: msa_update_with_pair.5
= control target key start
LH: loop header
LB: loop body
LE: loop exit
PB: predicated region body
PF: predicated region fallthrough
CT: control target
= control target key end

     0   :  { %s1246_s12 = smov 0   ;;  %s1248_s13 = smov 0   ;;  %s1590_s0 = inlined_call_operand.vmem [shape: f32[2,64,16], index: 0, kind: input, shape index: {}]   ;;  %s1591_s1 = inlined_call_operand.vmem [shape: bf16[16,16], index: 1, kind: input, shape index: {}]   ;;  %s1592_s2 = inlined_call_operand.vmem [shape: f32[1,16], index: 2, kind: input, shape index: {}]   ;;  %s1593_s3 = inlined_call_operand.vmem [shape: f32[2,4,4,8,8], index: 3, kind: output, shape index: {}]  }
   0x1   :  { %s1250_s14 = smov 0  }
   0x2 LB: > { %s25_s15 = sadd.s32 1, %s1211_s13  ;;  %p1046_p0 = scmp.ge.s32.totalorder %s1215_s14, 1  ;;  %s1215_s14 = sphi %s1250_s14, %s13_s14   ;;  %s1211_s13 = sphi %s1248_s13, %s1595_s13   ;;  %s1207_s12 = sphi %s1246_s12, %s1594_s12  }
   0x3   : > { %p27_p1 = scmp.ge.s32.totalorder %s25_s15, 2  ;;  %p158_p2 = scmp.lt.s32.totalorder %s1215_s14, 3 }
   0x5   : > { %s1597_s15 = smov (%p27_p1, %s25_s15), 0  ;;  %p159_p3 = pnand %p1046_p0, %p158_p2 }
   0x6   : > { %p190_p4 = scmp.lt.s32.totalorder (!%p159_p3), %s1207_s12, 1  ;;  %vm216_vm0 = vcmask (!%p159_p3), 130048   ;;  %v1112_v56 = vld [vmem:[%s1591_s1] sm:$0xff] (!%p159_p3)   ;;  %s1217_s24 = smov (!%p159_p3), 120   ;;  %vm766_vm1 = vcmask (!%p159_p3), 64512  }
   0x7   : > { %162 = sbr.rel (%p159_p3) target bundleno = 1186 (0x4a2), region = 32  ;;  %1066 = vmatprep.subr.bf16.mxu0 (!%p159_p3), %v1112_v56  ;;  %1076 = vmatprep.subr.bf16.mxu1 (!%p159_p3), %v1112_v56  ;;  %s1218_s25 = smov (!%p159_p3), 112  }
   0x8   : > { %1067 = vmatpush3.bf16.msra.mxu0 (!%p159_p3), %v1112_v56  ;;  %1077 = vmatpush3.bf16.msra.mxu1 (!%p159_p3), %v1112_v56  ;;  %s1219_s26 = smov (!%p159_p3), 104   ;;  %s1220_s27 = smov (!%p159_p3), 96  }
   0x9   : > { %s1221_s28 = smov (!%p159_p3), 88   ;;  %s1222_s29 = smov (!%p159_p3), 80  }
   0xa   : > { %s1223_s30 = smov (!%p159_p3), 72  }
   0xe   : > { %s1599_s12 = smov (!%p190_p4, %s1207_s12), 1 }
   0xf   : > { %s1059_s16 = sshll.u32 %s1599_s12, 6  ;;  %s1060_s4 = sshll.u32 %s1599_s12, 7 }
  0x10   : > { %s197_s19 = scalar_lea.vmem %s1590_s0, %s1059_s16  ;;  %s1531_s7 = scalar_lea.vmem %s1593_s3, %s1060_s4 }
  0x11   : > { %v208_v0 = vld [vmem:[%s197_s19] sm:$0xff]  ;;  %v210_v1 = vld [vmem:[%s197_s19 + $0x10] sm:$0xff]  ;;  %v209_v2 = vld [vmem:[%s197_s19 + $0x8] sm:$0xff] }
  0x12   : > { %v217_v3 = vsel %vm216_vm0, %v208_v0, 0.0  ;;  %v223_v4 = vsel %vm216_vm0, %v210_v1, 0.0  ;;  %v211_v5 = vld [vmem:[%s197_s19 + $0x18] sm:$0xff]  ;;  %v220_v6 = vsel %vm216_vm0, %v209_v2, 0.0  ;;  %v212_v8 = vld [vmem:[%s197_s19 + $0x20] sm:$0xff]  ;;  %v213_v9 = vld [vmem:[%s197_s19 + $0x28] sm:$0xff] }
  0x13   : > { %218 = vadd.xlane.f32.xlu0 %v217_v3  ;;  %224 = vadd.xlane.f32.xlu1 %v223_v4  ;;  %v226_v7 = vsel %vm216_vm0, %v211_v5, 0.0  ;;  %v229_v10 = vsel %vm216_vm0, %v212_v8, 0.0  ;;  %v232_v11 = vsel %vm216_vm0, %v213_v9, 0.0  ;;  %v214_v12 = vld [vmem:[%s197_s19 + $0x30] sm:$0xff]  ;;  %v215_v13 = vld [vmem:[%s197_s19 + $0x38] sm:$0xff] }
  0x14   : > { %v235_v14 = vsel %vm216_vm0, %v214_v12, 0.0  ;;  %v238_v15 = vsel %vm216_vm0, %v215_v13, 0.0 }
  0x17   : > { %221 = vadd.xlane.f32.xlu0 %v220_v6  ;;  %227 = vadd.xlane.f32.xlu1 %v226_v7 }
  0x1b   : > { %230 = vadd.xlane.f32.xlu0 %v229_v10  ;;  %233 = vadd.xlane.f32.xlu1 %v232_v11 }
  0x1f   : > { %236 = vadd.xlane.f32.xlu0 %v235_v14  ;;  %239 = vadd.xlane.f32.xlu1 %v238_v15 }
  0xa0   : > { %v219_v16 = vpop.xlane.xlu0 %218  ;;  %v225_v17 = vpop.xlane.xlu1 %224 }
  0xa1   : > { %v242_v18 = vmul.f32 0.0625, %v219_v16  ;;  %v244_v19 = vmul.f32 0.0625, %v225_v17 }
  0xa3   : > { %v1278_v20 = vsub.f32 %v208_v0, %v242_v18  ;;  %v1280_v21 = vsub.f32 %v210_v1, %v244_v19 }
  0xa4   : > { %v222_v22 = vpop.xlane.xlu0 %221  ;;  %v228_v23 = vpop.xlane.xlu1 %227 }
  0xa5   : > { %v243_v24 = vmul.f32 0.0625, %v222_v22  ;;  %v245_v25 = vmul.f32 0.0625, %v228_v23  ;;  %v258_v26 = vmul.f32 %v1278_v20, %v1278_v20  ;;  %v260_v27 = vmul.f32 %v1280_v21, %v1280_v21 }
  0xa7   : > { %v1286_v28 = vsub.f32 %v209_v2, %v243_v24  ;;  %v1288_v29 = vsub.f32 %v211_v5, %v245_v25  ;;  %v266_v30 = vsel %vm216_vm0, %v258_v26, 0.0  ;;  %v272_v33 = vsel %vm216_vm0, %v260_v27, 0.0 }
  0xa8   : > { %267 = vadd.xlane.f32.xlu0 %v266_v30  ;;  %v231_v31 = vpop.xlane.xlu0 %230  ;;  %v234_v32 = vpop.xlane.xlu1 %233 }
  0xa9   : > { %v246_v34 = vmul.f32 0.0625, %v231_v31  ;;  %v247_v35 = vmul.f32 0.0625, %v234_v32  ;;  %v259_v36 = vmul.f32 %v1286_v28, %v1286_v28  ;;  %v261_v37 = vmul.f32 %v1288_v29, %v1288_v29 }
  0xab   : > { %v1296_v38 = vsub.f32 %v212_v8, %v246_v34  ;;  %v1298_v39 = vsub.f32 %v213_v9, %v247_v35  ;;  %v269_v40 = vsel %vm216_vm0, %v259_v36, 0.0  ;;  %v275_v43 = vsel %vm216_vm0, %v261_v37, 0.0 }
  0xac   : > { %273 = vadd.xlane.f32.xlu0 %v272_v33  ;;  %270 = vadd.xlane.f32.xlu1 %v269_v40  ;;  %v237_v41 = vpop.xlane.xlu0 %236  ;;  %v240_v42 = vpop.xlane.xlu1 %239 }
  0xad   : > { %v248_v44 = vmul.f32 0.0625, %v237_v41  ;;  %v249_v45 = vmul.f32 0.0625, %v240_v42  ;;  %v262_v46 = vmul.f32 %v1296_v38, %v1296_v38  ;;  %v263_v47 = vmul.f32 %v1298_v39, %v1298_v39 }
  0xaf   : > { %v1306_v48 = vsub.f32 %v214_v12, %v248_v44  ;;  %v1308_v49 = vsub.f32 %v215_v13, %v249_v45  ;;  %v278_v50 = vsel %vm216_vm0, %v262_v46, 0.0  ;;  %v281_v51 = vsel %vm216_vm0, %v263_v47, 0.0 }
  0xb0   : > { %276 = vadd.xlane.f32.xlu1 %v275_v43  ;;  %279 = vadd.xlane.f32.xlu0 %v278_v50 }
  0xb1   : > { %v264_v52 = vmul.f32 %v1306_v48, %v1306_v48  ;;  %v265_v53 = vmul.f32 %v1308_v49, %v1308_v49 }
  0xb3   : > { %v284_v54 = vsel %vm216_vm0, %v264_v52, 0.0  ;;  %v287_v55 = vsel %vm216_vm0, %v265_v53, 0.0 }
  0xb4   : > { %282 = vadd.xlane.f32.xlu1 %v281_v51  ;;  %285 = vadd.xlane.f32.xlu0 %v284_v54 }
  0xb8   : > { %288 = vadd.xlane.f32.xlu1 %v287_v55 }
 0x135   : > { %v268_v57 = vpop.xlane.xlu0 %267 }
 0x136   : > { %v290_v58 = vmul.f32 0.0625, %v268_v57 }
 0x138   : > { %v298_v59 = vadd.f32 1e-05, %v290_v58 }
 0x139   : > { %v271_v60 = vpop.xlane.xlu1 %270  ;;  %v274_v61 = vpop.xlane.xlu0 %273 }
 0x13a   : > { %v291_v62 = vmul.f32 0.0625, %v271_v60  ;;  %v292_v63 = vmul.f32 0.0625, %v274_v61  ;;  %1113 = vrsqrt.f32 %v298_v59  ;;  %v1224_v59 = vmov 1983009808  }
 0x13b   : > { %v497_v60 = vunpack.c.l.s4 %v1224_v59  ;;  %v499_v61 = vlaneseq }
 0x13c   : > { %v299_v0 = vadd.f32 1e-05, %v291_v62  ;;  %v300_v1 = vadd.f32 1e-05, %v292_v63 }
 0x13d   : > { %v277_v2 = vpop.xlane.xlu1 %276  ;;  %v280_v3 = vpop.xlane.xlu0 %279  ;;  %v498_v63 = vunpack.c.0.s8 %v497_v60 }
 0x13e   : > { %1115 = vrsqrt.f32 %v299_v0  ;;  %v293_v4 = vmul.f32 0.0625, %v277_v2  ;;  %v294_v5 = vmul.f32 0.0625, %v280_v3  ;;  %v500_v0 = vshrl.u32 %v499_v61, 7 }
 0x13f   : > { %1117 = vrsqrt.f32 %v300_v1  ;;  %v1225_v3 = vmov 1934713408  }
 0x140   : > { %v301_v6 = vadd.f32 1e-05, %v293_v4  ;;  %v302_v7 = vadd.f32 1e-05, %v294_v5  ;;  %v561_v4 = vunpack.c.l.s4 %v1225_v3  ;;  %v1345_v5 = vsub.s32 %v498_v63, %v500_v0 }
 0x141   : > { %v283_v8 = vpop.xlane.xlu1 %282  ;;  %v286_v9 = vpop.xlane.xlu0 %285 }
 0x142   : > { %1119 = vrsqrt.f32 %v301_v6  ;;  %v295_v10 = vmul.f32 0.0625, %v283_v8  ;;  %v296_v11 = vmul.f32 0.0625, %v286_v9 }
 0x143   : > { %1121 = vrsqrt.f32 %v302_v7 }
 0x144   : > { %v303_v12 = vadd.f32 1e-05, %v295_v10  ;;  %v304_v13 = vadd.f32 1e-05, %v296_v11  ;;  %v1114_v15 = vpop.eup %1113  ;;  %v562_v11 = vunpack.c.0.s8 %v561_v4 }
 0x145   : > { %v289_v14 = vpop.xlane.xlu1 %288  ;;  %v314_v19 = vmul.f32 %v1114_v15, %v1278_v20 }
 0x146   : > { %1123 = vrsqrt.f32 %v303_v12  ;;  %v297_v16 = vmul.f32 0.0625, %v289_v14 }
 0x147   : > { %1125 = vrsqrt.f32 %v304_v13 }
 0x148   : > { %v1116_v17 = vpop.eup %1115  ;;  %v305_v18 = vadd.f32 1e-05, %v297_v16 }
 0x149   : > { %v315_v22 = vmul.f32 %v1116_v17, %v1286_v28  ;;  %v1118_v23 = vpop.eup %1117 }
 0x14a   : > { %1127 = vrsqrt.f32 %v305_v18  ;;  %v316_v26 = vmul.f32 %v1118_v23, %v1280_v21  ;;  %v1351_v23 = vsub.s32 %v562_v11, %v500_v0 }
 0x14b   : > { %v322_v24 = vpack.c.bf16 %v315_v22, %v314_v19 }
 0x14c   : > { %v1120_v25 = vpop.eup %1119 }
 0x14d   : > { %1068 = vmatprep.mubr.msk.bf16.mxu0 %vm216_vm0, %v322_v24  ;;  %v317_v27 = vmul.f32 %v1120_v25, %v1288_v29  ;;  %v1122_v30 = vpop.eup %1121  ;;  %v1051_v29 = vld [vmem:[%s1592_s2] ss:$0 sm:$0xff] }
 0x14e   : > { %v318_v33 = vmul.f32 %v1122_v30, %v1296_v38 }
 0x14f   : > { %v323_v31 = vpack.c.bf16 %v317_v27, %v316_v26 }
 0x150   : > { %v1124_v32 = vpop.eup %1123 }
 0x151   : > { %1069 = vmatmul.mubr.msk.bf16.vlgmr.msra.gmra.mrb[0].mxu0 %vm216_vm0, %v323_v31  ;;  %v319_v20 = vmul.f32 %v1124_v32, %v1298_v39  ;;  %v1126_v28 = vpop.eup %1125 }
 0x152   : > { %v320_v36 = vmul.f32 %v1126_v28, %v1306_v48 }
 0x153   : > { %v324_v34 = vpack.c.bf16 %v319_v20, %v318_v33 }
 0x154   : > { %v1128_v35 = vpop.eup %1127 }
 0x155   : > { %1072 = vmatprep.mubr.msk.bf16.mxu1 %vm216_vm0, %v324_v34  ;;  %v321_v21 = vmul.f32 %v1128_v35, %v1308_v49 }
 0x157   : > { %v325_v37 = vpack.c.bf16 %v321_v21, %v320_v36 }
 0x159   : > { %1073 = vmatmul.mubr.msk.bf16.vlgmr.msra.gmra.mrb[0].mxu1 %vm216_vm0, %v325_v37 }
 0x224   : > { %v1070_v40 = vpop.f32.mrb[0].mxu0 }
 0x225   : > { %v387_v38 = vpop.f32.mrb[1].mxu0  ;;  %v396_v46 = vadd.f32 %v1070_v40, %v1051_v29 }
 0x226   : > { %v388_v41 = vadd.f32 %v1051_v29, %v387_v38  ;;  %v1071_v39 = vpop.f32.mrb[2].mxu0 }
 0x227   : > { %v390_v42 = vpop.f32.mrb[3].mxu0  ;;  %v399_v49 = vadd.f32 %v1071_v39, %v1051_v29 }
 0x228   : > { %418 = vxpose.xlu0.b32.start [1/8] (short) (narrow) %v388_v41, 16  ;;  %v391_v43 = vadd.f32 %v1051_v29, %v390_v42 }
 0x22c   : > { %419 = vxpose.xlu0.b32.cont [2/8] (short) (narrow) %v391_v43, 16  ;;  %v1074_v44 = vpop.f32.mrb[0].mxu1 }
 0x22d   : > { %v403_v45 = vpop.f32.mrb[1].mxu1  ;;  %v412_v52 = vadd.f32 %v1074_v44, %v1051_v29 }
 0x22e   : > { %v1075_v47 = vpop.f32.mrb[2].mxu1  ;;  %v404_v50 = vadd.f32 %v1051_v29, %v403_v45 }
 0x22f   : > { %v406_v48 = vpop.f32.mrb[3].mxu1  ;;  %v415_v53 = vadd.f32 %v1075_v47, %v1051_v29 }
 0x230   : > { %420 = vxpose.xlu0.b32.cont [3/8] (short) (narrow) %v396_v46, 16  ;;  %v407_v51 = vadd.f32 %v1051_v29, %v406_v48 }
 0x234   : > { %421 = vxpose.xlu0.b32.cont [4/8] (short) (narrow) %v399_v49, 16 }
 0x238   : > { %422 = vxpose.xlu0.b32.cont [5/8] (short) (narrow) %v404_v50, 16 }
 0x23c   : > { %423 = vxpose.xlu0.b32.cont [6/8] (short) (narrow) %v407_v51, 16 }
 0x240   : > { %424 = vxpose.xlu0.b32.cont [7/8] (short) (narrow) %v412_v52, 16 }
 0x244   : > { %425 = vxpose.xlu0.b32.end [8/8] (short) (narrow) %v415_v53, 16 }
 0x2a8   : > { %v434_v54 = vpop.trf.xlu0 }
 0x2a9   : > { %452 = vrot.lane.b32.xlu1 %v434_v54, %s1217_s24 }
 0x2ac   : > { %v1336_v55 = vpop.trf.xlu0 }
 0x2ad   : > { %458 = vrot.lane.b32.xlu1 %v434_v54, %s1218_s25 }
 0x2b1   : > { %464 = vrot.lane.b32.xlu1 %v434_v54, %s1219_s26 }
 0x2b5   : > { %470 = vrot.lane.b32.xlu1 %v434_v54, %s1220_s27 }
 0x2b9   : > { %476 = vrot.lane.b32.xlu1 %v434_v54, %s1221_s28 }
 0x2bd   : > { %482 = vrot.lane.b32.xlu1 %v434_v54, %s1222_s29 }
 0x2c1   : > { %488 = vrot.lane.b32.xlu1 %v434_v54, %s1223_s30 }
 0x2c5   : > { %454 = vrot.lane.b32.xlu1 %v1336_v55, %s1217_s24 }
 0x2c9   : > { %460 = vrot.lane.b32.xlu1 %v1336_v55, %s1218_s25 }
 0x2cd   : > { %466 = vrot.lane.b32.xlu1 %v1336_v55, %s1219_s26 }
 0x2d1   : > { %472 = vrot.lane.b32.xlu1 %v1336_v55, %s1220_s27 }
 0x2d5   : > { %478 = vrot.lane.b32.xlu1 %v1336_v55, %s1221_s28 }
 0x2d9   : > { %484 = vrot.lane.b32.xlu1 %v1336_v55, %s1222_s29 }
 0x2dd   : > { %490 = vrot.lane.b32.xlu1 %v1336_v55, %s1223_s30 }
 0x31b   : > { %v453_v56 = vpop.permute.xlu1 %452 }
 0x31f   : > { %v459_v57 = vpop.permute.xlu1 %458 }
 0x320   : > { %v494_v6 = vcombine.low %v434_v54, %v459_v57  ;;  %v495_v9 = vcombine.high %v434_v54, %v459_v57 }
 0x322   : > { %v502_v14 = vrot.slane %v494_v6, %v1345_v5  ;;  %v509_v19 = vrot.slane %v495_v9, %v1345_v5 }
 0x323   : > { %v465_v58 = vpop.permute.xlu1 %464 }
 0x324   : > { %v510_v2 = vcombine.low %v453_v56, %v465_v58  ;;  %v511_v8 = vcombine.high %v453_v56, %v465_v58 }
 0x326   : > { %v518_v10 = vrot.slane %v510_v2, %v1345_v5  ;;  %v525_v16 = vrot.slane %v511_v8, %v1345_v5 }
 0x327   : > { %v471_v62 = vpop.permute.xlu1 %470 }
 0x328   : > { %v558_v22 = vcombine.low %v502_v14, %v518_v10  ;;  %v559_v30 = vcombine.high %v502_v14, %v518_v10  ;;  %v575_v32 = vcombine.high %v509_v19, %v525_v16  ;;  %v574_v47 = vcombine.low %v509_v19, %v525_v16 }
 0x32a   : > { %v566_v34 = vrot.slane %v558_v22, %v1351_v23  ;;  %v589_v38 = vrot.slane %v575_v32, %v1351_v23  ;;  %v573_v41 = vrot.slane %v559_v30, %v1351_v23  ;;  %v582_v53 = vrot.slane %v574_v47, %v1351_v23 }
 0x32b   : > { %v477_v1 = vpop.permute.xlu1 %476 }
 0x32f   : > { %v483_v7 = vpop.permute.xlu1 %482 }
 0x330   : > { %v526_v12 = vcombine.low %v471_v62, %v483_v7  ;;  %v527_v13 = vcombine.high %v471_v62, %v483_v7 }
 0x332   : > { %v534_v24 = vrot.slane %v526_v12, %v1345_v5  ;;  %v541_v25 = vrot.slane %v527_v13, %v1345_v5 }
 0x333   : > { %v489_v15 = vpop.permute.xlu1 %488 }
 0x334   : > { %v542_v17 = vcombine.low %v477_v1, %v489_v15  ;;  %v543_v18 = vcombine.high %v477_v1, %v489_v15 }
 0x336   : > { %v550_v26 = vrot.slane %v542_v17, %v1345_v5  ;;  %v557_v27 = vrot.slane %v543_v18, %v1345_v5 }
 0x337   : > { %v455_v31 = vpop.permute.xlu1 %454 }
 0x338   : > { %v590_v33 = vcombine.low %v534_v24, %v550_v26  ;;  %v591_v20 = vcombine.high %v534_v24, %v550_v26  ;;  %v607_v28 = vcombine.high %v541_v25, %v557_v27  ;;  %v606_v39 = vcombine.low %v541_v25, %v557_v27 }
 0x33a   : > { %v598_v35 = vrot.slane %v590_v33, %v1351_v23  ;;  %v621_v36 = vrot.slane %v607_v28, %v1351_v23  ;;  %v605_v21 = vrot.slane %v591_v20, %v1351_v23  ;;  %v614_v51 = vrot.slane %v606_v39, %v1351_v23 }
 0x33b   : > { %v461_v37 = vpop.permute.xlu1 %460 }
 0x33c   : > { %v1361_v29 = vcombine.high %v566_v34, %v598_v35  ;;  %v1363_v40 = vcombine.low %v566_v34, %v598_v35  ;;  %v1371_v44 = vcombine.low %v589_v38, %v621_v36  ;;  %v1373_v45 = vcombine.low %v573_v41, %v605_v21 }
 0x33d   : > { %v1379_v50 = vcombine.high %v573_v41, %v605_v21  ;;  %v1385_v56 = vcombine.low %v582_v53, %v614_v51  ;;  %v1389_v60 = vcombine.high %v582_v53, %v614_v51  ;;  %v630_v62 = vcombine.low %v1336_v55, %v461_v37 }
 0x33e   : > { %v770_v42 = vsel %vm766_vm1, %v1361_v29, -inf  ;;  %v767_v43 = vsel %vm766_vm1, %v1363_v40, -inf  ;;  %v785_v48 = vsel %vm766_vm1, %v1371_v44, -inf  ;;  %v773_v49 = vsel %vm766_vm1, %v1373_v45, -inf }
 0x33f   : > { %771 = vmax.xlane.f32.xlu0 %v770_v42  ;;  %768 = vmax.xlane.f32.xlu1 %v767_v43  ;;  %v467_v46 = vpop.permute.xlu1 %466  ;;  %v776_v54 = vsel %vm766_vm1, %v1379_v50, -inf  ;;  %v779_v59 = vsel %vm766_vm1, %v1385_v56, -inf  ;;  %v1392_v63 = vcombine.high %v589_v38, %v621_v36  ;;  %v782_v2 = vsel %vm766_vm1, %v1389_v60, -inf }
 0x340   : > { %v646_v58 = vcombine.low %v455_v31, %v467_v46  ;;  %v638_v6 = vrot.slane %v630_v62, %v1345_v5  ;;  %v647_v7 = vcombine.high %v455_v31, %v467_v46  ;;  %v631_v10 = vcombine.high %v1336_v55, %v461_v37 }
 0x341   : > { %v788_v11 = vsel %vm766_vm1, %v1392_v63, -inf }
 0x342   : > { %v654_v0 = vrot.slane %v646_v58, %v1345_v5  ;;  %v661_v17 = vrot.slane %v647_v7, %v1345_v5  ;;  %v645_v55 = vrot.slane %v631_v10, %v1345_v5 }
 0x343   : > { %786 = vmax.xlane.f32.xlu0 %v785_v48  ;;  %774 = vmax.xlane.f32.xlu1 %v773_v49  ;;  %v473_v52 = vpop.permute.xlu1 %472 }
 0x344   : > { %v694_v12 = vcombine.low %v638_v6, %v654_v0  ;;  %v695_v18 = vcombine.high %v638_v6, %v654_v0  ;;  %v710_v30 = vcombine.low %v645_v55, %v661_v17  ;;  %v711_v21 = vcombine.high %v645_v55, %v661_v17 }
 0x346   : > { %v702_v25 = vrot.slane %v694_v12, %v1351_v23  ;;  %v709_v33 = vrot.slane %v695_v18, %v1351_v23  ;;  %v718_v37 = vrot.slane %v710_v30, %v1351_v23  ;;  %v725_v46 = vrot.slane %v711_v21, %v1351_v23 }
 0x347   : > { %777 = vmax.xlane.f32.xlu1 %v776_v54  ;;  %v479_v57 = vpop.permute.xlu1 %478 }
 0x34b   : > { %780 = vmax.xlane.f32.xlu1 %v779_v59  ;;  %v485_v61 = vpop.permute.xlu1 %484 }
 0x34c   : > { %v662_v1 = vcombine.low %v473_v52, %v485_v61  ;;  %v663_v3 = vcombine.high %v473_v52, %v485_v61 }
 0x34e   : > { %v670_v13 = vrot.slane %v662_v1, %v1345_v5  ;;  %v677_v16 = vrot.slane %v663_v3, %v1345_v5 }
 0x34f   : > { %783 = vmax.xlane.f32.xlu1 %v782_v2  ;;  %v491_v4 = vpop.permute.xlu1 %490 }
 0x350   : > { %v678_v8 = vcombine.low %v479_v57, %v491_v4  ;;  %v679_v9 = vcombine.high %v479_v57, %v491_v4 }
 0x352   : > { %v686_v14 = vrot.slane %v678_v8, %v1345_v5  ;;  %v693_v15 = vrot.slane %v679_v9, %v1345_v5 }
 0x353   : > { %789 = vmax.xlane.f32.xlu1 %v788_v11 }
 0x354   : > { %v726_v19 = vcombine.low %v670_v13, %v686_v14  ;;  %v727_v22 = vcombine.high %v670_v13, %v686_v14  ;;  %v742_v24 = vcombine.low %v677_v16, %v693_v15  ;;  %v743_v20 = vcombine.high %v677_v16, %v693_v15 }
 0x356   : > { %v734_v26 = vrot.slane %v726_v19, %v1351_v23  ;;  %v741_v27 = vrot.slane %v727_v22, %v1351_v23  ;;  %v750_v28 = vrot.slane %v742_v24, %v1351_v23  ;;  %v757_v38 = vrot.slane %v743_v20, %v1351_v23 }
 0x358   : > { %v1410_v31 = vcombine.high %v702_v25, %v734_v26  ;;  %v1412_v32 = vcombine.low %v702_v25, %v734_v26  ;;  %v1420_v35 = vcombine.high %v709_v33, %v741_v27  ;;  %v1422_v36 = vcombine.low %v709_v33, %v741_v27 }
 0x359   : > { %v1430_v42 = vcombine.high %v718_v37, %v750_v28  ;;  %v1432_v43 = vcombine.low %v718_v37, %v750_v28  ;;  %v1439_v49 = vcombine.high %v725_v46, %v757_v38  ;;  %v1441_v51 = vcombine.low %v725_v46, %v757_v38 }
 0x35a   : > { %v794_v34 = vsel %vm766_vm1, %v1410_v31, -inf  ;;  %v791_v5 = vsel %vm766_vm1, %v1412_v32, -inf  ;;  %v800_v41 = vsel %vm766_vm1, %v1420_v35, -inf  ;;  %v797_v39 = vsel %vm766_vm1, %v1422_v36, -inf }
 0x35b   : > { %795 = vmax.xlane.f32.xlu1 %v794_v34  ;;  %792 = vmax.xlane.f32.xlu0 %v791_v5  ;;  %v806_v47 = vsel %vm766_vm1, %v1430_v42, -inf  ;;  %v803_v48 = vsel %vm766_vm1, %v1432_v43, -inf  ;;  %v812_v52 = vsel %vm766_vm1, %v1439_v49, -inf  ;;  %v809_v53 = vsel %vm766_vm1, %v1441_v51, -inf }
 0x35f   : > { %801 = vmax.xlane.f32.xlu1 %v800_v41  ;;  %798 = vmax.xlane.f32.xlu0 %v797_v39 }
 0x363   : > { %807 = vmax.xlane.f32.xlu1 %v806_v47  ;;  %804 = vmax.xlane.f32.xlu0 %v803_v48 }
 0x367   : > { %813 = vmax.xlane.f32.xlu1 %v812_v52  ;;  %810 = vmax.xlane.f32.xlu0 %v809_v53 }
 0x3cc   : > { %v772_v23 = vpop.xlane.xlu0 %771  ;;  %v769_v54 = vpop.xlane.xlu1 %768 }
 0x3cd   : > { %v816_v57 = vsub.f32 %v1361_v29, %v772_v23  ;;  %v815_v58 = vsub.f32 %v1363_v40, %v769_v54 }
 0x3cf   : > { %v833_v59 = vmul.f32 1.442695, %v816_v57  ;;  %v831_v61 = vmul.f32 1.442695, %v815_v58 }
 0x3d0   : > { %v775_v62 = vpop.xlane.xlu1 %774  ;;  %v787_v2 = vpop.xlane.xlu0 %786 }
 0x3d1   : > { %1129 = vpow2.f32 %v833_v59  ;;  %v817_v0 = vsub.f32 %v1373_v45, %v775_v62  ;;  %v821_v6 = vsub.f32 %v1371_v44, %v787_v2 }
 0x3d2   : > { %1131 = vpow2.f32 %v831_v61 }
 0x3d3   : > { %v835_v1 = vmul.f32 1.442695, %v817_v0  ;;  %v843_v9 = vmul.f32 1.442695, %v821_v6 }
 0x3d4   : > { %v778_v3 = vpop.xlane.xlu1 %777 }
 0x3d5   : > { %v818_v4 = vsub.f32 %v1379_v50, %v778_v3  ;;  %1133 = vpow2.f32 %v835_v1 }
 0x3d7   : > { %v837_v7 = vmul.f32 1.442695, %v818_v4 }
 0x3d8   : > { %v781_v8 = vpop.xlane.xlu1 %780 }
 0x3d9   : > { %1135 = vpow2.f32 %v837_v7  ;;  %v819_v29 = vsub.f32 %v1385_v56, %v781_v8 }
 0x3db   : > { %v1453_v40 = vpop.eup %1129  ;;  %v839_v10 = vmul.f32 1.442695, %v819_v29 }
 0x3dc   : > { %v1455_v11 = vpop.eup %1131  ;;  %v784_v45 = vpop.xlane.xlu1 %783  ;;  %v866_v12 = vsel %vm766_vm1, %v1453_v40, 0.0 }
 0x3dd   : > { %1137 = vpow2.f32 %v839_v10  ;;  %v820_v50 = vsub.f32 %v1389_v60, %v784_v45  ;;  %867 = vadd.xlane.f32.xlu1 %v866_v12  ;;  %v863_v44 = vsel %vm766_vm1, %v1455_v11, 0.0 }
 0x3de   : > { %864 = vadd.xlane.f32.xlu0 %v863_v44  ;;  %1139 = vpow2.f32 %v843_v9 }
 0x3df   : > { %v841_v56 = vmul.f32 1.442695, %v820_v50  ;;  %v1462_v13 = vpop.eup %1133 }
 0x3e0   : > { %v790_v14 = vpop.xlane.xlu1 %789  ;;  %v869_v16 = vsel %vm766_vm1, %v1462_v13, 0.0 }
 0x3e1   : > { %1141 = vpow2.f32 %v841_v56  ;;  %v822_v15 = vsub.f32 %v1392_v63, %v790_v14 }
 0x3e2   : > { %870 = vadd.xlane.f32.xlu0 %v869_v16 }
 0x3e3   : > { %v1467_v17 = vpop.eup %1135  ;;  %v845_v60 = vmul.f32 1.442695, %v822_v15 }
 0x3e4   : > { %v872_v18 = vsel %vm766_vm1, %v1467_v17, 0.0 }
 0x3e5   : > { %1143 = vpow2.f32 %v845_v60  ;;  %873 = vadd.xlane.f32.xlu1 %v872_v18 }
 0x3e7   : > { %v1471_v19 = vpop.eup %1137 }
 0x3e8   : > { %v793_v22 = vpop.xlane.xlu0 %792  ;;  %v796_v24 = vpop.xlane.xlu1 %795  ;;  %v875_v55 = vsel %vm766_vm1, %v1471_v19, 0.0 }
 0x3e9   : > { %v1475_v63 = vpop.eup %1139  ;;  %v823_v25 = vsub.f32 %v1412_v32, %v793_v22  ;;  %v824_v26 = vsub.f32 %v1410_v31, %v796_v24  ;;  %876 = vadd.xlane.f32.xlu0 %v875_v55 }
 0x3ea   : > { %v881_v34 = vsel %vm766_vm1, %v1475_v63, 0.0 }
 0x3eb   : > { %v1479_v27 = vpop.eup %1141  ;;  %v847_v30 = vmul.f32 1.442695, %v823_v25  ;;  %v849_v33 = vmul.f32 1.442695, %v824_v26 }
 0x3ec   : > { %v799_v20 = vpop.xlane.xlu0 %798  ;;  %v802_v28 = vpop.xlane.xlu1 %801  ;;  %v878_v5 = vsel %vm766_vm1, %v1479_v27, 0.0 }
 0x3ed   : > { %1145 = vpow2.f32 %v847_v30  ;;  %v825_v21 = vsub.f32 %v1422_v36, %v799_v20  ;;  %v826_v32 = vsub.f32 %v1420_v35, %v802_v28  ;;  %882 = vadd.xlane.f32.xlu0 %v881_v34  ;;  %879 = vadd.xlane.f32.xlu1 %v878_v5 }
 0x3ee   : > { %1147 = vpow2.f32 %v849_v33 }
 0x3ef   : > { %v1487_v31 = vpop.eup %1143  ;;  %v851_v37 = vmul.f32 1.442695, %v825_v21  ;;  %v853_v38 = vmul.f32 1.442695, %v826_v32 }
 0x3f0   : > { %v805_v41 = vpop.xlane.xlu0 %804  ;;  %v808_v39 = vpop.xlane.xlu1 %807  ;;  %v884_v46 = vsel %vm766_vm1, %v1487_v31, 0.0 }
 0x3f1   : > { %1149 = vpow2.f32 %v851_v37  ;;  %v827_v47 = vsub.f32 %v1432_v43, %v805_v41  ;;  %v828_v48 = vsub.f32 %v1430_v42, %v808_v39  ;;  %885 = vadd.xlane.f32.xlu1 %v884_v46 }
 0x3f2   : > { %1151 = vpow2.f32 %v853_v38 }
 0x3f3   : > { %v855_v35 = vmul.f32 1.442695, %v827_v47  ;;  %v857_v36 = vmul.f32 1.442695, %v828_v48 }
 0x3f4   : > { %v811_v52 = vpop.xlane.xlu0 %810  ;;  %v814_v53 = vpop.xlane.xlu1 %813 }
 0x3f5   : > { %1153 = vpow2.f32 %v855_v35  ;;  %v829_v23 = vsub.f32 %v1441_v51, %v811_v52  ;;  %v830_v54 = vsub.f32 %v1439_v49, %v814_v53 }
 0x3f6   : > { %1155 = vpow2.f32 %v857_v36 }
 0x3f7   : > { %v1495_v57 = vpop.eup %1145  ;;  %v859_v58 = vmul.f32 1.442695, %v829_v23  ;;  %v861_v59 = vmul.f32 1.442695, %v830_v54 }
 0x3f8   : > { %v1497_v61 = vpop.eup %1147  ;;  %v887_v42 = vsel %vm766_vm1, %v1495_v57, 0.0 }
 0x3f9   : > { %1157 = vpow2.f32 %v859_v58  ;;  %888 = vadd.xlane.f32.xlu0 %v887_v42  ;;  %v890_v43 = vsel %vm766_vm1, %v1497_v61, 0.0 }
 0x3fa   : > { %1159 = vpow2.f32 %v861_v59  ;;  %891 = vadd.xlane.f32.xlu1 %v890_v43 }
 0x3fb   : > { %v1503_v51 = vpop.eup %1149 }
 0x3fc   : > { %v1505_v49 = vpop.eup %1151  ;;  %v893_v62 = vsel %vm766_vm1, %v1503_v51, 0.0 }
 0x3fd   : > { %894 = vadd.xlane.f32.xlu0 %v893_v62  ;;  %v896_v0 = vsel %vm766_vm1, %v1505_v49, 0.0 }
 0x3fe   : > { %897 = vadd.xlane.f32.xlu1 %v896_v0 }
 0x3ff   : > { %v1511_v1 = vpop.eup %1153 }
 0x400   : > { %v1513_v2 = vpop.eup %1155  ;;  %v899_v3 = vsel %vm766_vm1, %v1511_v1, 0.0 }
 0x401   : > { %900 = vadd.xlane.f32.xlu0 %v899_v3  ;;  %v902_v4 = vsel %vm766_vm1, %v1513_v2, 0.0 }
 0x402   : > { %903 = vadd.xlane.f32.xlu1 %v902_v4 }
 0x403   : > { %v1519_v6 = vpop.eup %1157 }
 0x404   : > { %v1521_v7 = vpop.eup %1159  ;;  %v905_v8 = vsel %vm766_vm1, %v1519_v6, 0.0 }
 0x405   : > { %906 = vadd.xlane.f32.xlu0 %v905_v8  ;;  %v908_v29 = vsel %vm766_vm1, %v1521_v7, 0.0 }
 0x406   : > { %909 = vadd.xlane.f32.xlu1 %v908_v29 }
 0x46a   : > { %v868_v9 = vpop.xlane.xlu1 %867 }
 0x46b   : > { %v865_v10 = vpop.xlane.xlu0 %864  ;;  %1161 = vrcp.f32 %v868_v9 }
 0x46c   : > { %1163 = vrcp.f32 %v865_v10 }
 0x46f   : > { %v871_v45 = vpop.xlane.xlu0 %870 }
 0x470   : > { %1165 = vrcp.f32 %v871_v45 }
 0x472   : > { %v874_v12 = vpop.xlane.xlu1 %873 }
 0x473   : > { %1167 = vrcp.f32 %v874_v12 }
 0x475   : > { %v1162_v50 = vpop.eup %1161 }
 0x476   : > { %v1164_v44 = vpop.eup %1163  ;;  %v914_v56 = vmul.f32 %v1162_v50, %v1453_v40  ;;  %v877_v14 = vpop.xlane.xlu0 %876 }
 0x477   : > { %v912_v15 = vmul.f32 %v1164_v44, %v1455_v11  ;;  %1169 = vrcp.f32 %v877_v14 }
 0x478   : > { %944 = vst.msk [vmem:[%s1531_s7 + $0x8] sm:$0xff] %vm766_vm1, %v914_v56 }
 0x479   : > { %943 = vst.msk [vmem:[%s1531_s7] sm:$0xff] %vm766_vm1, %v912_v15 }
 0x47a   : > { %v1166_v16 = vpop.eup %1165  ;;  %v883_v60 = vpop.xlane.xlu0 %882 }
 0x47b   : > { %v880_v18 = vpop.xlane.xlu1 %879  ;;  %v916_v22 = vmul.f32 %v1166_v16, %v1462_v13  ;;  %1171 = vrcp.f32 %v883_v60 }
 0x47c   : > { %1173 = vrcp.f32 %v880_v18 }
 0x47d   : > { %v1168_v24 = vpop.eup %1167  ;;  %945 = vst.msk [vmem:[%s1531_s7 + $0x10] sm:$0xff] %vm766_vm1, %v916_v22 }
 0x47e   : > { %v918_v40 = vmul.f32 %v1168_v24, %v1467_v17 }
 0x47f   : > { %v886_v11 = vpop.xlane.xlu1 %885 }
 0x480   : > { %1175 = vrcp.f32 %v886_v11  ;;  %946 = vst.msk [vmem:[%s1531_s7 + $0x18] sm:$0xff] %vm766_vm1, %v918_v40 }
 0x481   : > { %v1170_v55 = vpop.eup %1169 }
 0x482   : > { %v920_v25 = vmul.f32 %v1170_v55, %v1471_v19 }
 0x484   : > { %947 = vst.msk [vmem:[%s1531_s7 + $0x20] sm:$0xff] %vm766_vm1, %v920_v25 }
 0x485   : > { %v1172_v13 = vpop.eup %1171 }
 0x486   : > { %v1174_v26 = vpop.eup %1173  ;;  %v924_v30 = vmul.f32 %v1172_v13, %v1475_v63  ;;  %v889_v33 = vpop.xlane.xlu0 %888 }
 0x487   : > { %v922_v20 = vmul.f32 %v1174_v26, %v1479_v27  ;;  %1177 = vrcp.f32 %v889_v33  ;;  %v892_v17 = vpop.xlane.xlu1 %891 }
 0x488   : > { %949 = vst.msk [vmem:[%s1531_s7 + $0x30] sm:$0xff] %vm766_vm1, %v924_v30  ;;  %1179 = vrcp.f32 %v892_v17 }
 0x489   : > { %948 = vst.msk [vmem:[%s1531_s7 + $0x28] sm:$0xff] %vm766_vm1, %v922_v20 }
 0x48a   : > { %v1176_v28 = vpop.eup %1175  ;;  %v895_v34 = vpop.xlane.xlu0 %894 }
 0x48b   : > { %v926_v19 = vmul.f32 %v1176_v28, %v1487_v31  ;;  %1181 = vrcp.f32 %v895_v34  ;;  %v898_v5 = vpop.xlane.xlu1 %897 }
 0x48c   : > { %1183 = vrcp.f32 %v898_v5 }
 0x48d   : > { %950 = vst.msk [vmem:[%s1531_s7 + $0x38] sm:$0xff] %vm766_vm1, %v926_v19 }
 0x48e   : > { %v901_v63 = vpop.xlane.xlu0 %900 }
 0x48f   : > { %1185 = vrcp.f32 %v901_v63  ;;  %v904_v27 = vpop.xlane.xlu1 %903 }
 0x490   : > { %1187 = vrcp.f32 %v904_v27 }
 0x491   : > { %v1178_v21 = vpop.eup %1177 }
 0x492   : > { %v1180_v32 = vpop.eup %1179  ;;  %v928_v37 = vmul.f32 %v1178_v21, %v1495_v57  ;;  %v907_v38 = vpop.xlane.xlu0 %906 }
 0x493   : > { %v930_v31 = vmul.f32 %v1180_v32, %v1497_v61  ;;  %1189 = vrcp.f32 %v907_v38  ;;  %v910_v41 = vpop.xlane.xlu1 %909 }
 0x494   : > { %951 = vst.msk [vmem:[%s1531_s7 + $0x40] sm:$0xff] %vm766_vm1, %v928_v37  ;;  %1191 = vrcp.f32 %v910_v41 }
 0x495   : > { %v1182_v39 = vpop.eup %1181  ;;  %952 = vst.msk [vmem:[%s1531_s7 + $0x48] sm:$0xff] %vm766_vm1, %v930_v31 }
 0x496   : > { %v1184_v46 = vpop.eup %1183  ;;  %v932_v47 = vmul.f32 %v1182_v39, %v1503_v51 }
 0x497   : > { %v934_v48 = vmul.f32 %v1184_v46, %v1505_v49 }
 0x498   : > { %953 = vst.msk [vmem:[%s1531_s7 + $0x50] sm:$0xff] %vm766_vm1, %v932_v47 }
 0x499   : > { %v1186_v35 = vpop.eup %1185  ;;  %954 = vst.msk [vmem:[%s1531_s7 + $0x58] sm:$0xff] %vm766_vm1, %v934_v48 }
 0x49a   : > { %v1188_v36 = vpop.eup %1187  ;;  %v936_v52 = vmul.f32 %v1186_v35, %v1511_v1 }
 0x49b   : > { %v938_v53 = vmul.f32 %v1188_v36, %v1513_v2 }
 0x49c   : > { %955 = vst.msk [vmem:[%s1531_s7 + $0x60] sm:$0xff] %vm766_vm1, %v936_v52 }
 0x49d   : > { %v1190_v23 = vpop.eup %1189  ;;  %956 = vst.msk [vmem:[%s1531_s7 + $0x68] sm:$0xff] %vm766_vm1, %v938_v53 }
 0x49e   : > { %v1192_v54 = vpop.eup %1191  ;;  %v940_v57 = vmul.f32 %v1190_v23, %v1519_v6 }
 0x49f   : > { %v942_v58 = vmul.f32 %v1192_v54, %v1521_v7 }
 0x4a0   : > { %957 = vst.msk [vmem:[%s1531_s7 + $0x70] sm:$0xff] %vm766_vm1, %v940_v57 }
 0x4a1   : > { %958 = vst.msk [vmem:[%s1531_s7 + $0x78] sm:$0xff] %vm766_vm1, %v942_v58 }
 0x4a2 PF: > { %s13_s14 = sadd.s32 1, %s1215_s14   ;;  %s1594_s12 = smov %s1211_s13 }
 0x4a3   : > { %p10_p5 = scmp.ge.s32.totalorder %s13_s14, 4   ;;  %s1595_s13 = smov %s1597_s15 }
 0x4a5   :  { %12 = sbr.rel (!%p10_p5) target bundleno = 2 (0x2), region = 62 }

// kernel: msa_update_with_pair.6
= control target key start
LH: loop header
LB: loop body
LE: loop exit
PB: predicated region body
PF: predicated region fallthrough
CT: control target
= control target key end

     0   :  { %s3581_s27 = smov 0   ;;  %s3583_s28 = smov 0   ;;  %s4229_s0 = inlined_call_operand.vmem [shape: f32[2,8,4,32], index: 0, kind: input, shape index: {}, may-alias: {0,8}]   ;;  %s4230_s1 = inlined_call_operand.vmem [shape: f32[2,4,4,8,8], index: 1, kind: input, shape index: {}]   ;;  %s4231_s2 = inlined_call_operand.vmem [shape: bf16[32,32], index: 2, kind: input, shape index: {}]   ;;  %s4232_s3 = inlined_call_operand.vmem [shape: f32[1,32], index: 3, kind: input, shape index: {}]   ;;  %s4233_s4 = inlined_call_operand.vmem [shape: bf16[32,32], index: 4, kind: input, shape index: {}]   ;;  %s4234_s5 = inlined_call_operand.vmem [shape: f32[1,32], index: 5, kind: input, shape index: {}]   ;;  %s4235_s6 = inlined_call_operand.vmem [shape: bf16[32,32], index: 6, kind: input, shape index: {}]   ;;  %s4236_s7 = inlined_call_operand.vmem [shape: f32[1,32], index: 7, kind: input, shape index: {}]   ;;  %s4237_s8 = inlined_call_operand.vmem [shape: f32[2,8,4,32], index: 8, kind: output, shape index: {}, may-alias: {0,8}]  }
   0x1   :  { %s3585_s29 = smov 0  }
   0x2 LB: > { %s30_s30 = sadd.s32 1, %s3518_s28  ;;  %p3284_p0 = scmp.ge.s32.totalorder %s3522_s29, 1  ;;  %s3522_s29 = sphi %s3585_s29, %s18_s29   ;;  %s3518_s28 = sphi %s3583_s28, %s4239_s28   ;;  %s3514_s27 = sphi %s3581_s27, %s4238_s27  }
   0x3   : > { %p32_p1 = scmp.ge.s32.totalorder %s30_s30, 2  ;;  %p291_p2 = scmp.lt.s32.totalorder %s3522_s29, 3 }
   0x5   : > { %s4241_s30 = smov (%p32_p1, %s30_s30), 0  ;;  %p292_p3 = pnand %p3284_p0, %p291_p2 }
   0x6   : > { %p336_p4 = scmp.lt.s32.totalorder (!%p292_p3), %s3514_s27, 1  ;;  %vm382_vm0 = vcmask (!%p292_p3), 261120   ;;  %v3524_v16 = vmov (!%p292_p3), 839922192   ;;  %v407_v18 = vlaneseq (!%p292_p3)  ;;  %v3525_v19 = vmov (!%p292_p3), 1985246804  }
   0x7   : > { %295 = sbr.rel (%p292_p3) target bundleno = 2164 (0x874), region = 52  ;;  %v405_v17 = vunpack.c.l.s4 (!%p292_p3), %v3524_v16  ;;  %v412_v20 = vunpack.c.l.s4 (!%p292_p3), %v3525_v19  ;;  %s3526_s19 = smov (!%p292_p3), 112   ;;  %vm3535_vm1 = vmmov (!%p292_p3), 0   ;;  %vm1600_vm2 = vcmask (!%p292_p3), 64512  }
   0x8   : > { %v3621_v22 = vshrl.u32 (!%p292_p3), %v407_v18, 7  ;;  %s3527_s20 = smov (!%p292_p3), 120   ;;  %s3528_s21 = smov (!%p292_p3), 104   ;;  %vm1605_vm3 = vcmask (!%p292_p3), 130048   ;;  %vm1610_vm4 = vcmask (!%p292_p3), 195584   ;;  %vm1630_vm5 = vcmask (!%p292_p3), 1043456  }
   0x9   : > { %v406_v21 = vunpack.c.0.s8 (!%p292_p3), %v405_v17  ;;  %v413_v23 = vunpack.c.0.s8 (!%p292_p3), %v412_v20  ;;  %s3531_s22 = smov (!%p292_p3), 16   ;;  %s3532_s23 = smov (!%p292_p3), 8   ;;  %vm3176_vm6 = vcmask (!%p292_p3), 257024  }
   0xa   : > { %s3533_s24 = smov (!%p292_p3), 24  }
   0xb   : > { %v3624_v24 = vsub.s32 (!%p292_p3), %v406_v21, %v3621_v22  ;;  %v3627_v25 = vsub.s32 (!%p292_p3), %v413_v23, %v3621_v22 }
   0xe   : > { %s4243_s27 = smov (!%p336_p4, %s3514_s27), 1 }
   0xf   : > { %s3344_s9 = sshll.u32 %s4243_s27, 5  ;;  %s3345_s25 = sshll.u32 %s4243_s27, 7 }
  0x10   : > { %s3607_s12 = scalar_lea.vmem %s4229_s0, %s3344_s9  ;;  %s3910_s11 = scalar_lea.vmem %s4230_s1, %s3345_s25 }
  0x11   : > { %v358_v0 = vld [vmem:[%s3607_s12] sm:$0xf]  ;;  %v359_v1 = vld [vmem:[%s3607_s12 + $0x4] sm:$0xf]  ;;  %v362_v2 = vld [vmem:[%s3607_s12 + $0x10] sm:$0xf]  ;;  %s356_s26 = scalar_lea.vmem %s4237_s8, %s3344_s9 }
  0x12   : > { %v374_v3 = vcombine.low %v358_v0, %v359_v1  ;;  %v363_v4 = vld [vmem:[%s3607_s12 + $0x14] sm:$0xf]  ;;  %v360_v5 = vld [vmem:[%s3607_s12 + $0x8] sm:$0xf]  ;;  %v361_v6 = vld [vmem:[%s3607_s12 + $0xc] sm:$0xf] }
  0x13   : > { %v376_v7 = vcombine.low %v362_v2, %v363_v4  ;;  %v375_v8 = vcombine.low %v360_v5, %v361_v6  ;;  %v364_v9 = vld [vmem:[%s3607_s12 + $0x18] sm:$0xf]  ;;  %v365_v10 = vld [vmem:[%s3607_s12 + $0x1c] sm:$0xf] }
  0x14   : > { %v383_v11 = vsel %vm382_vm0, %v374_v3, 0.0  ;;  %v377_v12 = vcombine.low %v364_v9, %v365_v10  ;;  %v3471_v3 = vld [vmem:[%s4231_s2 + $0x8] sm:$0xff]  }
  0x15   : > { %384 = vadd.xlane.f32.xlu0 %v383_v11  ;;  %v389_v13 = vsel %vm382_vm0, %v376_v7, 0.0  ;;  %v386_v14 = vsel %vm382_vm0, %v375_v8, 0.0 }
  0x16   : > { %390 = vadd.xlane.f32.xlu1 %v389_v13  ;;  %v392_v15 = vsel %vm382_vm0, %v377_v12, 0.0 }
  0x19   : > { %387 = vadd.xlane.f32.xlu0 %v386_v14 }
  0x1a   : > { %393 = vadd.xlane.f32.xlu1 %v392_v15 }
  0xa2   : > { %v385_v26 = vpop.xlane.xlu0 %384 }
  0xa3   : > { %v396_v27 = vmul.f32 0.03125, %v385_v26  ;;  %v391_v28 = vpop.xlane.xlu1 %390 }
  0xa4   : > { %v398_v29 = vmul.f32 0.03125, %v391_v28 }
  0xa5   : > { %v410_v30 = vrot.slane %v396_v27, %v3624_v24  ;;  %v417_v31 = vrot.slane %v396_v27, %v3627_v25 }
  0xa6   : > { %v438_v32 = vrot.slane %v398_v29, %v3624_v24  ;;  %v445_v33 = vrot.slane %v398_v29, %v3627_v25  ;;  %v388_v34 = vpop.xlane.xlu0 %387 }
  0xa7   : > { %v468_v35 = vsub.f32 %v358_v0, %v410_v30  ;;  %v469_v36 = vsub.f32 %v359_v1, %v417_v31  ;;  %v397_v37 = vmul.f32 0.03125, %v388_v34  ;;  %v394_v38 = vpop.xlane.xlu1 %393 }
  0xa8   : > { %v3633_v39 = vsub.f32 %v362_v2, %v438_v32  ;;  %v3635_v40 = vsub.f32 %v363_v4, %v445_v33  ;;  %v399_v41 = vmul.f32 0.03125, %v394_v38  ;;  %v3470_v2 = vld [vmem:[%s4231_s2] sm:$0xff]  }
  0xa9   : > { %v424_v42 = vrot.slane %v397_v37, %v3624_v24  ;;  %v431_v43 = vrot.slane %v397_v37, %v3627_v25  ;;  %v476_v44 = vmul.f32 %v468_v35, %v468_v35  ;;  %v477_v45 = vmul.f32 %v469_v36, %v469_v36  ;;  %3367 = vmatprep.subr.bf16.mxu0 %v3470_v2 }
  0xaa   : > { %v452_v46 = vrot.slane %v399_v41, %v3624_v24  ;;  %v459_v47 = vrot.slane %v399_v41, %v3627_v25  ;;  %v480_v48 = vmul.f32 %v3633_v39, %v3633_v39  ;;  %v481_v49 = vmul.f32 %v3635_v40, %v3635_v40  ;;  %3368 = vmatpush3.bf16.msra.mxu0 %v3470_v2 }
  0xab   : > { %v470_v50 = vsub.f32 %v360_v5, %v424_v42  ;;  %v471_v51 = vsub.f32 %v361_v6, %v431_v43  ;;  %v492_v52 = vcombine.low %v476_v44, %v477_v45  ;;  %3369 = vmatprep.subr.bf16.mxu0 %v3471_v3 }
  0xac   : > { %v474_v53 = vsub.f32 %v364_v9, %v452_v46  ;;  %v475_v54 = vsub.f32 %v365_v10, %v459_v47  ;;  %v494_v55 = vcombine.low %v480_v48, %v481_v49 }
  0xad   : > { %v500_v56 = vsel %vm382_vm0, %v492_v52, 0.0  ;;  %v478_v57 = vmul.f32 %v470_v50, %v470_v50  ;;  %v479_v58 = vmul.f32 %v471_v51, %v471_v51 }
  0xae   : > { %501 = vadd.xlane.f32.xlu0 %v500_v56  ;;  %v482_v59 = vmul.f32 %v474_v53, %v474_v53  ;;  %v483_v60 = vmul.f32 %v475_v54, %v475_v54  ;;  %v506_v61 = vsel %vm382_vm0, %v494_v55, 0.0  ;;  %3370 = vmatpush3.bf16.msra.mxu0 %v3471_v3  ;;  %v3529_v56 = vmov 1983009808  }
  0xaf   : > { %v493_v62 = vcombine.low %v478_v57, %v479_v58  ;;  %v739_v57 = vunpack.c.l.s4 %v3529_v56 }
  0xb0   : > { %v495_v63 = vcombine.low %v482_v59, %v483_v60  ;;  %v3530_v60 = vmov 1934713408  }
  0xb1   : > { %v503_v0 = vsel %vm382_vm0, %v493_v62, 0.0  ;;  %v740_v62 = vunpack.c.0.s8 %v739_v57 }
  0xb2   : > { %507 = vadd.xlane.f32.xlu0 %v506_v61  ;;  %504 = vadd.xlane.f32.xlu1 %v503_v0  ;;  %v509_v1 = vsel %vm382_vm0, %v495_v63, 0.0  ;;  %v771_v61 = vunpack.c.l.s4 %v3530_v60 }
  0xb6   : > { %510 = vadd.xlane.f32.xlu1 %v509_v1  ;;  %v772_v1 = vunpack.c.0.s8 %v771_v61 }
 0x13b   : > { %v502_v4 = vpop.xlane.xlu0 %501 }
 0x13c   : > { %v512_v5 = vmul.f32 0.03125, %v502_v4  ;;  %v3690_v4 = vsub.s32 %v740_v62, %v3621_v22 }
 0x13e   : > { %v516_v6 = vadd.f32 1e-05, %v512_v5 }
 0x13f   : > { %v505_v7 = vpop.xlane.xlu1 %504  ;;  %v508_v8 = vpop.xlane.xlu0 %507 }
 0x140   : > { %3476 = vrsqrt.f32 %v516_v6  ;;  %v513_v9 = vmul.f32 0.03125, %v505_v7  ;;  %v514_v10 = vmul.f32 0.03125, %v508_v8 }
 0x142   : > { %v517_v11 = vadd.f32 1e-05, %v513_v9  ;;  %v518_v12 = vadd.f32 1e-05, %v514_v10 }
 0x143   : > { %v511_v13 = vpop.xlane.xlu1 %510 }
 0x144   : > { %3478 = vrsqrt.f32 %v517_v11  ;;  %v515_v14 = vmul.f32 0.03125, %v511_v13  ;;  %v3695_v11 = vsub.s32 %v772_v1, %v3621_v22 }
 0x145   : > { %3480 = vrsqrt.f32 %v518_v12 }
 0x146   : > { %v519_v15 = vadd.f32 1e-05, %v515_v14 }
 0x148   : > { %3482 = vrsqrt.f32 %v519_v15 }
 0x14a   : > { %v3477_v16 = vpop.eup %3476 }
 0x14b   : > { %v534_v17 = vrot.slane %v3477_v16, %v3624_v24  ;;  %v541_v18 = vrot.slane %v3477_v16, %v3627_v25 }
 0x14d   : > { %v592_v20 = vmul.f32 %v534_v17, %v468_v35  ;;  %v593_v21 = vmul.f32 %v541_v18, %v469_v36 }
 0x14e   : > { %v3479_v19 = vpop.eup %3478 }
 0x14f   : > { %v3481_v23 = vpop.eup %3480  ;;  %v548_v26 = vrot.slane %v3479_v19, %v3624_v24  ;;  %v555_v27 = vrot.slane %v3479_v19, %v3627_v25  ;;  %v608_v33 = vcombine.low %v592_v20, %v593_v21 }
 0x150   : > { %v562_v28 = vrot.slane %v3481_v23, %v3624_v24  ;;  %v569_v29 = vrot.slane %v3481_v23, %v3627_v25 }
 0x151   : > { %v594_v30 = vmul.f32 %v548_v26, %v470_v50  ;;  %v595_v31 = vmul.f32 %v555_v27, %v471_v51 }
 0x152   : > { %v3483_v32 = vpop.eup %3482  ;;  %v596_v34 = vmul.f32 %v562_v28, %v3633_v39  ;;  %v597_v38 = vmul.f32 %v569_v29, %v3635_v40  ;;  %v3291_v39 = vld [vmem:[%s4232_s3] ss:$0 sm:$0xff] }
 0x153   : > { %v576_v37 = vrot.slane %v3483_v32, %v3624_v24  ;;  %v583_v35 = vrot.slane %v3483_v32, %v3627_v25  ;;  %v609_v36 = vcombine.low %v594_v30, %v595_v31 }
 0x154   : > { %v610_v44 = vcombine.low %v596_v34, %v597_v38 }
 0x155   : > { %v616_v41 = vpack.c.bf16 %v609_v36, %v608_v33  ;;  %v598_v42 = vmul.f32 %v576_v37, %v474_v53  ;;  %v599_v43 = vmul.f32 %v583_v35, %v475_v54 }
 0x157   : > { %3371 = vmatprep.mubr.msk.bf16.mxu0 %vm382_vm0, %v616_v41  ;;  %v611_v45 = vcombine.low %v598_v42, %v599_v43 }
 0x159   : > { %v617_v46 = vpack.c.bf16 %v611_v45, %v610_v44 }
 0x15b   : > { %3372 = vmatmul.mubr.msk.bf16.vlgmr.msra.gmra.mrb[0].mxu0 %vm382_vm0, %v617_v46 }
 0x22e   : > { %v3373_v47 = vpop.f32.mrb[0].mxu0 }
 0x22f   : > { %v690_v48 = vadd.f32 %v3373_v47, %v3291_v39  ;;  %v681_v49 = vpop.f32.mrb[1].mxu0 }
 0x230   : > { %v3374_v50 = vpop.f32.mrb[2].mxu0  ;;  %v682_v51 = vadd.f32 %v3291_v39, %v681_v49 }
 0x231   : > { %716 = vrot.lane.b32.xlu0 %v690_v48, %s3526_s19  ;;  %704 = vrot.lane.b32.xlu1 %v690_v48, %s3527_s20  ;;  %v684_v40 = vpop.f32.mrb[3].mxu0  ;;  %v693_v52 = vadd.f32 %v3374_v50, %v3291_v39 }
 0x232   : > { %v3676_v53 = vadd.f32 %v3291_v39, %v684_v40 }
 0x235   : > { %706 = vrot.lane.b32.xlu1 %v693_v52, %s3527_s20  ;;  %700 = vrot.lane.b32.xlu0 %v682_v51, %s3527_s20 }
 0x239   : > { %718 = vrot.lane.b32.xlu1 %v693_v52, %s3526_s19  ;;  %712 = vrot.lane.b32.xlu0 %v682_v51, %s3526_s19 }
 0x23d   : > { %702 = vrot.lane.b32.xlu1 %v3676_v53, %s3527_s20  ;;  %724 = vrot.lane.b32.xlu0 %v682_v51, %s3528_s21 }
 0x241   : > { %714 = vrot.lane.b32.xlu1 %v3676_v53, %s3526_s19  ;;  %728 = vrot.lane.b32.xlu0 %v690_v48, %s3528_s21 }
 0x245   : > { %726 = vrot.lane.b32.xlu1 %v3676_v53, %s3528_s21 }
 0x249   : > { %730 = vrot.lane.b32.xlu1 %v693_v52, %s3528_s21 }
 0x2a3   : > { %v717_v54 = vpop.permute.xlu0 %716  ;;  %v705_v55 = vpop.permute.xlu1 %704 }
 0x2a4   : > { %v872_v5 = vcombine.low %v690_v48, %v717_v54  ;;  %v873_v6 = vcombine.high %v690_v48, %v717_v54 }
 0x2a6   : > { %v880_v18 = vrot.slane %v872_v5, %v3690_v4  ;;  %v887_v19 = vrot.slane %v873_v6, %v3690_v4 }
 0x2a7   : > { %v3687_v58 = vpop.permute.xlu1 %706  ;;  %v701_v59 = vpop.permute.xlu0 %700 }
 0x2ab   : > { %v719_v63 = vpop.permute.xlu1 %718  ;;  %v713_v0 = vpop.permute.xlu0 %712 }
 0x2ac   : > { %v736_v2 = vcombine.low %v682_v51, %v713_v0  ;;  %v737_v3 = vcombine.high %v682_v51, %v713_v0  ;;  %v940_v12 = vcombine.low %v693_v52, %v719_v63  ;;  %v941_v13 = vcombine.high %v693_v52, %v719_v63 }
 0x2ae   : > { %v744_v14 = vrot.slane %v736_v2, %v3690_v4  ;;  %v751_v15 = vrot.slane %v737_v3, %v3690_v4  ;;  %v3704_v28 = vrot.slane %v940_v12, %v3690_v4  ;;  %v3707_v29 = vrot.slane %v941_v13, %v3690_v4 }
 0x2af   : > { %v3692_v7 = vpop.permute.xlu1 %702  ;;  %v725_v8 = vpop.permute.xlu0 %724 }
 0x2b0   : > { %v752_v9 = vcombine.low %v701_v59, %v725_v8  ;;  %v753_v10 = vcombine.high %v701_v59, %v725_v8 }
 0x2b2   : > { %v760_v16 = vrot.slane %v752_v9, %v3690_v4  ;;  %v767_v17 = vrot.slane %v753_v10, %v3690_v4 }
 0x2b3   : > { %v715_v20 = vpop.permute.xlu1 %714  ;;  %v729_v21 = vpop.permute.xlu0 %728 }
 0x2b4   : > { %v768_v23 = vcombine.low %v744_v14, %v760_v16  ;;  %v769_v26 = vcombine.high %v744_v14, %v760_v16  ;;  %v784_v22 = vcombine.low %v751_v15, %v767_v17  ;;  %v785_v27 = vcombine.high %v751_v15, %v767_v17 }
 0x2b5   : > { %v888_v30 = vcombine.low %v705_v55, %v729_v21  ;;  %v889_v31 = vcombine.high %v705_v55, %v729_v21  ;;  %v804_v35 = vcombine.low %v3676_v53, %v715_v20  ;;  %v805_v36 = vcombine.high %v3676_v53, %v715_v20 }
 0x2b6   : > { %v776_v32 = vrot.slane %v768_v23, %v3695_v11  ;;  %v783_v33 = vrot.slane %v769_v26, %v3695_v11  ;;  %v792_v34 = vrot.slane %v784_v22, %v3695_v11  ;;  %v799_v37 = vrot.slane %v785_v27, %v3695_v11 }
 0x2b7   : > { %v896_v38 = vrot.slane %v888_v30, %v3690_v4  ;;  %v903_v41 = vrot.slane %v889_v31, %v3690_v4  ;;  %v727_v42 = vpop.permute.xlu1 %726  ;;  %v812_v60 = vrot.slane %v804_v35, %v3690_v4  ;;  %v819_v61 = vrot.slane %v805_v36, %v3690_v4 }
 0x2b8   : > { %v1008_v43 = vcombine.low %v776_v32, %v783_v33  ;;  %v3296_v44 = vcombine.high %v776_v32, %v783_v33  ;;  %v1042_v45 = vcombine.low %v792_v34, %v799_v37  ;;  %v3297_v46 = vcombine.high %v792_v34, %v799_v37 }
 0x2b9   : > { %v904_v39 = vcombine.low %v880_v18, %v896_v38  ;;  %v905_v47 = vcombine.high %v880_v18, %v896_v38  ;;  %v920_v48 = vcombine.low %v887_v19, %v903_v41  ;;  %v921_v49 = vcombine.high %v887_v19, %v903_v41 }
 0x2ba   : > { %v3718_v50 = vrot.slane %v1008_v43, %v3690_v4  ;;  %v3721_v40 = vrot.slane %v3296_v44, %v3690_v4  ;;  %v3724_v51 = vrot.slane %v1042_v45, %v3690_v4  ;;  %v3727_v52 = vrot.slane %v3297_v46, %v3690_v4 }
 0x2bb   : > { %v912_v53 = vrot.slane %v904_v39, %v3695_v11  ;;  %v919_v54 = vrot.slane %v905_v47, %v3695_v11  ;;  %v928_v55 = vrot.slane %v920_v48, %v3695_v11  ;;  %v935_v56 = vrot.slane %v921_v49, %v3695_v11  ;;  %v731_v2 = vpop.permute.xlu1 %730 }
 0x2bc   : > { %v1025_v57 = vcombine.high %v3718_v50, %v3721_v40  ;;  %v1059_v59 = vcombine.high %v3724_v51, %v3727_v52  ;;  %v1024_v3 = vcombine.low %v3718_v50, %v3721_v40  ;;  %v1058_v5 = vcombine.low %v3724_v51, %v3727_v52 }
 0x2bd   : > { %v1144_v62 = vcombine.low %v912_v53, %v919_v54  ;;  %v3300_v63 = vcombine.high %v912_v53, %v919_v54  ;;  %v1178_v0 = vcombine.low %v928_v55, %v935_v56  ;;  %v3301_v1 = vcombine.high %v928_v55, %v935_v56 }
 0x2be   : > { %v820_v6 = vcombine.low %v3692_v7, %v727_v42  ;;  %v821_v8 = vcombine.high %v3692_v7, %v727_v42  ;;  %v956_v16 = vcombine.low %v3687_v58, %v731_v2  ;;  %v957_v7 = vcombine.high %v3687_v58, %v731_v2 }
 0x2bf   : > { %v3746_v9 = vrot.slane %v1144_v62, %v3690_v4  ;;  %v3749_v10 = vrot.slane %v3300_v63, %v3690_v4  ;;  %v3752_v12 = vrot.slane %v1178_v0, %v3690_v4  ;;  %v3755_v13 = vrot.slane %v3301_v1, %v3690_v4 }
 0x2c0   : > { %v828_v14 = vrot.slane %v820_v6, %v3690_v4  ;;  %v835_v15 = vrot.slane %v821_v8, %v3690_v4  ;;  %v3762_v17 = vrot.slane %v1025_v57, %v3695_v11  ;;  %v3765_v18 = vrot.slane %v1059_v59, %v3695_v11 }
 0x2c1   : > { %v1160_v19 = vcombine.low %v3746_v9, %v3749_v10  ;;  %v1161_v20 = vcombine.high %v3746_v9, %v3749_v10  ;;  %v1194_v27 = vcombine.low %v3752_v12, %v3755_v13  ;;  %v1195_v58 = vcombine.high %v3752_v12, %v3755_v13 }
 0x2c2   : > { %v836_v21 = vcombine.low %v812_v60, %v828_v14  ;;  %v837_v23 = vcombine.high %v812_v60, %v828_v14  ;;  %v852_v26 = vcombine.low %v819_v61, %v835_v15  ;;  %v853_v22 = vcombine.high %v819_v61, %v835_v15 }
 0x2c3   : > { %v964_v30 = vrot.slane %v956_v16, %v3690_v4  ;;  %v971_v31 = vrot.slane %v957_v7, %v3690_v4  ;;  %v3798_v63 = vrot.slane %v1161_v20, %v3695_v11  ;;  %v1032_v2 = vrot.slane %v1024_v3, %v3695_v11 }
 0x2c4   : > { %v844_v32 = vrot.slane %v836_v21, %v3695_v11  ;;  %v851_v33 = vrot.slane %v837_v23, %v3695_v11  ;;  %v860_v34 = vrot.slane %v852_v26, %v3695_v11  ;;  %v867_v37 = vrot.slane %v853_v22, %v3695_v11 }
 0x2c5   : > { %v972_v35 = vcombine.low %v3704_v28, %v964_v30  ;;  %v973_v36 = vcombine.high %v3704_v28, %v964_v30  ;;  %v988_v38 = vcombine.low %v3707_v29, %v971_v31  ;;  %v989_v41 = vcombine.high %v3707_v29, %v971_v31 }
 0x2c6   : > { %v1076_v42 = vcombine.low %v844_v32, %v851_v33  ;;  %v3298_v43 = vcombine.high %v844_v32, %v851_v33  ;;  %v1110_v44 = vcombine.low %v860_v34, %v867_v37  ;;  %v3299_v45 = vcombine.high %v860_v34, %v867_v37 }
 0x2c7   : > { %v980_v46 = vrot.slane %v972_v35, %v3695_v11  ;;  %v987_v39 = vrot.slane %v973_v36, %v3695_v11  ;;  %v996_v47 = vrot.slane %v988_v38, %v3695_v11  ;;  %v1003_v48 = vrot.slane %v989_v41, %v3695_v11 }
 0x2c8   : > { %v1083_v49 = vrot.slane %v1076_v42, %v3690_v4  ;;  %v1091_v28 = vrot.slane %v3298_v43, %v3690_v4  ;;  %v1117_v50 = vrot.slane %v1110_v44, %v3690_v4  ;;  %v1125_v29 = vrot.slane %v3299_v45, %v3690_v4 }
 0x2c9   : > { %v1212_v40 = vcombine.low %v980_v46, %v987_v39  ;;  %v3302_v51 = vcombine.high %v980_v46, %v987_v39  ;;  %v1246_v52 = vcombine.low %v996_v47, %v1003_v48  ;;  %v3303_v53 = vcombine.high %v996_v47, %v1003_v48 }
 0x2ca   : > { %v1092_v54 = vcombine.low %v1083_v49, %v1091_v28  ;;  %v1093_v55 = vcombine.high %v1083_v49, %v1091_v28  ;;  %v1126_v56 = vcombine.low %v1117_v50, %v1125_v29  ;;  %v1127_v57 = vcombine.high %v1117_v50, %v1125_v29 }
 0x2cb   : > { %v1219_v59 = vrot.slane %v1212_v40, %v3690_v4  ;;  %v1227_v60 = vrot.slane %v3302_v51, %v3690_v4  ;;  %v1253_v61 = vrot.slane %v1246_v52, %v3690_v4  ;;  %v1261_v62 = vrot.slane %v3303_v53, %v3690_v4 }
 0x2cc   : > { %v3801_v0 = vrot.slane %v1093_v55, %v3695_v11  ;;  %v3804_v1 = vrot.slane %v1127_v57, %v3695_v11  ;;  %v1066_v10 = vrot.slane %v1058_v5, %v3695_v11  ;;  %v1100_v15 = vrot.slane %v1092_v54, %v3695_v11 }
 0x2cd   : > { %v1228_v6 = vcombine.low %v1219_v59, %v1227_v60  ;;  %v1229_v8 = vcombine.high %v1219_v59, %v1227_v60  ;;  %v1262_v9 = vcombine.low %v1253_v61, %v1261_v62  ;;  %v1263_v14 = vcombine.high %v1253_v61, %v1261_v62 }
 0x2ce   : > { %v1134_v16 = vrot.slane %v1126_v56, %v3695_v11  ;;  %v1168_v7 = vrot.slane %v1160_v19, %v3695_v11  ;;  %v1202_v21 = vrot.slane %v1194_v27, %v3695_v11  ;;  %v1280_v26 = vcombine.low %v1032_v2, %v1100_v15 }
 0x2cf   : > { %v3812_v20 = vrot.slane %v1229_v8, %v3695_v11  ;;  %v1236_v23 = vrot.slane %v1228_v6, %v3695_v11  ;;  %v1270_v3 = vrot.slane %v1262_v9, %v3695_v11  ;;  %v3304_v30 = vcombine.high %v1032_v2, %v1100_v15 }
 0x2d0   : > { %v1288_v22 = vcombine.low %v1066_v10, %v1134_v16  ;;  %v3305_v5 = vcombine.high %v1066_v10, %v1134_v16  ;;  %v1287_v37 = vrot.slane %v1280_v26, %v3690_v4  ;;  %v1277_v43 = vrot.slane %v1263_v14, %v3695_v11 }
 0x2d1   : > { %v1296_v31 = vcombine.low %v1168_v7, %v1236_v23  ;;  %v1304_v32 = vcombine.low %v1202_v21, %v1270_v3  ;;  %v3306_v33 = vcombine.high %v1168_v7, %v1236_v23  ;;  %v3307_v34 = vcombine.high %v1202_v21, %v1270_v3 }
 0x2d2   : > { %v1295_v19 = vrot.slane %v1288_v22, %v3690_v4  ;;  %v1355_v35 = vrot.slane %v3304_v30, %v3690_v4  ;;  %v1363_v27 = vrot.slane %v3305_v5, %v3690_v4  ;;  %v1416_v46 = vcombine.low %v3762_v17, %v3801_v0 }
 0x2d3   : > { %v1303_v36 = vrot.slane %v1296_v31, %v3690_v4  ;;  %v1311_v38 = vrot.slane %v1304_v32, %v3690_v4  ;;  %v1371_v41 = vrot.slane %v3306_v33, %v3690_v4  ;;  %v1379_v42 = vrot.slane %v3307_v34, %v3690_v4 }
 0x2d4   : > { %v1313_v44 = vcombine.high %v1287_v37, %v1295_v19  ;;  %v1312_v45 = vcombine.low %v1287_v37, %v1295_v19  ;;  %v1424_v49 = vcombine.low %v3765_v18, %v3804_v1  ;;  %v1209_v28 = vrot.slane %v1195_v58, %v3695_v11 }
 0x2d5   : > { %v1329_v39 = vcombine.high %v1303_v36, %v1311_v38  ;;  %v1328_v47 = vcombine.low %v1303_v36, %v1311_v38  ;;  %v1396_v48 = vcombine.low %v1371_v41, %v1379_v42  ;;  %v1380_v29 = vcombine.low %v1355_v35, %v1363_v27 }
 0x2d6   : > { %v1327_v50 = vrot.slane %v1313_v44, %v3695_v11  ;;  %v1423_v40 = vrot.slane %v1416_v46, %v3690_v4  ;;  %v3838_v52 = vrot.slane %v1312_v45, %v3695_v11  ;;  %v1431_v54 = vrot.slane %v1424_v49, %v3690_v4 }
 0x2d7   : > { %v1343_v51 = vrot.slane %v1329_v39, %v3695_v11  ;;  %v3841_v53 = vrot.slane %v1328_v47, %v3695_v11  ;;  %v3845_v55 = vrot.slane %v1396_v48, %v3695_v11  ;;  %v1432_v12 = vcombine.low %v3798_v63, %v3812_v20 }
 0x2d8   : > { %v1440_v13 = vcombine.low %v1209_v28, %v1277_v43  ;;  %v1448_v57 = vcombine.low %v1423_v40, %v1431_v54  ;;  %v1397_v59 = vcombine.high %v1371_v41, %v1379_v42  ;;  %v3852_v60 = vrot.slane %v1380_v29, %v3695_v11 }
 0x2d9   : > { %v1346_v58 = vcombine.low %v1327_v50, %v1343_v51  ;;  %v1345_v56 = vcombine.high %v3838_v52, %v3841_v53  ;;  %v1439_v61 = vrot.slane %v1432_v12, %v3690_v4  ;;  %v1381_v2 = vcombine.high %v1355_v35, %v1363_v27 }
 0x2da   : > { %v1447_v62 = vrot.slane %v1440_v13, %v3690_v4  ;;  %v1413_v6 = vcombine.high %v3852_v60, %v3845_v55  ;;  %v3308_v9 = vcombine.high %v3762_v17, %v3801_v0  ;;  %v3309_v10 = vcombine.high %v3765_v18, %v3804_v1 }
 0x2db   : > { %1572 = vrot.lane.b32.xlu1 %v1346_v58, %s3531_s22  ;;  %1556 = vrot.lane.b32.xlu0 %v1345_v56, %s3532_s23  ;;  %v3865_v14 = vrot.slane %v1448_v57, %v3695_v11  ;;  %v1347_v15 = vcombine.high %v1327_v50, %v1343_v51  ;;  %v1411_v16 = vrot.slane %v1397_v59, %v3695_v11  ;;  %v3534_v27 = vmov 0.0  }
 0x2dc   : > { %v1464_v8 = vcombine.low %v1439_v61, %v1447_v62  ;;  %v3310_v7 = vcombine.high %v3798_v63, %v3812_v20  ;;  %v1465_v23 = vcombine.high %v1439_v61, %v1447_v62  ;;  %v1491_v3 = vrot.slane %v3308_v9, %v3690_v4  ;;  %3375 = vmatprep.subr.bf16.mxu1 %v3534_v27 }
 0x2dd   : > { %v1499_v17 = vrot.slane %v3309_v10, %v3690_v4  ;;  %v1395_v18 = vrot.slane %v1381_v2, %v3695_v11  ;;  %v3311_v1 = vcombine.high %v1209_v28, %v1277_v43  ;;  %v1344_v26 = vcombine.low %v3838_v52, %v3841_v53  ;;  %3387 = vmatprep.subr.bf16.mxu0 %v3534_v27 }
 0x2de   : > { %v3871_v21 = vrot.slane %v1464_v8, %v3695_v11  ;;  %v1507_v0 = vrot.slane %v3310_v7, %v3690_v4  ;;  %v1449_v22 = vcombine.high %v1423_v40, %v1431_v54  ;;  %v1479_v34 = vrot.slane %v1465_v23, %v3695_v11  ;;  %3377 = vmatprep.mubr.msk.bf16.mxu1 %vm3535_vm1, %v3534_v27  ;;  %v1616_v8 = vld [vmem:[%s3910_s11 + $0x8] sm:$0xff] }
 0x2df   : > { %1588 = vrot.lane.b32.xlu0 %v1347_v15, %s3533_s24  ;;  %v1517_v30 = vcombine.high %v1491_v3, %v1499_v17  ;;  %v1414_v5 = vcombine.low %v1395_v18, %v1411_v16  ;;  %v1515_v31 = vrot.slane %v3311_v1, %v3690_v4  ;;  %v1516_v32 = vcombine.low %v1491_v3, %v1499_v17 }
 0x2e0   : > { %v1480_v63 = vcombine.low %v3865_v14, %v3871_v21  ;;  %v1481_v20 = vcombine.high %v3865_v14, %v3871_v21  ;;  %v1412_v37 = vcombine.low %v3852_v60, %v3845_v55  ;;  %v1463_v36 = vrot.slane %v1449_v22, %v3695_v11  ;;  %3389 = vmatprep.mubr.msk.bf16.mxu0 %vm3535_vm1, %v3534_v27  ;;  %v1615_v55 = vld [vmem:[%s3910_s11] sm:$0xff]  ;;  %v1618_v14 = vld [vmem:[%s3910_s11 + $0x18] sm:$0xff] }
 0x2e1   : > { %v1533_v19 = vcombine.high %v1507_v0, %v1515_v31  ;;  %v1532_v35 = vcombine.low %v1507_v0, %v1515_v31  ;;  %v1531_v38 = vrot.slane %v1517_v30, %v3695_v11  ;;  %v1524_v42 = vrot.slane %v1516_v32, %v3695_v11  ;;  %v1617_v31 = vld [vmem:[%s3910_s11 + $0x10] sm:$0xff] }
 0x2e2   : > { %v3451_v33 = vpack.i.bf16 %v1481_v20, %v1413_v6  ;;  %v1415_v44 = vcombine.high %v1395_v18, %v1411_v16  ;;  %v1482_v45 = vcombine.low %v1463_v36, %v1479_v34  ;;  %v1483_v46 = vcombine.high %v1463_v36, %v1479_v34 }
 0x2e3   : > { %1574 = vrot.lane.b32.xlu0 %v1414_v5, %s3531_s22  ;;  %v1547_v41 = vrot.slane %v1533_v19, %v3695_v11  ;;  %v1540_v43 = vrot.slane %v1532_v35, %v3695_v11  ;;  %v1619_v56 = vpack.c.bf16 %v1615_v55, %v1615_v55  ;;  %v1620_v23 = vpack.c.bf16 %v1616_v8, %v1616_v8 }
 0x2e4   : > { %3452 = vrot.lane.b32.xlu1 %v3451_v33, %s3532_s23  ;;  %v1621_v34 = vpack.c.bf16 %v1617_v31, %v1617_v31 }
 0x2e5   : > { %v1550_v39 = vcombine.low %v1531_v38, %v1547_v41  ;;  %v1549_v47 = vcombine.high %v1524_v42, %v1540_v43  ;;  %v1551_v48 = vcombine.high %v1531_v38, %v1547_v41  ;;  %v1548_v49 = vcombine.low %v1524_v42, %v1540_v43 }
 0x2e7   : > { %1562 = vrot.lane.b32.xlu0 %v1549_v47, %s3532_s23  ;;  %v3456_v28 = vpack.i.bf16 %v1550_v39, %v1482_v45  ;;  %v3461_v50 = vpack.i.bf16 %v1551_v48, %v1483_v46 }
 0x2e8   : > { %1590 = vrot.lane.b32.xlu1 %v1415_v44, %s3533_s24 }
 0x2eb   : > { %3462 = vrot.lane.b32.xlu0 %v3461_v50, %s3533_s24 }
 0x2ec   : > { %3457 = vrot.lane.b32.xlu1 %v3456_v28, %s3531_s22 }
 0x34d   : > { %v1557_v29 = vpop.permute.xlu0 %1556  ;;  %v1573_v40 = vpop.permute.xlu1 %1572 }
 0x34e   : > { %v1601_v51 = vsel %vm1600_vm2, %v1344_v26, %v1557_v29 }
 0x34f   : > { %v1606_v53 = vsel %vm1605_vm3, %v1601_v51, %v1573_v40 }
 0x351   : > { %v1589_v52 = vpop.permute.xlu0 %1588 }
 0x352   : > { %v1611_v54 = vsel %vm1610_vm4, %v1606_v53, %v1589_v52 }
 0x353   : > { %v1623_v12 = vpack.c.bf16 %v1611_v54, %v1611_v54 }
 0x355   : > { %v1575_v13 = vpop.permute.xlu0 %1574  ;;  %v1632_v58 = vsel %vm1630_vm5, %v1623_v12, 0 }
 0x356   : > { %v3453_v57 = vpop.permute.xlu1 %3452  ;;  %3376 = vmatpush3.bf16.msra.mxu1 %v1632_v58 }
 0x357   : > { %v3454_v59 = vunpack.i.l.bf16 %v3453_v57  ;;  %3381 = vmatprep.subr.bf16.mxu1 %v3534_v27  ;;  %v3455_v9 = vunpack.i.h.bf16 %v3453_v57 }
 0x359   : > { %v1602_v60 = vsel %vm1600_vm2, %v1412_v37, %v3454_v59  ;;  %3378 = vmatmul.mubr.msk.bf16.vlgmr.msra.gmra.mrb[0].mxu1 %vm1600_vm2, %v1619_v56  ;;  %v1563_v6 = vpop.permute.xlu0 %1562  ;;  %v1603_v0 = vsel %vm1600_vm2, %v1480_v63, %v3455_v9  ;;  %v1622_v37 = vpack.c.bf16 %v1618_v14, %v1618_v14 }
 0x35a   : > { %v1591_v61 = vpop.permute.xlu1 %1590  ;;  %v1607_v62 = vsel %vm1605_vm3, %v1602_v60, %v1575_v13  ;;  %3383 = vmatprep.mubr.msk.bf16.mxu1 %vm3535_vm1, %v3534_v27  ;;  %v1604_v16 = vsel %vm1600_vm2, %v1548_v49, %v1563_v6 }
 0x35b   : > { %v1612_v2 = vsel %vm1610_vm4, %v1607_v62, %v1591_v61 }
 0x35c   : > { %v1624_v10 = vpack.c.bf16 %v1612_v2, %v1612_v2 }
 0x35d   : > { %v3463_v18 = vpop.permute.xlu0 %3462 }
 0x35e   : > { %v3458_v15 = vpop.permute.xlu1 %3457  ;;  %v1678_v7 = vsel %vm1630_vm5, %v1624_v10, 0  ;;  %v3465_v1 = vunpack.i.h.bf16 %v3463_v18  ;;  %v3464_v26 = vunpack.i.l.bf16 %v3463_v18 }
 0x35f   : > { %v3460_v3 = vunpack.i.h.bf16 %v3458_v15  ;;  %v3459_v17 = vunpack.i.l.bf16 %v3458_v15  ;;  %3382 = vmatpush3.bf16.msra.mxu1 %v1678_v7 }
 0x360   : > { %3393 = vmatprep.subr.bf16.mxu1 %v3534_v27 }
 0x361   : > { %v1608_v20 = vsel %vm1605_vm3, %v1603_v0, %v3459_v17  ;;  %v1609_v22 = vsel %vm1605_vm3, %v1604_v16, %v3460_v3 }
 0x362   : > { %3384 = vmatmul.mubr.msk.bf16.vlgmr.msra.gmra.mrb[4].mxu1 %vm1600_vm2, %v1620_v23  ;;  %v1613_v30 = vsel %vm1610_vm4, %v1608_v20, %v3464_v26  ;;  %v1614_v5 = vsel %vm1610_vm4, %v1609_v22, %v3465_v1 }
 0x363   : > { %v1625_v32 = vpack.c.bf16 %v1613_v30, %v1613_v30  ;;  %v1626_v33 = vpack.c.bf16 %v1614_v5, %v1614_v5  ;;  %3395 = vmatprep.mubr.msk.bf16.mxu1 %vm3535_vm1, %v3534_v27 }
 0x365   : > { %v1724_v21 = vsel %vm1630_vm5, %v1625_v32, 0  ;;  %v1770_v63 = vsel %vm1630_vm5, %v1626_v33, 0 }
 0x366   : > { %3388 = vmatpush3.bf16.msra.mxu0 %v1724_v21  ;;  %3394 = vmatpush3.bf16.msra.mxu1 %v1770_v63 }
 0x369   : > { %3390 = vmatmul.mubr.msk.bf16.vlgmr.msra.gmra.mrb[4].mxu0 %vm1600_vm2, %v1621_v34 }
 0x36a   : > { %3396 = vmatmul.mubr.msk.bf16.vlgmr.msra.gmra.mrb[8].mxu1 %vm1600_vm2, %v1622_v37 }
 0x42c   : > { %v1668_v19 = vpop.f32.mrb[0].mxu1 }
 0x42d   : > { %v3379_v35 = vpop.f32.mrb[1].mxu1  ;;  %1816 = vrot.lane.b32.xlu1 %v1668_v19, %s3527_s20 }
 0x42e   : > { %v1671_v36 = vpop.f32.mrb[2].mxu1 }
 0x42f   : > { %v3380_v38 = vpop.f32.mrb[3].mxu1 }
 0x435   : > { %v1714_v27 = vpop.f32.mrb[4].mxu1 }
 0x436   : > { %1818 = vrot.lane.b32.xlu0 %v1714_v27, %s3527_s20  ;;  %v3385_v41 = vpop.f32.mrb[5].mxu1 }
 0x437   : > { %v1717_v42 = vpop.f32.mrb[6].mxu1 }
 0x438   : > { %v3386_v43 = vpop.f32.mrb[7].mxu1 }
 0x43a   : > { %1830 = vrot.lane.b32.xlu0 %v1714_v27, %s3526_s19 }
 0x43c   : > { %v3947_v44 = vpop.f32.mrb[4].mxu0 }
 0x43d   : > { %1820 = vrot.lane.b32.xlu1 %v3947_v44, %s3527_s20  ;;  %v3391_v45 = vpop.f32.mrb[5].mxu0  ;;  %v1806_v46 = vpop.f32.mrb[8].mxu1 }
 0x43e   : > { %1842 = vrot.lane.b32.xlu0 %v1714_v27, %s3528_s21  ;;  %v1763_v39 = vpop.f32.mrb[6].mxu0  ;;  %v3397_v47 = vpop.f32.mrb[9].mxu1 }
 0x43f   : > { %v3392_v48 = vpop.f32.mrb[7].mxu0  ;;  %v1809_v49 = vpop.f32.mrb[10].mxu1 }
 0x440   : > { %v3398_v28 = vpop.f32.mrb[11].mxu1 }
 0x441   : > { %1828 = vrot.lane.b32.xlu1 %v1668_v19, %s3526_s19 }
 0x442   : > { %1822 = vrot.lane.b32.xlu0 %v1806_v46, %s3527_s20 }
 0x445   : > { %1832 = vrot.lane.b32.xlu1 %v3947_v44, %s3526_s19 }
 0x446   : > { %1834 = vrot.lane.b32.xlu0 %v1806_v46, %s3526_s19 }
 0x449   : > { %1840 = vrot.lane.b32.xlu1 %v1668_v19, %s3528_s21 }
 0x44a   : > { %1846 = vrot.lane.b32.xlu0 %v1806_v46, %s3528_s21 }
 0x44d   : > { %1844 = vrot.lane.b32.xlu1 %v3947_v44, %s3528_s21 }
 0x49f   : > { %v1817_v29 = vpop.permute.xlu1 %1816 }
 0x4a8   : > { %v1819_v50 = vpop.permute.xlu0 %1818 }
 0x4ac   : > { %v1831_v40 = vpop.permute.xlu0 %1830 }
 0x4ad   : > { %v1920_v55 = vcombine.low %v1714_v27, %v1831_v40  ;;  %v1921_v58 = vcombine.high %v1714_v27, %v1831_v40 }
 0x4af   : > { %v3961_v51 = vpop.permute.xlu1 %1820  ;;  %v1928_v59 = vrot.slane %v1920_v55, %v3690_v4  ;;  %v1935_v62 = vrot.slane %v1921_v58, %v3690_v4 }
 0x4b0   : > { %v1843_v52 = vpop.permute.xlu0 %1842 }
 0x4b1   : > { %v1936_v53 = vcombine.low %v1819_v50, %v1843_v52  ;;  %v1937_v12 = vcombine.high %v1819_v50, %v1843_v52 }
 0x4b3   : > { %v1829_v54 = vpop.permute.xlu1 %1828  ;;  %v1944_v56 = vrot.slane %v1936_v53, %v3690_v4  ;;  %v1951_v60 = vrot.slane %v1937_v12, %v3690_v4 }
 0x4b4   : > { %v1823_v13 = vpop.permute.xlu0 %1822  ;;  %v1852_v6 = vcombine.low %v1668_v19, %v1829_v54  ;;  %v1853_v8 = vcombine.high %v1668_v19, %v1829_v54 }
 0x4b5   : > { %v1952_v2 = vcombine.low %v1928_v59, %v1944_v56  ;;  %v1953_v9 = vcombine.high %v1928_v59, %v1944_v56  ;;  %v1968_v7 = vcombine.low %v1935_v62, %v1951_v60  ;;  %v1969_v23 = vcombine.high %v1935_v62, %v1951_v60 }
 0x4b6   : > { %v1860_v20 = vrot.slane %v1852_v6, %v3690_v4  ;;  %v1867_v22 = vrot.slane %v1853_v8, %v3690_v4 }
 0x4b7   : > { %v1833_v57 = vpop.permute.xlu1 %1832  ;;  %v1960_v26 = vrot.slane %v1952_v2, %v3695_v11  ;;  %v1967_v14 = vrot.slane %v1953_v9, %v3695_v11  ;;  %v1976_v21 = vrot.slane %v1968_v7, %v3695_v11  ;;  %v1983_v63 = vrot.slane %v1969_v23, %v3695_v11 }
 0x4b8   : > { %v1835_v61 = vpop.permute.xlu0 %1834  ;;  %v1988_v27 = vcombine.low %v3947_v44, %v1833_v57  ;;  %v1989_v41 = vcombine.high %v3947_v44, %v1833_v57 }
 0x4b9   : > { %v2056_v10 = vcombine.low %v1806_v46, %v1835_v61  ;;  %v2057_v15 = vcombine.high %v1806_v46, %v1835_v61 }
 0x4ba   : > { %v2003_v58 = vrot.slane %v1989_v41, %v3690_v4 }
 0x4bb   : > { %v1841_v16 = vpop.permute.xlu1 %1840  ;;  %v2064_v5 = vrot.slane %v2056_v10, %v3690_v4  ;;  %v2071_v31 = vrot.slane %v2057_v15, %v3690_v4 }
 0x4bc   : > { %v1868_v3 = vcombine.low %v1817_v29, %v1841_v16  ;;  %v1869_v17 = vcombine.high %v1817_v29, %v1841_v16  ;;  %v1847_v18 = vpop.permute.xlu0 %1846 }
 0x4bd   : > { %v2072_v0 = vcombine.low %v1823_v13, %v1847_v18  ;;  %v2073_v1 = vcombine.high %v1823_v13, %v1847_v18  ;;  %v1996_v13 = vrot.slane %v1988_v27, %v3690_v4 }
 0x4be   : > { %v1876_v30 = vrot.slane %v1868_v3, %v3690_v4  ;;  %v1883_v34 = vrot.slane %v1869_v17, %v3690_v4 }
 0x4bf   : > { %v2080_v32 = vrot.slane %v2072_v0, %v3690_v4  ;;  %v2087_v33 = vrot.slane %v2073_v1, %v3690_v4  ;;  %v1845_v38 = vpop.permute.xlu1 %1844 }
 0x4c0   : > { %v1884_v42 = vcombine.low %v1860_v20, %v1876_v30  ;;  %v1885_v43 = vcombine.high %v1860_v20, %v1876_v30  ;;  %v1900_v48 = vcombine.low %v1867_v22, %v1883_v34  ;;  %v1901_v49 = vcombine.high %v1867_v22, %v1883_v34 }
 0x4c1   : > { %v2088_v37 = vcombine.low %v2064_v5, %v2080_v32  ;;  %v2089_v19 = vcombine.high %v2064_v5, %v2080_v32  ;;  %v2104_v35 = vcombine.low %v2071_v31, %v2087_v33  ;;  %v2105_v36 = vcombine.high %v2071_v31, %v2087_v33 }
 0x4c2   : > { %v2004_v28 = vcombine.low %v3961_v51, %v1845_v38  ;;  %v2005_v50 = vcombine.high %v3961_v51, %v1845_v38  ;;  %v1892_v59 = vrot.slane %v1884_v42, %v3695_v11  ;;  %v1899_v51 = vrot.slane %v1885_v43, %v3695_v11 }
 0x4c3   : > { %v2096_v45 = vrot.slane %v2088_v37, %v3695_v11  ;;  %v2103_v46 = vrot.slane %v2089_v19, %v3695_v11  ;;  %v2112_v39 = vrot.slane %v2104_v35, %v3695_v11  ;;  %v2119_v47 = vrot.slane %v2105_v36, %v3695_v11 }
 0x4c4   : > { %v2012_v56 = vrot.slane %v2004_v28, %v3690_v4  ;;  %v2019_v57 = vrot.slane %v2005_v50, %v3690_v4  ;;  %v1908_v60 = vrot.slane %v1900_v48, %v3695_v11  ;;  %v1915_v61 = vrot.slane %v1901_v49, %v3695_v11 }
 0x4c5   : > { %v2132_v29 = vcombine.low %v1960_v26, %v2096_v45  ;;  %v3317_v40 = vcombine.high %v1960_v26, %v2096_v45  ;;  %v2200_v52 = vcombine.low %v1967_v14, %v2103_v46  ;;  %v3319_v44 = vcombine.high %v1967_v14, %v2103_v46 }
 0x4c6   : > { %v2268_v53 = vcombine.low %v1976_v21, %v2112_v39  ;;  %v3321_v54 = vcombine.high %v1976_v21, %v2112_v39  ;;  %v2336_v55 = vcombine.low %v1983_v63, %v2119_v47  ;;  %v3323_v12 = vcombine.high %v1983_v63, %v2119_v47 }
 0x4c7   : > { %v2020_v62 = vcombine.low %v1996_v13, %v2012_v56  ;;  %v2021_v2 = vcombine.high %v1996_v13, %v2012_v56  ;;  %v2036_v6 = vcombine.low %v2003_v58, %v2019_v57  ;;  %v2037_v8 = vcombine.high %v2003_v58, %v2019_v57 }
 0x4c8   : > { %v2139_v9 = vrot.slane %v2132_v29, %v3690_v4  ;;  %v2173_v10 = vrot.slane %v3317_v40, %v3690_v4  ;;  %v2207_v15 = vrot.slane %v2200_v52, %v3690_v4  ;;  %v2241_v16 = vrot.slane %v3319_v44, %v3690_v4 }
 0x4c9   : > { %v2028_v7 = vrot.slane %v2020_v62, %v3695_v11  ;;  %v2035_v23 = vrot.slane %v2021_v2, %v3695_v11  ;;  %v2044_v3 = vrot.slane %v2036_v6, %v3695_v11  ;;  %v2051_v17 = vrot.slane %v2037_v8, %v3695_v11 }
 0x4ca   : > { %v4004_v18 = vrot.slane %v2268_v53, %v3690_v4  ;;  %v4007_v0 = vrot.slane %v3321_v54, %v3690_v4  ;;  %v2343_v1 = vrot.slane %v2336_v55, %v3690_v4  ;;  %v4011_v26 = vrot.slane %v3323_v12, %v3690_v4 }
 0x4cb   : > { %v2124_v20 = vcombine.low %v1892_v59, %v2028_v7  ;;  %v3316_v22 = vcombine.high %v1892_v59, %v2028_v7  ;;  %v2192_v30 = vcombine.low %v1899_v51, %v2035_v23  ;;  %v3318_v5 = vcombine.high %v1899_v51, %v2035_v23 }
 0x4cc   : > { %v2260_v31 = vcombine.low %v1908_v60, %v2044_v3  ;;  %v3320_v32 = vcombine.high %v1908_v60, %v2044_v3  ;;  %v2328_v33 = vcombine.low %v1915_v61, %v2051_v17  ;;  %v3322_v14 = vcombine.high %v1915_v61, %v2051_v17 }
 0x4cd   : > { %v2131_v21 = vrot.slane %v2124_v20, %v3690_v4  ;;  %v2165_v63 = vrot.slane %v3316_v22, %v3690_v4  ;;  %v2199_v34 = vrot.slane %v2192_v30, %v3690_v4  ;;  %v2233_v37 = vrot.slane %v3318_v5, %v3690_v4 }
 0x4ce   : > { %v4018_v19 = vrot.slane %v2260_v31, %v3690_v4  ;;  %v4021_v35 = vrot.slane %v3320_v32, %v3690_v4  ;;  %v2335_v36 = vrot.slane %v2328_v33, %v3690_v4  ;;  %v2369_v38 = vrot.slane %v3322_v14, %v3690_v4 }
 0x4cf   : > { %v2140_v27 = vcombine.low %v2131_v21, %v2139_v9  ;;  %v2141_v41 = vcombine.high %v2131_v21, %v2139_v9  ;;  %v2174_v42 = vcombine.low %v2165_v63, %v2173_v10  ;;  %v2175_v43 = vcombine.high %v2165_v63, %v2173_v10 }
 0x4d0   : > { %v2208_v45 = vcombine.low %v2199_v34, %v2207_v15  ;;  %v2209_v46 = vcombine.high %v2199_v34, %v2207_v15  ;;  %v2242_v39 = vcombine.low %v2233_v37, %v2241_v16  ;;  %v2243_v47 = vcombine.high %v2233_v37, %v2241_v16 }
 0x4d1   : > { %v2276_v48 = vcombine.low %v4018_v19, %v4004_v18  ;;  %v2277_v49 = vcombine.high %v4018_v19, %v4004_v18  ;;  %v2310_v28 = vcombine.low %v4021_v35, %v4007_v0  ;;  %v2311_v50 = vcombine.high %v4021_v35, %v4007_v0 }
 0x4d2   : > { %v2344_v29 = vcombine.low %v2335_v36, %v2343_v1  ;;  %v2345_v40 = vcombine.high %v2335_v36, %v2343_v1  ;;  %v2378_v52 = vcombine.low %v2369_v38, %v4011_v26  ;;  %v2379_v44 = vcombine.high %v2369_v38, %v4011_v26 }
 0x4d3   : > { %v2216_v53 = vrot.slane %v2208_v45, %v3695_v11  ;;  %v2223_v54 = vrot.slane %v2209_v46, %v3695_v11  ;;  %v2250_v55 = vrot.slane %v2242_v39, %v3695_v11  ;;  %v2257_v12 = vrot.slane %v2243_v47, %v3695_v11 }
 0x4d4   : > { %v2148_v13 = vrot.slane %v2140_v27, %v3695_v11  ;;  %v2155_v58 = vrot.slane %v2141_v41, %v3695_v11  ;;  %v2182_v56 = vrot.slane %v2174_v42, %v3695_v11  ;;  %v2189_v57 = vrot.slane %v2175_v43, %v3695_v11 }
 0x4d5   : > { %v2464_v59 = vcombine.low %v2216_v53, %v2223_v54  ;;  %v3326_v51 = vcombine.high %v2216_v53, %v2223_v54  ;;  %v2480_v60 = vcombine.low %v2250_v55, %v2257_v12  ;;  %v3327_v61 = vcombine.high %v2250_v55, %v2257_v12 }
 0x4d6   : > { %v2396_v62 = vcombine.low %v2148_v13, %v2155_v58  ;;  %v3324_v2 = vcombine.high %v2148_v13, %v2155_v58  ;;  %v2412_v6 = vcombine.low %v2182_v56, %v2189_v57  ;;  %v3325_v8 = vcombine.high %v2182_v56, %v2189_v57 }
 0x4d7   : > { %v2471_v9 = vrot.slane %v2464_v59, %v3690_v4  ;;  %v2479_v10 = vrot.slane %v3326_v51, %v3690_v4  ;;  %v2487_v15 = vrot.slane %v2480_v60, %v3690_v4  ;;  %v2495_v16 = vrot.slane %v3327_v61, %v3690_v4 }
 0x4d8   : > { %v2403_v7 = vrot.slane %v2396_v62, %v3690_v4  ;;  %v2411_v23 = vrot.slane %v3324_v2, %v3690_v4  ;;  %v2419_v3 = vrot.slane %v2412_v6, %v3690_v4  ;;  %v2427_v17 = vrot.slane %v3325_v8, %v3690_v4 }
 0x4d9   : > { %v2496_v18 = vcombine.low %v2471_v9, %v2479_v10  ;;  %v2512_v0 = vcombine.low %v2487_v15, %v2495_v16  ;;  %v2352_v1 = vrot.slane %v2344_v29, %v3695_v11  ;;  %v2359_v26 = vrot.slane %v2345_v40, %v3695_v11 }
 0x4da   : > { %v2428_v20 = vcombine.low %v2403_v7, %v2411_v23  ;;  %v2444_v22 = vcombine.low %v2419_v3, %v2427_v17  ;;  %v2386_v30 = vrot.slane %v2378_v52, %v3695_v11  ;;  %v2393_v5 = vrot.slane %v2379_v44, %v3695_v11 }
 0x4db   : > { %v4056_v31 = vrot.slane %v2496_v18, %v3695_v11  ;;  %v4059_v32 = vrot.slane %v2512_v0, %v3695_v11  ;;  %v2600_v33 = vcombine.low %v2352_v1, %v2359_v26  ;;  %v3330_v14 = vcombine.high %v2352_v1, %v2359_v26 }
 0x4dc   : > { %v4062_v21 = vrot.slane %v2428_v20, %v3695_v11  ;;  %v4065_v63 = vrot.slane %v2444_v22, %v3695_v11  ;;  %v2616_v34 = vcombine.low %v2386_v30, %v2393_v5  ;;  %v3331_v37 = vcombine.high %v2386_v30, %v2393_v5 }
 0x4dd   : > { %v2529_v19 = vcombine.high %v4056_v31, %v4059_v32  ;;  %v2607_v35 = vrot.slane %v2600_v33, %v3690_v4  ;;  %v2615_v36 = vrot.slane %v3330_v14, %v3690_v4  ;;  %v2284_v38 = vrot.slane %v2276_v48, %v3695_v11 }
 0x4de   : > { %v2461_v27 = vcombine.high %v4062_v21, %v4065_v63  ;;  %v2623_v41 = vrot.slane %v2616_v34, %v3690_v4  ;;  %v2631_v42 = vrot.slane %v3331_v37, %v3690_v4  ;;  %v2291_v43 = vrot.slane %v2277_v49, %v3695_v11 }
 0x4df   : > { %2674 = vrot.lane.b32.xlu0 %v2529_v19, %s3532_s23  ;;  %v2632_v45 = vcombine.low %v2607_v35, %v2615_v36  ;;  %v2318_v46 = vrot.slane %v2310_v28, %v3695_v11  ;;  %v2325_v39 = vrot.slane %v2311_v50, %v3695_v11  ;;  %v2497_v47 = vcombine.high %v2471_v9, %v2479_v10 }
 0x4e0   : > { %2672 = vrot.lane.b32.xlu1 %v2461_v27, %s3532_s23  ;;  %v2648_v48 = vcombine.low %v2623_v41, %v2631_v42  ;;  %v2532_v29 = vcombine.low %v2284_v38, %v2291_v43  ;;  %v3328_v40 = vcombine.high %v2284_v38, %v2291_v43  ;;  %v2513_v52 = vcombine.high %v2487_v15, %v2495_v16 }
 0x4e1   : > { %v4082_v44 = vrot.slane %v2632_v45, %v3695_v11  ;;  %v2548_v53 = vcombine.low %v2318_v46, %v2325_v39  ;;  %v3329_v54 = vcombine.high %v2318_v46, %v2325_v39  ;;  %v2511_v49 = vrot.slane %v2497_v47, %v3695_v11  ;;  %v3492_v46 = vld [vmem:[%s3607_s12 + $0x8] sm:$0xf] }
 0x4e2   : > { %v2656_v55 = vrot.slane %v2648_v48, %v3695_v11  ;;  %v2539_v28 = vrot.slane %v2532_v29, %v3690_v4  ;;  %v2547_v50 = vrot.slane %v3328_v40, %v3690_v4  ;;  %v2527_v12 = vrot.slane %v2513_v52, %v3695_v11  ;;  %v3493_v48 = vld [vmem:[%s3607_s12 + $0xc] sm:$0xf] }
 0x4e3   : > { %v2555_v13 = vrot.slane %v2548_v53, %v3690_v4  ;;  %v2563_v58 = vrot.slane %v3329_v54, %v3690_v4  ;;  %v2429_v56 = vcombine.high %v2403_v7, %v2411_v23  ;;  %v2445_v57 = vcombine.high %v2419_v3, %v2427_v17 }
 0x4e4   : > { %v2665_v59 = vcombine.high %v4082_v44, %v2656_v55  ;;  %v2564_v51 = vcombine.low %v2539_v28, %v2547_v50  ;;  %v2530_v60 = vcombine.low %v2511_v49, %v2527_v12  ;;  %v2633_v61 = vcombine.high %v2607_v35, %v2615_v36 }
 0x4e5   : > { %v2580_v62 = vcombine.low %v2555_v13, %v2563_v58  ;;  %v2443_v2 = vrot.slane %v2429_v56, %v3695_v11  ;;  %v2459_v6 = vrot.slane %v2445_v57, %v3695_v11  ;;  %v2649_v8 = vcombine.high %v2623_v41, %v2631_v42 }
 0x4e6   : > { %2678 = vrot.lane.b32.xlu0 %v2665_v59, %s3532_s23  ;;  %v2572_v9 = vrot.slane %v2564_v51, %v3695_v11  ;;  %v2647_v10 = vrot.slane %v2633_v61, %v3695_v11  ;;  %v2565_v4 = vcombine.high %v2539_v28, %v2547_v50  ;;  %v2581_v15 = vcombine.high %v2555_v13, %v2563_v58  ;;  %v3494_v13 = vld [vmem:[%s3607_s12] sm:$0xf]  ;;  %v3495_v59 = vld [vmem:[%s3607_s12 + $0x4] sm:$0xf] }
 0x4e7   : > { %v2588_v16 = vrot.slane %v2580_v62, %v3695_v11  ;;  %v2462_v7 = vcombine.low %v2443_v2, %v2459_v6  ;;  %v2663_v23 = vrot.slane %v2649_v8, %v3695_v11  ;;  %v2531_v3 = vcombine.high %v2511_v49, %v2527_v12 }
 0x4e8   : > { %v2579_v17 = vrot.slane %v2565_v4, %v3695_v11  ;;  %v2595_v18 = vrot.slane %v2581_v15, %v3695_v11  ;;  %v2463_v0 = vcombine.high %v2443_v2, %v2459_v6  ;;  %v2528_v1 = vcombine.low %v4056_v31, %v4059_v32  ;;  %v3496_v2 = vld [vmem:[%s3607_s12 + $0x10] sm:$0xf]  ;;  %v3498_v4 = vld [vmem:[%s3607_s12 + $0x1c] sm:$0xf] }
 0x4e9   : > { %v2597_v26 = vcombine.high %v2572_v9, %v2588_v16  ;;  %v2666_v20 = vcombine.low %v2647_v10, %v2663_v23  ;;  %v2667_v22 = vcombine.high %v2647_v10, %v2663_v23  ;;  %v2460_v30 = vcombine.low %v4062_v21, %v4065_v63 }
 0x4ea   : > { %2690 = vrot.lane.b32.xlu0 %v2530_v60, %s3531_s22  ;;  %v2598_v5 = vcombine.low %v2579_v17, %v2595_v18  ;;  %v2599_v33 = vcombine.high %v2579_v17, %v2595_v18  ;;  %v2664_v14 = vcombine.low %v4082_v44, %v2656_v55  ;;  %v2596_v34 = vcombine.low %v2572_v9, %v2588_v16  ;;  %v3497_v9 = vld [vmem:[%s3607_s12 + $0x14] sm:$0xf]  ;;  %v3499_v16 = vld [vmem:[%s3607_s12 + $0x18] sm:$0xf] }
 0x4eb   : > { %2676 = vrot.lane.b32.xlu1 %v2597_v26, %s3532_s23 }
 0x4ee   : > { %2694 = vrot.lane.b32.xlu0 %v2666_v20, %s3531_s22 }
 0x4ef   : > { %2688 = vrot.lane.b32.xlu1 %v2462_v7, %s3531_s22 }
 0x4f2   : > { %2706 = vrot.lane.b32.xlu0 %v2531_v3, %s3533_s24 }
 0x4f3   : > { %2692 = vrot.lane.b32.xlu1 %v2598_v5, %s3531_s22 }
 0x4f6   : > { %2710 = vrot.lane.b32.xlu0 %v2667_v22, %s3533_s24 }
 0x4f7   : > { %2704 = vrot.lane.b32.xlu1 %v2463_v0, %s3533_s24 }
 0x4fb   : > { %2708 = vrot.lane.b32.xlu1 %v2599_v33, %s3533_s24 }
 0x551   : > { %v2675_v11 = vpop.permute.xlu0 %2674 }
 0x552   : > { %v2673_v31 = vpop.permute.xlu1 %2672  ;;  %v2717_v35 = vsel %vm1600_vm2, %v2528_v1, %v2675_v11 }
 0x553   : > { %v2716_v43 = vsel %vm1600_vm2, %v2460_v30, %v2673_v31 }
 0x558   : > { %v2679_v32 = vpop.permute.xlu0 %2678 }
 0x559   : > { %v2719_v45 = vsel %vm1600_vm2, %v2664_v14, %v2679_v32 }
 0x55c   : > { %v2691_v21 = vpop.permute.xlu0 %2690 }
 0x55d   : > { %v2677_v63 = vpop.permute.xlu1 %2676  ;;  %v2721_v36 = vsel %vm1605_vm3, %v2717_v35, %v2691_v21 }
 0x55e   : > { %v2718_v28 = vsel %vm1600_vm2, %v2596_v34, %v2677_v63 }
 0x560   : > { %v2695_v37 = vpop.permute.xlu0 %2694 }
 0x561   : > { %v2689_v19 = vpop.permute.xlu1 %2688  ;;  %v2723_v52 = vsel %vm1605_vm3, %v2719_v45, %v2695_v37 }
 0x562   : > { %v2720_v40 = vsel %vm1605_vm3, %v2716_v43, %v2689_v19 }
 0x564   : > { %v2707_v38 = vpop.permute.xlu0 %2706 }
 0x565   : > { %v2693_v27 = vpop.permute.xlu1 %2692  ;;  %v2725_v41 = vsel %vm1610_vm4, %v2721_v36, %v2707_v38 }
 0x566   : > { %v2733_v42 = vcombine.high %v2725_v41, %v2725_v41  ;;  %v2742_v39 = vadd.f32 %v3492_v46, %v2725_v41  ;;  %v2722_v12 = vsel %vm1605_vm3, %v2718_v28, %v2693_v27 }
 0x568   : > { %v2711_v47 = vpop.permute.xlu0 %2710  ;;  %v2743_v29 = vadd.f32 %v3493_v48, %v2733_v42 }
 0x569   : > { %v2705_v44 = vpop.permute.xlu1 %2704  ;;  %v2727_v54 = vsel %vm1610_vm4, %v2723_v52, %v2711_v47 }
 0x56a   : > { %v2724_v53 = vsel %vm1610_vm4, %v2720_v40, %v2705_v44  ;;  %v4126_v49 = vcombine.low %v2742_v39, %v2743_v29  ;;  %v2735_v56 = vcombine.high %v2727_v54, %v2727_v54  ;;  %v2746_v7 = vadd.f32 %v3499_v16, %v2727_v54 }
 0x56b   : > { %v2732_v55 = vcombine.high %v2724_v53, %v2724_v53  ;;  %v2740_v58 = vadd.f32 %v3494_v13, %v2724_v53 }
 0x56c   : > { %v2767_v50 = vsel %vm382_vm0, %v4126_v49, 0.0  ;;  %v2747_v15 = vadd.f32 %v3498_v4, %v2735_v56  ;;  %v3473_v56 = vld [vmem:[%s4233_s4 + $0x8] sm:$0xff]  }
 0x56d   : > { %v2709_v57 = vpop.permute.xlu1 %2708  ;;  %2768 = vadd.xlane.f32.xlu0 %v2767_v50  ;;  %v2741_v51 = vadd.f32 %v3495_v59, %v2732_v55 }
 0x56e   : > { %v2726_v60 = vsel %vm1610_vm4, %v2722_v12, %v2709_v57  ;;  %v4147_v17 = vcombine.low %v2746_v7, %v2747_v15 }
 0x56f   : > { %v2734_v61 = vcombine.high %v2726_v60, %v2726_v60  ;;  %v4135_v62 = vcombine.low %v2740_v58, %v2741_v51  ;;  %v2744_v6 = vadd.f32 %v3496_v2, %v2726_v60 }
 0x570   : > { %v2773_v18 = vsel %vm382_vm0, %v4147_v17, 0.0 }
 0x571   : > { %v2764_v8 = vsel %vm382_vm0, %v4135_v62, 0.0  ;;  %v2745_v10 = vadd.f32 %v3497_v9, %v2734_v61 }
 0x572   : > { %2765 = vadd.xlane.f32.xlu1 %v2764_v8 }
 0x573   : > { %v4143_v23 = vcombine.low %v2744_v6, %v2745_v10 }
 0x575   : > { %v2770_v3 = vsel %vm382_vm0, %v4143_v23, 0.0 }
 0x576   : > { %2771 = vadd.xlane.f32.xlu0 %v2770_v3 }
 0x57a   : > { %2774 = vadd.xlane.f32.xlu0 %v2773_v18 }
 0x5fa   : > { %v2769_v0 = vpop.xlane.xlu0 %2768 }
 0x5fb   : > { %v2777_v1 = vmul.f32 0.03125, %v2769_v0 }
 0x5fd   : > { %v2804_v26 = vrot.slane %v2777_v1, %v3624_v24  ;;  %v2811_v20 = vrot.slane %v2777_v1, %v3627_v25 }
 0x5ff   : > { %v4153_v22 = vsub.f32 %v2742_v39, %v2804_v26  ;;  %v4155_v30 = vsub.f32 %v2743_v29, %v2811_v20  ;;  %v2766_v5 = vpop.xlane.xlu1 %2765 }
 0x600   : > { %v2776_v33 = vmul.f32 0.03125, %v2766_v5 }
 0x601   : > { %v2858_v14 = vmul.f32 %v4153_v22, %v4153_v22  ;;  %v2859_v34 = vmul.f32 %v4155_v30, %v4155_v30 }
 0x602   : > { %v2790_v11 = vrot.slane %v2776_v33, %v3624_v24  ;;  %v2797_v31 = vrot.slane %v2776_v33, %v3627_v25 }
 0x603   : > { %v2772_v32 = vpop.xlane.xlu0 %2771  ;;  %v2873_v21 = vcombine.low %v2858_v14, %v2859_v34 }
 0x604   : > { %v2848_v63 = vsub.f32 %v2740_v58, %v2790_v11  ;;  %v2849_v37 = vsub.f32 %v2741_v51, %v2797_v31  ;;  %v2778_v19 = vmul.f32 0.03125, %v2772_v32  ;;  %v3472_v58 = vld [vmem:[%s4233_s4] sm:$0xff]  }
 0x605   : > { %v2883_v35 = vsel %vm382_vm0, %v2873_v21, 0.0  ;;  %3399 = vmatprep.subr.bf16.mxu0 %v3472_v58 }
 0x606   : > { %v2818_v36 = vrot.slane %v2778_v19, %v3624_v24  ;;  %v2825_v38 = vrot.slane %v2778_v19, %v3627_v25  ;;  %2884 = vadd.xlane.f32.xlu0 %v2883_v35  ;;  %v2856_v27 = vmul.f32 %v2848_v63, %v2848_v63  ;;  %v2857_v41 = vmul.f32 %v2849_v37, %v2849_v37 }
 0x607   : > { %v2775_v42 = vpop.xlane.xlu0 %2774  ;;  %3400 = vmatpush3.bf16.msra.mxu0 %v3472_v58 }
 0x608   : > { %v2852_v43 = vsub.f32 %v2744_v6, %v2818_v36  ;;  %v2853_v45 = vsub.f32 %v2745_v10, %v2825_v38  ;;  %v2779_v46 = vmul.f32 0.03125, %v2775_v42  ;;  %v2872_v39 = vcombine.low %v2856_v27, %v2857_v41  ;;  %3401 = vmatprep.subr.bf16.mxu0 %v3473_v56  ;;  %v3474_v42 = vld [vmem:[%s4235_s6] sm:$0xff]  }
 0x609   : > { %3407 = vmatprep.subr.bf16.mxu1 %v3474_v42 }
 0x60a   : > { %v2832_v47 = vrot.slane %v2779_v46, %v3624_v24  ;;  %v2839_v48 = vrot.slane %v2779_v46, %v3627_v25  ;;  %v2880_v29 = vsel %vm382_vm0, %v2872_v39, 0.0  ;;  %v2860_v40 = vmul.f32 %v2852_v43, %v2852_v43  ;;  %3408 = vmatpush3.bf16.msra.mxu1 %v3474_v42 }
 0x60b   : > { %2881 = vadd.xlane.f32.xlu1 %v2880_v29  ;;  %v2861_v52 = vmul.f32 %v2853_v45, %v2853_v45  ;;  %3402 = vmatpush3.bf16.msra.mxu0 %v3473_v56 }
 0x60c   : > { %v2854_v44 = vsub.f32 %v2746_v7, %v2832_v47  ;;  %v2855_v53 = vsub.f32 %v2747_v15, %v2839_v48 }
 0x60d   : > { %v2874_v54 = vcombine.low %v2860_v40, %v2861_v52 }
 0x60e   : > { %v2862_v55 = vmul.f32 %v2854_v44, %v2854_v44  ;;  %v2863_v28 = vmul.f32 %v2855_v53, %v2855_v53 }
 0x60f   : > { %v2886_v50 = vsel %vm382_vm0, %v2874_v54, 0.0 }
 0x610   : > { %2887 = vadd.xlane.f32.xlu1 %v2886_v50  ;;  %v2875_v12 = vcombine.low %v2862_v55, %v2863_v28  ;;  %v3337_v50 = vld [vmem:[%s4236_s7] ss:$0 sm:$0xff] }
 0x612   : > { %v2889_v13 = vsel %vm382_vm0, %v2875_v12, 0.0 }
 0x613   : > { %2890 = vadd.xlane.f32.xlu0 %v2889_v13 }
 0x693   : > { %v2885_v57 = vpop.xlane.xlu0 %2884 }
 0x694   : > { %v2893_v59 = vmul.f32 0.03125, %v2885_v57 }
 0x696   : > { %v2897_v51 = vadd.f32 1e-05, %v2893_v59 }
 0x698   : > { %3484 = vrsqrt.f32 %v2897_v51  ;;  %v2882_v60 = vpop.xlane.xlu1 %2881 }
 0x699   : > { %v2892_v61 = vmul.f32 0.03125, %v2882_v60 }
 0x69b   : > { %v2896_v2 = vadd.f32 1e-05, %v2892_v61 }
 0x69d   : > { %3486 = vrsqrt.f32 %v2896_v2  ;;  %v2888_v6 = vpop.xlane.xlu1 %2887 }
 0x69e   : > { %v2894_v8 = vmul.f32 0.03125, %v2888_v6 }
 0x6a0   : > { %v2898_v9 = vadd.f32 1e-05, %v2894_v8  ;;  %v2891_v10 = vpop.xlane.xlu0 %2890 }
 0x6a1   : > { %v2895_v4 = vmul.f32 0.03125, %v2891_v10 }
 0x6a2   : > { %v3485_v15 = vpop.eup %3484  ;;  %3488 = vrsqrt.f32 %v2898_v9 }
 0x6a3   : > { %v2928_v16 = vrot.slane %v3485_v15, %v3624_v24  ;;  %v2935_v7 = vrot.slane %v3485_v15, %v3627_v25  ;;  %v2899_v3 = vadd.f32 1e-05, %v2895_v4 }
 0x6a5   : > { %3490 = vrsqrt.f32 %v2899_v3  ;;  %v2974_v18 = vmul.f32 %v2928_v16, %v4153_v22  ;;  %v2975_v0 = vmul.f32 %v2935_v7, %v4155_v30 }
 0x6a7   : > { %v3487_v1 = vpop.eup %3486  ;;  %v2989_v14 = vcombine.low %v2974_v18, %v2975_v0 }
 0x6a8   : > { %v2914_v26 = vrot.slane %v3487_v1, %v3624_v24  ;;  %v2921_v20 = vrot.slane %v3487_v1, %v3627_v25 }
 0x6aa   : > { %v2972_v5 = vmul.f32 %v2914_v26, %v2848_v63  ;;  %v2973_v33 = vmul.f32 %v2921_v20, %v2849_v37 }
 0x6ac   : > { %v3489_v34 = vpop.eup %3488  ;;  %v2988_v11 = vcombine.low %v2972_v5, %v2973_v33 }
 0x6ad   : > { %v2942_v31 = vrot.slane %v3489_v34, %v3624_v24  ;;  %v2949_v32 = vrot.slane %v3489_v34, %v3627_v25 }
 0x6ae   : > { %v2996_v21 = vpack.c.bf16 %v2989_v14, %v2988_v11 }
 0x6af   : > { %v3491_v19 = vpop.eup %3490  ;;  %v2976_v35 = vmul.f32 %v2942_v31, %v2852_v43  ;;  %v2977_v22 = vmul.f32 %v2949_v32, %v2853_v45 }
 0x6b0   : > { %v2956_v30 = vrot.slane %v3491_v19, %v3624_v24  ;;  %v2963_v36 = vrot.slane %v3491_v19, %v3627_v25  ;;  %3403 = vmatprep.mubr.msk.bf16.mxu0 %vm382_vm0, %v2996_v21  ;;  %v3475_v24 = vld [vmem:[%s4235_s6 + $0x8] sm:$0xff]   ;;  %v3332_v25 = vld [vmem:[%s4234_s5] ss:$0 sm:$0xff] }
 0x6b1   : > { %v2990_v37 = vcombine.low %v2976_v35, %v2977_v22  ;;  %3409 = vmatprep.subr.bf16.mxu1 %v3475_v24 }
 0x6b2   : > { %v2978_v38 = vmul.f32 %v2956_v30, %v2854_v44  ;;  %v2979_v63 = vmul.f32 %v2963_v36, %v2855_v53  ;;  %3410 = vmatpush3.bf16.msra.mxu1 %v3475_v24 }
 0x6b4   : > { %v2991_v27 = vcombine.low %v2978_v38, %v2979_v63 }
 0x6b6   : > { %v2997_v41 = vpack.c.bf16 %v2991_v27, %v2990_v37 }
 0x6b8   : > { %3404 = vmatmul.mubr.msk.bf16.vlgmr.msra.gmra.mrb[8].mxu0 %vm382_vm0, %v2997_v41 }
 0x78b   : > { %v3405_v43 = vpop.f32.mrb[8].mxu0 }
 0x78c   : > { %v3070_v45 = vadd.f32 %v3405_v43, %v3332_v25  ;;  %v3061_v46 = vpop.f32.mrb[9].mxu0 }
 0x78d   : > { %v3062_v39 = vadd.f32 %v3332_v25, %v3061_v46  ;;  %v3406_v47 = vpop.f32.mrb[10].mxu0 }
 0x78e   : > { %v3073_v48 = vadd.f32 %v3406_v47, %v3332_v25  ;;  %v3064_v29 = vpop.f32.mrb[11].mxu0  ;;  %v3078_v52 = vmax.f32 %v3070_v45, 0.0 }
 0x78f   : > { %v3065_v40 = vadd.f32 %v3332_v25, %v3064_v29  ;;  %v3076_v53 = vmax.f32 %v3062_v39, 0.0 }
 0x790   : > { %v3079_v44 = vmax.f32 %v3073_v48, 0.0 }
 0x791   : > { %v3077_v54 = vmax.f32 %v3065_v40, 0.0 }
 0x792   : > { %v3081_v55 = vpack.c.bf16 %v3079_v44, %v3078_v52 }
 0x793   : > { %v3080_v28 = vpack.c.bf16 %v3077_v54, %v3076_v53 }
 0x795   : > { %3411 = vmatprep.mubr.msk.bf16.mxu1 %vm382_vm0, %v3080_v28 }
 0x796   : > { %3412 = vmatmul.mubr.msk.bf16.vlgmr.msra.gmra.mrb[12].mxu1 %vm382_vm0, %v3081_v55 }
 0x869   : > { %v3413_v12 = vpop.f32.mrb[12].mxu1 }
 0x86a   : > { %v3154_v13 = vadd.f32 %v3413_v12, %v3337_v50  ;;  %v3145_v58 = vpop.f32.mrb[13].mxu1 }
 0x86b   : > { %v3146_v56 = vadd.f32 %v3337_v50, %v3145_v58  ;;  %v3414_v57 = vpop.f32.mrb[14].mxu1 }
 0x86c   : > { %v3162_v59 = vadd.f32 %v3154_v13, %v4143_v23  ;;  %v3157_v51 = vadd.f32 %v3414_v57, %v3337_v50  ;;  %v3148_v60 = vpop.f32.mrb[15].mxu1 }
 0x86d   : > { %v3160_v61 = vadd.f32 %v3146_v56, %v4135_v62  ;;  %v3149_v2 = vadd.f32 %v3337_v50, %v3148_v60 }
 0x86e   : > { %v3170_v6 = vcombine.high %v3162_v59, %v3162_v59  ;;  %3181 = vst.msk [vmem:[%s356_s26 + $0x10] sm:$0xf] %vm3176_vm6, %v3162_v59  ;;  %v3163_v8 = vadd.f32 %v3157_v51, %v4147_v17 }
 0x86f   : > { %v3168_v9 = vcombine.high %v3160_v61, %v3160_v61  ;;  %3177 = vst.msk [vmem:[%s356_s26] sm:$0xf] %vm3176_vm6, %v3160_v61  ;;  %v3161_v10 = vadd.f32 %v3149_v2, %v4126_v49 }
 0x870   : > { %3182 = vst.msk [vmem:[%s356_s26 + $0x14] sm:$0xf] %vm3176_vm6, %v3170_v6  ;;  %v3171_v4 = vcombine.high %v3163_v8, %v3163_v8  ;;  %3183 = vst.msk [vmem:[%s356_s26 + $0x18] sm:$0xf] %vm3176_vm6, %v3163_v8 }
 0x871   : > { %3178 = vst.msk [vmem:[%s356_s26 + $0x4] sm:$0xf] %vm3176_vm6, %v3168_v9  ;;  %v3169_v23 = vcombine.high %v3161_v10, %v3161_v10  ;;  %3179 = vst.msk [vmem:[%s356_s26 + $0x8] sm:$0xf] %vm3176_vm6, %v3161_v10 }
 0x872   : > { %3184 = vst.msk [vmem:[%s356_s26 + $0x1c] sm:$0xf] %vm3176_vm6, %v3171_v4 }
 0x873   : > { %3180 = vst.msk [vmem:[%s356_s26 + $0xc] sm:$0xf] %vm3176_vm6, %v3169_v23 }
 0x874 PF: > { %s18_s29 = sadd.s32 1, %s3522_s29   ;;  %s4238_s27 = smov %s3518_s28 }
 0x875   : > { %p15_p5 = scmp.ge.s32.totalorder %s18_s29, 4   ;;  %s4239_s28 = smov %s4241_s30 }
 0x877   :  { %17 = sbr.rel (!%p15_p5) target bundleno = 2 (0x2), region = 85 }

// kernel: msa_update_with_pair.7
= control target key start
LH: loop header
LB: loop body
LE: loop exit
PB: predicated region body
PF: predicated region fallthrough
CT: control target
= control target key end

     0   :  { %s3594_s27 = smov 0   ;;  %s3596_s28 = smov 0   ;;  %s4242_s0 = inlined_call_operand.vmem [shape: f32[2,8,4,32], index: 0, kind: input, shape index: {}, may-alias: {0,8}]   ;;  %s4243_s1 = inlined_call_operand.vmem [shape: f32[2,4,4,8,8], index: 1, kind: input, shape index: {}]   ;;  %s4244_s2 = inlined_call_operand.vmem [shape: bf16[32,32], index: 2, kind: input, shape index: {}]   ;;  %s4245_s3 = inlined_call_operand.vmem [shape: f32[1,32], index: 3, kind: input, shape index: {}]   ;;  %s4246_s4 = inlined_call_operand.vmem [shape: bf16[32,32], index: 4, kind: input, shape index: {}]   ;;  %s4247_s5 = inlined_call_operand.vmem [shape: f32[1,32], index: 5, kind: input, shape index: {}]   ;;  %s4248_s6 = inlined_call_operand.vmem [shape: bf16[32,32], index: 6, kind: input, shape index: {}]   ;;  %s4249_s7 = inlined_call_operand.vmem [shape: f32[1,32], index: 7, kind: input, shape index: {}]   ;;  %s4250_s8 = inlined_call_operand.vmem [shape: f32[2,8,4,32], index: 8, kind: output, shape index: {}, may-alias: {0,8}]  }
   0x1   :  { %s3598_s29 = smov 0  }
   0x2 LB: > { %s30_s30 = sadd.s32 1, %s3531_s28  ;;  %p3293_p0 = scmp.ge.s32.totalorder %s3535_s29, 1  ;;  %s3535_s29 = sphi %s3598_s29, %s18_s29   ;;  %s3531_s28 = sphi %s3596_s28, %s4252_s28   ;;  %s3527_s27 = sphi %s3594_s27, %s4251_s27  }
   0x3   : > { %p32_p1 = scmp.ge.s32.totalorder %s30_s30, 2  ;;  %p292_p2 = scmp.lt.s32.totalorder %s3535_s29, 3 }
   0x5   : > { %s4254_s30 = smov (%p32_p1, %s30_s30), 0  ;;  %p293_p3 = pnand %p3293_p0, %p292_p2 }
   0x6   : > { %p338_p4 = scmp.lt.s32.totalorder (!%p293_p3), %s3527_s27, 1  ;;  %vm385_vm0 = vcmask (!%p293_p3), 261120   ;;  %v3537_v16 = vmov (!%p293_p3), 839922192   ;;  %v410_v18 = vlaneseq (!%p293_p3)  ;;  %v3538_v19 = vmov (!%p293_p3), 1985246804  }
   0x7   : > { %296 = sbr.rel (%p293_p3) target bundleno = 2164 (0x874), region = 52  ;;  %v408_v17 = vunpack.c.l.s4 (!%p293_p3), %v3537_v16  ;;  %v415_v20 = vunpack.c.l.s4 (!%p293_p3), %v3538_v19  ;;  %s3539_s19 = smov (!%p293_p3), 112   ;;  %vm3548_vm1 = vmmov (!%p293_p3), 0   ;;  %vm1603_vm2 = vcmask (!%p293_p3), 64512  }
   0x8   : > { %v3634_v22 = vshrl.u32 (!%p293_p3), %v410_v18, 7  ;;  %s3540_s20 = smov (!%p293_p3), 120   ;;  %s3541_s21 = smov (!%p293_p3), 104   ;;  %vm1608_vm3 = vcmask (!%p293_p3), 130048   ;;  %vm1613_vm4 = vcmask (!%p293_p3), 195584   ;;  %vm1633_vm5 = vcmask (!%p293_p3), 1043456  }
   0x9   : > { %v409_v21 = vunpack.c.0.s8 (!%p293_p3), %v408_v17  ;;  %v416_v23 = vunpack.c.0.s8 (!%p293_p3), %v415_v20  ;;  %s3544_s22 = smov (!%p293_p3), 16   ;;  %s3545_s23 = smov (!%p293_p3), 8   ;;  %vm3179_vm6 = vcmask (!%p293_p3), 257024  }
   0xa   : > { %s3546_s24 = smov (!%p293_p3), 24  }
   0xb   : > { %v3637_v24 = vsub.s32 (!%p293_p3), %v409_v21, %v3634_v22  ;;  %v3640_v25 = vsub.s32 (!%p293_p3), %v416_v23, %v3634_v22 }
   0xe   : > { %s4256_s27 = smov (!%p338_p4, %s3527_s27), 1 }
   0xf   : > { %s3357_s9 = sshll.u32 %s4256_s27, 5  ;;  %s3358_s25 = sshll.u32 %s4256_s27, 7 }
  0x10   : > { %s3620_s12 = scalar_lea.vmem %s4242_s0, %s3357_s9  ;;  %s3923_s11 = scalar_lea.vmem %s4243_s1, %s3358_s25 }
  0x11   : > { %v361_v0 = vld [vmem:[%s3620_s12] sm:$0xf]  ;;  %v362_v1 = vld [vmem:[%s3620_s12 + $0x4] sm:$0xf]  ;;  %v365_v2 = vld [vmem:[%s3620_s12 + $0x10] sm:$0xf]  ;;  %s359_s26 = scalar_lea.vmem %s4250_s8, %s3357_s9 }
  0x12   : > { %v377_v3 = vcombine.low %v361_v0, %v362_v1  ;;  %v366_v4 = vld [vmem:[%s3620_s12 + $0x14] sm:$0xf]  ;;  %v363_v5 = vld [vmem:[%s3620_s12 + $0x8] sm:$0xf]  ;;  %v364_v6 = vld [vmem:[%s3620_s12 + $0xc] sm:$0xf] }
  0x13   : > { %v379_v7 = vcombine.low %v365_v2, %v366_v4  ;;  %v378_v8 = vcombine.low %v363_v5, %v364_v6  ;;  %v367_v9 = vld [vmem:[%s3620_s12 + $0x18] sm:$0xf]  ;;  %v368_v10 = vld [vmem:[%s3620_s12 + $0x1c] sm:$0xf] }
  0x14   : > { %v386_v11 = vsel %vm385_vm0, %v377_v3, 0.0  ;;  %v380_v12 = vcombine.low %v367_v9, %v368_v10  ;;  %v3484_v3 = vld [vmem:[%s4244_s2 + $0x8] sm:$0xff]  }
  0x15   : > { %387 = vadd.xlane.f32.xlu0 %v386_v11  ;;  %v392_v13 = vsel %vm385_vm0, %v379_v7, 0.0  ;;  %v389_v14 = vsel %vm385_vm0, %v378_v8, 0.0 }
  0x16   : > { %393 = vadd.xlane.f32.xlu1 %v392_v13  ;;  %v395_v15 = vsel %vm385_vm0, %v380_v12, 0.0 }
  0x19   : > { %390 = vadd.xlane.f32.xlu0 %v389_v14 }
  0x1a   : > { %396 = vadd.xlane.f32.xlu1 %v395_v15 }
  0xa2   : > { %v388_v26 = vpop.xlane.xlu0 %387 }
  0xa3   : > { %v399_v27 = vmul.f32 0.03125, %v388_v26  ;;  %v394_v28 = vpop.xlane.xlu1 %393 }
  0xa4   : > { %v401_v29 = vmul.f32 0.03125, %v394_v28 }
  0xa5   : > { %v413_v30 = vrot.slane %v399_v27, %v3637_v24  ;;  %v420_v31 = vrot.slane %v399_v27, %v3640_v25 }
  0xa6   : > { %v441_v32 = vrot.slane %v401_v29, %v3637_v24  ;;  %v448_v33 = vrot.slane %v401_v29, %v3640_v25  ;;  %v391_v34 = vpop.xlane.xlu0 %390 }
  0xa7   : > { %v471_v35 = vsub.f32 %v361_v0, %v413_v30  ;;  %v472_v36 = vsub.f32 %v362_v1, %v420_v31  ;;  %v400_v37 = vmul.f32 0.03125, %v391_v34  ;;  %v397_v38 = vpop.xlane.xlu1 %396 }
  0xa8   : > { %v3646_v39 = vsub.f32 %v365_v2, %v441_v32  ;;  %v3648_v40 = vsub.f32 %v366_v4, %v448_v33  ;;  %v402_v41 = vmul.f32 0.03125, %v397_v38  ;;  %v3483_v2 = vld [vmem:[%s4244_s2] sm:$0xff]  }
  0xa9   : > { %v427_v42 = vrot.slane %v400_v37, %v3637_v24  ;;  %v434_v43 = vrot.slane %v400_v37, %v3640_v25  ;;  %v479_v44 = vmul.f32 %v471_v35, %v471_v35  ;;  %v480_v45 = vmul.f32 %v472_v36, %v472_v36  ;;  %3380 = vmatprep.subr.bf16.mxu0 %v3483_v2 }
  0xaa   : > { %v455_v46 = vrot.slane %v402_v41, %v3637_v24  ;;  %v462_v47 = vrot.slane %v402_v41, %v3640_v25  ;;  %v483_v48 = vmul.f32 %v3646_v39, %v3646_v39  ;;  %v484_v49 = vmul.f32 %v3648_v40, %v3648_v40  ;;  %3381 = vmatpush3.bf16.msra.mxu0 %v3483_v2 }
  0xab   : > { %v473_v50 = vsub.f32 %v363_v5, %v427_v42  ;;  %v474_v51 = vsub.f32 %v364_v6, %v434_v43  ;;  %v495_v52 = vcombine.low %v479_v44, %v480_v45  ;;  %3382 = vmatprep.subr.bf16.mxu0 %v3484_v3 }
  0xac   : > { %v477_v53 = vsub.f32 %v367_v9, %v455_v46  ;;  %v478_v54 = vsub.f32 %v368_v10, %v462_v47  ;;  %v497_v55 = vcombine.low %v483_v48, %v484_v49 }
  0xad   : > { %v503_v56 = vsel %vm385_vm0, %v495_v52, 0.0  ;;  %v481_v57 = vmul.f32 %v473_v50, %v473_v50  ;;  %v482_v58 = vmul.f32 %v474_v51, %v474_v51 }
  0xae   : > { %504 = vadd.xlane.f32.xlu0 %v503_v56  ;;  %v485_v59 = vmul.f32 %v477_v53, %v477_v53  ;;  %v486_v60 = vmul.f32 %v478_v54, %v478_v54  ;;  %v509_v61 = vsel %vm385_vm0, %v497_v55, 0.0  ;;  %3383 = vmatpush3.bf16.msra.mxu0 %v3484_v3  ;;  %v3542_v56 = vmov 1983009808  }
  0xaf   : > { %v496_v62 = vcombine.low %v481_v57, %v482_v58  ;;  %v742_v57 = vunpack.c.l.s4 %v3542_v56 }
  0xb0   : > { %v498_v63 = vcombine.low %v485_v59, %v486_v60  ;;  %v3543_v60 = vmov 1934713408  }
  0xb1   : > { %v506_v0 = vsel %vm385_vm0, %v496_v62, 0.0  ;;  %v743_v62 = vunpack.c.0.s8 %v742_v57 }
  0xb2   : > { %510 = vadd.xlane.f32.xlu0 %v509_v61  ;;  %507 = vadd.xlane.f32.xlu1 %v506_v0  ;;  %v512_v1 = vsel %vm385_vm0, %v498_v63, 0.0  ;;  %v774_v61 = vunpack.c.l.s4 %v3543_v60 }
  0xb6   : > { %513 = vadd.xlane.f32.xlu1 %v512_v1  ;;  %v775_v1 = vunpack.c.0.s8 %v774_v61 }
 0x13b   : > { %v505_v4 = vpop.xlane.xlu0 %504 }
 0x13c   : > { %v515_v5 = vmul.f32 0.03125, %v505_v4  ;;  %v3703_v4 = vsub.s32 %v743_v62, %v3634_v22 }
 0x13e   : > { %v519_v6 = vadd.f32 1e-05, %v515_v5 }
 0x13f   : > { %v508_v7 = vpop.xlane.xlu1 %507  ;;  %v511_v8 = vpop.xlane.xlu0 %510 }
 0x140   : > { %3489 = vrsqrt.f32 %v519_v6  ;;  %v516_v9 = vmul.f32 0.03125, %v508_v7  ;;  %v517_v10 = vmul.f32 0.03125, %v511_v8 }
 0x142   : > { %v520_v11 = vadd.f32 1e-05, %v516_v9  ;;  %v521_v12 = vadd.f32 1e-05, %v517_v10 }
 0x143   : > { %v514_v13 = vpop.xlane.xlu1 %513 }
 0x144   : > { %3491 = vrsqrt.f32 %v520_v11  ;;  %v518_v14 = vmul.f32 0.03125, %v514_v13  ;;  %v3708_v11 = vsub.s32 %v775_v1, %v3634_v22 }
 0x145   : > { %3493 = vrsqrt.f32 %v521_v12 }
 0x146   : > { %v522_v15 = vadd.f32 1e-05, %v518_v14 }
 0x148   : > { %3495 = vrsqrt.f32 %v522_v15 }
 0x14a   : > { %v3490_v16 = vpop.eup %3489 }
 0x14b   : > { %v537_v17 = vrot.slane %v3490_v16, %v3637_v24  ;;  %v544_v18 = vrot.slane %v3490_v16, %v3640_v25 }
 0x14d   : > { %v595_v20 = vmul.f32 %v537_v17, %v471_v35  ;;  %v596_v21 = vmul.f32 %v544_v18, %v472_v36 }
 0x14e   : > { %v3492_v19 = vpop.eup %3491 }
 0x14f   : > { %v3494_v23 = vpop.eup %3493  ;;  %v551_v26 = vrot.slane %v3492_v19, %v3637_v24  ;;  %v558_v27 = vrot.slane %v3492_v19, %v3640_v25  ;;  %v611_v33 = vcombine.low %v595_v20, %v596_v21 }
 0x150   : > { %v565_v28 = vrot.slane %v3494_v23, %v3637_v24  ;;  %v572_v29 = vrot.slane %v3494_v23, %v3640_v25 }
 0x151   : > { %v597_v30 = vmul.f32 %v551_v26, %v473_v50  ;;  %v598_v31 = vmul.f32 %v558_v27, %v474_v51 }
 0x152   : > { %v3496_v32 = vpop.eup %3495  ;;  %v599_v34 = vmul.f32 %v565_v28, %v3646_v39  ;;  %v600_v38 = vmul.f32 %v572_v29, %v3648_v40  ;;  %v3300_v39 = vld [vmem:[%s4245_s3] ss:$0 sm:$0xff] }
 0x153   : > { %v579_v37 = vrot.slane %v3496_v32, %v3637_v24  ;;  %v586_v35 = vrot.slane %v3496_v32, %v3640_v25  ;;  %v612_v36 = vcombine.low %v597_v30, %v598_v31 }
 0x154   : > { %v613_v44 = vcombine.low %v599_v34, %v600_v38 }
 0x155   : > { %v619_v41 = vpack.c.bf16 %v612_v36, %v611_v33  ;;  %v601_v42 = vmul.f32 %v579_v37, %v477_v53  ;;  %v602_v43 = vmul.f32 %v586_v35, %v478_v54 }
 0x157   : > { %3384 = vmatprep.mubr.msk.bf16.mxu0 %vm385_vm0, %v619_v41  ;;  %v614_v45 = vcombine.low %v601_v42, %v602_v43 }
 0x159   : > { %v620_v46 = vpack.c.bf16 %v614_v45, %v613_v44 }
 0x15b   : > { %3385 = vmatmul.mubr.msk.bf16.vlgmr.msra.gmra.mrb[0].mxu0 %vm385_vm0, %v620_v46 }
 0x22e   : > { %v3386_v47 = vpop.f32.mrb[0].mxu0 }
 0x22f   : > { %v693_v48 = vadd.f32 %v3386_v47, %v3300_v39  ;;  %v684_v49 = vpop.f32.mrb[1].mxu0 }
 0x230   : > { %v3387_v50 = vpop.f32.mrb[2].mxu0  ;;  %v685_v51 = vadd.f32 %v3300_v39, %v684_v49 }
 0x231   : > { %719 = vrot.lane.b32.xlu0 %v693_v48, %s3539_s19  ;;  %707 = vrot.lane.b32.xlu1 %v693_v48, %s3540_s20  ;;  %v687_v40 = vpop.f32.mrb[3].mxu0  ;;  %v696_v52 = vadd.f32 %v3387_v50, %v3300_v39 }
 0x232   : > { %v3689_v53 = vadd.f32 %v3300_v39, %v687_v40 }
 0x235   : > { %709 = vrot.lane.b32.xlu1 %v696_v52, %s3540_s20  ;;  %703 = vrot.lane.b32.xlu0 %v685_v51, %s3540_s20 }
 0x239   : > { %721 = vrot.lane.b32.xlu1 %v696_v52, %s3539_s19  ;;  %715 = vrot.lane.b32.xlu0 %v685_v51, %s3539_s19 }
 0x23d   : > { %705 = vrot.lane.b32.xlu1 %v3689_v53, %s3540_s20  ;;  %727 = vrot.lane.b32.xlu0 %v685_v51, %s3541_s21 }
 0x241   : > { %717 = vrot.lane.b32.xlu1 %v3689_v53, %s3539_s19  ;;  %731 = vrot.lane.b32.xlu0 %v693_v48, %s3541_s21 }
 0x245   : > { %729 = vrot.lane.b32.xlu1 %v3689_v53, %s3541_s21 }
 0x249   : > { %733 = vrot.lane.b32.xlu1 %v696_v52, %s3541_s21 }
 0x2a3   : > { %v720_v54 = vpop.permute.xlu0 %719  ;;  %v708_v55 = vpop.permute.xlu1 %707 }
 0x2a4   : > { %v875_v5 = vcombine.low %v693_v48, %v720_v54  ;;  %v876_v6 = vcombine.high %v693_v48, %v720_v54 }
 0x2a6   : > { %v883_v18 = vrot.slane %v875_v5, %v3703_v4  ;;  %v890_v19 = vrot.slane %v876_v6, %v3703_v4 }
 0x2a7   : > { %v3700_v58 = vpop.permute.xlu1 %709  ;;  %v704_v59 = vpop.permute.xlu0 %703 }
 0x2ab   : > { %v722_v63 = vpop.permute.xlu1 %721  ;;  %v716_v0 = vpop.permute.xlu0 %715 }
 0x2ac   : > { %v739_v2 = vcombine.low %v685_v51, %v716_v0  ;;  %v740_v3 = vcombine.high %v685_v51, %v716_v0  ;;  %v943_v12 = vcombine.low %v696_v52, %v722_v63  ;;  %v944_v13 = vcombine.high %v696_v52, %v722_v63 }
 0x2ae   : > { %v747_v14 = vrot.slane %v739_v2, %v3703_v4  ;;  %v754_v15 = vrot.slane %v740_v3, %v3703_v4  ;;  %v3717_v28 = vrot.slane %v943_v12, %v3703_v4  ;;  %v3720_v29 = vrot.slane %v944_v13, %v3703_v4 }
 0x2af   : > { %v3705_v7 = vpop.permute.xlu1 %705  ;;  %v728_v8 = vpop.permute.xlu0 %727 }
 0x2b0   : > { %v755_v9 = vcombine.low %v704_v59, %v728_v8  ;;  %v756_v10 = vcombine.high %v704_v59, %v728_v8 }
 0x2b2   : > { %v763_v16 = vrot.slane %v755_v9, %v3703_v4  ;;  %v770_v17 = vrot.slane %v756_v10, %v3703_v4 }
 0x2b3   : > { %v718_v20 = vpop.permute.xlu1 %717  ;;  %v732_v21 = vpop.permute.xlu0 %731 }
 0x2b4   : > { %v771_v23 = vcombine.low %v747_v14, %v763_v16  ;;  %v772_v26 = vcombine.high %v747_v14, %v763_v16  ;;  %v787_v22 = vcombine.low %v754_v15, %v770_v17  ;;  %v788_v27 = vcombine.high %v754_v15, %v770_v17 }
 0x2b5   : > { %v891_v30 = vcombine.low %v708_v55, %v732_v21  ;;  %v892_v31 = vcombine.high %v708_v55, %v732_v21  ;;  %v807_v35 = vcombine.low %v3689_v53, %v718_v20  ;;  %v808_v36 = vcombine.high %v3689_v53, %v718_v20 }
 0x2b6   : > { %v779_v32 = vrot.slane %v771_v23, %v3708_v11  ;;  %v786_v33 = vrot.slane %v772_v26, %v3708_v11  ;;  %v795_v34 = vrot.slane %v787_v22, %v3708_v11  ;;  %v802_v37 = vrot.slane %v788_v27, %v3708_v11 }
 0x2b7   : > { %v899_v38 = vrot.slane %v891_v30, %v3703_v4  ;;  %v906_v41 = vrot.slane %v892_v31, %v3703_v4  ;;  %v730_v42 = vpop.permute.xlu1 %729  ;;  %v815_v60 = vrot.slane %v807_v35, %v3703_v4  ;;  %v822_v61 = vrot.slane %v808_v36, %v3703_v4 }
 0x2b8   : > { %v1011_v43 = vcombine.low %v779_v32, %v786_v33  ;;  %v3305_v44 = vcombine.high %v779_v32, %v786_v33  ;;  %v1045_v45 = vcombine.low %v795_v34, %v802_v37  ;;  %v3306_v46 = vcombine.high %v795_v34, %v802_v37 }
 0x2b9   : > { %v907_v39 = vcombine.low %v883_v18, %v899_v38  ;;  %v908_v47 = vcombine.high %v883_v18, %v899_v38  ;;  %v923_v48 = vcombine.low %v890_v19, %v906_v41  ;;  %v924_v49 = vcombine.high %v890_v19, %v906_v41 }
 0x2ba   : > { %v3731_v50 = vrot.slane %v1011_v43, %v3703_v4  ;;  %v3734_v40 = vrot.slane %v3305_v44, %v3703_v4  ;;  %v3737_v51 = vrot.slane %v1045_v45, %v3703_v4  ;;  %v3740_v52 = vrot.slane %v3306_v46, %v3703_v4 }
 0x2bb   : > { %v915_v53 = vrot.slane %v907_v39, %v3708_v11  ;;  %v922_v54 = vrot.slane %v908_v47, %v3708_v11  ;;  %v931_v55 = vrot.slane %v923_v48, %v3708_v11  ;;  %v938_v56 = vrot.slane %v924_v49, %v3708_v11  ;;  %v734_v2 = vpop.permute.xlu1 %733 }
 0x2bc   : > { %v1028_v57 = vcombine.high %v3731_v50, %v3734_v40  ;;  %v1062_v59 = vcombine.high %v3737_v51, %v3740_v52  ;;  %v1027_v3 = vcombine.low %v3731_v50, %v3734_v40  ;;  %v1061_v5 = vcombine.low %v3737_v51, %v3740_v52 }
 0x2bd   : > { %v1147_v62 = vcombine.low %v915_v53, %v922_v54  ;;  %v3309_v63 = vcombine.high %v915_v53, %v922_v54  ;;  %v1181_v0 = vcombine.low %v931_v55, %v938_v56  ;;  %v3310_v1 = vcombine.high %v931_v55, %v938_v56 }
 0x2be   : > { %v823_v6 = vcombine.low %v3705_v7, %v730_v42  ;;  %v824_v8 = vcombine.high %v3705_v7, %v730_v42  ;;  %v959_v16 = vcombine.low %v3700_v58, %v734_v2  ;;  %v960_v7 = vcombine.high %v3700_v58, %v734_v2 }
 0x2bf   : > { %v3759_v9 = vrot.slane %v1147_v62, %v3703_v4  ;;  %v3762_v10 = vrot.slane %v3309_v63, %v3703_v4  ;;  %v3765_v12 = vrot.slane %v1181_v0, %v3703_v4  ;;  %v3768_v13 = vrot.slane %v3310_v1, %v3703_v4 }
 0x2c0   : > { %v831_v14 = vrot.slane %v823_v6, %v3703_v4  ;;  %v838_v15 = vrot.slane %v824_v8, %v3703_v4  ;;  %v3775_v17 = vrot.slane %v1028_v57, %v3708_v11  ;;  %v3778_v18 = vrot.slane %v1062_v59, %v3708_v11 }
 0x2c1   : > { %v1163_v19 = vcombine.low %v3759_v9, %v3762_v10  ;;  %v1164_v20 = vcombine.high %v3759_v9, %v3762_v10  ;;  %v1197_v27 = vcombine.low %v3765_v12, %v3768_v13  ;;  %v1198_v58 = vcombine.high %v3765_v12, %v3768_v13 }
 0x2c2   : > { %v839_v21 = vcombine.low %v815_v60, %v831_v14  ;;  %v840_v23 = vcombine.high %v815_v60, %v831_v14  ;;  %v855_v26 = vcombine.low %v822_v61, %v838_v15  ;;  %v856_v22 = vcombine.high %v822_v61, %v838_v15 }
 0x2c3   : > { %v967_v30 = vrot.slane %v959_v16, %v3703_v4  ;;  %v974_v31 = vrot.slane %v960_v7, %v3703_v4  ;;  %v3811_v63 = vrot.slane %v1164_v20, %v3708_v11  ;;  %v1035_v2 = vrot.slane %v1027_v3, %v3708_v11 }
 0x2c4   : > { %v847_v32 = vrot.slane %v839_v21, %v3708_v11  ;;  %v854_v33 = vrot.slane %v840_v23, %v3708_v11  ;;  %v863_v34 = vrot.slane %v855_v26, %v3708_v11  ;;  %v870_v37 = vrot.slane %v856_v22, %v3708_v11 }
 0x2c5   : > { %v975_v35 = vcombine.low %v3717_v28, %v967_v30  ;;  %v976_v36 = vcombine.high %v3717_v28, %v967_v30  ;;  %v991_v38 = vcombine.low %v3720_v29, %v974_v31  ;;  %v992_v41 = vcombine.high %v3720_v29, %v974_v31 }
 0x2c6   : > { %v1079_v42 = vcombine.low %v847_v32, %v854_v33  ;;  %v3307_v43 = vcombine.high %v847_v32, %v854_v33  ;;  %v1113_v44 = vcombine.low %v863_v34, %v870_v37  ;;  %v3308_v45 = vcombine.high %v863_v34, %v870_v37 }
 0x2c7   : > { %v983_v46 = vrot.slane %v975_v35, %v3708_v11  ;;  %v990_v39 = vrot.slane %v976_v36, %v3708_v11  ;;  %v999_v47 = vrot.slane %v991_v38, %v3708_v11  ;;  %v1006_v48 = vrot.slane %v992_v41, %v3708_v11 }
 0x2c8   : > { %v1086_v49 = vrot.slane %v1079_v42, %v3703_v4  ;;  %v1094_v28 = vrot.slane %v3307_v43, %v3703_v4  ;;  %v1120_v50 = vrot.slane %v1113_v44, %v3703_v4  ;;  %v1128_v29 = vrot.slane %v3308_v45, %v3703_v4 }
 0x2c9   : > { %v1215_v40 = vcombine.low %v983_v46, %v990_v39  ;;  %v3311_v51 = vcombine.high %v983_v46, %v990_v39  ;;  %v1249_v52 = vcombine.low %v999_v47, %v1006_v48  ;;  %v3312_v53 = vcombine.high %v999_v47, %v1006_v48 }
 0x2ca   : > { %v1095_v54 = vcombine.low %v1086_v49, %v1094_v28  ;;  %v1096_v55 = vcombine.high %v1086_v49, %v1094_v28  ;;  %v1129_v56 = vcombine.low %v1120_v50, %v1128_v29  ;;  %v1130_v57 = vcombine.high %v1120_v50, %v1128_v29 }
 0x2cb   : > { %v1222_v59 = vrot.slane %v1215_v40, %v3703_v4  ;;  %v1230_v60 = vrot.slane %v3311_v51, %v3703_v4  ;;  %v1256_v61 = vrot.slane %v1249_v52, %v3703_v4  ;;  %v1264_v62 = vrot.slane %v3312_v53, %v3703_v4 }
 0x2cc   : > { %v3814_v0 = vrot.slane %v1096_v55, %v3708_v11  ;;  %v3817_v1 = vrot.slane %v1130_v57, %v3708_v11  ;;  %v1069_v10 = vrot.slane %v1061_v5, %v3708_v11  ;;  %v1103_v15 = vrot.slane %v1095_v54, %v3708_v11 }
 0x2cd   : > { %v1231_v6 = vcombine.low %v1222_v59, %v1230_v60  ;;  %v1232_v8 = vcombine.high %v1222_v59, %v1230_v60  ;;  %v1265_v9 = vcombine.low %v1256_v61, %v1264_v62  ;;  %v1266_v14 = vcombine.high %v1256_v61, %v1264_v62 }
 0x2ce   : > { %v1137_v16 = vrot.slane %v1129_v56, %v3708_v11  ;;  %v1171_v7 = vrot.slane %v1163_v19, %v3708_v11  ;;  %v1205_v21 = vrot.slane %v1197_v27, %v3708_v11  ;;  %v1283_v26 = vcombine.low %v1035_v2, %v1103_v15 }
 0x2cf   : > { %v3825_v20 = vrot.slane %v1232_v8, %v3708_v11  ;;  %v1239_v23 = vrot.slane %v1231_v6, %v3708_v11  ;;  %v1273_v3 = vrot.slane %v1265_v9, %v3708_v11  ;;  %v3313_v30 = vcombine.high %v1035_v2, %v1103_v15 }
 0x2d0   : > { %v1291_v22 = vcombine.low %v1069_v10, %v1137_v16  ;;  %v3314_v5 = vcombine.high %v1069_v10, %v1137_v16  ;;  %v1290_v37 = vrot.slane %v1283_v26, %v3703_v4  ;;  %v1280_v43 = vrot.slane %v1266_v14, %v3708_v11 }
 0x2d1   : > { %v1299_v31 = vcombine.low %v1171_v7, %v1239_v23  ;;  %v1307_v32 = vcombine.low %v1205_v21, %v1273_v3  ;;  %v3315_v33 = vcombine.high %v1171_v7, %v1239_v23  ;;  %v3316_v34 = vcombine.high %v1205_v21, %v1273_v3 }
 0x2d2   : > { %v1298_v19 = vrot.slane %v1291_v22, %v3703_v4  ;;  %v1358_v35 = vrot.slane %v3313_v30, %v3703_v4  ;;  %v1366_v27 = vrot.slane %v3314_v5, %v3703_v4  ;;  %v1419_v46 = vcombine.low %v3775_v17, %v3814_v0 }
 0x2d3   : > { %v1306_v36 = vrot.slane %v1299_v31, %v3703_v4  ;;  %v1314_v38 = vrot.slane %v1307_v32, %v3703_v4  ;;  %v1374_v41 = vrot.slane %v3315_v33, %v3703_v4  ;;  %v1382_v42 = vrot.slane %v3316_v34, %v3703_v4 }
 0x2d4   : > { %v1316_v44 = vcombine.high %v1290_v37, %v1298_v19  ;;  %v1315_v45 = vcombine.low %v1290_v37, %v1298_v19  ;;  %v1427_v49 = vcombine.low %v3778_v18, %v3817_v1  ;;  %v1212_v28 = vrot.slane %v1198_v58, %v3708_v11 }
 0x2d5   : > { %v1332_v39 = vcombine.high %v1306_v36, %v1314_v38  ;;  %v1331_v47 = vcombine.low %v1306_v36, %v1314_v38  ;;  %v1399_v48 = vcombine.low %v1374_v41, %v1382_v42  ;;  %v1383_v29 = vcombine.low %v1358_v35, %v1366_v27 }
 0x2d6   : > { %v1330_v50 = vrot.slane %v1316_v44, %v3708_v11  ;;  %v1426_v40 = vrot.slane %v1419_v46, %v3703_v4  ;;  %v3851_v52 = vrot.slane %v1315_v45, %v3708_v11  ;;  %v1434_v54 = vrot.slane %v1427_v49, %v3703_v4 }
 0x2d7   : > { %v1346_v51 = vrot.slane %v1332_v39, %v3708_v11  ;;  %v3854_v53 = vrot.slane %v1331_v47, %v3708_v11  ;;  %v3858_v55 = vrot.slane %v1399_v48, %v3708_v11  ;;  %v1435_v12 = vcombine.low %v3811_v63, %v3825_v20 }
 0x2d8   : > { %v1443_v13 = vcombine.low %v1212_v28, %v1280_v43  ;;  %v1451_v57 = vcombine.low %v1426_v40, %v1434_v54  ;;  %v1400_v59 = vcombine.high %v1374_v41, %v1382_v42  ;;  %v3865_v60 = vrot.slane %v1383_v29, %v3708_v11 }
 0x2d9   : > { %v1349_v58 = vcombine.low %v1330_v50, %v1346_v51  ;;  %v1348_v56 = vcombine.high %v3851_v52, %v3854_v53  ;;  %v1442_v61 = vrot.slane %v1435_v12, %v3703_v4  ;;  %v1384_v2 = vcombine.high %v1358_v35, %v1366_v27 }
 0x2da   : > { %v1450_v62 = vrot.slane %v1443_v13, %v3703_v4  ;;  %v1416_v6 = vcombine.high %v3865_v60, %v3858_v55  ;;  %v3317_v9 = vcombine.high %v3775_v17, %v3814_v0  ;;  %v3318_v10 = vcombine.high %v3778_v18, %v3817_v1 }
 0x2db   : > { %1575 = vrot.lane.b32.xlu1 %v1349_v58, %s3544_s22  ;;  %1559 = vrot.lane.b32.xlu0 %v1348_v56, %s3545_s23  ;;  %v3878_v14 = vrot.slane %v1451_v57, %v3708_v11  ;;  %v1350_v15 = vcombine.high %v1330_v50, %v1346_v51  ;;  %v1414_v16 = vrot.slane %v1400_v59, %v3708_v11  ;;  %v3547_v27 = vmov 0.0  }
 0x2dc   : > { %v1467_v8 = vcombine.low %v1442_v61, %v1450_v62  ;;  %v3319_v7 = vcombine.high %v3811_v63, %v3825_v20  ;;  %v1468_v23 = vcombine.high %v1442_v61, %v1450_v62  ;;  %v1494_v3 = vrot.slane %v3317_v9, %v3703_v4  ;;  %3388 = vmatprep.subr.bf16.mxu1 %v3547_v27 }
 0x2dd   : > { %v1502_v17 = vrot.slane %v3318_v10, %v3703_v4  ;;  %v1398_v18 = vrot.slane %v1384_v2, %v3708_v11  ;;  %v3320_v1 = vcombine.high %v1212_v28, %v1280_v43  ;;  %v1347_v26 = vcombine.low %v3851_v52, %v3854_v53  ;;  %3400 = vmatprep.subr.bf16.mxu0 %v3547_v27 }
 0x2de   : > { %v3884_v21 = vrot.slane %v1467_v8, %v3708_v11  ;;  %v1510_v0 = vrot.slane %v3319_v7, %v3703_v4  ;;  %v1452_v22 = vcombine.high %v1426_v40, %v1434_v54  ;;  %v1482_v34 = vrot.slane %v1468_v23, %v3708_v11  ;;  %3390 = vmatprep.mubr.msk.bf16.mxu1 %vm3548_vm1, %v3547_v27  ;;  %v3322_v8 = vld [vmem:[%s3923_s11 + $0x28] sm:$0xff] }
 0x2df   : > { %1591 = vrot.lane.b32.xlu0 %v1350_v15, %s3546_s24  ;;  %v1520_v30 = vcombine.high %v1494_v3, %v1502_v17  ;;  %v1417_v5 = vcombine.low %v1398_v18, %v1414_v16  ;;  %v1518_v31 = vrot.slane %v3320_v1, %v3703_v4  ;;  %v1519_v32 = vcombine.low %v1494_v3, %v1502_v17 }
 0x2e0   : > { %v1483_v63 = vcombine.low %v3878_v14, %v3884_v21  ;;  %v1484_v20 = vcombine.high %v3878_v14, %v3884_v21  ;;  %v1415_v37 = vcombine.low %v3865_v60, %v3858_v55  ;;  %v1466_v36 = vrot.slane %v1452_v22, %v3708_v11  ;;  %3402 = vmatprep.mubr.msk.bf16.mxu0 %vm3548_vm1, %v3547_v27  ;;  %v3321_v55 = vld [vmem:[%s3923_s11 + $0x20] sm:$0xff]  ;;  %v3324_v14 = vld [vmem:[%s3923_s11 + $0x38] sm:$0xff] }
 0x2e1   : > { %v1536_v19 = vcombine.high %v1510_v0, %v1518_v31  ;;  %v1535_v35 = vcombine.low %v1510_v0, %v1518_v31  ;;  %v1534_v38 = vrot.slane %v1520_v30, %v3708_v11  ;;  %v1527_v42 = vrot.slane %v1519_v32, %v3708_v11  ;;  %v3323_v31 = vld [vmem:[%s3923_s11 + $0x30] sm:$0xff] }
 0x2e2   : > { %v3464_v33 = vpack.i.bf16 %v1484_v20, %v1416_v6  ;;  %v1418_v44 = vcombine.high %v1398_v18, %v1414_v16  ;;  %v1485_v45 = vcombine.low %v1466_v36, %v1482_v34  ;;  %v1486_v46 = vcombine.high %v1466_v36, %v1482_v34 }
 0x2e3   : > { %1577 = vrot.lane.b32.xlu0 %v1417_v5, %s3544_s22  ;;  %v1550_v41 = vrot.slane %v1536_v19, %v3708_v11  ;;  %v1543_v43 = vrot.slane %v1535_v35, %v3708_v11  ;;  %v1622_v56 = vpack.c.bf16 %v3321_v55, %v3321_v55  ;;  %v1623_v23 = vpack.c.bf16 %v3322_v8, %v3322_v8 }
 0x2e4   : > { %3465 = vrot.lane.b32.xlu1 %v3464_v33, %s3545_s23  ;;  %v1624_v34 = vpack.c.bf16 %v3323_v31, %v3323_v31 }
 0x2e5   : > { %v1553_v39 = vcombine.low %v1534_v38, %v1550_v41  ;;  %v1552_v47 = vcombine.high %v1527_v42, %v1543_v43  ;;  %v1554_v48 = vcombine.high %v1534_v38, %v1550_v41  ;;  %v1551_v49 = vcombine.low %v1527_v42, %v1543_v43 }
 0x2e7   : > { %1565 = vrot.lane.b32.xlu0 %v1552_v47, %s3545_s23  ;;  %v3469_v28 = vpack.i.bf16 %v1553_v39, %v1485_v45  ;;  %v3474_v50 = vpack.i.bf16 %v1554_v48, %v1486_v46 }
 0x2e8   : > { %1593 = vrot.lane.b32.xlu1 %v1418_v44, %s3546_s24 }
 0x2eb   : > { %3475 = vrot.lane.b32.xlu0 %v3474_v50, %s3546_s24 }
 0x2ec   : > { %3470 = vrot.lane.b32.xlu1 %v3469_v28, %s3544_s22 }
 0x34d   : > { %v1560_v29 = vpop.permute.xlu0 %1559  ;;  %v1576_v40 = vpop.permute.xlu1 %1575 }
 0x34e   : > { %v1604_v51 = vsel %vm1603_vm2, %v1347_v26, %v1560_v29 }
 0x34f   : > { %v1609_v53 = vsel %vm1608_vm3, %v1604_v51, %v1576_v40 }
 0x351   : > { %v1592_v52 = vpop.permute.xlu0 %1591 }
 0x352   : > { %v1614_v54 = vsel %vm1613_vm4, %v1609_v53, %v1592_v52 }
 0x353   : > { %v1626_v12 = vpack.c.bf16 %v1614_v54, %v1614_v54 }
 0x355   : > { %v1578_v13 = vpop.permute.xlu0 %1577  ;;  %v1635_v58 = vsel %vm1633_vm5, %v1626_v12, 0 }
 0x356   : > { %v3466_v57 = vpop.permute.xlu1 %3465  ;;  %3389 = vmatpush3.bf16.msra.mxu1 %v1635_v58 }
 0x357   : > { %v3467_v59 = vunpack.i.l.bf16 %v3466_v57  ;;  %3394 = vmatprep.subr.bf16.mxu1 %v3547_v27  ;;  %v3468_v9 = vunpack.i.h.bf16 %v3466_v57 }
 0x359   : > { %v1605_v60 = vsel %vm1603_vm2, %v1415_v37, %v3467_v59  ;;  %3391 = vmatmul.mubr.msk.bf16.vlgmr.msra.gmra.mrb[0].mxu1 %vm1603_vm2, %v1622_v56  ;;  %v1566_v6 = vpop.permute.xlu0 %1565  ;;  %v1606_v0 = vsel %vm1603_vm2, %v1483_v63, %v3468_v9  ;;  %v1625_v37 = vpack.c.bf16 %v3324_v14, %v3324_v14 }
 0x35a   : > { %v1594_v61 = vpop.permute.xlu1 %1593  ;;  %v1610_v62 = vsel %vm1608_vm3, %v1605_v60, %v1578_v13  ;;  %3396 = vmatprep.mubr.msk.bf16.mxu1 %vm3548_vm1, %v3547_v27  ;;  %v1607_v16 = vsel %vm1603_vm2, %v1551_v49, %v1566_v6 }
 0x35b   : > { %v1615_v2 = vsel %vm1613_vm4, %v1610_v62, %v1594_v61 }
 0x35c   : > { %v1627_v10 = vpack.c.bf16 %v1615_v2, %v1615_v2 }
 0x35d   : > { %v3476_v18 = vpop.permute.xlu0 %3475 }
 0x35e   : > { %v3471_v15 = vpop.permute.xlu1 %3470  ;;  %v1681_v7 = vsel %vm1633_vm5, %v1627_v10, 0  ;;  %v3478_v1 = vunpack.i.h.bf16 %v3476_v18  ;;  %v3477_v26 = vunpack.i.l.bf16 %v3476_v18 }
 0x35f   : > { %v3473_v3 = vunpack.i.h.bf16 %v3471_v15  ;;  %v3472_v17 = vunpack.i.l.bf16 %v3471_v15  ;;  %3395 = vmatpush3.bf16.msra.mxu1 %v1681_v7 }
 0x360   : > { %3406 = vmatprep.subr.bf16.mxu1 %v3547_v27 }
 0x361   : > { %v1611_v20 = vsel %vm1608_vm3, %v1606_v0, %v3472_v17  ;;  %v1612_v22 = vsel %vm1608_vm3, %v1607_v16, %v3473_v3 }
 0x362   : > { %3397 = vmatmul.mubr.msk.bf16.vlgmr.msra.gmra.mrb[4].mxu1 %vm1603_vm2, %v1623_v23  ;;  %v1616_v30 = vsel %vm1613_vm4, %v1611_v20, %v3477_v26  ;;  %v1617_v5 = vsel %vm1613_vm4, %v1612_v22, %v3478_v1 }
 0x363   : > { %v1628_v32 = vpack.c.bf16 %v1616_v30, %v1616_v30  ;;  %v1629_v33 = vpack.c.bf16 %v1617_v5, %v1617_v5  ;;  %3408 = vmatprep.mubr.msk.bf16.mxu1 %vm3548_vm1, %v3547_v27 }
 0x365   : > { %v1727_v21 = vsel %vm1633_vm5, %v1628_v32, 0  ;;  %v1773_v63 = vsel %vm1633_vm5, %v1629_v33, 0 }
 0x366   : > { %3401 = vmatpush3.bf16.msra.mxu0 %v1727_v21  ;;  %3407 = vmatpush3.bf16.msra.mxu1 %v1773_v63 }
 0x369   : > { %3403 = vmatmul.mubr.msk.bf16.vlgmr.msra.gmra.mrb[4].mxu0 %vm1603_vm2, %v1624_v34 }
 0x36a   : > { %3409 = vmatmul.mubr.msk.bf16.vlgmr.msra.gmra.mrb[8].mxu1 %vm1603_vm2, %v1625_v37 }
 0x42c   : > { %v1671_v19 = vpop.f32.mrb[0].mxu1 }
 0x42d   : > { %v3392_v35 = vpop.f32.mrb[1].mxu1  ;;  %1819 = vrot.lane.b32.xlu1 %v1671_v19, %s3540_s20 }
 0x42e   : > { %v1674_v36 = vpop.f32.mrb[2].mxu1 }
 0x42f   : > { %v3393_v38 = vpop.f32.mrb[3].mxu1 }
 0x435   : > { %v1717_v27 = vpop.f32.mrb[4].mxu1 }
 0x436   : > { %1821 = vrot.lane.b32.xlu0 %v1717_v27, %s3540_s20  ;;  %v3398_v41 = vpop.f32.mrb[5].mxu1 }
 0x437   : > { %v1720_v42 = vpop.f32.mrb[6].mxu1 }
 0x438   : > { %v3399_v43 = vpop.f32.mrb[7].mxu1 }
 0x43a   : > { %1833 = vrot.lane.b32.xlu0 %v1717_v27, %s3539_s19 }
 0x43c   : > { %v3960_v44 = vpop.f32.mrb[4].mxu0 }
 0x43d   : > { %1823 = vrot.lane.b32.xlu1 %v3960_v44, %s3540_s20  ;;  %v3404_v45 = vpop.f32.mrb[5].mxu0  ;;  %v1809_v46 = vpop.f32.mrb[8].mxu1 }
 0x43e   : > { %1845 = vrot.lane.b32.xlu0 %v1717_v27, %s3541_s21  ;;  %v1766_v39 = vpop.f32.mrb[6].mxu0  ;;  %v3410_v47 = vpop.f32.mrb[9].mxu1 }
 0x43f   : > { %v3405_v48 = vpop.f32.mrb[7].mxu0  ;;  %v1812_v49 = vpop.f32.mrb[10].mxu1 }
 0x440   : > { %v3411_v28 = vpop.f32.mrb[11].mxu1 }
 0x441   : > { %1831 = vrot.lane.b32.xlu1 %v1671_v19, %s3539_s19 }
 0x442   : > { %1825 = vrot.lane.b32.xlu0 %v1809_v46, %s3540_s20 }
 0x445   : > { %1835 = vrot.lane.b32.xlu1 %v3960_v44, %s3539_s19 }
 0x446   : > { %1837 = vrot.lane.b32.xlu0 %v1809_v46, %s3539_s19 }
 0x449   : > { %1843 = vrot.lane.b32.xlu1 %v1671_v19, %s3541_s21 }
 0x44a   : > { %1849 = vrot.lane.b32.xlu0 %v1809_v46, %s3541_s21 }
 0x44d   : > { %1847 = vrot.lane.b32.xlu1 %v3960_v44, %s3541_s21 }
 0x49f   : > { %v1820_v29 = vpop.permute.xlu1 %1819 }
 0x4a8   : > { %v1822_v50 = vpop.permute.xlu0 %1821 }
 0x4ac   : > { %v1834_v40 = vpop.permute.xlu0 %1833 }
 0x4ad   : > { %v1923_v55 = vcombine.low %v1717_v27, %v1834_v40  ;;  %v1924_v58 = vcombine.high %v1717_v27, %v1834_v40 }
 0x4af   : > { %v3974_v51 = vpop.permute.xlu1 %1823  ;;  %v1931_v59 = vrot.slane %v1923_v55, %v3703_v4  ;;  %v1938_v62 = vrot.slane %v1924_v58, %v3703_v4 }
 0x4b0   : > { %v1846_v52 = vpop.permute.xlu0 %1845 }
 0x4b1   : > { %v1939_v53 = vcombine.low %v1822_v50, %v1846_v52  ;;  %v1940_v12 = vcombine.high %v1822_v50, %v1846_v52 }
 0x4b3   : > { %v1832_v54 = vpop.permute.xlu1 %1831  ;;  %v1947_v56 = vrot.slane %v1939_v53, %v3703_v4  ;;  %v1954_v60 = vrot.slane %v1940_v12, %v3703_v4 }
 0x4b4   : > { %v1826_v13 = vpop.permute.xlu0 %1825  ;;  %v1855_v6 = vcombine.low %v1671_v19, %v1832_v54  ;;  %v1856_v8 = vcombine.high %v1671_v19, %v1832_v54 }
 0x4b5   : > { %v1955_v2 = vcombine.low %v1931_v59, %v1947_v56  ;;  %v1956_v9 = vcombine.high %v1931_v59, %v1947_v56  ;;  %v1971_v7 = vcombine.low %v1938_v62, %v1954_v60  ;;  %v1972_v23 = vcombine.high %v1938_v62, %v1954_v60 }
 0x4b6   : > { %v1863_v20 = vrot.slane %v1855_v6, %v3703_v4  ;;  %v1870_v22 = vrot.slane %v1856_v8, %v3703_v4 }
 0x4b7   : > { %v1836_v57 = vpop.permute.xlu1 %1835  ;;  %v1963_v26 = vrot.slane %v1955_v2, %v3708_v11  ;;  %v1970_v14 = vrot.slane %v1956_v9, %v3708_v11  ;;  %v1979_v21 = vrot.slane %v1971_v7, %v3708_v11  ;;  %v1986_v63 = vrot.slane %v1972_v23, %v3708_v11 }
 0x4b8   : > { %v1838_v61 = vpop.permute.xlu0 %1837  ;;  %v1991_v27 = vcombine.low %v3960_v44, %v1836_v57  ;;  %v1992_v41 = vcombine.high %v3960_v44, %v1836_v57 }
 0x4b9   : > { %v2059_v10 = vcombine.low %v1809_v46, %v1838_v61  ;;  %v2060_v15 = vcombine.high %v1809_v46, %v1838_v61 }
 0x4ba   : > { %v2006_v58 = vrot.slane %v1992_v41, %v3703_v4 }
 0x4bb   : > { %v1844_v16 = vpop.permute.xlu1 %1843  ;;  %v2067_v5 = vrot.slane %v2059_v10, %v3703_v4  ;;  %v2074_v31 = vrot.slane %v2060_v15, %v3703_v4 }
 0x4bc   : > { %v1871_v3 = vcombine.low %v1820_v29, %v1844_v16  ;;  %v1872_v17 = vcombine.high %v1820_v29, %v1844_v16  ;;  %v1850_v18 = vpop.permute.xlu0 %1849 }
 0x4bd   : > { %v2075_v0 = vcombine.low %v1826_v13, %v1850_v18  ;;  %v2076_v1 = vcombine.high %v1826_v13, %v1850_v18  ;;  %v1999_v13 = vrot.slane %v1991_v27, %v3703_v4 }
 0x4be   : > { %v1879_v30 = vrot.slane %v1871_v3, %v3703_v4  ;;  %v1886_v34 = vrot.slane %v1872_v17, %v3703_v4 }
 0x4bf   : > { %v2083_v32 = vrot.slane %v2075_v0, %v3703_v4  ;;  %v2090_v33 = vrot.slane %v2076_v1, %v3703_v4  ;;  %v1848_v38 = vpop.permute.xlu1 %1847 }
 0x4c0   : > { %v1887_v42 = vcombine.low %v1863_v20, %v1879_v30  ;;  %v1888_v43 = vcombine.high %v1863_v20, %v1879_v30  ;;  %v1903_v48 = vcombine.low %v1870_v22, %v1886_v34  ;;  %v1904_v49 = vcombine.high %v1870_v22, %v1886_v34 }
 0x4c1   : > { %v2091_v37 = vcombine.low %v2067_v5, %v2083_v32  ;;  %v2092_v19 = vcombine.high %v2067_v5, %v2083_v32  ;;  %v2107_v35 = vcombine.low %v2074_v31, %v2090_v33  ;;  %v2108_v36 = vcombine.high %v2074_v31, %v2090_v33 }
 0x4c2   : > { %v2007_v28 = vcombine.low %v3974_v51, %v1848_v38  ;;  %v2008_v50 = vcombine.high %v3974_v51, %v1848_v38  ;;  %v1895_v59 = vrot.slane %v1887_v42, %v3708_v11  ;;  %v1902_v51 = vrot.slane %v1888_v43, %v3708_v11 }
 0x4c3   : > { %v2099_v45 = vrot.slane %v2091_v37, %v3708_v11  ;;  %v2106_v46 = vrot.slane %v2092_v19, %v3708_v11  ;;  %v2115_v39 = vrot.slane %v2107_v35, %v3708_v11  ;;  %v2122_v47 = vrot.slane %v2108_v36, %v3708_v11 }
 0x4c4   : > { %v2015_v56 = vrot.slane %v2007_v28, %v3703_v4  ;;  %v2022_v57 = vrot.slane %v2008_v50, %v3703_v4  ;;  %v1911_v60 = vrot.slane %v1903_v48, %v3708_v11  ;;  %v1918_v61 = vrot.slane %v1904_v49, %v3708_v11 }
 0x4c5   : > { %v2135_v29 = vcombine.low %v1963_v26, %v2099_v45  ;;  %v3330_v40 = vcombine.high %v1963_v26, %v2099_v45  ;;  %v2203_v52 = vcombine.low %v1970_v14, %v2106_v46  ;;  %v3332_v44 = vcombine.high %v1970_v14, %v2106_v46 }
 0x4c6   : > { %v2271_v53 = vcombine.low %v1979_v21, %v2115_v39  ;;  %v3334_v54 = vcombine.high %v1979_v21, %v2115_v39  ;;  %v2339_v55 = vcombine.low %v1986_v63, %v2122_v47  ;;  %v3336_v12 = vcombine.high %v1986_v63, %v2122_v47 }
 0x4c7   : > { %v2023_v62 = vcombine.low %v1999_v13, %v2015_v56  ;;  %v2024_v2 = vcombine.high %v1999_v13, %v2015_v56  ;;  %v2039_v6 = vcombine.low %v2006_v58, %v2022_v57  ;;  %v2040_v8 = vcombine.high %v2006_v58, %v2022_v57 }
 0x4c8   : > { %v2142_v9 = vrot.slane %v2135_v29, %v3703_v4  ;;  %v2176_v10 = vrot.slane %v3330_v40, %v3703_v4  ;;  %v2210_v15 = vrot.slane %v2203_v52, %v3703_v4  ;;  %v2244_v16 = vrot.slane %v3332_v44, %v3703_v4 }
 0x4c9   : > { %v2031_v7 = vrot.slane %v2023_v62, %v3708_v11  ;;  %v2038_v23 = vrot.slane %v2024_v2, %v3708_v11  ;;  %v2047_v3 = vrot.slane %v2039_v6, %v3708_v11  ;;  %v2054_v17 = vrot.slane %v2040_v8, %v3708_v11 }
 0x4ca   : > { %v4017_v18 = vrot.slane %v2271_v53, %v3703_v4  ;;  %v4020_v0 = vrot.slane %v3334_v54, %v3703_v4  ;;  %v2346_v1 = vrot.slane %v2339_v55, %v3703_v4  ;;  %v4024_v26 = vrot.slane %v3336_v12, %v3703_v4 }
 0x4cb   : > { %v2127_v20 = vcombine.low %v1895_v59, %v2031_v7  ;;  %v3329_v22 = vcombine.high %v1895_v59, %v2031_v7  ;;  %v2195_v30 = vcombine.low %v1902_v51, %v2038_v23  ;;  %v3331_v5 = vcombine.high %v1902_v51, %v2038_v23 }
 0x4cc   : > { %v2263_v31 = vcombine.low %v1911_v60, %v2047_v3  ;;  %v3333_v32 = vcombine.high %v1911_v60, %v2047_v3  ;;  %v2331_v33 = vcombine.low %v1918_v61, %v2054_v17  ;;  %v3335_v14 = vcombine.high %v1918_v61, %v2054_v17 }
 0x4cd   : > { %v2134_v21 = vrot.slane %v2127_v20, %v3703_v4  ;;  %v2168_v63 = vrot.slane %v3329_v22, %v3703_v4  ;;  %v2202_v34 = vrot.slane %v2195_v30, %v3703_v4  ;;  %v2236_v37 = vrot.slane %v3331_v5, %v3703_v4 }
 0x4ce   : > { %v4031_v19 = vrot.slane %v2263_v31, %v3703_v4  ;;  %v4034_v35 = vrot.slane %v3333_v32, %v3703_v4  ;;  %v2338_v36 = vrot.slane %v2331_v33, %v3703_v4  ;;  %v2372_v38 = vrot.slane %v3335_v14, %v3703_v4 }
 0x4cf   : > { %v2143_v27 = vcombine.low %v2134_v21, %v2142_v9  ;;  %v2144_v41 = vcombine.high %v2134_v21, %v2142_v9  ;;  %v2177_v42 = vcombine.low %v2168_v63, %v2176_v10  ;;  %v2178_v43 = vcombine.high %v2168_v63, %v2176_v10 }
 0x4d0   : > { %v2211_v45 = vcombine.low %v2202_v34, %v2210_v15  ;;  %v2212_v46 = vcombine.high %v2202_v34, %v2210_v15  ;;  %v2245_v39 = vcombine.low %v2236_v37, %v2244_v16  ;;  %v2246_v47 = vcombine.high %v2236_v37, %v2244_v16 }
 0x4d1   : > { %v2279_v48 = vcombine.low %v4031_v19, %v4017_v18  ;;  %v2280_v49 = vcombine.high %v4031_v19, %v4017_v18  ;;  %v2313_v28 = vcombine.low %v4034_v35, %v4020_v0  ;;  %v2314_v50 = vcombine.high %v4034_v35, %v4020_v0 }
 0x4d2   : > { %v2347_v29 = vcombine.low %v2338_v36, %v2346_v1  ;;  %v2348_v40 = vcombine.high %v2338_v36, %v2346_v1  ;;  %v2381_v52 = vcombine.low %v2372_v38, %v4024_v26  ;;  %v2382_v44 = vcombine.high %v2372_v38, %v4024_v26 }
 0x4d3   : > { %v2219_v53 = vrot.slane %v2211_v45, %v3708_v11  ;;  %v2226_v54 = vrot.slane %v2212_v46, %v3708_v11  ;;  %v2253_v55 = vrot.slane %v2245_v39, %v3708_v11  ;;  %v2260_v12 = vrot.slane %v2246_v47, %v3708_v11 }
 0x4d4   : > { %v2151_v13 = vrot.slane %v2143_v27, %v3708_v11  ;;  %v2158_v58 = vrot.slane %v2144_v41, %v3708_v11  ;;  %v2185_v56 = vrot.slane %v2177_v42, %v3708_v11  ;;  %v2192_v57 = vrot.slane %v2178_v43, %v3708_v11 }
 0x4d5   : > { %v2467_v59 = vcombine.low %v2219_v53, %v2226_v54  ;;  %v3339_v51 = vcombine.high %v2219_v53, %v2226_v54  ;;  %v2483_v60 = vcombine.low %v2253_v55, %v2260_v12  ;;  %v3340_v61 = vcombine.high %v2253_v55, %v2260_v12 }
 0x4d6   : > { %v2399_v62 = vcombine.low %v2151_v13, %v2158_v58  ;;  %v3337_v2 = vcombine.high %v2151_v13, %v2158_v58  ;;  %v2415_v6 = vcombine.low %v2185_v56, %v2192_v57  ;;  %v3338_v8 = vcombine.high %v2185_v56, %v2192_v57 }
 0x4d7   : > { %v2474_v9 = vrot.slane %v2467_v59, %v3703_v4  ;;  %v2482_v10 = vrot.slane %v3339_v51, %v3703_v4  ;;  %v2490_v15 = vrot.slane %v2483_v60, %v3703_v4  ;;  %v2498_v16 = vrot.slane %v3340_v61, %v3703_v4 }
 0x4d8   : > { %v2406_v7 = vrot.slane %v2399_v62, %v3703_v4  ;;  %v2414_v23 = vrot.slane %v3337_v2, %v3703_v4  ;;  %v2422_v3 = vrot.slane %v2415_v6, %v3703_v4  ;;  %v2430_v17 = vrot.slane %v3338_v8, %v3703_v4 }
 0x4d9   : > { %v2499_v18 = vcombine.low %v2474_v9, %v2482_v10  ;;  %v2515_v0 = vcombine.low %v2490_v15, %v2498_v16  ;;  %v2355_v1 = vrot.slane %v2347_v29, %v3708_v11  ;;  %v2362_v26 = vrot.slane %v2348_v40, %v3708_v11 }
 0x4da   : > { %v2431_v20 = vcombine.low %v2406_v7, %v2414_v23  ;;  %v2447_v22 = vcombine.low %v2422_v3, %v2430_v17  ;;  %v2389_v30 = vrot.slane %v2381_v52, %v3708_v11  ;;  %v2396_v5 = vrot.slane %v2382_v44, %v3708_v11 }
 0x4db   : > { %v4069_v31 = vrot.slane %v2499_v18, %v3708_v11  ;;  %v4072_v32 = vrot.slane %v2515_v0, %v3708_v11  ;;  %v2603_v33 = vcombine.low %v2355_v1, %v2362_v26  ;;  %v3343_v14 = vcombine.high %v2355_v1, %v2362_v26 }
 0x4dc   : > { %v4075_v21 = vrot.slane %v2431_v20, %v3708_v11  ;;  %v4078_v63 = vrot.slane %v2447_v22, %v3708_v11  ;;  %v2619_v34 = vcombine.low %v2389_v30, %v2396_v5  ;;  %v3344_v37 = vcombine.high %v2389_v30, %v2396_v5 }
 0x4dd   : > { %v2532_v19 = vcombine.high %v4069_v31, %v4072_v32  ;;  %v2610_v35 = vrot.slane %v2603_v33, %v3703_v4  ;;  %v2618_v36 = vrot.slane %v3343_v14, %v3703_v4  ;;  %v2287_v38 = vrot.slane %v2279_v48, %v3708_v11 }
 0x4de   : > { %v2464_v27 = vcombine.high %v4075_v21, %v4078_v63  ;;  %v2626_v41 = vrot.slane %v2619_v34, %v3703_v4  ;;  %v2634_v42 = vrot.slane %v3344_v37, %v3703_v4  ;;  %v2294_v43 = vrot.slane %v2280_v49, %v3708_v11 }
 0x4df   : > { %2677 = vrot.lane.b32.xlu0 %v2532_v19, %s3545_s23  ;;  %v2635_v45 = vcombine.low %v2610_v35, %v2618_v36  ;;  %v2321_v46 = vrot.slane %v2313_v28, %v3708_v11  ;;  %v2328_v39 = vrot.slane %v2314_v50, %v3708_v11  ;;  %v2500_v47 = vcombine.high %v2474_v9, %v2482_v10 }
 0x4e0   : > { %2675 = vrot.lane.b32.xlu1 %v2464_v27, %s3545_s23  ;;  %v2651_v48 = vcombine.low %v2626_v41, %v2634_v42  ;;  %v2535_v29 = vcombine.low %v2287_v38, %v2294_v43  ;;  %v3341_v40 = vcombine.high %v2287_v38, %v2294_v43  ;;  %v2516_v52 = vcombine.high %v2490_v15, %v2498_v16 }
 0x4e1   : > { %v4095_v44 = vrot.slane %v2635_v45, %v3708_v11  ;;  %v2551_v53 = vcombine.low %v2321_v46, %v2328_v39  ;;  %v3342_v54 = vcombine.high %v2321_v46, %v2328_v39  ;;  %v2514_v49 = vrot.slane %v2500_v47, %v3708_v11  ;;  %v3505_v46 = vld [vmem:[%s3620_s12 + $0x8] sm:$0xf] }
 0x4e2   : > { %v2659_v55 = vrot.slane %v2651_v48, %v3708_v11  ;;  %v2542_v28 = vrot.slane %v2535_v29, %v3703_v4  ;;  %v2550_v50 = vrot.slane %v3341_v40, %v3703_v4  ;;  %v2530_v12 = vrot.slane %v2516_v52, %v3708_v11  ;;  %v3506_v48 = vld [vmem:[%s3620_s12 + $0xc] sm:$0xf] }
 0x4e3   : > { %v2558_v13 = vrot.slane %v2551_v53, %v3703_v4  ;;  %v2566_v58 = vrot.slane %v3342_v54, %v3703_v4  ;;  %v2432_v56 = vcombine.high %v2406_v7, %v2414_v23  ;;  %v2448_v57 = vcombine.high %v2422_v3, %v2430_v17 }
 0x4e4   : > { %v2668_v59 = vcombine.high %v4095_v44, %v2659_v55  ;;  %v2567_v51 = vcombine.low %v2542_v28, %v2550_v50  ;;  %v2533_v60 = vcombine.low %v2514_v49, %v2530_v12  ;;  %v2636_v61 = vcombine.high %v2610_v35, %v2618_v36 }
 0x4e5   : > { %v2583_v62 = vcombine.low %v2558_v13, %v2566_v58  ;;  %v2446_v2 = vrot.slane %v2432_v56, %v3708_v11  ;;  %v2462_v6 = vrot.slane %v2448_v57, %v3708_v11  ;;  %v2652_v8 = vcombine.high %v2626_v41, %v2634_v42 }
 0x4e6   : > { %2681 = vrot.lane.b32.xlu0 %v2668_v59, %s3545_s23  ;;  %v2575_v9 = vrot.slane %v2567_v51, %v3708_v11  ;;  %v2650_v10 = vrot.slane %v2636_v61, %v3708_v11  ;;  %v2568_v4 = vcombine.high %v2542_v28, %v2550_v50  ;;  %v2584_v15 = vcombine.high %v2558_v13, %v2566_v58  ;;  %v3507_v13 = vld [vmem:[%s3620_s12] sm:$0xf]  ;;  %v3508_v59 = vld [vmem:[%s3620_s12 + $0x4] sm:$0xf] }
 0x4e7   : > { %v2591_v16 = vrot.slane %v2583_v62, %v3708_v11  ;;  %v2465_v7 = vcombine.low %v2446_v2, %v2462_v6  ;;  %v2666_v23 = vrot.slane %v2652_v8, %v3708_v11  ;;  %v2534_v3 = vcombine.high %v2514_v49, %v2530_v12 }
 0x4e8   : > { %v2582_v17 = vrot.slane %v2568_v4, %v3708_v11  ;;  %v2598_v18 = vrot.slane %v2584_v15, %v3708_v11  ;;  %v2466_v0 = vcombine.high %v2446_v2, %v2462_v6  ;;  %v2531_v1 = vcombine.low %v4069_v31, %v4072_v32  ;;  %v3509_v2 = vld [vmem:[%s3620_s12 + $0x10] sm:$0xf]  ;;  %v3511_v4 = vld [vmem:[%s3620_s12 + $0x1c] sm:$0xf] }
 0x4e9   : > { %v2600_v26 = vcombine.high %v2575_v9, %v2591_v16  ;;  %v2669_v20 = vcombine.low %v2650_v10, %v2666_v23  ;;  %v2670_v22 = vcombine.high %v2650_v10, %v2666_v23  ;;  %v2463_v30 = vcombine.low %v4075_v21, %v4078_v63 }
 0x4ea   : > { %2693 = vrot.lane.b32.xlu0 %v2533_v60, %s3544_s22  ;;  %v2601_v5 = vcombine.low %v2582_v17, %v2598_v18  ;;  %v2602_v33 = vcombine.high %v2582_v17, %v2598_v18  ;;  %v2667_v14 = vcombine.low %v4095_v44, %v2659_v55  ;;  %v2599_v34 = vcombine.low %v2575_v9, %v2591_v16  ;;  %v3510_v9 = vld [vmem:[%s3620_s12 + $0x14] sm:$0xf]  ;;  %v3512_v16 = vld [vmem:[%s3620_s12 + $0x18] sm:$0xf] }
 0x4eb   : > { %2679 = vrot.lane.b32.xlu1 %v2600_v26, %s3545_s23 }
 0x4ee   : > { %2697 = vrot.lane.b32.xlu0 %v2669_v20, %s3544_s22 }
 0x4ef   : > { %2691 = vrot.lane.b32.xlu1 %v2465_v7, %s3544_s22 }
 0x4f2   : > { %2709 = vrot.lane.b32.xlu0 %v2534_v3, %s3546_s24 }
 0x4f3   : > { %2695 = vrot.lane.b32.xlu1 %v2601_v5, %s3544_s22 }
 0x4f6   : > { %2713 = vrot.lane.b32.xlu0 %v2670_v22, %s3546_s24 }
 0x4f7   : > { %2707 = vrot.lane.b32.xlu1 %v2466_v0, %s3546_s24 }
 0x4fb   : > { %2711 = vrot.lane.b32.xlu1 %v2602_v33, %s3546_s24 }
 0x551   : > { %v2678_v11 = vpop.permute.xlu0 %2677 }
 0x552   : > { %v2676_v31 = vpop.permute.xlu1 %2675  ;;  %v2720_v35 = vsel %vm1603_vm2, %v2531_v1, %v2678_v11 }
 0x553   : > { %v2719_v43 = vsel %vm1603_vm2, %v2463_v30, %v2676_v31 }
 0x558   : > { %v2682_v32 = vpop.permute.xlu0 %2681 }
 0x559   : > { %v2722_v45 = vsel %vm1603_vm2, %v2667_v14, %v2682_v32 }
 0x55c   : > { %v2694_v21 = vpop.permute.xlu0 %2693 }
 0x55d   : > { %v2680_v63 = vpop.permute.xlu1 %2679  ;;  %v2724_v36 = vsel %vm1608_vm3, %v2720_v35, %v2694_v21 }
 0x55e   : > { %v2721_v28 = vsel %vm1603_vm2, %v2599_v34, %v2680_v63 }
 0x560   : > { %v2698_v37 = vpop.permute.xlu0 %2697 }
 0x561   : > { %v2692_v19 = vpop.permute.xlu1 %2691  ;;  %v2726_v52 = vsel %vm1608_vm3, %v2722_v45, %v2698_v37 }
 0x562   : > { %v2723_v40 = vsel %vm1608_vm3, %v2719_v43, %v2692_v19 }
 0x564   : > { %v2710_v38 = vpop.permute.xlu0 %2709 }
 0x565   : > { %v2696_v27 = vpop.permute.xlu1 %2695  ;;  %v2728_v41 = vsel %vm1613_vm4, %v2724_v36, %v2710_v38 }
 0x566   : > { %v2736_v42 = vcombine.high %v2728_v41, %v2728_v41  ;;  %v2745_v39 = vadd.f32 %v3505_v46, %v2728_v41  ;;  %v2725_v12 = vsel %vm1608_vm3, %v2721_v28, %v2696_v27 }
 0x568   : > { %v2714_v47 = vpop.permute.xlu0 %2713  ;;  %v2746_v29 = vadd.f32 %v3506_v48, %v2736_v42 }
 0x569   : > { %v2708_v44 = vpop.permute.xlu1 %2707  ;;  %v2730_v54 = vsel %vm1613_vm4, %v2726_v52, %v2714_v47 }
 0x56a   : > { %v2727_v53 = vsel %vm1613_vm4, %v2723_v40, %v2708_v44  ;;  %v4139_v49 = vcombine.low %v2745_v39, %v2746_v29  ;;  %v2738_v56 = vcombine.high %v2730_v54, %v2730_v54  ;;  %v2749_v7 = vadd.f32 %v3512_v16, %v2730_v54 }
 0x56b   : > { %v2735_v55 = vcombine.high %v2727_v53, %v2727_v53  ;;  %v2743_v58 = vadd.f32 %v3507_v13, %v2727_v53 }
 0x56c   : > { %v2770_v50 = vsel %vm385_vm0, %v4139_v49, 0.0  ;;  %v2750_v15 = vadd.f32 %v3511_v4, %v2738_v56  ;;  %v3486_v56 = vld [vmem:[%s4246_s4 + $0x8] sm:$0xff]  }
 0x56d   : > { %v2712_v57 = vpop.permute.xlu1 %2711  ;;  %2771 = vadd.xlane.f32.xlu0 %v2770_v50  ;;  %v2744_v51 = vadd.f32 %v3508_v59, %v2735_v55 }
 0x56e   : > { %v2729_v60 = vsel %vm1613_vm4, %v2725_v12, %v2712_v57  ;;  %v4160_v17 = vcombine.low %v2749_v7, %v2750_v15 }
 0x56f   : > { %v2737_v61 = vcombine.high %v2729_v60, %v2729_v60  ;;  %v4148_v62 = vcombine.low %v2743_v58, %v2744_v51  ;;  %v2747_v6 = vadd.f32 %v3509_v2, %v2729_v60 }
 0x570   : > { %v2776_v18 = vsel %vm385_vm0, %v4160_v17, 0.0 }
 0x571   : > { %v2767_v8 = vsel %vm385_vm0, %v4148_v62, 0.0  ;;  %v2748_v10 = vadd.f32 %v3510_v9, %v2737_v61 }
 0x572   : > { %2768 = vadd.xlane.f32.xlu1 %v2767_v8 }
 0x573   : > { %v4156_v23 = vcombine.low %v2747_v6, %v2748_v10 }
 0x575   : > { %v2773_v3 = vsel %vm385_vm0, %v4156_v23, 0.0 }
 0x576   : > { %2774 = vadd.xlane.f32.xlu0 %v2773_v3 }
 0x57a   : > { %2777 = vadd.xlane.f32.xlu0 %v2776_v18 }
 0x5fa   : > { %v2772_v0 = vpop.xlane.xlu0 %2771 }
 0x5fb   : > { %v2780_v1 = vmul.f32 0.03125, %v2772_v0 }
 0x5fd   : > { %v2807_v26 = vrot.slane %v2780_v1, %v3637_v24  ;;  %v2814_v20 = vrot.slane %v2780_v1, %v3640_v25 }
 0x5ff   : > { %v4166_v22 = vsub.f32 %v2745_v39, %v2807_v26  ;;  %v4168_v30 = vsub.f32 %v2746_v29, %v2814_v20  ;;  %v2769_v5 = vpop.xlane.xlu1 %2768 }
 0x600   : > { %v2779_v33 = vmul.f32 0.03125, %v2769_v5 }
 0x601   : > { %v2861_v14 = vmul.f32 %v4166_v22, %v4166_v22  ;;  %v2862_v34 = vmul.f32 %v4168_v30, %v4168_v30 }
 0x602   : > { %v2793_v11 = vrot.slane %v2779_v33, %v3637_v24  ;;  %v2800_v31 = vrot.slane %v2779_v33, %v3640_v25 }
 0x603   : > { %v2775_v32 = vpop.xlane.xlu0 %2774  ;;  %v2876_v21 = vcombine.low %v2861_v14, %v2862_v34 }
 0x604   : > { %v2851_v63 = vsub.f32 %v2743_v58, %v2793_v11  ;;  %v2852_v37 = vsub.f32 %v2744_v51, %v2800_v31  ;;  %v2781_v19 = vmul.f32 0.03125, %v2775_v32  ;;  %v3485_v58 = vld [vmem:[%s4246_s4] sm:$0xff]  }
 0x605   : > { %v2886_v35 = vsel %vm385_vm0, %v2876_v21, 0.0  ;;  %3412 = vmatprep.subr.bf16.mxu0 %v3485_v58 }
 0x606   : > { %v2821_v36 = vrot.slane %v2781_v19, %v3637_v24  ;;  %v2828_v38 = vrot.slane %v2781_v19, %v3640_v25  ;;  %2887 = vadd.xlane.f32.xlu0 %v2886_v35  ;;  %v2859_v27 = vmul.f32 %v2851_v63, %v2851_v63  ;;  %v2860_v41 = vmul.f32 %v2852_v37, %v2852_v37 }
 0x607   : > { %v2778_v42 = vpop.xlane.xlu0 %2777  ;;  %3413 = vmatpush3.bf16.msra.mxu0 %v3485_v58 }
 0x608   : > { %v2855_v43 = vsub.f32 %v2747_v6, %v2821_v36  ;;  %v2856_v45 = vsub.f32 %v2748_v10, %v2828_v38  ;;  %v2782_v46 = vmul.f32 0.03125, %v2778_v42  ;;  %v2875_v39 = vcombine.low %v2859_v27, %v2860_v41  ;;  %3414 = vmatprep.subr.bf16.mxu0 %v3486_v56  ;;  %v3487_v42 = vld [vmem:[%s4248_s6] sm:$0xff]  }
 0x609   : > { %3420 = vmatprep.subr.bf16.mxu1 %v3487_v42 }
 0x60a   : > { %v2835_v47 = vrot.slane %v2782_v46, %v3637_v24  ;;  %v2842_v48 = vrot.slane %v2782_v46, %v3640_v25  ;;  %v2883_v29 = vsel %vm385_vm0, %v2875_v39, 0.0  ;;  %v2863_v40 = vmul.f32 %v2855_v43, %v2855_v43  ;;  %3421 = vmatpush3.bf16.msra.mxu1 %v3487_v42 }
 0x60b   : > { %2884 = vadd.xlane.f32.xlu1 %v2883_v29  ;;  %v2864_v52 = vmul.f32 %v2856_v45, %v2856_v45  ;;  %3415 = vmatpush3.bf16.msra.mxu0 %v3486_v56 }
 0x60c   : > { %v2857_v44 = vsub.f32 %v2749_v7, %v2835_v47  ;;  %v2858_v53 = vsub.f32 %v2750_v15, %v2842_v48 }
 0x60d   : > { %v2877_v54 = vcombine.low %v2863_v40, %v2864_v52 }
 0x60e   : > { %v2865_v55 = vmul.f32 %v2857_v44, %v2857_v44  ;;  %v2866_v28 = vmul.f32 %v2858_v53, %v2858_v53 }
 0x60f   : > { %v2889_v50 = vsel %vm385_vm0, %v2877_v54, 0.0 }
 0x610   : > { %2890 = vadd.xlane.f32.xlu1 %v2889_v50  ;;  %v2878_v12 = vcombine.low %v2865_v55, %v2866_v28  ;;  %v3350_v50 = vld [vmem:[%s4249_s7] ss:$0 sm:$0xff] }
 0x612   : > { %v2892_v13 = vsel %vm385_vm0, %v2878_v12, 0.0 }
 0x613   : > { %2893 = vadd.xlane.f32.xlu0 %v2892_v13 }
 0x693   : > { %v2888_v57 = vpop.xlane.xlu0 %2887 }
 0x694   : > { %v2896_v59 = vmul.f32 0.03125, %v2888_v57 }
 0x696   : > { %v2900_v51 = vadd.f32 1e-05, %v2896_v59 }
 0x698   : > { %3497 = vrsqrt.f32 %v2900_v51  ;;  %v2885_v60 = vpop.xlane.xlu1 %2884 }
 0x699   : > { %v2895_v61 = vmul.f32 0.03125, %v2885_v60 }
 0x69b   : > { %v2899_v2 = vadd.f32 1e-05, %v2895_v61 }
 0x69d   : > { %3499 = vrsqrt.f32 %v2899_v2  ;;  %v2891_v6 = vpop.xlane.xlu1 %2890 }
 0x69e   : > { %v2897_v8 = vmul.f32 0.03125, %v2891_v6 }
 0x6a0   : > { %v2901_v9 = vadd.f32 1e-05, %v2897_v8  ;;  %v2894_v10 = vpop.xlane.xlu0 %2893 }
 0x6a1   : > { %v2898_v4 = vmul.f32 0.03125, %v2894_v10 }
 0x6a2   : > { %v3498_v15 = vpop.eup %3497  ;;  %3501 = vrsqrt.f32 %v2901_v9 }
 0x6a3   : > { %v2931_v16 = vrot.slane %v3498_v15, %v3637_v24  ;;  %v2938_v7 = vrot.slane %v3498_v15, %v3640_v25  ;;  %v2902_v3 = vadd.f32 1e-05, %v2898_v4 }
 0x6a5   : > { %3503 = vrsqrt.f32 %v2902_v3  ;;  %v2977_v18 = vmul.f32 %v2931_v16, %v4166_v22  ;;  %v2978_v0 = vmul.f32 %v2938_v7, %v4168_v30 }
 0x6a7   : > { %v3500_v1 = vpop.eup %3499  ;;  %v2992_v14 = vcombine.low %v2977_v18, %v2978_v0 }
 0x6a8   : > { %v2917_v26 = vrot.slane %v3500_v1, %v3637_v24  ;;  %v2924_v20 = vrot.slane %v3500_v1, %v3640_v25 }
 0x6aa   : > { %v2975_v5 = vmul.f32 %v2917_v26, %v2851_v63  ;;  %v2976_v33 = vmul.f32 %v2924_v20, %v2852_v37 }
 0x6ac   : > { %v3502_v34 = vpop.eup %3501  ;;  %v2991_v11 = vcombine.low %v2975_v5, %v2976_v33 }
 0x6ad   : > { %v2945_v31 = vrot.slane %v3502_v34, %v3637_v24  ;;  %v2952_v32 = vrot.slane %v3502_v34, %v3640_v25 }
 0x6ae   : > { %v2999_v21 = vpack.c.bf16 %v2992_v14, %v2991_v11 }
 0x6af   : > { %v3504_v19 = vpop.eup %3503  ;;  %v2979_v35 = vmul.f32 %v2945_v31, %v2855_v43  ;;  %v2980_v22 = vmul.f32 %v2952_v32, %v2856_v45 }
 0x6b0   : > { %v2959_v30 = vrot.slane %v3504_v19, %v3637_v24  ;;  %v2966_v36 = vrot.slane %v3504_v19, %v3640_v25  ;;  %3416 = vmatprep.mubr.msk.bf16.mxu0 %vm385_vm0, %v2999_v21  ;;  %v3488_v24 = vld [vmem:[%s4248_s6 + $0x8] sm:$0xff]   ;;  %v3345_v25 = vld [vmem:[%s4247_s5] ss:$0 sm:$0xff] }
 0x6b1   : > { %v2993_v37 = vcombine.low %v2979_v35, %v2980_v22  ;;  %3422 = vmatprep.subr.bf16.mxu1 %v3488_v24 }
 0x6b2   : > { %v2981_v38 = vmul.f32 %v2959_v30, %v2857_v44  ;;  %v2982_v63 = vmul.f32 %v2966_v36, %v2858_v53  ;;  %3423 = vmatpush3.bf16.msra.mxu1 %v3488_v24 }
 0x6b4   : > { %v2994_v27 = vcombine.low %v2981_v38, %v2982_v63 }
 0x6b6   : > { %v3000_v41 = vpack.c.bf16 %v2994_v27, %v2993_v37 }
 0x6b8   : > { %3417 = vmatmul.mubr.msk.bf16.vlgmr.msra.gmra.mrb[8].mxu0 %vm385_vm0, %v3000_v41 }
 0x78b   : > { %v3418_v43 = vpop.f32.mrb[8].mxu0 }
 0x78c   : > { %v3073_v45 = vadd.f32 %v3418_v43, %v3345_v25  ;;  %v3064_v46 = vpop.f32.mrb[9].mxu0 }
 0x78d   : > { %v3065_v39 = vadd.f32 %v3345_v25, %v3064_v46  ;;  %v3419_v47 = vpop.f32.mrb[10].mxu0 }
 0x78e   : > { %v3076_v48 = vadd.f32 %v3419_v47, %v3345_v25  ;;  %v3067_v29 = vpop.f32.mrb[11].mxu0  ;;  %v3081_v52 = vmax.f32 %v3073_v45, 0.0 }
 0x78f   : > { %v3068_v40 = vadd.f32 %v3345_v25, %v3067_v29  ;;  %v3079_v53 = vmax.f32 %v3065_v39, 0.0 }
 0x790   : > { %v3082_v44 = vmax.f32 %v3076_v48, 0.0 }
 0x791   : > { %v3080_v54 = vmax.f32 %v3068_v40, 0.0 }
 0x792   : > { %v3084_v55 = vpack.c.bf16 %v3082_v44, %v3081_v52 }
 0x793   : > { %v3083_v28 = vpack.c.bf16 %v3080_v54, %v3079_v53 }
 0x795   : > { %3424 = vmatprep.mubr.msk.bf16.mxu1 %vm385_vm0, %v3083_v28 }
 0x796   : > { %3425 = vmatmul.mubr.msk.bf16.vlgmr.msra.gmra.mrb[12].mxu1 %vm385_vm0, %v3084_v55 }
 0x869   : > { %v3426_v12 = vpop.f32.mrb[12].mxu1 }
 0x86a   : > { %v3157_v13 = vadd.f32 %v3426_v12, %v3350_v50  ;;  %v3148_v58 = vpop.f32.mrb[13].mxu1 }
 0x86b   : > { %v3149_v56 = vadd.f32 %v3350_v50, %v3148_v58  ;;  %v3427_v57 = vpop.f32.mrb[14].mxu1 }
 0x86c   : > { %v3165_v59 = vadd.f32 %v3157_v13, %v4156_v23  ;;  %v3160_v51 = vadd.f32 %v3427_v57, %v3350_v50  ;;  %v3151_v60 = vpop.f32.mrb[15].mxu1 }
 0x86d   : > { %v3163_v61 = vadd.f32 %v3149_v56, %v4148_v62  ;;  %v3152_v2 = vadd.f32 %v3350_v50, %v3151_v60 }
 0x86e   : > { %v3173_v6 = vcombine.high %v3165_v59, %v3165_v59  ;;  %3184 = vst.msk [vmem:[%s359_s26 + $0x10] sm:$0xf] %vm3179_vm6, %v3165_v59  ;;  %v3166_v8 = vadd.f32 %v3160_v51, %v4160_v17 }
 0x86f   : > { %v3171_v9 = vcombine.high %v3163_v61, %v3163_v61  ;;  %3180 = vst.msk [vmem:[%s359_s26] sm:$0xf] %vm3179_vm6, %v3163_v61  ;;  %v3164_v10 = vadd.f32 %v3152_v2, %v4139_v49 }
 0x870   : > { %3185 = vst.msk [vmem:[%s359_s26 + $0x14] sm:$0xf] %vm3179_vm6, %v3173_v6  ;;  %v3174_v4 = vcombine.high %v3166_v8, %v3166_v8  ;;  %3186 = vst.msk [vmem:[%s359_s26 + $0x18] sm:$0xf] %vm3179_vm6, %v3166_v8 }
 0x871   : > { %3181 = vst.msk [vmem:[%s359_s26 + $0x4] sm:$0xf] %vm3179_vm6, %v3171_v9  ;;  %v3172_v23 = vcombine.high %v3164_v10, %v3164_v10  ;;  %3182 = vst.msk [vmem:[%s359_s26 + $0x8] sm:$0xf] %vm3179_vm6, %v3164_v10 }
 0x872   : > { %3187 = vst.msk [vmem:[%s359_s26 + $0x1c] sm:$0xf] %vm3179_vm6, %v3174_v4 }
 0x873   : > { %3183 = vst.msk [vmem:[%s359_s26 + $0xc] sm:$0xf] %vm3179_vm6, %v3172_v23 }
 0x874 PF: > { %s18_s29 = sadd.s32 1, %s3535_s29   ;;  %s4251_s27 = smov %s3531_s28 }
 0x875   : > { %p15_p5 = scmp.ge.s32.totalorder %s18_s29, 4   ;;  %s4252_s28 = smov %s4254_s30 }
 0x877   :  { %17 = sbr.rel (!%p15_p5) target bundleno = 2 (0x2), region = 85 }

// kernel: msa_update_with_pair.8
= control target key start
LH: loop header
LB: loop body
LE: loop exit
PB: predicated region body
PF: predicated region fallthrough
CT: control target
= control target key end

     0   :  { %s3594_s27 = smov 0   ;;  %s3596_s28 = smov 0   ;;  %s4242_s0 = inlined_call_operand.vmem [shape: f32[2,8,4,32], index: 0, kind: input, shape index: {}, may-alias: {0,8}]   ;;  %s4243_s1 = inlined_call_operand.vmem [shape: f32[2,4,4,8,8], index: 1, kind: input, shape index: {}]   ;;  %s4244_s2 = inlined_call_operand.vmem [shape: bf16[32,32], index: 2, kind: input, shape index: {}]   ;;  %s4245_s3 = inlined_call_operand.vmem [shape: f32[1,32], index: 3, kind: input, shape index: {}]   ;;  %s4246_s4 = inlined_call_operand.vmem [shape: bf16[32,32], index: 4, kind: input, shape index: {}]   ;;  %s4247_s5 = inlined_call_operand.vmem [shape: f32[1,32], index: 5, kind: input, shape index: {}]   ;;  %s4248_s6 = inlined_call_operand.vmem [shape: bf16[32,32], index: 6, kind: input, shape index: {}]   ;;  %s4249_s7 = inlined_call_operand.vmem [shape: f32[1,32], index: 7, kind: input, shape index: {}]   ;;  %s4250_s8 = inlined_call_operand.vmem [shape: f32[2,8,4,32], index: 8, kind: output, shape index: {}, may-alias: {0,8}]  }
   0x1   :  { %s3598_s29 = smov 0  }
   0x2 LB: > { %s30_s30 = sadd.s32 1, %s3531_s28  ;;  %p3293_p0 = scmp.ge.s32.totalorder %s3535_s29, 1  ;;  %s3535_s29 = sphi %s3598_s29, %s18_s29   ;;  %s3531_s28 = sphi %s3596_s28, %s4252_s28   ;;  %s3527_s27 = sphi %s3594_s27, %s4251_s27  }
   0x3   : > { %p32_p1 = scmp.ge.s32.totalorder %s30_s30, 2  ;;  %p292_p2 = scmp.lt.s32.totalorder %s3535_s29, 3 }
   0x5   : > { %s4254_s30 = smov (%p32_p1, %s30_s30), 0  ;;  %p293_p3 = pnand %p3293_p0, %p292_p2 }
   0x6   : > { %p338_p4 = scmp.lt.s32.totalorder (!%p293_p3), %s3527_s27, 1  ;;  %vm385_vm0 = vcmask (!%p293_p3), 261120   ;;  %v3537_v16 = vmov (!%p293_p3), 839922192   ;;  %v410_v18 = vlaneseq (!%p293_p3)  ;;  %v3538_v19 = vmov (!%p293_p3), 1985246804  }
   0x7   : > { %296 = sbr.rel (%p293_p3) target bundleno = 2164 (0x874), region = 52  ;;  %v408_v17 = vunpack.c.l.s4 (!%p293_p3), %v3537_v16  ;;  %v415_v20 = vunpack.c.l.s4 (!%p293_p3), %v3538_v19  ;;  %s3539_s19 = smov (!%p293_p3), 112   ;;  %vm3548_vm1 = vmmov (!%p293_p3), 0   ;;  %vm1603_vm2 = vcmask (!%p293_p3), 64512  }
   0x8   : > { %v3634_v22 = vshrl.u32 (!%p293_p3), %v410_v18, 7  ;;  %s3540_s20 = smov (!%p293_p3), 120   ;;  %s3541_s21 = smov (!%p293_p3), 104   ;;  %vm1608_vm3 = vcmask (!%p293_p3), 130048   ;;  %vm1613_vm4 = vcmask (!%p293_p3), 195584   ;;  %vm1633_vm5 = vcmask (!%p293_p3), 1043456  }
   0x9   : > { %v409_v21 = vunpack.c.0.s8 (!%p293_p3), %v408_v17  ;;  %v416_v23 = vunpack.c.0.s8 (!%p293_p3), %v415_v20  ;;  %s3544_s22 = smov (!%p293_p3), 16   ;;  %s3545_s23 = smov (!%p293_p3), 8   ;;  %vm3179_vm6 = vcmask (!%p293_p3), 257024  }
   0xa   : > { %s3546_s24 = smov (!%p293_p3), 24  }
   0xb   : > { %v3637_v24 = vsub.s32 (!%p293_p3), %v409_v21, %v3634_v22  ;;  %v3640_v25 = vsub.s32 (!%p293_p3), %v416_v23, %v3634_v22 }
   0xe   : > { %s4256_s27 = smov (!%p338_p4, %s3527_s27), 1 }
   0xf   : > { %s3357_s9 = sshll.u32 %s4256_s27, 5  ;;  %s3358_s25 = sshll.u32 %s4256_s27, 7 }
  0x10   : > { %s3620_s12 = scalar_lea.vmem %s4242_s0, %s3357_s9  ;;  %s3923_s11 = scalar_lea.vmem %s4243_s1, %s3358_s25 }
  0x11   : > { %v361_v0 = vld [vmem:[%s3620_s12] sm:$0xf]  ;;  %v362_v1 = vld [vmem:[%s3620_s12 + $0x4] sm:$0xf]  ;;  %v365_v2 = vld [vmem:[%s3620_s12 + $0x10] sm:$0xf]  ;;  %s359_s26 = scalar_lea.vmem %s4250_s8, %s3357_s9 }
  0x12   : > { %v377_v3 = vcombine.low %v361_v0, %v362_v1  ;;  %v366_v4 = vld [vmem:[%s3620_s12 + $0x14] sm:$0xf]  ;;  %v363_v5 = vld [vmem:[%s3620_s12 + $0x8] sm:$0xf]  ;;  %v364_v6 = vld [vmem:[%s3620_s12 + $0xc] sm:$0xf] }
  0x13   : > { %v379_v7 = vcombine.low %v365_v2, %v366_v4  ;;  %v378_v8 = vcombine.low %v363_v5, %v364_v6  ;;  %v367_v9 = vld [vmem:[%s3620_s12 + $0x18] sm:$0xf]  ;;  %v368_v10 = vld [vmem:[%s3620_s12 + $0x1c] sm:$0xf] }
  0x14   : > { %v386_v11 = vsel %vm385_vm0, %v377_v3, 0.0  ;;  %v380_v12 = vcombine.low %v367_v9, %v368_v10  ;;  %v3484_v3 = vld [vmem:[%s4244_s2 + $0x8] sm:$0xff]  }
  0x15   : > { %387 = vadd.xlane.f32.xlu0 %v386_v11  ;;  %v392_v13 = vsel %vm385_vm0, %v379_v7, 0.0  ;;  %v389_v14 = vsel %vm385_vm0, %v378_v8, 0.0 }
  0x16   : > { %393 = vadd.xlane.f32.xlu1 %v392_v13  ;;  %v395_v15 = vsel %vm385_vm0, %v380_v12, 0.0 }
  0x19   : > { %390 = vadd.xlane.f32.xlu0 %v389_v14 }
  0x1a   : > { %396 = vadd.xlane.f32.xlu1 %v395_v15 }
  0xa2   : > { %v388_v26 = vpop.xlane.xlu0 %387 }
  0xa3   : > { %v399_v27 = vmul.f32 0.03125, %v388_v26  ;;  %v394_v28 = vpop.xlane.xlu1 %393 }
  0xa4   : > { %v401_v29 = vmul.f32 0.03125, %v394_v28 }
  0xa5   : > { %v413_v30 = vrot.slane %v399_v27, %v3637_v24  ;;  %v420_v31 = vrot.slane %v399_v27, %v3640_v25 }
  0xa6   : > { %v441_v32 = vrot.slane %v401_v29, %v3637_v24  ;;  %v448_v33 = vrot.slane %v401_v29, %v3640_v25  ;;  %v391_v34 = vpop.xlane.xlu0 %390 }
  0xa7   : > { %v471_v35 = vsub.f32 %v361_v0, %v413_v30  ;;  %v472_v36 = vsub.f32 %v362_v1, %v420_v31  ;;  %v400_v37 = vmul.f32 0.03125, %v391_v34  ;;  %v397_v38 = vpop.xlane.xlu1 %396 }
  0xa8   : > { %v3646_v39 = vsub.f32 %v365_v2, %v441_v32  ;;  %v3648_v40 = vsub.f32 %v366_v4, %v448_v33  ;;  %v402_v41 = vmul.f32 0.03125, %v397_v38  ;;  %v3483_v2 = vld [vmem:[%s4244_s2] sm:$0xff]  }
  0xa9   : > { %v427_v42 = vrot.slane %v400_v37, %v3637_v24  ;;  %v434_v43 = vrot.slane %v400_v37, %v3640_v25  ;;  %v479_v44 = vmul.f32 %v471_v35, %v471_v35  ;;  %v480_v45 = vmul.f32 %v472_v36, %v472_v36  ;;  %3380 = vmatprep.subr.bf16.mxu0 %v3483_v2 }
  0xaa   : > { %v455_v46 = vrot.slane %v402_v41, %v3637_v24  ;;  %v462_v47 = vrot.slane %v402_v41, %v3640_v25  ;;  %v483_v48 = vmul.f32 %v3646_v39, %v3646_v39  ;;  %v484_v49 = vmul.f32 %v3648_v40, %v3648_v40  ;;  %3381 = vmatpush3.bf16.msra.mxu0 %v3483_v2 }
  0xab   : > { %v473_v50 = vsub.f32 %v363_v5, %v427_v42  ;;  %v474_v51 = vsub.f32 %v364_v6, %v434_v43  ;;  %v495_v52 = vcombine.low %v479_v44, %v480_v45  ;;  %3382 = vmatprep.subr.bf16.mxu0 %v3484_v3 }
  0xac   : > { %v477_v53 = vsub.f32 %v367_v9, %v455_v46  ;;  %v478_v54 = vsub.f32 %v368_v10, %v462_v47  ;;  %v497_v55 = vcombine.low %v483_v48, %v484_v49 }
  0xad   : > { %v503_v56 = vsel %vm385_vm0, %v495_v52, 0.0  ;;  %v481_v57 = vmul.f32 %v473_v50, %v473_v50  ;;  %v482_v58 = vmul.f32 %v474_v51, %v474_v51 }
  0xae   : > { %504 = vadd.xlane.f32.xlu0 %v503_v56  ;;  %v485_v59 = vmul.f32 %v477_v53, %v477_v53  ;;  %v486_v60 = vmul.f32 %v478_v54, %v478_v54  ;;  %v509_v61 = vsel %vm385_vm0, %v497_v55, 0.0  ;;  %3383 = vmatpush3.bf16.msra.mxu0 %v3484_v3  ;;  %v3542_v56 = vmov 1983009808  }
  0xaf   : > { %v496_v62 = vcombine.low %v481_v57, %v482_v58  ;;  %v742_v57 = vunpack.c.l.s4 %v3542_v56 }
  0xb0   : > { %v498_v63 = vcombine.low %v485_v59, %v486_v60  ;;  %v3543_v60 = vmov 1934713408  }
  0xb1   : > { %v506_v0 = vsel %vm385_vm0, %v496_v62, 0.0  ;;  %v743_v62 = vunpack.c.0.s8 %v742_v57 }
  0xb2   : > { %510 = vadd.xlane.f32.xlu0 %v509_v61  ;;  %507 = vadd.xlane.f32.xlu1 %v506_v0  ;;  %v512_v1 = vsel %vm385_vm0, %v498_v63, 0.0  ;;  %v774_v61 = vunpack.c.l.s4 %v3543_v60 }
  0xb6   : > { %513 = vadd.xlane.f32.xlu1 %v512_v1  ;;  %v775_v1 = vunpack.c.0.s8 %v774_v61 }
 0x13b   : > { %v505_v4 = vpop.xlane.xlu0 %504 }
 0x13c   : > { %v515_v5 = vmul.f32 0.03125, %v505_v4  ;;  %v3703_v4 = vsub.s32 %v743_v62, %v3634_v22 }
 0x13e   : > { %v519_v6 = vadd.f32 1e-05, %v515_v5 }
 0x13f   : > { %v508_v7 = vpop.xlane.xlu1 %507  ;;  %v511_v8 = vpop.xlane.xlu0 %510 }
 0x140   : > { %3489 = vrsqrt.f32 %v519_v6  ;;  %v516_v9 = vmul.f32 0.03125, %v508_v7  ;;  %v517_v10 = vmul.f32 0.03125, %v511_v8 }
 0x142   : > { %v520_v11 = vadd.f32 1e-05, %v516_v9  ;;  %v521_v12 = vadd.f32 1e-05, %v517_v10 }
 0x143   : > { %v514_v13 = vpop.xlane.xlu1 %513 }
 0x144   : > { %3491 = vrsqrt.f32 %v520_v11  ;;  %v518_v14 = vmul.f32 0.03125, %v514_v13  ;;  %v3708_v11 = vsub.s32 %v775_v1, %v3634_v22 }
 0x145   : > { %3493 = vrsqrt.f32 %v521_v12 }
 0x146   : > { %v522_v15 = vadd.f32 1e-05, %v518_v14 }
 0x148   : > { %3495 = vrsqrt.f32 %v522_v15 }
 0x14a   : > { %v3490_v16 = vpop.eup %3489 }
 0x14b   : > { %v537_v17 = vrot.slane %v3490_v16, %v3637_v24  ;;  %v544_v18 = vrot.slane %v3490_v16, %v3640_v25 }
 0x14d   : > { %v595_v20 = vmul.f32 %v537_v17, %v471_v35  ;;  %v596_v21 = vmul.f32 %v544_v18, %v472_v36 }
 0x14e   : > { %v3492_v19 = vpop.eup %3491 }
 0x14f   : > { %v3494_v23 = vpop.eup %3493  ;;  %v551_v26 = vrot.slane %v3492_v19, %v3637_v24  ;;  %v558_v27 = vrot.slane %v3492_v19, %v3640_v25  ;;  %v611_v33 = vcombine.low %v595_v20, %v596_v21 }
 0x150   : > { %v565_v28 = vrot.slane %v3494_v23, %v3637_v24  ;;  %v572_v29 = vrot.slane %v3494_v23, %v3640_v25 }
 0x151   : > { %v597_v30 = vmul.f32 %v551_v26, %v473_v50  ;;  %v598_v31 = vmul.f32 %v558_v27, %v474_v51 }
 0x152   : > { %v3496_v32 = vpop.eup %3495  ;;  %v599_v34 = vmul.f32 %v565_v28, %v3646_v39  ;;  %v600_v38 = vmul.f32 %v572_v29, %v3648_v40  ;;  %v3300_v39 = vld [vmem:[%s4245_s3] ss:$0 sm:$0xff] }
 0x153   : > { %v579_v37 = vrot.slane %v3496_v32, %v3637_v24  ;;  %v586_v35 = vrot.slane %v3496_v32, %v3640_v25  ;;  %v612_v36 = vcombine.low %v597_v30, %v598_v31 }
 0x154   : > { %v613_v44 = vcombine.low %v599_v34, %v600_v38 }
 0x155   : > { %v619_v41 = vpack.c.bf16 %v612_v36, %v611_v33  ;;  %v601_v42 = vmul.f32 %v579_v37, %v477_v53  ;;  %v602_v43 = vmul.f32 %v586_v35, %v478_v54 }
 0x157   : > { %3384 = vmatprep.mubr.msk.bf16.mxu0 %vm385_vm0, %v619_v41  ;;  %v614_v45 = vcombine.low %v601_v42, %v602_v43 }
 0x159   : > { %v620_v46 = vpack.c.bf16 %v614_v45, %v613_v44 }
 0x15b   : > { %3385 = vmatmul.mubr.msk.bf16.vlgmr.msra.gmra.mrb[0].mxu0 %vm385_vm0, %v620_v46 }
 0x22e   : > { %v3386_v47 = vpop.f32.mrb[0].mxu0 }
 0x22f   : > { %v693_v48 = vadd.f32 %v3386_v47, %v3300_v39  ;;  %v684_v49 = vpop.f32.mrb[1].mxu0 }
 0x230   : > { %v3387_v50 = vpop.f32.mrb[2].mxu0  ;;  %v685_v51 = vadd.f32 %v3300_v39, %v684_v49 }
 0x231   : > { %719 = vrot.lane.b32.xlu0 %v693_v48, %s3539_s19  ;;  %707 = vrot.lane.b32.xlu1 %v693_v48, %s3540_s20  ;;  %v687_v40 = vpop.f32.mrb[3].mxu0  ;;  %v696_v52 = vadd.f32 %v3387_v50, %v3300_v39 }
 0x232   : > { %v3689_v53 = vadd.f32 %v3300_v39, %v687_v40 }
 0x235   : > { %709 = vrot.lane.b32.xlu1 %v696_v52, %s3540_s20  ;;  %703 = vrot.lane.b32.xlu0 %v685_v51, %s3540_s20 }
 0x239   : > { %721 = vrot.lane.b32.xlu1 %v696_v52, %s3539_s19  ;;  %715 = vrot.lane.b32.xlu0 %v685_v51, %s3539_s19 }
 0x23d   : > { %705 = vrot.lane.b32.xlu1 %v3689_v53, %s3540_s20  ;;  %727 = vrot.lane.b32.xlu0 %v685_v51, %s3541_s21 }
 0x241   : > { %717 = vrot.lane.b32.xlu1 %v3689_v53, %s3539_s19  ;;  %731 = vrot.lane.b32.xlu0 %v693_v48, %s3541_s21 }
 0x245   : > { %729 = vrot.lane.b32.xlu1 %v3689_v53, %s3541_s21 }
 0x249   : > { %733 = vrot.lane.b32.xlu1 %v696_v52, %s3541_s21 }
 0x2a3   : > { %v720_v54 = vpop.permute.xlu0 %719  ;;  %v708_v55 = vpop.permute.xlu1 %707 }
 0x2a4   : > { %v875_v5 = vcombine.low %v693_v48, %v720_v54  ;;  %v876_v6 = vcombine.high %v693_v48, %v720_v54 }
 0x2a6   : > { %v883_v18 = vrot.slane %v875_v5, %v3703_v4  ;;  %v890_v19 = vrot.slane %v876_v6, %v3703_v4 }
 0x2a7   : > { %v3700_v58 = vpop.permute.xlu1 %709  ;;  %v704_v59 = vpop.permute.xlu0 %703 }
 0x2ab   : > { %v722_v63 = vpop.permute.xlu1 %721  ;;  %v716_v0 = vpop.permute.xlu0 %715 }
 0x2ac   : > { %v739_v2 = vcombine.low %v685_v51, %v716_v0  ;;  %v740_v3 = vcombine.high %v685_v51, %v716_v0  ;;  %v943_v12 = vcombine.low %v696_v52, %v722_v63  ;;  %v944_v13 = vcombine.high %v696_v52, %v722_v63 }
 0x2ae   : > { %v747_v14 = vrot.slane %v739_v2, %v3703_v4  ;;  %v754_v15 = vrot.slane %v740_v3, %v3703_v4  ;;  %v3717_v28 = vrot.slane %v943_v12, %v3703_v4  ;;  %v3720_v29 = vrot.slane %v944_v13, %v3703_v4 }
 0x2af   : > { %v3705_v7 = vpop.permute.xlu1 %705  ;;  %v728_v8 = vpop.permute.xlu0 %727 }
 0x2b0   : > { %v755_v9 = vcombine.low %v704_v59, %v728_v8  ;;  %v756_v10 = vcombine.high %v704_v59, %v728_v8 }
 0x2b2   : > { %v763_v16 = vrot.slane %v755_v9, %v3703_v4  ;;  %v770_v17 = vrot.slane %v756_v10, %v3703_v4 }
 0x2b3   : > { %v718_v20 = vpop.permute.xlu1 %717  ;;  %v732_v21 = vpop.permute.xlu0 %731 }
 0x2b4   : > { %v771_v23 = vcombine.low %v747_v14, %v763_v16  ;;  %v772_v26 = vcombine.high %v747_v14, %v763_v16  ;;  %v787_v22 = vcombine.low %v754_v15, %v770_v17  ;;  %v788_v27 = vcombine.high %v754_v15, %v770_v17 }
 0x2b5   : > { %v891_v30 = vcombine.low %v708_v55, %v732_v21  ;;  %v892_v31 = vcombine.high %v708_v55, %v732_v21  ;;  %v807_v35 = vcombine.low %v3689_v53, %v718_v20  ;;  %v808_v36 = vcombine.high %v3689_v53, %v718_v20 }
 0x2b6   : > { %v779_v32 = vrot.slane %v771_v23, %v3708_v11  ;;  %v786_v33 = vrot.slane %v772_v26, %v3708_v11  ;;  %v795_v34 = vrot.slane %v787_v22, %v3708_v11  ;;  %v802_v37 = vrot.slane %v788_v27, %v3708_v11 }
 0x2b7   : > { %v899_v38 = vrot.slane %v891_v30, %v3703_v4  ;;  %v906_v41 = vrot.slane %v892_v31, %v3703_v4  ;;  %v730_v42 = vpop.permute.xlu1 %729  ;;  %v815_v60 = vrot.slane %v807_v35, %v3703_v4  ;;  %v822_v61 = vrot.slane %v808_v36, %v3703_v4 }
 0x2b8   : > { %v1011_v43 = vcombine.low %v779_v32, %v786_v33  ;;  %v3305_v44 = vcombine.high %v779_v32, %v786_v33  ;;  %v1045_v45 = vcombine.low %v795_v34, %v802_v37  ;;  %v3306_v46 = vcombine.high %v795_v34, %v802_v37 }
 0x2b9   : > { %v907_v39 = vcombine.low %v883_v18, %v899_v38  ;;  %v908_v47 = vcombine.high %v883_v18, %v899_v38  ;;  %v923_v48 = vcombine.low %v890_v19, %v906_v41  ;;  %v924_v49 = vcombine.high %v890_v19, %v906_v41 }
 0x2ba   : > { %v3731_v50 = vrot.slane %v1011_v43, %v3703_v4  ;;  %v3734_v40 = vrot.slane %v3305_v44, %v3703_v4  ;;  %v3737_v51 = vrot.slane %v1045_v45, %v3703_v4  ;;  %v3740_v52 = vrot.slane %v3306_v46, %v3703_v4 }
 0x2bb   : > { %v915_v53 = vrot.slane %v907_v39, %v3708_v11  ;;  %v922_v54 = vrot.slane %v908_v47, %v3708_v11  ;;  %v931_v55 = vrot.slane %v923_v48, %v3708_v11  ;;  %v938_v56 = vrot.slane %v924_v49, %v3708_v11  ;;  %v734_v2 = vpop.permute.xlu1 %733 }
 0x2bc   : > { %v1028_v57 = vcombine.high %v3731_v50, %v3734_v40  ;;  %v1062_v59 = vcombine.high %v3737_v51, %v3740_v52  ;;  %v1027_v3 = vcombine.low %v3731_v50, %v3734_v40  ;;  %v1061_v5 = vcombine.low %v3737_v51, %v3740_v52 }
 0x2bd   : > { %v1147_v62 = vcombine.low %v915_v53, %v922_v54  ;;  %v3309_v63 = vcombine.high %v915_v53, %v922_v54  ;;  %v1181_v0 = vcombine.low %v931_v55, %v938_v56  ;;  %v3310_v1 = vcombine.high %v931_v55, %v938_v56 }
 0x2be   : > { %v823_v6 = vcombine.low %v3705_v7, %v730_v42  ;;  %v824_v8 = vcombine.high %v3705_v7, %v730_v42  ;;  %v959_v16 = vcombine.low %v3700_v58, %v734_v2  ;;  %v960_v7 = vcombine.high %v3700_v58, %v734_v2 }
 0x2bf   : > { %v3759_v9 = vrot.slane %v1147_v62, %v3703_v4  ;;  %v3762_v10 = vrot.slane %v3309_v63, %v3703_v4  ;;  %v3765_v12 = vrot.slane %v1181_v0, %v3703_v4  ;;  %v3768_v13 = vrot.slane %v3310_v1, %v3703_v4 }
 0x2c0   : > { %v831_v14 = vrot.slane %v823_v6, %v3703_v4  ;;  %v838_v15 = vrot.slane %v824_v8, %v3703_v4  ;;  %v3775_v17 = vrot.slane %v1028_v57, %v3708_v11  ;;  %v3778_v18 = vrot.slane %v1062_v59, %v3708_v11 }
 0x2c1   : > { %v1163_v19 = vcombine.low %v3759_v9, %v3762_v10  ;;  %v1164_v20 = vcombine.high %v3759_v9, %v3762_v10  ;;  %v1197_v27 = vcombine.low %v3765_v12, %v3768_v13  ;;  %v1198_v58 = vcombine.high %v3765_v12, %v3768_v13 }
 0x2c2   : > { %v839_v21 = vcombine.low %v815_v60, %v831_v14  ;;  %v840_v23 = vcombine.high %v815_v60, %v831_v14  ;;  %v855_v26 = vcombine.low %v822_v61, %v838_v15  ;;  %v856_v22 = vcombine.high %v822_v61, %v838_v15 }
 0x2c3   : > { %v967_v30 = vrot.slane %v959_v16, %v3703_v4  ;;  %v974_v31 = vrot.slane %v960_v7, %v3703_v4  ;;  %v3811_v63 = vrot.slane %v1164_v20, %v3708_v11  ;;  %v1035_v2 = vrot.slane %v1027_v3, %v3708_v11 }
 0x2c4   : > { %v847_v32 = vrot.slane %v839_v21, %v3708_v11  ;;  %v854_v33 = vrot.slane %v840_v23, %v3708_v11  ;;  %v863_v34 = vrot.slane %v855_v26, %v3708_v11  ;;  %v870_v37 = vrot.slane %v856_v22, %v3708_v11 }
 0x2c5   : > { %v975_v35 = vcombine.low %v3717_v28, %v967_v30  ;;  %v976_v36 = vcombine.high %v3717_v28, %v967_v30  ;;  %v991_v38 = vcombine.low %v3720_v29, %v974_v31  ;;  %v992_v41 = vcombine.high %v3720_v29, %v974_v31 }
 0x2c6   : > { %v1079_v42 = vcombine.low %v847_v32, %v854_v33  ;;  %v3307_v43 = vcombine.high %v847_v32, %v854_v33  ;;  %v1113_v44 = vcombine.low %v863_v34, %v870_v37  ;;  %v3308_v45 = vcombine.high %v863_v34, %v870_v37 }
 0x2c7   : > { %v983_v46 = vrot.slane %v975_v35, %v3708_v11  ;;  %v990_v39 = vrot.slane %v976_v36, %v3708_v11  ;;  %v999_v47 = vrot.slane %v991_v38, %v3708_v11  ;;  %v1006_v48 = vrot.slane %v992_v41, %v3708_v11 }
 0x2c8   : > { %v1086_v49 = vrot.slane %v1079_v42, %v3703_v4  ;;  %v1094_v28 = vrot.slane %v3307_v43, %v3703_v4  ;;  %v1120_v50 = vrot.slane %v1113_v44, %v3703_v4  ;;  %v1128_v29 = vrot.slane %v3308_v45, %v3703_v4 }
 0x2c9   : > { %v1215_v40 = vcombine.low %v983_v46, %v990_v39  ;;  %v3311_v51 = vcombine.high %v983_v46, %v990_v39  ;;  %v1249_v52 = vcombine.low %v999_v47, %v1006_v48  ;;  %v3312_v53 = vcombine.high %v999_v47, %v1006_v48 }
 0x2ca   : > { %v1095_v54 = vcombine.low %v1086_v49, %v1094_v28  ;;  %v1096_v55 = vcombine.high %v1086_v49, %v1094_v28  ;;  %v1129_v56 = vcombine.low %v1120_v50, %v1128_v29  ;;  %v1130_v57 = vcombine.high %v1120_v50, %v1128_v29 }
 0x2cb   : > { %v1222_v59 = vrot.slane %v1215_v40, %v3703_v4  ;;  %v1230_v60 = vrot.slane %v3311_v51, %v3703_v4  ;;  %v1256_v61 = vrot.slane %v1249_v52, %v3703_v4  ;;  %v1264_v62 = vrot.slane %v3312_v53, %v3703_v4 }
 0x2cc   : > { %v3814_v0 = vrot.slane %v1096_v55, %v3708_v11  ;;  %v3817_v1 = vrot.slane %v1130_v57, %v3708_v11  ;;  %v1069_v10 = vrot.slane %v1061_v5, %v3708_v11  ;;  %v1103_v15 = vrot.slane %v1095_v54, %v3708_v11 }
 0x2cd   : > { %v1231_v6 = vcombine.low %v1222_v59, %v1230_v60  ;;  %v1232_v8 = vcombine.high %v1222_v59, %v1230_v60  ;;  %v1265_v9 = vcombine.low %v1256_v61, %v1264_v62  ;;  %v1266_v14 = vcombine.high %v1256_v61, %v1264_v62 }
 0x2ce   : > { %v1137_v16 = vrot.slane %v1129_v56, %v3708_v11  ;;  %v1171_v7 = vrot.slane %v1163_v19, %v3708_v11  ;;  %v1205_v21 = vrot.slane %v1197_v27, %v3708_v11  ;;  %v1283_v26 = vcombine.low %v1035_v2, %v1103_v15 }
 0x2cf   : > { %v3825_v20 = vrot.slane %v1232_v8, %v3708_v11  ;;  %v1239_v23 = vrot.slane %v1231_v6, %v3708_v11  ;;  %v1273_v3 = vrot.slane %v1265_v9, %v3708_v11  ;;  %v3313_v30 = vcombine.high %v1035_v2, %v1103_v15 }
 0x2d0   : > { %v1291_v22 = vcombine.low %v1069_v10, %v1137_v16  ;;  %v3314_v5 = vcombine.high %v1069_v10, %v1137_v16  ;;  %v1290_v37 = vrot.slane %v1283_v26, %v3703_v4  ;;  %v1280_v43 = vrot.slane %v1266_v14, %v3708_v11 }
 0x2d1   : > { %v1299_v31 = vcombine.low %v1171_v7, %v1239_v23  ;;  %v1307_v32 = vcombine.low %v1205_v21, %v1273_v3  ;;  %v3315_v33 = vcombine.high %v1171_v7, %v1239_v23  ;;  %v3316_v34 = vcombine.high %v1205_v21, %v1273_v3 }
 0x2d2   : > { %v1298_v19 = vrot.slane %v1291_v22, %v3703_v4  ;;  %v1358_v35 = vrot.slane %v3313_v30, %v3703_v4  ;;  %v1366_v27 = vrot.slane %v3314_v5, %v3703_v4  ;;  %v1419_v46 = vcombine.low %v3775_v17, %v3814_v0 }
 0x2d3   : > { %v1306_v36 = vrot.slane %v1299_v31, %v3703_v4  ;;  %v1314_v38 = vrot.slane %v1307_v32, %v3703_v4  ;;  %v1374_v41 = vrot.slane %v3315_v33, %v3703_v4  ;;  %v1382_v42 = vrot.slane %v3316_v34, %v3703_v4 }
 0x2d4   : > { %v1316_v44 = vcombine.high %v1290_v37, %v1298_v19  ;;  %v1315_v45 = vcombine.low %v1290_v37, %v1298_v19  ;;  %v1427_v49 = vcombine.low %v3778_v18, %v3817_v1  ;;  %v1212_v28 = vrot.slane %v1198_v58, %v3708_v11 }
 0x2d5   : > { %v1332_v39 = vcombine.high %v1306_v36, %v1314_v38  ;;  %v1331_v47 = vcombine.low %v1306_v36, %v1314_v38  ;;  %v1399_v48 = vcombine.low %v1374_v41, %v1382_v42  ;;  %v1383_v29 = vcombine.low %v1358_v35, %v1366_v27 }
 0x2d6   : > { %v1330_v50 = vrot.slane %v1316_v44, %v3708_v11  ;;  %v1426_v40 = vrot.slane %v1419_v46, %v3703_v4  ;;  %v3851_v52 = vrot.slane %v1315_v45, %v3708_v11  ;;  %v1434_v54 = vrot.slane %v1427_v49, %v3703_v4 }
 0x2d7   : > { %v1346_v51 = vrot.slane %v1332_v39, %v3708_v11  ;;  %v3854_v53 = vrot.slane %v1331_v47, %v3708_v11  ;;  %v3858_v55 = vrot.slane %v1399_v48, %v3708_v11  ;;  %v1435_v12 = vcombine.low %v3811_v63, %v3825_v20 }
 0x2d8   : > { %v1443_v13 = vcombine.low %v1212_v28, %v1280_v43  ;;  %v1451_v57 = vcombine.low %v1426_v40, %v1434_v54  ;;  %v1400_v59 = vcombine.high %v1374_v41, %v1382_v42  ;;  %v3865_v60 = vrot.slane %v1383_v29, %v3708_v11 }
 0x2d9   : > { %v1349_v58 = vcombine.low %v1330_v50, %v1346_v51  ;;  %v1348_v56 = vcombine.high %v3851_v52, %v3854_v53  ;;  %v1442_v61 = vrot.slane %v1435_v12, %v3703_v4  ;;  %v1384_v2 = vcombine.high %v1358_v35, %v1366_v27 }
 0x2da   : > { %v1450_v62 = vrot.slane %v1443_v13, %v3703_v4  ;;  %v1416_v6 = vcombine.high %v3865_v60, %v3858_v55  ;;  %v3317_v9 = vcombine.high %v3775_v17, %v3814_v0  ;;  %v3318_v10 = vcombine.high %v3778_v18, %v3817_v1 }
 0x2db   : > { %1575 = vrot.lane.b32.xlu1 %v1349_v58, %s3544_s22  ;;  %1559 = vrot.lane.b32.xlu0 %v1348_v56, %s3545_s23  ;;  %v3878_v14 = vrot.slane %v1451_v57, %v3708_v11  ;;  %v1350_v15 = vcombine.high %v1330_v50, %v1346_v51  ;;  %v1414_v16 = vrot.slane %v1400_v59, %v3708_v11  ;;  %v3547_v27 = vmov 0.0  }
 0x2dc   : > { %v1467_v8 = vcombine.low %v1442_v61, %v1450_v62  ;;  %v3319_v7 = vcombine.high %v3811_v63, %v3825_v20  ;;  %v1468_v23 = vcombine.high %v1442_v61, %v1450_v62  ;;  %v1494_v3 = vrot.slane %v3317_v9, %v3703_v4  ;;  %3388 = vmatprep.subr.bf16.mxu1 %v3547_v27 }
 0x2dd   : > { %v1502_v17 = vrot.slane %v3318_v10, %v3703_v4  ;;  %v1398_v18 = vrot.slane %v1384_v2, %v3708_v11  ;;  %v3320_v1 = vcombine.high %v1212_v28, %v1280_v43  ;;  %v1347_v26 = vcombine.low %v3851_v52, %v3854_v53  ;;  %3400 = vmatprep.subr.bf16.mxu0 %v3547_v27 }
 0x2de   : > { %v3884_v21 = vrot.slane %v1467_v8, %v3708_v11  ;;  %v1510_v0 = vrot.slane %v3319_v7, %v3703_v4  ;;  %v1452_v22 = vcombine.high %v1426_v40, %v1434_v54  ;;  %v1482_v34 = vrot.slane %v1468_v23, %v3708_v11  ;;  %3390 = vmatprep.mubr.msk.bf16.mxu1 %vm3548_vm1, %v3547_v27  ;;  %v3322_v8 = vld [vmem:[%s3923_s11 + $0x48] sm:$0xff] }
 0x2df   : > { %1591 = vrot.lane.b32.xlu0 %v1350_v15, %s3546_s24  ;;  %v1520_v30 = vcombine.high %v1494_v3, %v1502_v17  ;;  %v1417_v5 = vcombine.low %v1398_v18, %v1414_v16  ;;  %v1518_v31 = vrot.slane %v3320_v1, %v3703_v4  ;;  %v1519_v32 = vcombine.low %v1494_v3, %v1502_v17 }
 0x2e0   : > { %v1483_v63 = vcombine.low %v3878_v14, %v3884_v21  ;;  %v1484_v20 = vcombine.high %v3878_v14, %v3884_v21  ;;  %v1415_v37 = vcombine.low %v3865_v60, %v3858_v55  ;;  %v1466_v36 = vrot.slane %v1452_v22, %v3708_v11  ;;  %3402 = vmatprep.mubr.msk.bf16.mxu0 %vm3548_vm1, %v3547_v27  ;;  %v3321_v55 = vld [vmem:[%s3923_s11 + $0x40] sm:$0xff]  ;;  %v3324_v14 = vld [vmem:[%s3923_s11 + $0x58] sm:$0xff] }
 0x2e1   : > { %v1536_v19 = vcombine.high %v1510_v0, %v1518_v31  ;;  %v1535_v35 = vcombine.low %v1510_v0, %v1518_v31  ;;  %v1534_v38 = vrot.slane %v1520_v30, %v3708_v11  ;;  %v1527_v42 = vrot.slane %v1519_v32, %v3708_v11  ;;  %v3323_v31 = vld [vmem:[%s3923_s11 + $0x50] sm:$0xff] }
 0x2e2   : > { %v3464_v33 = vpack.i.bf16 %v1484_v20, %v1416_v6  ;;  %v1418_v44 = vcombine.high %v1398_v18, %v1414_v16  ;;  %v1485_v45 = vcombine.low %v1466_v36, %v1482_v34  ;;  %v1486_v46 = vcombine.high %v1466_v36, %v1482_v34 }
 0x2e3   : > { %1577 = vrot.lane.b32.xlu0 %v1417_v5, %s3544_s22  ;;  %v1550_v41 = vrot.slane %v1536_v19, %v3708_v11  ;;  %v1543_v43 = vrot.slane %v1535_v35, %v3708_v11  ;;  %v1622_v56 = vpack.c.bf16 %v3321_v55, %v3321_v55  ;;  %v1623_v23 = vpack.c.bf16 %v3322_v8, %v3322_v8 }
 0x2e4   : > { %3465 = vrot.lane.b32.xlu1 %v3464_v33, %s3545_s23  ;;  %v1624_v34 = vpack.c.bf16 %v3323_v31, %v3323_v31 }
 0x2e5   : > { %v1553_v39 = vcombine.low %v1534_v38, %v1550_v41  ;;  %v1552_v47 = vcombine.high %v1527_v42, %v1543_v43  ;;  %v1554_v48 = vcombine.high %v1534_v38, %v1550_v41  ;;  %v1551_v49 = vcombine.low %v1527_v42, %v1543_v43 }
 0x2e7   : > { %1565 = vrot.lane.b32.xlu0 %v1552_v47, %s3545_s23  ;;  %v3469_v28 = vpack.i.bf16 %v1553_v39, %v1485_v45  ;;  %v3474_v50 = vpack.i.bf16 %v1554_v48, %v1486_v46 }
 0x2e8   : > { %1593 = vrot.lane.b32.xlu1 %v1418_v44, %s3546_s24 }
 0x2eb   : > { %3475 = vrot.lane.b32.xlu0 %v3474_v50, %s3546_s24 }
 0x2ec   : > { %3470 = vrot.lane.b32.xlu1 %v3469_v28, %s3544_s22 }
 0x34d   : > { %v1560_v29 = vpop.permute.xlu0 %1559  ;;  %v1576_v40 = vpop.permute.xlu1 %1575 }
 0x34e   : > { %v1604_v51 = vsel %vm1603_vm2, %v1347_v26, %v1560_v29 }
 0x34f   : > { %v1609_v53 = vsel %vm1608_vm3, %v1604_v51, %v1576_v40 }
 0x351   : > { %v1592_v52 = vpop.permute.xlu0 %1591 }
 0x352   : > { %v1614_v54 = vsel %vm1613_vm4, %v1609_v53, %v1592_v52 }
 0x353   : > { %v1626_v12 = vpack.c.bf16 %v1614_v54, %v1614_v54 }
 0x355   : > { %v1578_v13 = vpop.permute.xlu0 %1577  ;;  %v1635_v58 = vsel %vm1633_vm5, %v1626_v12, 0 }
 0x356   : > { %v3466_v57 = vpop.permute.xlu1 %3465  ;;  %3389 = vmatpush3.bf16.msra.mxu1 %v1635_v58 }
 0x357   : > { %v3467_v59 = vunpack.i.l.bf16 %v3466_v57  ;;  %3394 = vmatprep.subr.bf16.mxu1 %v3547_v27  ;;  %v3468_v9 = vunpack.i.h.bf16 %v3466_v57 }
 0x359   : > { %v1605_v60 = vsel %vm1603_vm2, %v1415_v37, %v3467_v59  ;;  %3391 = vmatmul.mubr.msk.bf16.vlgmr.msra.gmra.mrb[0].mxu1 %vm1603_vm2, %v1622_v56  ;;  %v1566_v6 = vpop.permute.xlu0 %1565  ;;  %v1606_v0 = vsel %vm1603_vm2, %v1483_v63, %v3468_v9  ;;  %v1625_v37 = vpack.c.bf16 %v3324_v14, %v3324_v14 }
 0x35a   : > { %v1594_v61 = vpop.permute.xlu1 %1593  ;;  %v1610_v62 = vsel %vm1608_vm3, %v1605_v60, %v1578_v13  ;;  %3396 = vmatprep.mubr.msk.bf16.mxu1 %vm3548_vm1, %v3547_v27  ;;  %v1607_v16 = vsel %vm1603_vm2, %v1551_v49, %v1566_v6 }
 0x35b   : > { %v1615_v2 = vsel %vm1613_vm4, %v1610_v62, %v1594_v61 }
 0x35c   : > { %v1627_v10 = vpack.c.bf16 %v1615_v2, %v1615_v2 }
 0x35d   : > { %v3476_v18 = vpop.permute.xlu0 %3475 }
 0x35e   : > { %v3471_v15 = vpop.permute.xlu1 %3470  ;;  %v1681_v7 = vsel %vm1633_vm5, %v1627_v10, 0  ;;  %v3478_v1 = vunpack.i.h.bf16 %v3476_v18  ;;  %v3477_v26 = vunpack.i.l.bf16 %v3476_v18 }
 0x35f   : > { %v3473_v3 = vunpack.i.h.bf16 %v3471_v15  ;;  %v3472_v17 = vunpack.i.l.bf16 %v3471_v15  ;;  %3395 = vmatpush3.bf16.msra.mxu1 %v1681_v7 }
 0x360   : > { %3406 = vmatprep.subr.bf16.mxu1 %v3547_v27 }
 0x361   : > { %v1611_v20 = vsel %vm1608_vm3, %v1606_v0, %v3472_v17  ;;  %v1612_v22 = vsel %vm1608_vm3, %v1607_v16, %v3473_v3 }
 0x362   : > { %3397 = vmatmul.mubr.msk.bf16.vlgmr.msra.gmra.mrb[4].mxu1 %vm1603_vm2, %v1623_v23  ;;  %v1616_v30 = vsel %vm1613_vm4, %v1611_v20, %v3477_v26  ;;  %v1617_v5 = vsel %vm1613_vm4, %v1612_v22, %v3478_v1 }
 0x363   : > { %v1628_v32 = vpack.c.bf16 %v1616_v30, %v1616_v30  ;;  %v1629_v33 = vpack.c.bf16 %v1617_v5, %v1617_v5  ;;  %3408 = vmatprep.mubr.msk.bf16.mxu1 %vm3548_vm1, %v3547_v27 }
 0x365   : > { %v1727_v21 = vsel %vm1633_vm5, %v1628_v32, 0  ;;  %v1773_v63 = vsel %vm1633_vm5, %v1629_v33, 0 }
 0x366   : > { %3401 = vmatpush3.bf16.msra.mxu0 %v1727_v21  ;;  %3407 = vmatpush3.bf16.msra.mxu1 %v1773_v63 }
 0x369   : > { %3403 = vmatmul.mubr.msk.bf16.vlgmr.msra.gmra.mrb[4].mxu0 %vm1603_vm2, %v1624_v34 }
 0x36a   : > { %3409 = vmatmul.mubr.msk.bf16.vlgmr.msra.gmra.mrb[8].mxu1 %vm1603_vm2, %v1625_v37 }
 0x42c   : > { %v1671_v19 = vpop.f32.mrb[0].mxu1 }
 0x42d   : > { %v3392_v35 = vpop.f32.mrb[1].mxu1  ;;  %1819 = vrot.lane.b32.xlu1 %v1671_v19, %s3540_s20 }
 0x42e   : > { %v1674_v36 = vpop.f32.mrb[2].mxu1 }
 0x42f   : > { %v3393_v38 = vpop.f32.mrb[3].mxu1 }
 0x435   : > { %v1717_v27 = vpop.f32.mrb[4].mxu1 }
 0x436   : > { %1821 = vrot.lane.b32.xlu0 %v1717_v27, %s3540_s20  ;;  %v3398_v41 = vpop.f32.mrb[5].mxu1 }
 0x437   : > { %v1720_v42 = vpop.f32.mrb[6].mxu1 }
 0x438   : > { %v3399_v43 = vpop.f32.mrb[7].mxu1 }
 0x43a   : > { %1833 = vrot.lane.b32.xlu0 %v1717_v27, %s3539_s19 }
 0x43c   : > { %v3960_v44 = vpop.f32.mrb[4].mxu0 }
 0x43d   : > { %1823 = vrot.lane.b32.xlu1 %v3960_v44, %s3540_s20  ;;  %v3404_v45 = vpop.f32.mrb[5].mxu0  ;;  %v1809_v46 = vpop.f32.mrb[8].mxu1 }
 0x43e   : > { %1845 = vrot.lane.b32.xlu0 %v1717_v27, %s3541_s21  ;;  %v1766_v39 = vpop.f32.mrb[6].mxu0  ;;  %v3410_v47 = vpop.f32.mrb[9].mxu1 }
 0x43f   : > { %v3405_v48 = vpop.f32.mrb[7].mxu0  ;;  %v1812_v49 = vpop.f32.mrb[10].mxu1 }
 0x440   : > { %v3411_v28 = vpop.f32.mrb[11].mxu1 }
 0x441   : > { %1831 = vrot.lane.b32.xlu1 %v1671_v19, %s3539_s19 }
 0x442   : > { %1825 = vrot.lane.b32.xlu0 %v1809_v46, %s3540_s20 }
 0x445   : > { %1835 = vrot.lane.b32.xlu1 %v3960_v44, %s3539_s19 }
 0x446   : > { %1837 = vrot.lane.b32.xlu0 %v1809_v46, %s3539_s19 }
 0x449   : > { %1843 = vrot.lane.b32.xlu1 %v1671_v19, %s3541_s21 }
 0x44a   : > { %1849 = vrot.lane.b32.xlu0 %v1809_v46, %s3541_s21 }
 0x44d   : > { %1847 = vrot.lane.b32.xlu1 %v3960_v44, %s3541_s21 }
 0x49f   : > { %v1820_v29 = vpop.permute.xlu1 %1819 }
 0x4a8   : > { %v1822_v50 = vpop.permute.xlu0 %1821 }
 0x4ac   : > { %v1834_v40 = vpop.permute.xlu0 %1833 }
 0x4ad   : > { %v1923_v55 = vcombine.low %v1717_v27, %v1834_v40  ;;  %v1924_v58 = vcombine.high %v1717_v27, %v1834_v40 }
 0x4af   : > { %v3974_v51 = vpop.permute.xlu1 %1823  ;;  %v1931_v59 = vrot.slane %v1923_v55, %v3703_v4  ;;  %v1938_v62 = vrot.slane %v1924_v58, %v3703_v4 }
 0x4b0   : > { %v1846_v52 = vpop.permute.xlu0 %1845 }
 0x4b1   : > { %v1939_v53 = vcombine.low %v1822_v50, %v1846_v52  ;;  %v1940_v12 = vcombine.high %v1822_v50, %v1846_v52 }
 0x4b3   : > { %v1832_v54 = vpop.permute.xlu1 %1831  ;;  %v1947_v56 = vrot.slane %v1939_v53, %v3703_v4  ;;  %v1954_v60 = vrot.slane %v1940_v12, %v3703_v4 }
 0x4b4   : > { %v1826_v13 = vpop.permute.xlu0 %1825  ;;  %v1855_v6 = vcombine.low %v1671_v19, %v1832_v54  ;;  %v1856_v8 = vcombine.high %v1671_v19, %v1832_v54 }
 0x4b5   : > { %v1955_v2 = vcombine.low %v1931_v59, %v1947_v56  ;;  %v1956_v9 = vcombine.high %v1931_v59, %v1947_v56  ;;  %v1971_v7 = vcombine.low %v1938_v62, %v1954_v60  ;;  %v1972_v23 = vcombine.high %v1938_v62, %v1954_v60 }
 0x4b6   : > { %v1863_v20 = vrot.slane %v1855_v6, %v3703_v4  ;;  %v1870_v22 = vrot.slane %v1856_v8, %v3703_v4 }
 0x4b7   : > { %v1836_v57 = vpop.permute.xlu1 %1835  ;;  %v1963_v26 = vrot.slane %v1955_v2, %v3708_v11  ;;  %v1970_v14 = vrot.slane %v1956_v9, %v3708_v11  ;;  %v1979_v21 = vrot.slane %v1971_v7, %v3708_v11  ;;  %v1986_v63 = vrot.slane %v1972_v23, %v3708_v11 }
 0x4b8   : > { %v1838_v61 = vpop.permute.xlu0 %1837  ;;  %v1991_v27 = vcombine.low %v3960_v44, %v1836_v57  ;;  %v1992_v41 = vcombine.high %v3960_v44, %v1836_v57 }
 0x4b9   : > { %v2059_v10 = vcombine.low %v1809_v46, %v1838_v61  ;;  %v2060_v15 = vcombine.high %v1809_v46, %v1838_v61 }
 0x4ba   : > { %v2006_v58 = vrot.slane %v1992_v41, %v3703_v4 }
 0x4bb   : > { %v1844_v16 = vpop.permute.xlu1 %1843  ;;  %v2067_v5 = vrot.slane %v2059_v10, %v3703_v4  ;;  %v2074_v31 = vrot.slane %v2060_v15, %v3703_v4 }
 0x4bc   : > { %v1871_v3 = vcombine.low %v1820_v29, %v1844_v16  ;;  %v1872_v17 = vcombine.high %v1820_v29, %v1844_v16  ;;  %v1850_v18 = vpop.permute.xlu0 %1849 }
 0x4bd   : > { %v2075_v0 = vcombine.low %v1826_v13, %v1850_v18  ;;  %v2076_v1 = vcombine.high %v1826_v13, %v1850_v18  ;;  %v1999_v13 = vrot.slane %v1991_v27, %v3703_v4 }
 0x4be   : > { %v1879_v30 = vrot.slane %v1871_v3, %v3703_v4  ;;  %v1886_v34 = vrot.slane %v1872_v17, %v3703_v4 }
 0x4bf   : > { %v2083_v32 = vrot.slane %v2075_v0, %v3703_v4  ;;  %v2090_v33 = vrot.slane %v2076_v1, %v3703_v4  ;;  %v1848_v38 = vpop.permute.xlu1 %1847 }
 0x4c0   : > { %v1887_v42 = vcombine.low %v1863_v20, %v1879_v30  ;;  %v1888_v43 = vcombine.high %v1863_v20, %v1879_v30  ;;  %v1903_v48 = vcombine.low %v1870_v22, %v1886_v34  ;;  %v1904_v49 = vcombine.high %v1870_v22, %v1886_v34 }
 0x4c1   : > { %v2091_v37 = vcombine.low %v2067_v5, %v2083_v32  ;;  %v2092_v19 = vcombine.high %v2067_v5, %v2083_v32  ;;  %v2107_v35 = vcombine.low %v2074_v31, %v2090_v33  ;;  %v2108_v36 = vcombine.high %v2074_v31, %v2090_v33 }
 0x4c2   : > { %v2007_v28 = vcombine.low %v3974_v51, %v1848_v38  ;;  %v2008_v50 = vcombine.high %v3974_v51, %v1848_v38  ;;  %v1895_v59 = vrot.slane %v1887_v42, %v3708_v11  ;;  %v1902_v51 = vrot.slane %v1888_v43, %v3708_v11 }
 0x4c3   : > { %v2099_v45 = vrot.slane %v2091_v37, %v3708_v11  ;;  %v2106_v46 = vrot.slane %v2092_v19, %v3708_v11  ;;  %v2115_v39 = vrot.slane %v2107_v35, %v3708_v11  ;;  %v2122_v47 = vrot.slane %v2108_v36, %v3708_v11 }
 0x4c4   : > { %v2015_v56 = vrot.slane %v2007_v28, %v3703_v4  ;;  %v2022_v57 = vrot.slane %v2008_v50, %v3703_v4  ;;  %v1911_v60 = vrot.slane %v1903_v48, %v3708_v11  ;;  %v1918_v61 = vrot.slane %v1904_v49, %v3708_v11 }
 0x4c5   : > { %v2135_v29 = vcombine.low %v1963_v26, %v2099_v45  ;;  %v3330_v40 = vcombine.high %v1963_v26, %v2099_v45  ;;  %v2203_v52 = vcombine.low %v1970_v14, %v2106_v46  ;;  %v3332_v44 = vcombine.high %v1970_v14, %v2106_v46 }
 0x4c6   : > { %v2271_v53 = vcombine.low %v1979_v21, %v2115_v39  ;;  %v3334_v54 = vcombine.high %v1979_v21, %v2115_v39  ;;  %v2339_v55 = vcombine.low %v1986_v63, %v2122_v47  ;;  %v3336_v12 = vcombine.high %v1986_v63, %v2122_v47 }
 0x4c7   : > { %v2023_v62 = vcombine.low %v1999_v13, %v2015_v56  ;;  %v2024_v2 = vcombine.high %v1999_v13, %v2015_v56  ;;  %v2039_v6 = vcombine.low %v2006_v58, %v2022_v57  ;;  %v2040_v8 = vcombine.high %v2006_v58, %v2022_v57 }
 0x4c8   : > { %v2142_v9 = vrot.slane %v2135_v29, %v3703_v4  ;;  %v2176_v10 = vrot.slane %v3330_v40, %v3703_v4  ;;  %v2210_v15 = vrot.slane %v2203_v52, %v3703_v4  ;;  %v2244_v16 = vrot.slane %v3332_v44, %v3703_v4 }
 0x4c9   : > { %v2031_v7 = vrot.slane %v2023_v62, %v3708_v11  ;;  %v2038_v23 = vrot.slane %v2024_v2, %v3708_v11  ;;  %v2047_v3 = vrot.slane %v2039_v6, %v3708_v11  ;;  %v2054_v17 = vrot.slane %v2040_v8, %v3708_v11 }
 0x4ca   : > { %v4017_v18 = vrot.slane %v2271_v53, %v3703_v4  ;;  %v4020_v0 = vrot.slane %v3334_v54, %v3703_v4  ;;  %v2346_v1 = vrot.slane %v2339_v55, %v3703_v4  ;;  %v4024_v26 = vrot.slane %v3336_v12, %v3703_v4 }
 0x4cb   : > { %v2127_v20 = vcombine.low %v1895_v59, %v2031_v7  ;;  %v3329_v22 = vcombine.high %v1895_v59, %v2031_v7  ;;  %v2195_v30 = vcombine.low %v1902_v51, %v2038_v23  ;;  %v3331_v5 = vcombine.high %v1902_v51, %v2038_v23 }
 0x4cc   : > { %v2263_v31 = vcombine.low %v1911_v60, %v2047_v3  ;;  %v3333_v32 = vcombine.high %v1911_v60, %v2047_v3  ;;  %v2331_v33 = vcombine.low %v1918_v61, %v2054_v17  ;;  %v3335_v14 = vcombine.high %v1918_v61, %v2054_v17 }
 0x4cd   : > { %v2134_v21 = vrot.slane %v2127_v20, %v3703_v4  ;;  %v2168_v63 = vrot.slane %v3329_v22, %v3703_v4  ;;  %v2202_v34 = vrot.slane %v2195_v30, %v3703_v4  ;;  %v2236_v37 = vrot.slane %v3331_v5, %v3703_v4 }
 0x4ce   : > { %v4031_v19 = vrot.slane %v2263_v31, %v3703_v4  ;;  %v4034_v35 = vrot.slane %v3333_v32, %v3703_v4  ;;  %v2338_v36 = vrot.slane %v2331_v33, %v3703_v4  ;;  %v2372_v38 = vrot.slane %v3335_v14, %v3703_v4 }
 0x4cf   : > { %v2143_v27 = vcombine.low %v2134_v21, %v2142_v9  ;;  %v2144_v41 = vcombine.high %v2134_v21, %v2142_v9  ;;  %v2177_v42 = vcombine.low %v2168_v63, %v2176_v10  ;;  %v2178_v43 = vcombine.high %v2168_v63, %v2176_v10 }
 0x4d0   : > { %v2211_v45 = vcombine.low %v2202_v34, %v2210_v15  ;;  %v2212_v46 = vcombine.high %v2202_v34, %v2210_v15  ;;  %v2245_v39 = vcombine.low %v2236_v37, %v2244_v16  ;;  %v2246_v47 = vcombine.high %v2236_v37, %v2244_v16 }
 0x4d1   : > { %v2279_v48 = vcombine.low %v4031_v19, %v4017_v18  ;;  %v2280_v49 = vcombine.high %v4031_v19, %v4017_v18  ;;  %v2313_v28 = vcombine.low %v4034_v35, %v4020_v0  ;;  %v2314_v50 = vcombine.high %v4034_v35, %v4020_v0 }
 0x4d2   : > { %v2347_v29 = vcombine.low %v2338_v36, %v2346_v1  ;;  %v2348_v40 = vcombine.high %v2338_v36, %v2346_v1  ;;  %v2381_v52 = vcombine.low %v2372_v38, %v4024_v26  ;;  %v2382_v44 = vcombine.high %v2372_v38, %v4024_v26 }
 0x4d3   : > { %v2219_v53 = vrot.slane %v2211_v45, %v3708_v11  ;;  %v2226_v54 = vrot.slane %v2212_v46, %v3708_v11  ;;  %v2253_v55 = vrot.slane %v2245_v39, %v3708_v11  ;;  %v2260_v12 = vrot.slane %v2246_v47, %v3708_v11 }
 0x4d4   : > { %v2151_v13 = vrot.slane %v2143_v27, %v3708_v11  ;;  %v2158_v58 = vrot.slane %v2144_v41, %v3708_v11  ;;  %v2185_v56 = vrot.slane %v2177_v42, %v3708_v11  ;;  %v2192_v57 = vrot.slane %v2178_v43, %v3708_v11 }
 0x4d5   : > { %v2467_v59 = vcombine.low %v2219_v53, %v2226_v54  ;;  %v3339_v51 = vcombine.high %v2219_v53, %v2226_v54  ;;  %v2483_v60 = vcombine.low %v2253_v55, %v2260_v12  ;;  %v3340_v61 = vcombine.high %v2253_v55, %v2260_v12 }
 0x4d6   : > { %v2399_v62 = vcombine.low %v2151_v13, %v2158_v58  ;;  %v3337_v2 = vcombine.high %v2151_v13, %v2158_v58  ;;  %v2415_v6 = vcombine.low %v2185_v56, %v2192_v57  ;;  %v3338_v8 = vcombine.high %v2185_v56, %v2192_v57 }
 0x4d7   : > { %v2474_v9 = vrot.slane %v2467_v59, %v3703_v4  ;;  %v2482_v10 = vrot.slane %v3339_v51, %v3703_v4  ;;  %v2490_v15 = vrot.slane %v2483_v60, %v3703_v4  ;;  %v2498_v16 = vrot.slane %v3340_v61, %v3703_v4 }
 0x4d8   : > { %v2406_v7 = vrot.slane %v2399_v62, %v3703_v4  ;;  %v2414_v23 = vrot.slane %v3337_v2, %v3703_v4  ;;  %v2422_v3 = vrot.slane %v2415_v6, %v3703_v4  ;;  %v2430_v17 = vrot.slane %v3338_v8, %v3703_v4 }
 0x4d9   : > { %v2499_v18 = vcombine.low %v2474_v9, %v2482_v10  ;;  %v2515_v0 = vcombine.low %v2490_v15, %v2498_v16  ;;  %v2355_v1 = vrot.slane %v2347_v29, %v3708_v11  ;;  %v2362_v26 = vrot.slane %v2348_v40, %v3708_v11 }
 0x4da   : > { %v2431_v20 = vcombine.low %v2406_v7, %v2414_v23  ;;  %v2447_v22 = vcombine.low %v2422_v3, %v2430_v17  ;;  %v2389_v30 = vrot.slane %v2381_v52, %v3708_v11  ;;  %v2396_v5 = vrot.slane %v2382_v44, %v3708_v11 }
 0x4db   : > { %v4069_v31 = vrot.slane %v2499_v18, %v3708_v11  ;;  %v4072_v32 = vrot.slane %v2515_v0, %v3708_v11  ;;  %v2603_v33 = vcombine.low %v2355_v1, %v2362_v26  ;;  %v3343_v14 = vcombine.high %v2355_v1, %v2362_v26 }
 0x4dc   : > { %v4075_v21 = vrot.slane %v2431_v20, %v3708_v11  ;;  %v4078_v63 = vrot.slane %v2447_v22, %v3708_v11  ;;  %v2619_v34 = vcombine.low %v2389_v30, %v2396_v5  ;;  %v3344_v37 = vcombine.high %v2389_v30, %v2396_v5 }
 0x4dd   : > { %v2532_v19 = vcombine.high %v4069_v31, %v4072_v32  ;;  %v2610_v35 = vrot.slane %v2603_v33, %v3703_v4  ;;  %v2618_v36 = vrot.slane %v3343_v14, %v3703_v4  ;;  %v2287_v38 = vrot.slane %v2279_v48, %v3708_v11 }
 0x4de   : > { %v2464_v27 = vcombine.high %v4075_v21, %v4078_v63  ;;  %v2626_v41 = vrot.slane %v2619_v34, %v3703_v4  ;;  %v2634_v42 = vrot.slane %v3344_v37, %v3703_v4  ;;  %v2294_v43 = vrot.slane %v2280_v49, %v3708_v11 }
 0x4df   : > { %2677 = vrot.lane.b32.xlu0 %v2532_v19, %s3545_s23  ;;  %v2635_v45 = vcombine.low %v2610_v35, %v2618_v36  ;;  %v2321_v46 = vrot.slane %v2313_v28, %v3708_v11  ;;  %v2328_v39 = vrot.slane %v2314_v50, %v3708_v11  ;;  %v2500_v47 = vcombine.high %v2474_v9, %v2482_v10 }
 0x4e0   : > { %2675 = vrot.lane.b32.xlu1 %v2464_v27, %s3545_s23  ;;  %v2651_v48 = vcombine.low %v2626_v41, %v2634_v42  ;;  %v2535_v29 = vcombine.low %v2287_v38, %v2294_v43  ;;  %v3341_v40 = vcombine.high %v2287_v38, %v2294_v43  ;;  %v2516_v52 = vcombine.high %v2490_v15, %v2498_v16 }
 0x4e1   : > { %v4095_v44 = vrot.slane %v2635_v45, %v3708_v11  ;;  %v2551_v53 = vcombine.low %v2321_v46, %v2328_v39  ;;  %v3342_v54 = vcombine.high %v2321_v46, %v2328_v39  ;;  %v2514_v49 = vrot.slane %v2500_v47, %v3708_v11  ;;  %v3505_v46 = vld [vmem:[%s3620_s12 + $0x8] sm:$0xf] }
 0x4e2   : > { %v2659_v55 = vrot.slane %v2651_v48, %v3708_v11  ;;  %v2542_v28 = vrot.slane %v2535_v29, %v3703_v4  ;;  %v2550_v50 = vrot.slane %v3341_v40, %v3703_v4  ;;  %v2530_v12 = vrot.slane %v2516_v52, %v3708_v11  ;;  %v3506_v48 = vld [vmem:[%s3620_s12 + $0xc] sm:$0xf] }
 0x4e3   : > { %v2558_v13 = vrot.slane %v2551_v53, %v3703_v4  ;;  %v2566_v58 = vrot.slane %v3342_v54, %v3703_v4  ;;  %v2432_v56 = vcombine.high %v2406_v7, %v2414_v23  ;;  %v2448_v57 = vcombine.high %v2422_v3, %v2430_v17 }
 0x4e4   : > { %v2668_v59 = vcombine.high %v4095_v44, %v2659_v55  ;;  %v2567_v51 = vcombine.low %v2542_v28, %v2550_v50  ;;  %v2533_v60 = vcombine.low %v2514_v49, %v2530_v12  ;;  %v2636_v61 = vcombine.high %v2610_v35, %v2618_v36 }
 0x4e5   : > { %v2583_v62 = vcombine.low %v2558_v13, %v2566_v58  ;;  %v2446_v2 = vrot.slane %v2432_v56, %v3708_v11  ;;  %v2462_v6 = vrot.slane %v2448_v57, %v3708_v11  ;;  %v2652_v8 = vcombine.high %v2626_v41, %v2634_v42 }
 0x4e6   : > { %2681 = vrot.lane.b32.xlu0 %v2668_v59, %s3545_s23  ;;  %v2575_v9 = vrot.slane %v2567_v51, %v3708_v11  ;;  %v2650_v10 = vrot.slane %v2636_v61, %v3708_v11  ;;  %v2568_v4 = vcombine.high %v2542_v28, %v2550_v50  ;;  %v2584_v15 = vcombine.high %v2558_v13, %v2566_v58  ;;  %v3507_v13 = vld [vmem:[%s3620_s12] sm:$0xf]  ;;  %v3508_v59 = vld [vmem:[%s3620_s12 + $0x4] sm:$0xf] }
 0x4e7   : > { %v2591_v16 = vrot.slane %v2583_v62, %v3708_v11  ;;  %v2465_v7 = vcombine.low %v2446_v2, %v2462_v6  ;;  %v2666_v23 = vrot.slane %v2652_v8, %v3708_v11  ;;  %v2534_v3 = vcombine.high %v2514_v49, %v2530_v12 }
 0x4e8   : > { %v2582_v17 = vrot.slane %v2568_v4, %v3708_v11  ;;  %v2598_v18 = vrot.slane %v2584_v15, %v3708_v11  ;;  %v2466_v0 = vcombine.high %v2446_v2, %v2462_v6  ;;  %v2531_v1 = vcombine.low %v4069_v31, %v4072_v32  ;;  %v3509_v2 = vld [vmem:[%s3620_s12 + $0x10] sm:$0xf]  ;;  %v3511_v4 = vld [vmem:[%s3620_s12 + $0x1c] sm:$0xf] }
 0x4e9   : > { %v2600_v26 = vcombine.high %v2575_v9, %v2591_v16  ;;  %v2669_v20 = vcombine.low %v2650_v10, %v2666_v23  ;;  %v2670_v22 = vcombine.high %v2650_v10, %v2666_v23  ;;  %v2463_v30 = vcombine.low %v4075_v21, %v4078_v63 }
 0x4ea   : > { %2693 = vrot.lane.b32.xlu0 %v2533_v60, %s3544_s22  ;;  %v2601_v5 = vcombine.low %v2582_v17, %v2598_v18  ;;  %v2602_v33 = vcombine.high %v2582_v17, %v2598_v18  ;;  %v2667_v14 = vcombine.low %v4095_v44, %v2659_v55  ;;  %v2599_v34 = vcombine.low %v2575_v9, %v2591_v16  ;;  %v3510_v9 = vld [vmem:[%s3620_s12 + $0x14] sm:$0xf]  ;;  %v3512_v16 = vld [vmem:[%s3620_s12 + $0x18] sm:$0xf] }
 0x4eb   : > { %2679 = vrot.lane.b32.xlu1 %v2600_v26, %s3545_s23 }
 0x4ee   : > { %2697 = vrot.lane.b32.xlu0 %v2669_v20, %s3544_s22 }
 0x4ef   : > { %2691 = vrot.lane.b32.xlu1 %v2465_v7, %s3544_s22 }
 0x4f2   : > { %2709 = vrot.lane.b32.xlu0 %v2534_v3, %s3546_s24 }
 0x4f3   : > { %2695 = vrot.lane.b32.xlu1 %v2601_v5, %s3544_s22 }
 0x4f6   : > { %2713 = vrot.lane.b32.xlu0 %v2670_v22, %s3546_s24 }
 0x4f7   : > { %2707 = vrot.lane.b32.xlu1 %v2466_v0, %s3546_s24 }
 0x4fb   : > { %2711 = vrot.lane.b32.xlu1 %v2602_v33, %s3546_s24 }
 0x551   : > { %v2678_v11 = vpop.permute.xlu0 %2677 }
 0x552   : > { %v2676_v31 = vpop.permute.xlu1 %2675  ;;  %v2720_v35 = vsel %vm1603_vm2, %v2531_v1, %v2678_v11 }
 0x553   : > { %v2719_v43 = vsel %vm1603_vm2, %v2463_v30, %v2676_v31 }
 0x558   : > { %v2682_v32 = vpop.permute.xlu0 %2681 }
 0x559   : > { %v2722_v45 = vsel %vm1603_vm2, %v2667_v14, %v2682_v32 }
 0x55c   : > { %v2694_v21 = vpop.permute.xlu0 %2693 }
 0x55d   : > { %v2680_v63 = vpop.permute.xlu1 %2679  ;;  %v2724_v36 = vsel %vm1608_vm3, %v2720_v35, %v2694_v21 }
 0x55e   : > { %v2721_v28 = vsel %vm1603_vm2, %v2599_v34, %v2680_v63 }
 0x560   : > { %v2698_v37 = vpop.permute.xlu0 %2697 }
 0x561   : > { %v2692_v19 = vpop.permute.xlu1 %2691  ;;  %v2726_v52 = vsel %vm1608_vm3, %v2722_v45, %v2698_v37 }
 0x562   : > { %v2723_v40 = vsel %vm1608_vm3, %v2719_v43, %v2692_v19 }
 0x564   : > { %v2710_v38 = vpop.permute.xlu0 %2709 }
 0x565   : > { %v2696_v27 = vpop.permute.xlu1 %2695  ;;  %v2728_v41 = vsel %vm1613_vm4, %v2724_v36, %v2710_v38 }
 0x566   : > { %v2736_v42 = vcombine.high %v2728_v41, %v2728_v41  ;;  %v2745_v39 = vadd.f32 %v3505_v46, %v2728_v41  ;;  %v2725_v12 = vsel %vm1608_vm3, %v2721_v28, %v2696_v27 }
 0x568   : > { %v2714_v47 = vpop.permute.xlu0 %2713  ;;  %v2746_v29 = vadd.f32 %v3506_v48, %v2736_v42 }
 0x569   : > { %v2708_v44 = vpop.permute.xlu1 %2707  ;;  %v2730_v54 = vsel %vm1613_vm4, %v2726_v52, %v2714_v47 }
 0x56a   : > { %v2727_v53 = vsel %vm1613_vm4, %v2723_v40, %v2708_v44  ;;  %v4139_v49 = vcombine.low %v2745_v39, %v2746_v29  ;;  %v2738_v56 = vcombine.high %v2730_v54, %v2730_v54  ;;  %v2749_v7 = vadd.f32 %v3512_v16, %v2730_v54 }
 0x56b   : > { %v2735_v55 = vcombine.high %v2727_v53, %v2727_v53  ;;  %v2743_v58 = vadd.f32 %v3507_v13, %v2727_v53 }
 0x56c   : > { %v2770_v50 = vsel %vm385_vm0, %v4139_v49, 0.0  ;;  %v2750_v15 = vadd.f32 %v3511_v4, %v2738_v56  ;;  %v3486_v56 = vld [vmem:[%s4246_s4 + $0x8] sm:$0xff]  }
 0x56d   : > { %v2712_v57 = vpop.permute.xlu1 %2711  ;;  %2771 = vadd.xlane.f32.xlu0 %v2770_v50  ;;  %v2744_v51 = vadd.f32 %v3508_v59, %v2735_v55 }
 0x56e   : > { %v2729_v60 = vsel %vm1613_vm4, %v2725_v12, %v2712_v57  ;;  %v4160_v17 = vcombine.low %v2749_v7, %v2750_v15 }
 0x56f   : > { %v2737_v61 = vcombine.high %v2729_v60, %v2729_v60  ;;  %v4148_v62 = vcombine.low %v2743_v58, %v2744_v51  ;;  %v2747_v6 = vadd.f32 %v3509_v2, %v2729_v60 }
 0x570   : > { %v2776_v18 = vsel %vm385_vm0, %v4160_v17, 0.0 }
 0x571   : > { %v2767_v8 = vsel %vm385_vm0, %v4148_v62, 0.0  ;;  %v2748_v10 = vadd.f32 %v3510_v9, %v2737_v61 }
 0x572   : > { %2768 = vadd.xlane.f32.xlu1 %v2767_v8 }
 0x573   : > { %v4156_v23 = vcombine.low %v2747_v6, %v2748_v10 }
 0x575   : > { %v2773_v3 = vsel %vm385_vm0, %v4156_v23, 0.0 }
 0x576   : > { %2774 = vadd.xlane.f32.xlu0 %v2773_v3 }
 0x57a   : > { %2777 = vadd.xlane.f32.xlu0 %v2776_v18 }
 0x5fa   : > { %v2772_v0 = vpop.xlane.xlu0 %2771 }
 0x5fb   : > { %v2780_v1 = vmul.f32 0.03125, %v2772_v0 }
 0x5fd   : > { %v2807_v26 = vrot.slane %v2780_v1, %v3637_v24  ;;  %v2814_v20 = vrot.slane %v2780_v1, %v3640_v25 }
 0x5ff   : > { %v4166_v22 = vsub.f32 %v2745_v39, %v2807_v26  ;;  %v4168_v30 = vsub.f32 %v2746_v29, %v2814_v20  ;;  %v2769_v5 = vpop.xlane.xlu1 %2768 }
 0x600   : > { %v2779_v33 = vmul.f32 0.03125, %v2769_v5 }
 0x601   : > { %v2861_v14 = vmul.f32 %v4166_v22, %v4166_v22  ;;  %v2862_v34 = vmul.f32 %v4168_v30, %v4168_v30 }
 0x602   : > { %v2793_v11 = vrot.slane %v2779_v33, %v3637_v24  ;;  %v2800_v31 = vrot.slane %v2779_v33, %v3640_v25 }
 0x603   : > { %v2775_v32 = vpop.xlane.xlu0 %2774  ;;  %v2876_v21 = vcombine.low %v2861_v14, %v2862_v34 }
 0x604   : > { %v2851_v63 = vsub.f32 %v2743_v58, %v2793_v11  ;;  %v2852_v37 = vsub.f32 %v2744_v51, %v2800_v31  ;;  %v2781_v19 = vmul.f32 0.03125, %v2775_v32  ;;  %v3485_v58 = vld [vmem:[%s4246_s4] sm:$0xff]  }
 0x605   : > { %v2886_v35 = vsel %vm385_vm0, %v2876_v21, 0.0  ;;  %3412 = vmatprep.subr.bf16.mxu0 %v3485_v58 }
 0x606   : > { %v2821_v36 = vrot.slane %v2781_v19, %v3637_v24  ;;  %v2828_v38 = vrot.slane %v2781_v19, %v3640_v25  ;;  %2887 = vadd.xlane.f32.xlu0 %v2886_v35  ;;  %v2859_v27 = vmul.f32 %v2851_v63, %v2851_v63  ;;  %v2860_v41 = vmul.f32 %v2852_v37, %v2852_v37 }
 0x607   : > { %v2778_v42 = vpop.xlane.xlu0 %2777  ;;  %3413 = vmatpush3.bf16.msra.mxu0 %v3485_v58 }
 0x608   : > { %v2855_v43 = vsub.f32 %v2747_v6, %v2821_v36  ;;  %v2856_v45 = vsub.f32 %v2748_v10, %v2828_v38  ;;  %v2782_v46 = vmul.f32 0.03125, %v2778_v42  ;;  %v2875_v39 = vcombine.low %v2859_v27, %v2860_v41  ;;  %3414 = vmatprep.subr.bf16.mxu0 %v3486_v56  ;;  %v3487_v42 = vld [vmem:[%s4248_s6] sm:$0xff]  }
 0x609   : > { %3420 = vmatprep.subr.bf16.mxu1 %v3487_v42 }
 0x60a   : > { %v2835_v47 = vrot.slane %v2782_v46, %v3637_v24  ;;  %v2842_v48 = vrot.slane %v2782_v46, %v3640_v25  ;;  %v2883_v29 = vsel %vm385_vm0, %v2875_v39, 0.0  ;;  %v2863_v40 = vmul.f32 %v2855_v43, %v2855_v43  ;;  %3421 = vmatpush3.bf16.msra.mxu1 %v3487_v42 }
 0x60b   : > { %2884 = vadd.xlane.f32.xlu1 %v2883_v29  ;;  %v2864_v52 = vmul.f32 %v2856_v45, %v2856_v45  ;;  %3415 = vmatpush3.bf16.msra.mxu0 %v3486_v56 }
 0x60c   : > { %v2857_v44 = vsub.f32 %v2749_v7, %v2835_v47  ;;  %v2858_v53 = vsub.f32 %v2750_v15, %v2842_v48 }
 0x60d   : > { %v2877_v54 = vcombine.low %v2863_v40, %v2864_v52 }
 0x60e   : > { %v2865_v55 = vmul.f32 %v2857_v44, %v2857_v44  ;;  %v2866_v28 = vmul.f32 %v2858_v53, %v2858_v53 }
 0x60f   : > { %v2889_v50 = vsel %vm385_vm0, %v2877_v54, 0.0 }
 0x610   : > { %2890 = vadd.xlane.f32.xlu1 %v2889_v50  ;;  %v2878_v12 = vcombine.low %v2865_v55, %v2866_v28  ;;  %v3350_v50 = vld [vmem:[%s4249_s7] ss:$0 sm:$0xff] }
 0x612   : > { %v2892_v13 = vsel %vm385_vm0, %v2878_v12, 0.0 }
 0x613   : > { %2893 = vadd.xlane.f32.xlu0 %v2892_v13 }
 0x693   : > { %v2888_v57 = vpop.xlane.xlu0 %2887 }
 0x694   : > { %v2896_v59 = vmul.f32 0.03125, %v2888_v57 }
 0x696   : > { %v2900_v51 = vadd.f32 1e-05, %v2896_v59 }
 0x698   : > { %3497 = vrsqrt.f32 %v2900_v51  ;;  %v2885_v60 = vpop.xlane.xlu1 %2884 }
 0x699   : > { %v2895_v61 = vmul.f32 0.03125, %v2885_v60 }
 0x69b   : > { %v2899_v2 = vadd.f32 1e-05, %v2895_v61 }
 0x69d   : > { %3499 = vrsqrt.f32 %v2899_v2  ;;  %v2891_v6 = vpop.xlane.xlu1 %2890 }
 0x69e   : > { %v2897_v8 = vmul.f32 0.03125, %v2891_v6 }
 0x6a0   : > { %v2901_v9 = vadd.f32 1e-05, %v2897_v8  ;;  %v2894_v10 = vpop.xlane.xlu0 %2893 }
 0x6a1   : > { %v2898_v4 = vmul.f32 0.03125, %v2894_v10 }
 0x6a2   : > { %v3498_v15 = vpop.eup %3497  ;;  %3501 = vrsqrt.f32 %v2901_v9 }
 0x6a3   : > { %v2931_v16 = vrot.slane %v3498_v15, %v3637_v24  ;;  %v2938_v7 = vrot.slane %v3498_v15, %v3640_v25  ;;  %v2902_v3 = vadd.f32 1e-05, %v2898_v4 }
 0x6a5   : > { %3503 = vrsqrt.f32 %v2902_v3  ;;  %v2977_v18 = vmul.f32 %v2931_v16, %v4166_v22  ;;  %v2978_v0 = vmul.f32 %v2938_v7, %v4168_v30 }
 0x6a7   : > { %v3500_v1 = vpop.eup %3499  ;;  %v2992_v14 = vcombine.low %v2977_v18, %v2978_v0 }
 0x6a8   : > { %v2917_v26 = vrot.slane %v3500_v1, %v3637_v24  ;;  %v2924_v20 = vrot.slane %v3500_v1, %v3640_v25 }
 0x6aa   : > { %v2975_v5 = vmul.f32 %v2917_v26, %v2851_v63  ;;  %v2976_v33 = vmul.f32 %v2924_v20, %v2852_v37 }
 0x6ac   : > { %v3502_v34 = vpop.eup %3501  ;;  %v2991_v11 = vcombine.low %v2975_v5, %v2976_v33 }
 0x6ad   : > { %v2945_v31 = vrot.slane %v3502_v34, %v3637_v24  ;;  %v2952_v32 = vrot.slane %v3502_v34, %v3640_v25 }
 0x6ae   : > { %v2999_v21 = vpack.c.bf16 %v2992_v14, %v2991_v11 }
 0x6af   : > { %v3504_v19 = vpop.eup %3503  ;;  %v2979_v35 = vmul.f32 %v2945_v31, %v2855_v43  ;;  %v2980_v22 = vmul.f32 %v2952_v32, %v2856_v45 }
 0x6b0   : > { %v2959_v30 = vrot.slane %v3504_v19, %v3637_v24  ;;  %v2966_v36 = vrot.slane %v3504_v19, %v3640_v25  ;;  %3416 = vmatprep.mubr.msk.bf16.mxu0 %vm385_vm0, %v2999_v21  ;;  %v3488_v24 = vld [vmem:[%s4248_s6 + $0x8] sm:$0xff]   ;;  %v3345_v25 = vld [vmem:[%s4247_s5] ss:$0 sm:$0xff] }
 0x6b1   : > { %v2993_v37 = vcombine.low %v2979_v35, %v2980_v22  ;;  %3422 = vmatprep.subr.bf16.mxu1 %v3488_v24 }
 0x6b2   : > { %v2981_v38 = vmul.f32 %v2959_v30, %v2857_v44  ;;  %v2982_v63 = vmul.f32 %v2966_v36, %v2858_v53  ;;  %3423 = vmatpush3.bf16.msra.mxu1 %v3488_v24 }
 0x6b4   : > { %v2994_v27 = vcombine.low %v2981_v38, %v2982_v63 }
 0x6b6   : > { %v3000_v41 = vpack.c.bf16 %v2994_v27, %v2993_v37 }
 0x6b8   : > { %3417 = vmatmul.mubr.msk.bf16.vlgmr.msra.gmra.mrb[8].mxu0 %vm385_vm0, %v3000_v41 }
 0x78b   : > { %v3418_v43 = vpop.f32.mrb[8].mxu0 }
 0x78c   : > { %v3073_v45 = vadd.f32 %v3418_v43, %v3345_v25  ;;  %v3064_v46 = vpop.f32.mrb[9].mxu0 }
 0x78d   : > { %v3065_v39 = vadd.f32 %v3345_v25, %v3064_v46  ;;  %v3419_v47 = vpop.f32.mrb[10].mxu0 }
 0x78e   : > { %v3076_v48 = vadd.f32 %v3419_v47, %v3345_v25  ;;  %v3067_v29 = vpop.f32.mrb[11].mxu0  ;;  %v3081_v52 = vmax.f32 %v3073_v45, 0.0 }
 0x78f   : > { %v3068_v40 = vadd.f32 %v3345_v25, %v3067_v29  ;;  %v3079_v53 = vmax.f32 %v3065_v39, 0.0 }
 0x790   : > { %v3082_v44 = vmax.f32 %v3076_v48, 0.0 }
 0x791   : > { %v3080_v54 = vmax.f32 %v3068_v40, 0.0 }
 0x792   : > { %v3084_v55 = vpack.c.bf16 %v3082_v44, %v3081_v52 }
 0x793   : > { %v3083_v28 = vpack.c.bf16 %v3080_v54, %v3079_v53 }
 0x795   : > { %3424 = vmatprep.mubr.msk.bf16.mxu1 %vm385_vm0, %v3083_v28 }
 0x796   : > { %3425 = vmatmul.mubr.msk.bf16.vlgmr.msra.gmra.mrb[12].mxu1 %vm385_vm0, %v3084_v55 }
 0x869   : > { %v3426_v12 = vpop.f32.mrb[12].mxu1 }
 0x86a   : > { %v3157_v13 = vadd.f32 %v3426_v12, %v3350_v50  ;;  %v3148_v58 = vpop.f32.mrb[13].mxu1 }
 0x86b   : > { %v3149_v56 = vadd.f32 %v3350_v50, %v3148_v58  ;;  %v3427_v57 = vpop.f32.mrb[14].mxu1 }
 0x86c   : > { %v3165_v59 = vadd.f32 %v3157_v13, %v4156_v23  ;;  %v3160_v51 = vadd.f32 %v3427_v57, %v3350_v50  ;;  %v3151_v60 = vpop.f32.mrb[15].mxu1 }
 0x86d   : > { %v3163_v61 = vadd.f32 %v3149_v56, %v4148_v62  ;;  %v3152_v2 = vadd.f32 %v3350_v50, %v3151_v60 }
 0x86e   : > { %v3173_v6 = vcombine.high %v3165_v59, %v3165_v59  ;;  %3184 = vst.msk [vmem:[%s359_s26 + $0x10] sm:$0xf] %vm3179_vm6, %v3165_v59  ;;  %v3166_v8 = vadd.f32 %v3160_v51, %v4160_v17 }
 0x86f   : > { %v3171_v9 = vcombine.high %v3163_v61, %v3163_v61  ;;  %3180 = vst.msk [vmem:[%s359_s26] sm:$0xf] %vm3179_vm6, %v3163_v61  ;;  %v3164_v10 = vadd.f32 %v3152_v2, %v4139_v49 }
 0x870   : > { %3185 = vst.msk [vmem:[%s359_s26 + $0x14] sm:$0xf] %vm3179_vm6, %v3173_v6  ;;  %v3174_v4 = vcombine.high %v3166_v8, %v3166_v8  ;;  %3186 = vst.msk [vmem:[%s359_s26 + $0x18] sm:$0xf] %vm3179_vm6, %v3166_v8 }
 0x871   : > { %3181 = vst.msk [vmem:[%s359_s26 + $0x4] sm:$0xf] %vm3179_vm6, %v3171_v9  ;;  %v3172_v23 = vcombine.high %v3164_v10, %v3164_v10  ;;  %3182 = vst.msk [vmem:[%s359_s26 + $0x8] sm:$0xf] %vm3179_vm6, %v3164_v10 }
 0x872   : > { %3187 = vst.msk [vmem:[%s359_s26 + $0x1c] sm:$0xf] %vm3179_vm6, %v3174_v4 }
 0x873   : > { %3183 = vst.msk [vmem:[%s359_s26 + $0xc] sm:$0xf] %vm3179_vm6, %v3172_v23 }
 0x874 PF: > { %s18_s29 = sadd.s32 1, %s3535_s29   ;;  %s4251_s27 = smov %s3531_s28 }
 0x875   : > { %p15_p5 = scmp.ge.s32.totalorder %s18_s29, 4   ;;  %s4252_s28 = smov %s4254_s30 }
 0x877   :  { %17 = sbr.rel (!%p15_p5) target bundleno = 2 (0x2), region = 85 }

// kernel: msa_update_with_pair.9
= control target key start
LH: loop header
LB: loop body
LE: loop exit
PB: predicated region body
PF: predicated region fallthrough
CT: control target
= control target key end

     0   :  { %s3594_s27 = smov 0   ;;  %s3596_s28 = smov 0   ;;  %s4242_s0 = inlined_call_operand.vmem [shape: f32[2,8,4,32], index: 0, kind: input, shape index: {}, may-alias: {0,8}]   ;;  %s4243_s1 = inlined_call_operand.vmem [shape: f32[2,4,4,8,8], index: 1, kind: input, shape index: {}]   ;;  %s4244_s2 = inlined_call_operand.vmem [shape: bf16[32,32], index: 2, kind: input, shape index: {}]   ;;  %s4245_s3 = inlined_call_operand.vmem [shape: f32[1,32], index: 3, kind: input, shape index: {}]   ;;  %s4246_s4 = inlined_call_operand.vmem [shape: bf16[32,32], index: 4, kind: input, shape index: {}]   ;;  %s4247_s5 = inlined_call_operand.vmem [shape: f32[1,32], index: 5, kind: input, shape index: {}]   ;;  %s4248_s6 = inlined_call_operand.vmem [shape: bf16[32,32], index: 6, kind: input, shape index: {}]   ;;  %s4249_s7 = inlined_call_operand.vmem [shape: f32[1,32], index: 7, kind: input, shape index: {}]   ;;  %s4250_s8 = inlined_call_operand.vmem [shape: f32[2,8,4,32], index: 8, kind: output, shape index: {}, may-alias: {0,8}]  }
   0x1   :  { %s3598_s29 = smov 0  }
   0x2 LB: > { %s30_s30 = sadd.s32 1, %s3531_s28  ;;  %p3293_p0 = scmp.ge.s32.totalorder %s3535_s29, 1  ;;  %s3535_s29 = sphi %s3598_s29, %s18_s29   ;;  %s3531_s28 = sphi %s3596_s28, %s4252_s28   ;;  %s3527_s27 = sphi %s3594_s27, %s4251_s27  }
   0x3   : > { %p32_p1 = scmp.ge.s32.totalorder %s30_s30, 2  ;;  %p292_p2 = scmp.lt.s32.totalorder %s3535_s29, 3 }
   0x5   : > { %s4254_s30 = smov (%p32_p1, %s30_s30), 0  ;;  %p293_p3 = pnand %p3293_p0, %p292_p2 }
   0x6   : > { %p338_p4 = scmp.lt.s32.totalorder (!%p293_p3), %s3527_s27, 1  ;;  %vm385_vm0 = vcmask (!%p293_p3), 261120   ;;  %v3537_v16 = vmov (!%p293_p3), 839922192   ;;  %v410_v18 = vlaneseq (!%p293_p3)  ;;  %v3538_v19 = vmov (!%p293_p3), 1985246804  }
   0x7   : > { %296 = sbr.rel (%p293_p3) target bundleno = 2164 (0x874), region = 52  ;;  %v408_v17 = vunpack.c.l.s4 (!%p293_p3), %v3537_v16  ;;  %v415_v20 = vunpack.c.l.s4 (!%p293_p3), %v3538_v19  ;;  %s3539_s19 = smov (!%p293_p3), 112   ;;  %vm3548_vm1 = vmmov (!%p293_p3), 0   ;;  %vm1603_vm2 = vcmask (!%p293_p3), 64512  }
   0x8   : > { %v3634_v22 = vshrl.u32 (!%p293_p3), %v410_v18, 7  ;;  %s3540_s20 = smov (!%p293_p3), 120   ;;  %s3541_s21 = smov (!%p293_p3), 104   ;;  %vm1608_vm3 = vcmask (!%p293_p3), 130048   ;;  %vm1613_vm4 = vcmask (!%p293_p3), 195584   ;;  %vm1633_vm5 = vcmask (!%p293_p3), 1043456  }
   0x9   : > { %v409_v21 = vunpack.c.0.s8 (!%p293_p3), %v408_v17  ;;  %v416_v23 = vunpack.c.0.s8 (!%p293_p3), %v415_v20  ;;  %s3544_s22 = smov (!%p293_p3), 16   ;;  %s3545_s23 = smov (!%p293_p3), 8   ;;  %vm3179_vm6 = vcmask (!%p293_p3), 257024  }
   0xa   : > { %s3546_s24 = smov (!%p293_p3), 24  }
   0xb   : > { %v3637_v24 = vsub.s32 (!%p293_p3), %v409_v21, %v3634_v22  ;;  %v3640_v25 = vsub.s32 (!%p293_p3), %v416_v23, %v3634_v22 }
   0xe   : > { %s4256_s27 = smov (!%p338_p4, %s3527_s27), 1 }
   0xf   : > { %s3357_s9 = sshll.u32 %s4256_s27, 5  ;;  %s3358_s25 = sshll.u32 %s4256_s27, 7 }
  0x10   : > { %s3620_s12 = scalar_lea.vmem %s4242_s0, %s3357_s9  ;;  %s3923_s11 = scalar_lea.vmem %s4243_s1, %s3358_s25 }
  0x11   : > { %v361_v0 = vld [vmem:[%s3620_s12] sm:$0xf]  ;;  %v362_v1 = vld [vmem:[%s3620_s12 + $0x4] sm:$0xf]  ;;  %v365_v2 = vld [vmem:[%s3620_s12 + $0x10] sm:$0xf]  ;;  %s359_s26 = scalar_lea.vmem %s4250_s8, %s3357_s9 }
  0x12   : > { %v377_v3 = vcombine.low %v361_v0, %v362_v1  ;;  %v366_v4 = vld [vmem:[%s3620_s12 + $0x14] sm:$0xf]  ;;  %v363_v5 = vld [vmem:[%s3620_s12 + $0x8] sm:$0xf]  ;;  %v364_v6 = vld [vmem:[%s3620_s12 + $0xc] sm:$0xf] }
  0x13   : > { %v379_v7 = vcombine.low %v365_v2, %v366_v4  ;;  %v378_v8 = vcombine.low %v363_v5, %v364_v6  ;;  %v367_v9 = vld [vmem:[%s3620_s12 + $0x18] sm:$0xf]  ;;  %v368_v10 = vld [vmem:[%s3620_s12 + $0x1c] sm:$0xf] }
  0x14   : > { %v386_v11 = vsel %vm385_vm0, %v377_v3, 0.0  ;;  %v380_v12 = vcombine.low %v367_v9, %v368_v10  ;;  %v3484_v3 = vld [vmem:[%s4244_s2 + $0x8] sm:$0xff]  }
  0x15   : > { %387 = vadd.xlane.f32.xlu0 %v386_v11  ;;  %v392_v13 = vsel %vm385_vm0, %v379_v7, 0.0  ;;  %v389_v14 = vsel %vm385_vm0, %v378_v8, 0.0 }
  0x16   : > { %393 = vadd.xlane.f32.xlu1 %v392_v13  ;;  %v395_v15 = vsel %vm385_vm0, %v380_v12, 0.0 }
  0x19   : > { %390 = vadd.xlane.f32.xlu0 %v389_v14 }
  0x1a   : > { %396 = vadd.xlane.f32.xlu1 %v395_v15 }
  0xa2   : > { %v388_v26 = vpop.xlane.xlu0 %387 }
  0xa3   : > { %v399_v27 = vmul.f32 0.03125, %v388_v26  ;;  %v394_v28 = vpop.xlane.xlu1 %393 }
  0xa4   : > { %v401_v29 = vmul.f32 0.03125, %v394_v28 }
  0xa5   : > { %v413_v30 = vrot.slane %v399_v27, %v3637_v24  ;;  %v420_v31 = vrot.slane %v399_v27, %v3640_v25 }
  0xa6   : > { %v441_v32 = vrot.slane %v401_v29, %v3637_v24  ;;  %v448_v33 = vrot.slane %v401_v29, %v3640_v25  ;;  %v391_v34 = vpop.xlane.xlu0 %390 }
  0xa7   : > { %v471_v35 = vsub.f32 %v361_v0, %v413_v30  ;;  %v472_v36 = vsub.f32 %v362_v1, %v420_v31  ;;  %v400_v37 = vmul.f32 0.03125, %v391_v34  ;;  %v397_v38 = vpop.xlane.xlu1 %396 }
  0xa8   : > { %v3646_v39 = vsub.f32 %v365_v2, %v441_v32  ;;  %v3648_v40 = vsub.f32 %v366_v4, %v448_v33  ;;  %v402_v41 = vmul.f32 0.03125, %v397_v38  ;;  %v3483_v2 = vld [vmem:[%s4244_s2] sm:$0xff]  }
  0xa9   : > { %v427_v42 = vrot.slane %v400_v37, %v3637_v24  ;;  %v434_v43 = vrot.slane %v400_v37, %v3640_v25  ;;  %v479_v44 = vmul.f32 %v471_v35, %v471_v35  ;;  %v480_v45 = vmul.f32 %v472_v36, %v472_v36  ;;  %3380 = vmatprep.subr.bf16.mxu0 %v3483_v2 }
  0xaa   : > { %v455_v46 = vrot.slane %v402_v41, %v3637_v24  ;;  %v462_v47 = vrot.slane %v402_v41, %v3640_v25  ;;  %v483_v48 = vmul.f32 %v3646_v39, %v3646_v39  ;;  %v484_v49 = vmul.f32 %v3648_v40, %v3648_v40  ;;  %3381 = vmatpush3.bf16.msra.mxu0 %v3483_v2 }
  0xab   : > { %v473_v50 = vsub.f32 %v363_v5, %v427_v42  ;;  %v474_v51 = vsub.f32 %v364_v6, %v434_v43  ;;  %v495_v52 = vcombine.low %v479_v44, %v480_v45  ;;  %3382 = vmatprep.subr.bf16.mxu0 %v3484_v3 }
  0xac   : > { %v477_v53 = vsub.f32 %v367_v9, %v455_v46  ;;  %v478_v54 = vsub.f32 %v368_v10, %v462_v47  ;;  %v497_v55 = vcombine.low %v483_v48, %v484_v49 }
  0xad   : > { %v503_v56 = vsel %vm385_vm0, %v495_v52, 0.0  ;;  %v481_v57 = vmul.f32 %v473_v50, %v473_v50  ;;  %v482_v58 = vmul.f32 %v474_v51, %v474_v51 }
  0xae   : > { %504 = vadd.xlane.f32.xlu0 %v503_v56  ;;  %v485_v59 = vmul.f32 %v477_v53, %v477_v53  ;;  %v486_v60 = vmul.f32 %v478_v54, %v478_v54  ;;  %v509_v61 = vsel %vm385_vm0, %v497_v55, 0.0  ;;  %3383 = vmatpush3.bf16.msra.mxu0 %v3484_v3  ;;  %v3542_v56 = vmov 1983009808  }
  0xaf   : > { %v496_v62 = vcombine.low %v481_v57, %v482_v58  ;;  %v742_v57 = vunpack.c.l.s4 %v3542_v56 }
  0xb0   : > { %v498_v63 = vcombine.low %v485_v59, %v486_v60  ;;  %v3543_v60 = vmov 1934713408  }
  0xb1   : > { %v506_v0 = vsel %vm385_vm0, %v496_v62, 0.0  ;;  %v743_v62 = vunpack.c.0.s8 %v742_v57 }
  0xb2   : > { %510 = vadd.xlane.f32.xlu0 %v509_v61  ;;  %507 = vadd.xlane.f32.xlu1 %v506_v0  ;;  %v512_v1 = vsel %vm385_vm0, %v498_v63, 0.0  ;;  %v774_v61 = vunpack.c.l.s4 %v3543_v60 }
  0xb6   : > { %513 = vadd.xlane.f32.xlu1 %v512_v1  ;;  %v775_v1 = vunpack.c.0.s8 %v774_v61 }
 0x13b   : > { %v505_v4 = vpop.xlane.xlu0 %504 }
 0x13c   : > { %v515_v5 = vmul.f32 0.03125, %v505_v4  ;;  %v3703_v4 = vsub.s32 %v743_v62, %v3634_v22 }
 0x13e   : > { %v519_v6 = vadd.f32 1e-05, %v515_v5 }
 0x13f   : > { %v508_v7 = vpop.xlane.xlu1 %507  ;;  %v511_v8 = vpop.xlane.xlu0 %510 }
 0x140   : > { %3489 = vrsqrt.f32 %v519_v6  ;;  %v516_v9 = vmul.f32 0.03125, %v508_v7  ;;  %v517_v10 = vmul.f32 0.03125, %v511_v8 }
 0x142   : > { %v520_v11 = vadd.f32 1e-05, %v516_v9  ;;  %v521_v12 = vadd.f32 1e-05, %v517_v10 }
 0x143   : > { %v514_v13 = vpop.xlane.xlu1 %513 }
 0x144   : > { %3491 = vrsqrt.f32 %v520_v11  ;;  %v518_v14 = vmul.f32 0.03125, %v514_v13  ;;  %v3708_v11 = vsub.s32 %v775_v1, %v3634_v22 }
 0x145   : > { %3493 = vrsqrt.f32 %v521_v12 }
 0x146   : > { %v522_v15 = vadd.f32 1e-05, %v518_v14 }
 0x148   : > { %3495 = vrsqrt.f32 %v522_v15 }
 0x14a   : > { %v3490_v16 = vpop.eup %3489 }
 0x14b   : > { %v537_v17 = vrot.slane %v3490_v16, %v3637_v24  ;;  %v544_v18 = vrot.slane %v3490_v16, %v3640_v25 }
 0x14d   : > { %v595_v20 = vmul.f32 %v537_v17, %v471_v35  ;;  %v596_v21 = vmul.f32 %v544_v18, %v472_v36 }
 0x14e   : > { %v3492_v19 = vpop.eup %3491 }
 0x14f   : > { %v3494_v23 = vpop.eup %3493  ;;  %v551_v26 = vrot.slane %v3492_v19, %v3637_v24  ;;  %v558_v27 = vrot.slane %v3492_v19, %v3640_v25  ;;  %v611_v33 = vcombine.low %v595_v20, %v596_v21 }
 0x150   : > { %v565_v28 = vrot.slane %v3494_v23, %v3637_v24  ;;  %v572_v29 = vrot.slane %v3494_v23, %v3640_v25 }
 0x151   : > { %v597_v30 = vmul.f32 %v551_v26, %v473_v50  ;;  %v598_v31 = vmul.f32 %v558_v27, %v474_v51 }
 0x152   : > { %v3496_v32 = vpop.eup %3495  ;;  %v599_v34 = vmul.f32 %v565_v28, %v3646_v39  ;;  %v600_v38 = vmul.f32 %v572_v29, %v3648_v40  ;;  %v3300_v39 = vld [vmem:[%s4245_s3] ss:$0 sm:$0xff] }
 0x153   : > { %v579_v37 = vrot.slane %v3496_v32, %v3637_v24  ;;  %v586_v35 = vrot.slane %v3496_v32, %v3640_v25  ;;  %v612_v36 = vcombine.low %v597_v30, %v598_v31 }
 0x154   : > { %v613_v44 = vcombine.low %v599_v34, %v600_v38 }
 0x155   : > { %v619_v41 = vpack.c.bf16 %v612_v36, %v611_v33  ;;  %v601_v42 = vmul.f32 %v579_v37, %v477_v53  ;;  %v602_v43 = vmul.f32 %v586_v35, %v478_v54 }
 0x157   : > { %3384 = vmatprep.mubr.msk.bf16.mxu0 %vm385_vm0, %v619_v41  ;;  %v614_v45 = vcombine.low %v601_v42, %v602_v43 }
 0x159   : > { %v620_v46 = vpack.c.bf16 %v614_v45, %v613_v44 }
 0x15b   : > { %3385 = vmatmul.mubr.msk.bf16.vlgmr.msra.gmra.mrb[0].mxu0 %vm385_vm0, %v620_v46 }
 0x22e   : > { %v3386_v47 = vpop.f32.mrb[0].mxu0 }
 0x22f   : > { %v693_v48 = vadd.f32 %v3386_v47, %v3300_v39  ;;  %v684_v49 = vpop.f32.mrb[1].mxu0 }
 0x230   : > { %v3387_v50 = vpop.f32.mrb[2].mxu0  ;;  %v685_v51 = vadd.f32 %v3300_v39, %v684_v49 }
 0x231   : > { %719 = vrot.lane.b32.xlu0 %v693_v48, %s3539_s19  ;;  %707 = vrot.lane.b32.xlu1 %v693_v48, %s3540_s20  ;;  %v687_v40 = vpop.f32.mrb[3].mxu0  ;;  %v696_v52 = vadd.f32 %v3387_v50, %v3300_v39 }
 0x232   : > { %v3689_v53 = vadd.f32 %v3300_v39, %v687_v40 }
 0x235   : > { %709 = vrot.lane.b32.xlu1 %v696_v52, %s3540_s20  ;;  %703 = vrot.lane.b32.xlu0 %v685_v51, %s3540_s20 }
 0x239   : > { %721 = vrot.lane.b32.xlu1 %v696_v52, %s3539_s19  ;;  %715 = vrot.lane.b32.xlu0 %v685_v51, %s3539_s19 }
 0x23d   : > { %705 = vrot.lane.b32.xlu1 %v3689_v53, %s3540_s20  ;;  %727 = vrot.lane.b32.xlu0 %v685_v51, %s3541_s21 }
 0x241   : > { %717 = vrot.lane.b32.xlu1 %v3689_v53, %s3539_s19  ;;  %731 = vrot.lane.b32.xlu0 %v693_v48, %s3541_s21 }
 0x245   : > { %729 = vrot.lane.b32.xlu1 %v3689_v53, %s3541_s21 }
 0x249   : > { %733 = vrot.lane.b32.xlu1 %v696_v52, %s3541_s21 }
 0x2a3   : > { %v720_v54 = vpop.permute.xlu0 %719  ;;  %v708_v55 = vpop.permute.xlu1 %707 }
 0x2a4   : > { %v875_v5 = vcombine.low %v693_v48, %v720_v54  ;;  %v876_v6 = vcombine.high %v693_v48, %v720_v54 }
 0x2a6   : > { %v883_v18 = vrot.slane %v875_v5, %v3703_v4  ;;  %v890_v19 = vrot.slane %v876_v6, %v3703_v4 }
 0x2a7   : > { %v3700_v58 = vpop.permute.xlu1 %709  ;;  %v704_v59 = vpop.permute.xlu0 %703 }
 0x2ab   : > { %v722_v63 = vpop.permute.xlu1 %721  ;;  %v716_v0 = vpop.permute.xlu0 %715 }
 0x2ac   : > { %v739_v2 = vcombine.low %v685_v51, %v716_v0  ;;  %v740_v3 = vcombine.high %v685_v51, %v716_v0  ;;  %v943_v12 = vcombine.low %v696_v52, %v722_v63  ;;  %v944_v13 = vcombine.high %v696_v52, %v722_v63 }
 0x2ae   : > { %v747_v14 = vrot.slane %v739_v2, %v3703_v4  ;;  %v754_v15 = vrot.slane %v740_v3, %v3703_v4  ;;  %v3717_v28 = vrot.slane %v943_v12, %v3703_v4  ;;  %v3720_v29 = vrot.slane %v944_v13, %v3703_v4 }
 0x2af   : > { %v3705_v7 = vpop.permute.xlu1 %705  ;;  %v728_v8 = vpop.permute.xlu0 %727 }
 0x2b0   : > { %v755_v9 = vcombine.low %v704_v59, %v728_v8  ;;  %v756_v10 = vcombine.high %v704_v59, %v728_v8 }
 0x2b2   : > { %v763_v16 = vrot.slane %v755_v9, %v3703_v4  ;;  %v770_v17 = vrot.slane %v756_v10, %v3703_v4 }
 0x2b3   : > { %v718_v20 = vpop.permute.xlu1 %717  ;;  %v732_v21 = vpop.permute.xlu0 %731 }
 0x2b4   : > { %v771_v23 = vcombine.low %v747_v14, %v763_v16  ;;  %v772_v26 = vcombine.high %v747_v14, %v763_v16  ;;  %v787_v22 = vcombine.low %v754_v15, %v770_v17  ;;  %v788_v27 = vcombine.high %v754_v15, %v770_v17 }
 0x2b5   : > { %v891_v30 = vcombine.low %v708_v55, %v732_v21  ;;  %v892_v31 = vcombine.high %v708_v55, %v732_v21  ;;  %v807_v35 = vcombine.low %v3689_v53, %v718_v20  ;;  %v808_v36 = vcombine.high %v3689_v53, %v718_v20 }
 0x2b6   : > { %v779_v32 = vrot.slane %v771_v23, %v3708_v11  ;;  %v786_v33 = vrot.slane %v772_v26, %v3708_v11  ;;  %v795_v34 = vrot.slane %v787_v22, %v3708_v11  ;;  %v802_v37 = vrot.slane %v788_v27, %v3708_v11 }
 0x2b7   : > { %v899_v38 = vrot.slane %v891_v30, %v3703_v4  ;;  %v906_v41 = vrot.slane %v892_v31, %v3703_v4  ;;  %v730_v42 = vpop.permute.xlu1 %729  ;;  %v815_v60 = vrot.slane %v807_v35, %v3703_v4  ;;  %v822_v61 = vrot.slane %v808_v36, %v3703_v4 }
 0x2b8   : > { %v1011_v43 = vcombine.low %v779_v32, %v786_v33  ;;  %v3305_v44 = vcombine.high %v779_v32, %v786_v33  ;;  %v1045_v45 = vcombine.low %v795_v34, %v802_v37  ;;  %v3306_v46 = vcombine.high %v795_v34, %v802_v37 }
 0x2b9   : > { %v907_v39 = vcombine.low %v883_v18, %v899_v38  ;;  %v908_v47 = vcombine.high %v883_v18, %v899_v38  ;;  %v923_v48 = vcombine.low %v890_v19, %v906_v41  ;;  %v924_v49 = vcombine.high %v890_v19, %v906_v41 }
 0x2ba   : > { %v3731_v50 = vrot.slane %v1011_v43, %v3703_v4  ;;  %v3734_v40 = vrot.slane %v3305_v44, %v3703_v4  ;;  %v3737_v51 = vrot.slane %v1045_v45, %v3703_v4  ;;  %v3740_v52 = vrot.slane %v3306_v46, %v3703_v4 }
 0x2bb   : > { %v915_v53 = vrot.slane %v907_v39, %v3708_v11  ;;  %v922_v54 = vrot.slane %v908_v47, %v3708_v11  ;;  %v931_v55 = vrot.slane %v923_v48, %v3708_v11  ;;  %v938_v56 = vrot.slane %v924_v49, %v3708_v11  ;;  %v734_v2 = vpop.permute.xlu1 %733 }
 0x2bc   : > { %v1028_v57 = vcombine.high %v3731_v50, %v3734_v40  ;;  %v1062_v59 = vcombine.high %v3737_v51, %v3740_v52  ;;  %v1027_v3 = vcombine.low %v3731_v50, %v3734_v40  ;;  %v1061_v5 = vcombine.low %v3737_v51, %v3740_v52 }
 0x2bd   : > { %v1147_v62 = vcombine.low %v915_v53, %v922_v54  ;;  %v3309_v63 = vcombine.high %v915_v53, %v922_v54  ;;  %v1181_v0 = vcombine.low %v931_v55, %v938_v56  ;;  %v3310_v1 = vcombine.high %v931_v55, %v938_v56 }
 0x2be   : > { %v823_v6 = vcombine.low %v3705_v7, %v730_v42  ;;  %v824_v8 = vcombine.high %v3705_v7, %v730_v42  ;;  %v959_v16 = vcombine.low %v3700_v58, %v734_v2  ;;  %v960_v7 = vcombine.high %v3700_v58, %v734_v2 }
 0x2bf   : > { %v3759_v9 = vrot.slane %v1147_v62, %v3703_v4  ;;  %v3762_v10 = vrot.slane %v3309_v63, %v3703_v4  ;;  %v3765_v12 = vrot.slane %v1181_v0, %v3703_v4  ;;  %v3768_v13 = vrot.slane %v3310_v1, %v3703_v4 }
 0x2c0   : > { %v831_v14 = vrot.slane %v823_v6, %v3703_v4  ;;  %v838_v15 = vrot.slane %v824_v8, %v3703_v4  ;;  %v3775_v17 = vrot.slane %v1028_v57, %v3708_v11  ;;  %v3778_v18 = vrot.slane %v1062_v59, %v3708_v11 }
 0x2c1   : > { %v1163_v19 = vcombine.low %v3759_v9, %v3762_v10  ;;  %v1164_v20 = vcombine.high %v3759_v9, %v3762_v10  ;;  %v1197_v27 = vcombine.low %v3765_v12, %v3768_v13  ;;  %v1198_v58 = vcombine.high %v3765_v12, %v3768_v13 }
 0x2c2   : > { %v839_v21 = vcombine.low %v815_v60, %v831_v14  ;;  %v840_v23 = vcombine.high %v815_v60, %v831_v14  ;;  %v855_v26 = vcombine.low %v822_v61, %v838_v15  ;;  %v856_v22 = vcombine.high %v822_v61, %v838_v15 }
 0x2c3   : > { %v967_v30 = vrot.slane %v959_v16, %v3703_v4  ;;  %v974_v31 = vrot.slane %v960_v7, %v3703_v4  ;;  %v3811_v63 = vrot.slane %v1164_v20, %v3708_v11  ;;  %v1035_v2 = vrot.slane %v1027_v3, %v3708_v11 }
 0x2c4   : > { %v847_v32 = vrot.slane %v839_v21, %v3708_v11  ;;  %v854_v33 = vrot.slane %v840_v23, %v3708_v11  ;;  %v863_v34 = vrot.slane %v855_v26, %v3708_v11  ;;  %v870_v37 = vrot.slane %v856_v22, %v3708_v11 }
 0x2c5   : > { %v975_v35 = vcombine.low %v3717_v28, %v967_v30  ;;  %v976_v36 = vcombine.high %v3717_v28, %v967_v30  ;;  %v991_v38 = vcombine.low %v3720_v29, %v974_v31  ;;  %v992_v41 = vcombine.high %v3720_v29, %v974_v31 }
 0x2c6   : > { %v1079_v42 = vcombine.low %v847_v32, %v854_v33  ;;  %v3307_v43 = vcombine.high %v847_v32, %v854_v33  ;;  %v1113_v44 = vcombine.low %v863_v34, %v870_v37  ;;  %v3308_v45 = vcombine.high %v863_v34, %v870_v37 }
 0x2c7   : > { %v983_v46 = vrot.slane %v975_v35, %v3708_v11  ;;  %v990_v39 = vrot.slane %v976_v36, %v3708_v11  ;;  %v999_v47 = vrot.slane %v991_v38, %v3708_v11  ;;  %v1006_v48 = vrot.slane %v992_v41, %v3708_v11 }
 0x2c8   : > { %v1086_v49 = vrot.slane %v1079_v42, %v3703_v4  ;;  %v1094_v28 = vrot.slane %v3307_v43, %v3703_v4  ;;  %v1120_v50 = vrot.slane %v1113_v44, %v3703_v4  ;;  %v1128_v29 = vrot.slane %v3308_v45, %v3703_v4 }
 0x2c9   : > { %v1215_v40 = vcombine.low %v983_v46, %v990_v39  ;;  %v3311_v51 = vcombine.high %v983_v46, %v990_v39  ;;  %v1249_v52 = vcombine.low %v999_v47, %v1006_v48  ;;  %v3312_v53 = vcombine.high %v999_v47, %v1006_v48 }
 0x2ca   : > { %v1095_v54 = vcombine.low %v1086_v49, %v1094_v28  ;;  %v1096_v55 = vcombine.high %v1086_v49, %v1094_v28  ;;  %v1129_v56 = vcombine.low %v1120_v50, %v1128_v29  ;;  %v1130_v57 = vcombine.high %v1120_v50, %v1128_v29 }
 0x2cb   : > { %v1222_v59 = vrot.slane %v1215_v40, %v3703_v4  ;;  %v1230_v60 = vrot.slane %v3311_v51, %v3703_v4  ;;  %v1256_v61 = vrot.slane %v1249_v52, %v3703_v4  ;;  %v1264_v62 = vrot.slane %v3312_v53, %v3703_v4 }
 0x2cc   : > { %v3814_v0 = vrot.slane %v1096_v55, %v3708_v11  ;;  %v3817_v1 = vrot.slane %v1130_v57, %v3708_v11  ;;  %v1069_v10 = vrot.slane %v1061_v5, %v3708_v11  ;;  %v1103_v15 = vrot.slane %v1095_v54, %v3708_v11 }
 0x2cd   : > { %v1231_v6 = vcombine.low %v1222_v59, %v1230_v60  ;;  %v1232_v8 = vcombine.high %v1222_v59, %v1230_v60  ;;  %v1265_v9 = vcombine.low %v1256_v61, %v1264_v62  ;;  %v1266_v14 = vcombine.high %v1256_v61, %v1264_v62 }
 0x2ce   : > { %v1137_v16 = vrot.slane %v1129_v56, %v3708_v11  ;;  %v1171_v7 = vrot.slane %v1163_v19, %v3708_v11  ;;  %v1205_v21 = vrot.slane %v1197_v27, %v3708_v11  ;;  %v1283_v26 = vcombine.low %v1035_v2, %v1103_v15 }
 0x2cf   : > { %v3825_v20 = vrot.slane %v1232_v8, %v3708_v11  ;;  %v1239_v23 = vrot.slane %v1231_v6, %v3708_v11  ;;  %v1273_v3 = vrot.slane %v1265_v9, %v3708_v11  ;;  %v3313_v30 = vcombine.high %v1035_v2, %v1103_v15 }
 0x2d0   : > { %v1291_v22 = vcombine.low %v1069_v10, %v1137_v16  ;;  %v3314_v5 = vcombine.high %v1069_v10, %v1137_v16  ;;  %v1290_v37 = vrot.slane %v1283_v26, %v3703_v4  ;;  %v1280_v43 = vrot.slane %v1266_v14, %v3708_v11 }
 0x2d1   : > { %v1299_v31 = vcombine.low %v1171_v7, %v1239_v23  ;;  %v1307_v32 = vcombine.low %v1205_v21, %v1273_v3  ;;  %v3315_v33 = vcombine.high %v1171_v7, %v1239_v23  ;;  %v3316_v34 = vcombine.high %v1205_v21, %v1273_v3 }
 0x2d2   : > { %v1298_v19 = vrot.slane %v1291_v22, %v3703_v4  ;;  %v1358_v35 = vrot.slane %v3313_v30, %v3703_v4  ;;  %v1366_v27 = vrot.slane %v3314_v5, %v3703_v4  ;;  %v1419_v46 = vcombine.low %v3775_v17, %v3814_v0 }
 0x2d3   : > { %v1306_v36 = vrot.slane %v1299_v31, %v3703_v4  ;;  %v1314_v38 = vrot.slane %v1307_v32, %v3703_v4  ;;  %v1374_v41 = vrot.slane %v3315_v33, %v3703_v4  ;;  %v1382_v42 = vrot.slane %v3316_v34, %v3703_v4 }
 0x2d4   : > { %v1316_v44 = vcombine.high %v1290_v37, %v1298_v19  ;;  %v1315_v45 = vcombine.low %v1290_v37, %v1298_v19  ;;  %v1427_v49 = vcombine.low %v3778_v18, %v3817_v1  ;;  %v1212_v28 = vrot.slane %v1198_v58, %v3708_v11 }
 0x2d5   : > { %v1332_v39 = vcombine.high %v1306_v36, %v1314_v38  ;;  %v1331_v47 = vcombine.low %v1306_v36, %v1314_v38  ;;  %v1399_v48 = vcombine.low %v1374_v41, %v1382_v42  ;;  %v1383_v29 = vcombine.low %v1358_v35, %v1366_v27 }
 0x2d6   : > { %v1330_v50 = vrot.slane %v1316_v44, %v3708_v11  ;;  %v1426_v40 = vrot.slane %v1419_v46, %v3703_v4  ;;  %v3851_v52 = vrot.slane %v1315_v45, %v3708_v11  ;;  %v1434_v54 = vrot.slane %v1427_v49, %v3703_v4 }
 0x2d7   : > { %v1346_v51 = vrot.slane %v1332_v39, %v3708_v11  ;;  %v3854_v53 = vrot.slane %v1331_v47, %v3708_v11  ;;  %v3858_v55 = vrot.slane %v1399_v48, %v3708_v11  ;;  %v1435_v12 = vcombine.low %v3811_v63, %v3825_v20 }
 0x2d8   : > { %v1443_v13 = vcombine.low %v1212_v28, %v1280_v43  ;;  %v1451_v57 = vcombine.low %v1426_v40, %v1434_v54  ;;  %v1400_v59 = vcombine.high %v1374_v41, %v1382_v42  ;;  %v3865_v60 = vrot.slane %v1383_v29, %v3708_v11 }
 0x2d9   : > { %v1349_v58 = vcombine.low %v1330_v50, %v1346_v51  ;;  %v1348_v56 = vcombine.high %v3851_v52, %v3854_v53  ;;  %v1442_v61 = vrot.slane %v1435_v12, %v3703_v4  ;;  %v1384_v2 = vcombine.high %v1358_v35, %v1366_v27 }
 0x2da   : > { %v1450_v62 = vrot.slane %v1443_v13, %v3703_v4  ;;  %v1416_v6 = vcombine.high %v3865_v60, %v3858_v55  ;;  %v3317_v9 = vcombine.high %v3775_v17, %v3814_v0  ;;  %v3318_v10 = vcombine.high %v3778_v18, %v3817_v1 }
 0x2db   : > { %1575 = vrot.lane.b32.xlu1 %v1349_v58, %s3544_s22  ;;  %1559 = vrot.lane.b32.xlu0 %v1348_v56, %s3545_s23  ;;  %v3878_v14 = vrot.slane %v1451_v57, %v3708_v11  ;;  %v1350_v15 = vcombine.high %v1330_v50, %v1346_v51  ;;  %v1414_v16 = vrot.slane %v1400_v59, %v3708_v11  ;;  %v3547_v27 = vmov 0.0  }
 0x2dc   : > { %v1467_v8 = vcombine.low %v1442_v61, %v1450_v62  ;;  %v3319_v7 = vcombine.high %v3811_v63, %v3825_v20  ;;  %v1468_v23 = vcombine.high %v1442_v61, %v1450_v62  ;;  %v1494_v3 = vrot.slane %v3317_v9, %v3703_v4  ;;  %3388 = vmatprep.subr.bf16.mxu1 %v3547_v27 }
 0x2dd   : > { %v1502_v17 = vrot.slane %v3318_v10, %v3703_v4  ;;  %v1398_v18 = vrot.slane %v1384_v2, %v3708_v11  ;;  %v3320_v1 = vcombine.high %v1212_v28, %v1280_v43  ;;  %v1347_v26 = vcombine.low %v3851_v52, %v3854_v53  ;;  %3400 = vmatprep.subr.bf16.mxu0 %v3547_v27 }
 0x2de   : > { %v3884_v21 = vrot.slane %v1467_v8, %v3708_v11  ;;  %v1510_v0 = vrot.slane %v3319_v7, %v3703_v4  ;;  %v1452_v22 = vcombine.high %v1426_v40, %v1434_v54  ;;  %v1482_v34 = vrot.slane %v1468_v23, %v3708_v11  ;;  %3390 = vmatprep.mubr.msk.bf16.mxu1 %vm3548_vm1, %v3547_v27  ;;  %v3322_v8 = vld [vmem:[%s3923_s11 + $0x68] sm:$0xff] }
 0x2df   : > { %1591 = vrot.lane.b32.xlu0 %v1350_v15, %s3546_s24  ;;  %v1520_v30 = vcombine.high %v1494_v3, %v1502_v17  ;;  %v1417_v5 = vcombine.low %v1398_v18, %v1414_v16  ;;  %v1518_v31 = vrot.slane %v3320_v1, %v3703_v4  ;;  %v1519_v32 = vcombine.low %v1494_v3, %v1502_v17 }
 0x2e0   : > { %v1483_v63 = vcombine.low %v3878_v14, %v3884_v21  ;;  %v1484_v20 = vcombine.high %v3878_v14, %v3884_v21  ;;  %v1415_v37 = vcombine.low %v3865_v60, %v3858_v55  ;;  %v1466_v36 = vrot.slane %v1452_v22, %v3708_v11  ;;  %3402 = vmatprep.mubr.msk.bf16.mxu0 %vm3548_vm1, %v3547_v27  ;;  %v3321_v55 = vld [vmem:[%s3923_s11 + $0x60] sm:$0xff]  ;;  %v3324_v14 = vld [vmem:[%s3923_s11 + $0x78] sm:$0xff] }
 0x2e1   : > { %v1536_v19 = vcombine.high %v1510_v0, %v1518_v31  ;;  %v1535_v35 = vcombine.low %v1510_v0, %v1518_v31  ;;  %v1534_v38 = vrot.slane %v1520_v30, %v3708_v11  ;;  %v1527_v42 = vrot.slane %v1519_v32, %v3708_v11  ;;  %v3323_v31 = vld [vmem:[%s3923_s11 + $0x70] sm:$0xff] }
 0x2e2   : > { %v3464_v33 = vpack.i.bf16 %v1484_v20, %v1416_v6  ;;  %v1418_v44 = vcombine.high %v1398_v18, %v1414_v16  ;;  %v1485_v45 = vcombine.low %v1466_v36, %v1482_v34  ;;  %v1486_v46 = vcombine.high %v1466_v36, %v1482_v34 }
 0x2e3   : > { %1577 = vrot.lane.b32.xlu0 %v1417_v5, %s3544_s22  ;;  %v1550_v41 = vrot.slane %v1536_v19, %v3708_v11  ;;  %v1543_v43 = vrot.slane %v1535_v35, %v3708_v11  ;;  %v1622_v56 = vpack.c.bf16 %v3321_v55, %v3321_v55  ;;  %v1623_v23 = vpack.c.bf16 %v3322_v8, %v3322_v8 }
 0x2e4   : > { %3465 = vrot.lane.b32.xlu1 %v3464_v33, %s3545_s23  ;;  %v1624_v34 = vpack.c.bf16 %v3323_v31, %v3323_v31 }
 0x2e5   : > { %v1553_v39 = vcombine.low %v1534_v38, %v1550_v41  ;;  %v1552_v47 = vcombine.high %v1527_v42, %v1543_v43  ;;  %v1554_v48 = vcombine.high %v1534_v38, %v1550_v41  ;;  %v1551_v49 = vcombine.low %v1527_v42, %v1543_v43 }
 0x2e7   : > { %1565 = vrot.lane.b32.xlu0 %v1552_v47, %s3545_s23  ;;  %v3469_v28 = vpack.i.bf16 %v1553_v39, %v1485_v45  ;;  %v3474_v50 = vpack.i.bf16 %v1554_v48, %v1486_v46 }
 0x2e8   : > { %1593 = vrot.lane.b32.xlu1 %v1418_v44, %s3546_s24 }
 0x2eb   : > { %3475 = vrot.lane.b32.xlu0 %v3474_v50, %s3546_s24 }
 0x2ec   : > { %3470 = vrot.lane.b32.xlu1 %v3469_v28, %s3544_s22 }
 0x34d   : > { %v1560_v29 = vpop.permute.xlu0 %1559  ;;  %v1576_v40 = vpop.permute.xlu1 %1575 }
 0x34e   : > { %v1604_v51 = vsel %vm1603_vm2, %v1347_v26, %v1560_v29 }
 0x34f   : > { %v1609_v53 = vsel %vm1608_vm3, %v1604_v51, %v1576_v40 }
 0x351   : > { %v1592_v52 = vpop.permute.xlu0 %1591 }
 0x352   : > { %v1614_v54 = vsel %vm1613_vm4, %v1609_v53, %v1592_v52 }
 0x353   : > { %v1626_v12 = vpack.c.bf16 %v1614_v54, %v1614_v54 }
 0x355   : > { %v1578_v13 = vpop.permute.xlu0 %1577  ;;  %v1635_v58 = vsel %vm1633_vm5, %v1626_v12, 0 }
 0x356   : > { %v3466_v57 = vpop.permute.xlu1 %3465  ;;  %3389 = vmatpush3.bf16.msra.mxu1 %v1635_v58 }
 0x357   : > { %v3467_v59 = vunpack.i.l.bf16 %v3466_v57  ;;  %3394 = vmatprep.subr.bf16.mxu1 %v3547_v27  ;;  %v3468_v9 = vunpack.i.h.bf16 %v3466_v57 }
 0x359   : > { %v1605_v60 = vsel %vm1603_vm2, %v1415_v37, %v3467_v59  ;;  %3391 = vmatmul.mubr.msk.bf16.vlgmr.msra.gmra.mrb[0].mxu1 %vm1603_vm2, %v1622_v56  ;;  %v1566_v6 = vpop.permute.xlu0 %1565  ;;  %v1606_v0 = vsel %vm1603_vm2, %v1483_v63, %v3468_v9  ;;  %v1625_v37 = vpack.c.bf16 %v3324_v14, %v3324_v14 }
 0x35a   : > { %v1594_v61 = vpop.permute.xlu1 %1593  ;;  %v1610_v62 = vsel %vm1608_vm3, %v1605_v60, %v1578_v13  ;;  %3396 = vmatprep.mubr.msk.bf16.mxu1 %vm3548_vm1, %v3547_v27  ;;  %v1607_v16 = vsel %vm1603_vm2, %v1551_v49, %v1566_v6 }
 0x35b   : > { %v1615_v2 = vsel %vm1613_vm4, %v1610_v62, %v1594_v61 }
 0x35c   : > { %v1627_v10 = vpack.c.bf16 %v1615_v2, %v1615_v2 }
 0x35d   : > { %v3476_v18 = vpop.permute.xlu0 %3475 }
 0x35e   : > { %v3471_v15 = vpop.permute.xlu1 %3470  ;;  %v1681_v7 = vsel %vm1633_vm5, %v1627_v10, 0  ;;  %v3478_v1 = vunpack.i.h.bf16 %v3476_v18  ;;  %v3477_v26 = vunpack.i.l.bf16 %v3476_v18 }
 0x35f   : > { %v3473_v3 = vunpack.i.h.bf16 %v3471_v15  ;;  %v3472_v17 = vunpack.i.l.bf16 %v3471_v15  ;;  %3395 = vmatpush3.bf16.msra.mxu1 %v1681_v7 }
 0x360   : > { %3406 = vmatprep.subr.bf16.mxu1 %v3547_v27 }
 0x361   : > { %v1611_v20 = vsel %vm1608_vm3, %v1606_v0, %v3472_v17  ;;  %v1612_v22 = vsel %vm1608_vm3, %v1607_v16, %v3473_v3 }
 0x362   : > { %3397 = vmatmul.mubr.msk.bf16.vlgmr.msra.gmra.mrb[4].mxu1 %vm1603_vm2, %v1623_v23  ;;  %v1616_v30 = vsel %vm1613_vm4, %v1611_v20, %v3477_v26  ;;  %v1617_v5 = vsel %vm1613_vm4, %v1612_v22, %v3478_v1 }
 0x363   : > { %v1628_v32 = vpack.c.bf16 %v1616_v30, %v1616_v30  ;;  %v1629_v33 = vpack.c.bf16 %v1617_v5, %v1617_v5  ;;  %3408 = vmatprep.mubr.msk.bf16.mxu1 %vm3548_vm1, %v3547_v27 }
 0x365   : > { %v1727_v21 = vsel %vm1633_vm5, %v1628_v32, 0  ;;  %v1773_v63 = vsel %vm1633_vm5, %v1629_v33, 0 }
 0x366   : > { %3401 = vmatpush3.bf16.msra.mxu0 %v1727_v21  ;;  %3407 = vmatpush3.bf16.msra.mxu1 %v1773_v63 }
 0x369   : > { %3403 = vmatmul.mubr.msk.bf16.vlgmr.msra.gmra.mrb[4].mxu0 %vm1603_vm2, %v1624_v34 }
 0x36a   : > { %3409 = vmatmul.mubr.msk.bf16.vlgmr.msra.gmra.mrb[8].mxu1 %vm1603_vm2, %v1625_v37 }
 0x42c   : > { %v1671_v19 = vpop.f32.mrb[0].mxu1 }
 0x42d   : > { %v3392_v35 = vpop.f32.mrb[1].mxu1  ;;  %1819 = vrot.lane.b32.xlu1 %v1671_v19, %s3540_s20 }
 0x42e   : > { %v1674_v36 = vpop.f32.mrb[2].mxu1 }
 0x42f   : > { %v3393_v38 = vpop.f32.mrb[3].mxu1 }
 0x435   : > { %v1717_v27 = vpop.f32.mrb[4].mxu1 }
 0x436   : > { %1821 = vrot.lane.b32.xlu0 %v1717_v27, %s3540_s20  ;;  %v3398_v41 = vpop.f32.mrb[5].mxu1 }
 0x437   : > { %v1720_v42 = vpop.f32.mrb[6].mxu1 }
 0x438   : > { %v3399_v43 = vpop.f32.mrb[7].mxu1 }
 0x43a   : > { %1833 = vrot.lane.b32.xlu0 %v1717_v27, %s3539_s19 }
 0x43c   : > { %v3960_v44 = vpop.f32.mrb[4].mxu0 }
 0x43d   : > { %1823 = vrot.lane.b32.xlu1 %v3960_v44, %s3540_s20  ;;  %v3404_v45 = vpop.f32.mrb[5].mxu0  ;;  %v1809_v46 = vpop.f32.mrb[8].mxu1 }
 0x43e   : > { %1845 = vrot.lane.b32.xlu0 %v1717_v27, %s3541_s21  ;;  %v1766_v39 = vpop.f32.mrb[6].mxu0  ;;  %v3410_v47 = vpop.f32.mrb[9].mxu1 }
 0x43f   : > { %v3405_v48 = vpop.f32.mrb[7].mxu0  ;;  %v1812_v49 = vpop.f32.mrb[10].mxu1 }
 0x440   : > { %v3411_v28 = vpop.f32.mrb[11].mxu1 }
 0x441   : > { %1831 = vrot.lane.b32.xlu1 %v1671_v19, %s3539_s19 }
 0x442   : > { %1825 = vrot.lane.b32.xlu0 %v1809_v46, %s3540_s20 }
 0x445   : > { %1835 = vrot.lane.b32.xlu1 %v3960_v44, %s3539_s19 }
 0x446   : > { %1837 = vrot.lane.b32.xlu0 %v1809_v46, %s3539_s19 }
 0x449   : > { %1843 = vrot.lane.b32.xlu1 %v1671_v19, %s3541_s21 }
 0x44a   : > { %1849 = vrot.lane.b32.xlu0 %v1809_v46, %s3541_s21 }
 0x44d   : > { %1847 = vrot.lane.b32.xlu1 %v3960_v44, %s3541_s21 }
 0x49f   : > { %v1820_v29 = vpop.permute.xlu1 %1819 }
 0x4a8   : > { %v1822_v50 = vpop.permute.xlu0 %1821 }
 0x4ac   : > { %v1834_v40 = vpop.permute.xlu0 %1833 }
 0x4ad   : > { %v1923_v55 = vcombine.low %v1717_v27, %v1834_v40  ;;  %v1924_v58 = vcombine.high %v1717_v27, %v1834_v40 }
 0x4af   : > { %v3974_v51 = vpop.permute.xlu1 %1823  ;;  %v1931_v59 = vrot.slane %v1923_v55, %v3703_v4  ;;  %v1938_v62 = vrot.slane %v1924_v58, %v3703_v4 }
 0x4b0   : > { %v1846_v52 = vpop.permute.xlu0 %1845 }
 0x4b1   : > { %v1939_v53 = vcombine.low %v1822_v50, %v1846_v52  ;;  %v1940_v12 = vcombine.high %v1822_v50, %v1846_v52 }
 0x4b3   : > { %v1832_v54 = vpop.permute.xlu1 %1831  ;;  %v1947_v56 = vrot.slane %v1939_v53, %v3703_v4  ;;  %v1954_v60 = vrot.slane %v1940_v12, %v3703_v4 }
 0x4b4   : > { %v1826_v13 = vpop.permute.xlu0 %1825  ;;  %v1855_v6 = vcombine.low %v1671_v19, %v1832_v54  ;;  %v1856_v8 = vcombine.high %v1671_v19, %v1832_v54 }
 0x4b5   : > { %v1955_v2 = vcombine.low %v1931_v59, %v1947_v56  ;;  %v1956_v9 = vcombine.high %v1931_v59, %v1947_v56  ;;  %v1971_v7 = vcombine.low %v1938_v62, %v1954_v60  ;;  %v1972_v23 = vcombine.high %v1938_v62, %v1954_v60 }
 0x4b6   : > { %v1863_v20 = vrot.slane %v1855_v6, %v3703_v4  ;;  %v1870_v22 = vrot.slane %v1856_v8, %v3703_v4 }
 0x4b7   : > { %v1836_v57 = vpop.permute.xlu1 %1835  ;;  %v1963_v26 = vrot.slane %v1955_v2, %v3708_v11  ;;  %v1970_v14 = vrot.slane %v1956_v9, %v3708_v11  ;;  %v1979_v21 = vrot.slane %v1971_v7, %v3708_v11  ;;  %v1986_v63 = vrot.slane %v1972_v23, %v3708_v11 }
 0x4b8   : > { %v1838_v61 = vpop.permute.xlu0 %1837  ;;  %v1991_v27 = vcombine.low %v3960_v44, %v1836_v57  ;;  %v1992_v41 = vcombine.high %v3960_v44, %v1836_v57 }
 0x4b9   : > { %v2059_v10 = vcombine.low %v1809_v46, %v1838_v61  ;;  %v2060_v15 = vcombine.high %v1809_v46, %v1838_v61 }
 0x4ba   : > { %v2006_v58 = vrot.slane %v1992_v41, %v3703_v4 }
 0x4bb   : > { %v1844_v16 = vpop.permute.xlu1 %1843  ;;  %v2067_v5 = vrot.slane %v2059_v10, %v3703_v4  ;;  %v2074_v31 = vrot.slane %v2060_v15, %v3703_v4 }
 0x4bc   : > { %v1871_v3 = vcombine.low %v1820_v29, %v1844_v16  ;;  %v1872_v17 = vcombine.high %v1820_v29, %v1844_v16  ;;  %v1850_v18 = vpop.permute.xlu0 %1849 }
 0x4bd   : > { %v2075_v0 = vcombine.low %v1826_v13, %v1850_v18  ;;  %v2076_v1 = vcombine.high %v1826_v13, %v1850_v18  ;;  %v1999_v13 = vrot.slane %v1991_v27, %v3703_v4 }
 0x4be   : > { %v1879_v30 = vrot.slane %v1871_v3, %v3703_v4  ;;  %v1886_v34 = vrot.slane %v1872_v17, %v3703_v4 }
 0x4bf   : > { %v2083_v32 = vrot.slane %v2075_v0, %v3703_v4  ;;  %v2090_v33 = vrot.slane %v2076_v1, %v3703_v4  ;;  %v1848_v38 = vpop.permute.xlu1 %1847 }
 0x4c0   : > { %v1887_v42 = vcombine.low %v1863_v20, %v1879_v30  ;;  %v1888_v43 = vcombine.high %v1863_v20, %v1879_v30  ;;  %v1903_v48 = vcombine.low %v1870_v22, %v1886_v34  ;;  %v1904_v49 = vcombine.high %v1870_v22, %v1886_v34 }
 0x4c1   : > { %v2091_v37 = vcombine.low %v2067_v5, %v2083_v32  ;;  %v2092_v19 = vcombine.high %v2067_v5, %v2083_v32  ;;  %v2107_v35 = vcombine.low %v2074_v31, %v2090_v33  ;;  %v2108_v36 = vcombine.high %v2074_v31, %v2090_v33 }
 0x4c2   : > { %v2007_v28 = vcombine.low %v3974_v51, %v1848_v38  ;;  %v2008_v50 = vcombine.high %v3974_v51, %v1848_v38  ;;  %v1895_v59 = vrot.slane %v1887_v42, %v3708_v11  ;;  %v1902_v51 = vrot.slane %v1888_v43, %v3708_v11 }
 0x4c3   : > { %v2099_v45 = vrot.slane %v2091_v37, %v3708_v11  ;;  %v2106_v46 = vrot.slane %v2092_v19, %v3708_v11  ;;  %v2115_v39 = vrot.slane %v2107_v35, %v3708_v11  ;;  %v2122_v47 = vrot.slane %v2108_v36, %v3708_v11 }
 0x4c4   : > { %v2015_v56 = vrot.slane %v2007_v28, %v3703_v4  ;;  %v2022_v57 = vrot.slane %v2008_v50, %v3703_v4  ;;  %v1911_v60 = vrot.slane %v1903_v48, %v3708_v11  ;;  %v1918_v61 = vrot.slane %v1904_v49, %v3708_v11 }
 0x4c5   : > { %v2135_v29 = vcombine.low %v1963_v26, %v2099_v45  ;;  %v3330_v40 = vcombine.high %v1963_v26, %v2099_v45  ;;  %v2203_v52 = vcombine.low %v1970_v14, %v2106_v46  ;;  %v3332_v44 = vcombine.high %v1970_v14, %v2106_v46 }
 0x4c6   : > { %v2271_v53 = vcombine.low %v1979_v21, %v2115_v39  ;;  %v3334_v54 = vcombine.high %v1979_v21, %v2115_v39  ;;  %v2339_v55 = vcombine.low %v1986_v63, %v2122_v47  ;;  %v3336_v12 = vcombine.high %v1986_v63, %v2122_v47 }
 0x4c7   : > { %v2023_v62 = vcombine.low %v1999_v13, %v2015_v56  ;;  %v2024_v2 = vcombine.high %v1999_v13, %v2015_v56  ;;  %v2039_v6 = vcombine.low %v2006_v58, %v2022_v57  ;;  %v2040_v8 = vcombine.high %v2006_v58, %v2022_v57 }
 0x4c8   : > { %v2142_v9 = vrot.slane %v2135_v29, %v3703_v4  ;;  %v2176_v10 = vrot.slane %v3330_v40, %v3703_v4  ;;  %v2210_v15 = vrot.slane %v2203_v52, %v3703_v4  ;;  %v2244_v16 = vrot.slane %v3332_v44, %v3703_v4 }
 0x4c9   : > { %v2031_v7 = vrot.slane %v2023_v62, %v3708_v11  ;;  %v2038_v23 = vrot.slane %v2024_v2, %v3708_v11  ;;  %v2047_v3 = vrot.slane %v2039_v6, %v3708_v11  ;;  %v2054_v17 = vrot.slane %v2040_v8, %v3708_v11 }
 0x4ca   : > { %v4017_v18 = vrot.slane %v2271_v53, %v3703_v4  ;;  %v4020_v0 = vrot.slane %v3334_v54, %v3703_v4  ;;  %v2346_v1 = vrot.slane %v2339_v55, %v3703_v4  ;;  %v4024_v26 = vrot.slane %v3336_v12, %v3703_v4 }
 0x4cb   : > { %v2127_v20 = vcombine.low %v1895_v59, %v2031_v7  ;;  %v3329_v22 = vcombine.high %v1895_v59, %v2031_v7  ;;  %v2195_v30 = vcombine.low %v1902_v51, %v2038_v23  ;;  %v3331_v5 = vcombine.high %v1902_v51, %v2038_v23 }
 0x4cc   : > { %v2263_v31 = vcombine.low %v1911_v60, %v2047_v3  ;;  %v3333_v32 = vcombine.high %v1911_v60, %v2047_v3  ;;  %v2331_v33 = vcombine.low %v1918_v61, %v2054_v17  ;;  %v3335_v14 = vcombine.high %v1918_v61, %v2054_v17 }
 0x4cd   : > { %v2134_v21 = vrot.slane %v2127_v20, %v3703_v4  ;;  %v2168_v63 = vrot.slane %v3329_v22, %v3703_v4  ;;  %v2202_v34 = vrot.slane %v2195_v30, %v3703_v4  ;;  %v2236_v37 = vrot.slane %v3331_v5, %v3703_v4 }
 0x4ce   : > { %v4031_v19 = vrot.slane %v2263_v31, %v3703_v4  ;;  %v4034_v35 = vrot.slane %v3333_v32, %v3703_v4  ;;  %v2338_v36 = vrot.slane %v2331_v33, %v3703_v4  ;;  %v2372_v38 = vrot.slane %v3335_v14, %v3703_v4 }
 0x4cf   : > { %v2143_v27 = vcombine.low %v2134_v21, %v2142_v9  ;;  %v2144_v41 = vcombine.high %v2134_v21, %v2142_v9  ;;  %v2177_v42 = vcombine.low %v2168_v63, %v2176_v10  ;;  %v2178_v43 = vcombine.high %v2168_v63, %v2176_v10 }
 0x4d0   : > { %v2211_v45 = vcombine.low %v2202_v34, %v2210_v15  ;;  %v2212_v46 = vcombine.high %v2202_v34, %v2210_v15  ;;  %v2245_v39 = vcombine.low %v2236_v37, %v2244_v16  ;;  %v2246_v47 = vcombine.high %v2236_v37, %v2244_v16 }
 0x4d1   : > { %v2279_v48 = vcombine.low %v4031_v19, %v4017_v18  ;;  %v2280_v49 = vcombine.high %v4031_v19, %v4017_v18  ;;  %v2313_v28 = vcombine.low %v4034_v35, %v4020_v0  ;;  %v2314_v50 = vcombine.high %v4034_v35, %v4020_v0 }
 0x4d2   : > { %v2347_v29 = vcombine.low %v2338_v36, %v2346_v1  ;;  %v2348_v40 = vcombine.high %v2338_v36, %v2346_v1  ;;  %v2381_v52 = vcombine.low %v2372_v38, %v4024_v26  ;;  %v2382_v44 = vcombine.high %v2372_v38, %v4024_v26 }
 0x4d3   : > { %v2219_v53 = vrot.slane %v2211_v45, %v3708_v11  ;;  %v2226_v54 = vrot.slane %v2212_v46, %v3708_v11  ;;  %v2253_v55 = vrot.slane %v2245_v39, %v3708_v11  ;;  %v2260_v12 = vrot.slane %v2246_v47, %v3708_v11 }
 0x4d4   : > { %v2151_v13 = vrot.slane %v2143_v27, %v3708_v11  ;;  %v2158_v58 = vrot.slane %v2144_v41, %v3708_v11  ;;  %v2185_v56 = vrot.slane %v2177_v42, %v3708_v11  ;;  %v2192_v57 = vrot.slane %v2178_v43, %v3708_v11 }
 0x4d5   : > { %v2467_v59 = vcombine.low %v2219_v53, %v2226_v54  ;;  %v3339_v51 = vcombine.high %v2219_v53, %v2226_v54  ;;  %v2483_v60 = vcombine.low %v2253_v55, %v2260_v12  ;;  %v3340_v61 = vcombine.high %v2253_v55, %v2260_v12 }
 0x4d6   : > { %v2399_v62 = vcombine.low %v2151_v13, %v2158_v58  ;;  %v3337_v2 = vcombine.high %v2151_v13, %v2158_v58  ;;  %v2415_v6 = vcombine.low %v2185_v56, %v2192_v57  ;;  %v3338_v8 = vcombine.high %v2185_v56, %v2192_v57 }
 0x4d7   : > { %v2474_v9 = vrot.slane %v2467_v59, %v3703_v4  ;;  %v2482_v10 = vrot.slane %v3339_v51, %v3703_v4  ;;  %v2490_v15 = vrot.slane %v2483_v60, %v3703_v4  ;;  %v2498_v16 = vrot.slane %v3340_v61, %v3703_v4 }
 0x4d8   : > { %v2406_v7 = vrot.slane %v2399_v62, %v3703_v4  ;;  %v2414_v23 = vrot.slane %v3337_v2, %v3703_v4  ;;  %v2422_v3 = vrot.slane %v2415_v6, %v3703_v4  ;;  %v2430_v17 = vrot.slane %v3338_v8, %v3703_v4 }
 0x4d9   : > { %v2499_v18 = vcombine.low %v2474_v9, %v2482_v10  ;;  %v2515_v0 = vcombine.low %v2490_v15, %v2498_v16  ;;  %v2355_v1 = vrot.slane %v2347_v29, %v3708_v11  ;;  %v2362_v26 = vrot.slane %v2348_v40, %v3708_v11 }
 0x4da   : > { %v2431_v20 = vcombine.low %v2406_v7, %v2414_v23  ;;  %v2447_v22 = vcombine.low %v2422_v3, %v2430_v17  ;;  %v2389_v30 = vrot.slane %v2381_v52, %v3708_v11  ;;  %v2396_v5 = vrot.slane %v2382_v44, %v3708_v11 }
 0x4db   : > { %v4069_v31 = vrot.slane %v2499_v18, %v3708_v11  ;;  %v4072_v32 = vrot.slane %v2515_v0, %v3708_v11  ;;  %v2603_v33 = vcombine.low %v2355_v1, %v2362_v26  ;;  %v3343_v14 = vcombine.high %v2355_v1, %v2362_v26 }
 0x4dc   : > { %v4075_v21 = vrot.slane %v2431_v20, %v3708_v11  ;;  %v4078_v63 = vrot.slane %v2447_v22, %v3708_v11  ;;  %v2619_v34 = vcombine.low %v2389_v30, %v2396_v5  ;;  %v3344_v37 = vcombine.high %v2389_v30, %v2396_v5 }
 0x4dd   : > { %v2532_v19 = vcombine.high %v4069_v31, %v4072_v32  ;;  %v2610_v35 = vrot.slane %v2603_v33, %v3703_v4  ;;  %v2618_v36 = vrot.slane %v3343_v14, %v3703_v4  ;;  %v2287_v38 = vrot.slane %v2279_v48, %v3708_v11 }
 0x4de   : > { %v2464_v27 = vcombine.high %v4075_v21, %v4078_v63  ;;  %v2626_v41 = vrot.slane %v2619_v34, %v3703_v4  ;;  %v2634_v42 = vrot.slane %v3344_v37, %v3703_v4  ;;  %v2294_v43 = vrot.slane %v2280_v49, %v3708_v11 }
 0x4df   : > { %2677 = vrot.lane.b32.xlu0 %v2532_v19, %s3545_s23  ;;  %v2635_v45 = vcombine.low %v2610_v35, %v2618_v36  ;;  %v2321_v46 = vrot.slane %v2313_v28, %v3708_v11  ;;  %v2328_v39 = vrot.slane %v2314_v50, %v3708_v11  ;;  %v2500_v47 = vcombine.high %v2474_v9, %v2482_v10 }
 0x4e0   : > { %2675 = vrot.lane.b32.xlu1 %v2464_v27, %s3545_s23  ;;  %v2651_v48 = vcombine.low %v2626_v41, %v2634_v42  ;;  %v2535_v29 = vcombine.low %v2287_v38, %v2294_v43  ;;  %v3341_v40 = vcombine.high %v2287_v38, %v2294_v43  ;;  %v2516_v52 = vcombine.high %v2490_v15, %v2498_v16 }
 0x4e1   : > { %v4095_v44 = vrot.slane %v2635_v45, %v3708_v11  ;;  %v2551_v53 = vcombine.low %v2321_v46, %v2328_v39  ;;  %v3342_v54 = vcombine.high %v2321_v46, %v2328_v39  ;;  %v2514_v49 = vrot.slane %v2500_v47, %v3708_v11  ;;  %v3505_v46 = vld [vmem:[%s3620_s12 + $0x8] sm:$0xf] }
 0x4e2   : > { %v2659_v55 = vrot.slane %v2651_v48, %v3708_v11  ;;  %v2542_v28 = vrot.slane %v2535_v29, %v3703_v4  ;;  %v2550_v50 = vrot.slane %v3341_v40, %v3703_v4  ;;  %v2530_v12 = vrot.slane %v2516_v52, %v3708_v11  ;;  %v3506_v48 = vld [vmem:[%s3620_s12 + $0xc] sm:$0xf] }
 0x4e3   : > { %v2558_v13 = vrot.slane %v2551_v53, %v3703_v4  ;;  %v2566_v58 = vrot.slane %v3342_v54, %v3703_v4  ;;  %v2432_v56 = vcombine.high %v2406_v7, %v2414_v23  ;;  %v2448_v57 = vcombine.high %v2422_v3, %v2430_v17 }
 0x4e4   : > { %v2668_v59 = vcombine.high %v4095_v44, %v2659_v55  ;;  %v2567_v51 = vcombine.low %v2542_v28, %v2550_v50  ;;  %v2533_v60 = vcombine.low %v2514_v49, %v2530_v12  ;;  %v2636_v61 = vcombine.high %v2610_v35, %v2618_v36 }
 0x4e5   : > { %v2583_v62 = vcombine.low %v2558_v13, %v2566_v58  ;;  %v2446_v2 = vrot.slane %v2432_v56, %v3708_v11  ;;  %v2462_v6 = vrot.slane %v2448_v57, %v3708_v11  ;;  %v2652_v8 = vcombine.high %v2626_v41, %v2634_v42 }
 0x4e6   : > { %2681 = vrot.lane.b32.xlu0 %v2668_v59, %s3545_s23  ;;  %v2575_v9 = vrot.slane %v2567_v51, %v3708_v11  ;;  %v2650_v10 = vrot.slane %v2636_v61, %v3708_v11  ;;  %v2568_v4 = vcombine.high %v2542_v28, %v2550_v50  ;;  %v2584_v15 = vcombine.high %v2558_v13, %v2566_v58  ;;  %v3507_v13 = vld [vmem:[%s3620_s12] sm:$0xf]  ;;  %v3508_v59 = vld [vmem:[%s3620_s12 + $0x4] sm:$0xf] }
 0x4e7   : > { %v2591_v16 = vrot.slane %v2583_v62, %v3708_v11  ;;  %v2465_v7 = vcombine.low %v2446_v2, %v2462_v6  ;;  %v2666_v23 = vrot.slane %v2652_v8, %v3708_v11  ;;  %v2534_v3 = vcombine.high %v2514_v49, %v2530_v12 }
 0x4e8   : > { %v2582_v17 = vrot.slane %v2568_v4, %v3708_v11  ;;  %v2598_v18 = vrot.slane %v2584_v15, %v3708_v11  ;;  %v2466_v0 = vcombine.high %v2446_v2, %v2462_v6  ;;  %v2531_v1 = vcombine.low %v4069_v31, %v4072_v32  ;;  %v3509_v2 = vld [vmem:[%s3620_s12 + $0x10] sm:$0xf]  ;;  %v3511_v4 = vld [vmem:[%s3620_s12 + $0x1c] sm:$0xf] }
 0x4e9   : > { %v2600_v26 = vcombine.high %v2575_v9, %v2591_v16  ;;  %v2669_v20 = vcombine.low %v2650_v10, %v2666_v23  ;;  %v2670_v22 = vcombine.high %v2650_v10, %v2666_v23  ;;  %v2463_v30 = vcombine.low %v4075_v21, %v4078_v63 }
 0x4ea   : > { %2693 = vrot.lane.b32.xlu0 %v2533_v60, %s3544_s22  ;;  %v2601_v5 = vcombine.low %v2582_v17, %v2598_v18  ;;  %v2602_v33 = vcombine.high %v2582_v17, %v2598_v18  ;;  %v2667_v14 = vcombine.low %v4095_v44, %v2659_v55  ;;  %v2599_v34 = vcombine.low %v2575_v9, %v2591_v16  ;;  %v3510_v9 = vld [vmem:[%s3620_s12 + $0x14] sm:$0xf]  ;;  %v3512_v16 = vld [vmem:[%s3620_s12 + $0x18] sm:$0xf] }
 0x4eb   : > { %2679 = vrot.lane.b32.xlu1 %v2600_v26, %s3545_s23 }
 0x4ee   : > { %2697 = vrot.lane.b32.xlu0 %v2669_v20, %s3544_s22 }
 0x4ef   : > { %2691 = vrot.lane.b32.xlu1 %v2465_v7, %s3544_s22 }
 0x4f2   : > { %2709 = vrot.lane.b32.xlu0 %v2534_v3, %s3546_s24 }
 0x4f3   : > { %2695 = vrot.lane.b32.xlu1 %v2601_v5, %s3544_s22 }
 0x4f6   : > { %2713 = vrot.lane.b32.xlu0 %v2670_v22, %s3546_s24 }
 0x4f7   : > { %2707 = vrot.lane.b32.xlu1 %v2466_v0, %s3546_s24 }
 0x4fb   : > { %2711 = vrot.lane.b32.xlu1 %v2602_v33, %s3546_s24 }
 0x551   : > { %v2678_v11 = vpop.permute.xlu0 %2677 }
 0x552   : > { %v2676_v31 = vpop.permute.xlu1 %2675  ;;  %v2720_v35 = vsel %vm1603_vm2, %v2531_v1, %v2678_v11 }
 0x553   : > { %v2719_v43 = vsel %vm1603_vm2, %v2463_v30, %v2676_v31 }
 0x558   : > { %v2682_v32 = vpop.permute.xlu0 %2681 }
 0x559   : > { %v2722_v45 = vsel %vm1603_vm2, %v2667_v14, %v2682_v32 }
 0x55c   : > { %v2694_v21 = vpop.permute.xlu0 %2693 }
 0x55d   : > { %v2680_v63 = vpop.permute.xlu1 %2679  ;;  %v2724_v36 = vsel %vm1608_vm3, %v2720_v35, %v2694_v21 }
 0x55e   : > { %v2721_v28 = vsel %vm1603_vm2, %v2599_v34, %v2680_v63 }
 0x560   : > { %v2698_v37 = vpop.permute.xlu0 %2697 }
 0x561   : > { %v2692_v19 = vpop.permute.xlu1 %2691  ;;  %v2726_v52 = vsel %vm1608_vm3, %v2722_v45, %v2698_v37 }
 0x562   : > { %v2723_v40 = vsel %vm1608_vm3, %v2719_v43, %v2692_v19 }
 0x564   : > { %v2710_v38 = vpop.permute.xlu0 %2709 }
 0x565   : > { %v2696_v27 = vpop.permute.xlu1 %2695  ;;  %v2728_v41 = vsel %vm1613_vm4, %v2724_v36, %v2710_v38 }
 0x566   : > { %v2736_v42 = vcombine.high %v2728_v41, %v2728_v41  ;;  %v2745_v39 = vadd.f32 %v3505_v46, %v2728_v41  ;;  %v2725_v12 = vsel %vm1608_vm3, %v2721_v28, %v2696_v27 }
 0x568   : > { %v2714_v47 = vpop.permute.xlu0 %2713  ;;  %v2746_v29 = vadd.f32 %v3506_v48, %v2736_v42 }
 0x569   : > { %v2708_v44 = vpop.permute.xlu1 %2707  ;;  %v2730_v54 = vsel %vm1613_vm4, %v2726_v52, %v2714_v47 }
 0x56a   : > { %v2727_v53 = vsel %vm1613_vm4, %v2723_v40, %v2708_v44  ;;  %v4139_v49 = vcombine.low %v2745_v39, %v2746_v29  ;;  %v2738_v56 = vcombine.high %v2730_v54, %v2730_v54  ;;  %v2749_v7 = vadd.f32 %v3512_v16, %v2730_v54 }
 0x56b   : > { %v2735_v55 = vcombine.high %v2727_v53, %v2727_v53  ;;  %v2743_v58 = vadd.f32 %v3507_v13, %v2727_v53 }
 0x56c   : > { %v2770_v50 = vsel %vm385_vm0, %v4139_v49, 0.0  ;;  %v2750_v15 = vadd.f32 %v3511_v4, %v2738_v56  ;;  %v3486_v56 = vld [vmem:[%s4246_s4 + $0x8] sm:$0xff]  }
 0x56d   : > { %v2712_v57 = vpop.permute.xlu1 %2711  ;;  %2771 = vadd.xlane.f32.xlu0 %v2770_v50  ;;  %v2744_v51 = vadd.f32 %v3508_v59, %v2735_v55 }
 0x56e   : > { %v2729_v60 = vsel %vm1613_vm4, %v2725_v12, %v2712_v57  ;;  %v4160_v17 = vcombine.low %v2749_v7, %v2750_v15 }
 0x56f   : > { %v2737_v61 = vcombine.high %v2729_v60, %v2729_v60  ;;  %v4148_v62 = vcombine.low %v2743_v58, %v2744_v51  ;;  %v2747_v6 = vadd.f32 %v3509_v2, %v2729_v60 }
 0x570   : > { %v2776_v18 = vsel %vm385_vm0, %v4160_v17, 0.0 }
 0x571   : > { %v2767_v8 = vsel %vm385_vm0, %v4148_v62, 0.0  ;;  %v2748_v10 = vadd.f32 %v3510_v9, %v2737_v61 }
 0x572   : > { %2768 = vadd.xlane.f32.xlu1 %v2767_v8 }
 0x573   : > { %v4156_v23 = vcombine.low %v2747_v6, %v2748_v10 }
 0x575   : > { %v2773_v3 = vsel %vm385_vm0, %v4156_v23, 0.0 }
 0x576   : > { %2774 = vadd.xlane.f32.xlu0 %v2773_v3 }
 0x57a   : > { %2777 = vadd.xlane.f32.xlu0 %v2776_v18 }
 0x5fa   : > { %v2772_v0 = vpop.xlane.xlu0 %2771 }
 0x5fb   : > { %v2780_v1 = vmul.f32 0.03125, %v2772_v0 }
 0x5fd   : > { %v2807_v26 = vrot.slane %v2780_v1, %v3637_v24  ;;  %v2814_v20 = vrot.slane %v2780_v1, %v3640_v25 }
 0x5ff   : > { %v4166_v22 = vsub.f32 %v2745_v39, %v2807_v26  ;;  %v4168_v30 = vsub.f32 %v2746_v29, %v2814_v20  ;;  %v2769_v5 = vpop.xlane.xlu1 %2768 }
 0x600   : > { %v2779_v33 = vmul.f32 0.03125, %v2769_v5 }
 0x601   : > { %v2861_v14 = vmul.f32 %v4166_v22, %v4166_v22  ;;  %v2862_v34 = vmul.f32 %v4168_v30, %v4168_v30 }
 0x602   : > { %v2793_v11 = vrot.slane %v2779_v33, %v3637_v24  ;;  %v2800_v31 = vrot.slane %v2779_v33, %v3640_v25 }
 0x603   : > { %v2775_v32 = vpop.xlane.xlu0 %2774  ;;  %v2876_v21 = vcombine.low %v2861_v14, %v2862_v34 }
 0x604   : > { %v2851_v63 = vsub.f32 %v2743_v58, %v2793_v11  ;;  %v2852_v37 = vsub.f32 %v2744_v51, %v2800_v31  ;;  %v2781_v19 = vmul.f32 0.03125, %v2775_v32  ;;  %v3485_v58 = vld [vmem:[%s4246_s4] sm:$0xff]  }
 0x605   : > { %v2886_v35 = vsel %vm385_vm0, %v2876_v21, 0.0  ;;  %3412 = vmatprep.subr.bf16.mxu0 %v3485_v58 }
 0x606   : > { %v2821_v36 = vrot.slane %v2781_v19, %v3637_v24  ;;  %v2828_v38 = vrot.slane %v2781_v19, %v3640_v25  ;;  %2887 = vadd.xlane.f32.xlu0 %v2886_v35  ;;  %v2859_v27 = vmul.f32 %v2851_v63, %v2851_v63  ;;  %v2860_v41 = vmul.f32 %v2852_v37, %v2852_v37 }
 0x607   : > { %v2778_v42 = vpop.xlane.xlu0 %2777  ;;  %3413 = vmatpush3.bf16.msra.mxu0 %v3485_v58 }
 0x608   : > { %v2855_v43 = vsub.f32 %v2747_v6, %v2821_v36  ;;  %v2856_v45 = vsub.f32 %v2748_v10, %v2828_v38  ;;  %v2782_v46 = vmul.f32 0.03125, %v2778_v42  ;;  %v2875_v39 = vcombine.low %v2859_v27, %v2860_v41  ;;  %3414 = vmatprep.subr.bf16.mxu0 %v3486_v56  ;;  %v3487_v42 = vld [vmem:[%s4248_s6] sm:$0xff]  }
 0x609   : > { %3420 = vmatprep.subr.bf16.mxu1 %v3487_v42 }
 0x60a   : > { %v2835_v47 = vrot.slane %v2782_v46, %v3637_v24  ;;  %v2842_v48 = vrot.slane %v2782_v46, %v3640_v25  ;;  %v2883_v29 = vsel %vm385_vm0, %v2875_v39, 0.0  ;;  %v2863_v40 = vmul.f32 %v2855_v43, %v2855_v43  ;;  %3421 = vmatpush3.bf16.msra.mxu1 %v3487_v42 }
 0x60b   : > { %2884 = vadd.xlane.f32.xlu1 %v2883_v29  ;;  %v2864_v52 = vmul.f32 %v2856_v45, %v2856_v45  ;;  %3415 = vmatpush3.bf16.msra.mxu0 %v3486_v56 }
 0x60c   : > { %v2857_v44 = vsub.f32 %v2749_v7, %v2835_v47  ;;  %v2858_v53 = vsub.f32 %v2750_v15, %v2842_v48 }
 0x60d   : > { %v2877_v54 = vcombine.low %v2863_v40, %v2864_v52 }
 0x60e   : > { %v2865_v55 = vmul.f32 %v2857_v44, %v2857_v44  ;;  %v2866_v28 = vmul.f32 %v2858_v53, %v2858_v53 }
 0x60f   : > { %v2889_v50 = vsel %vm385_vm0, %v2877_v54, 0.0 }
 0x610   : > { %2890 = vadd.xlane.f32.xlu1 %v2889_v50  ;;  %v2878_v12 = vcombine.low %v2865_v55, %v2866_v28  ;;  %v3350_v50 = vld [vmem:[%s4249_s7] ss:$0 sm:$0xff] }
 0x612   : > { %v2892_v13 = vsel %vm385_vm0, %v2878_v12, 0.0 }
 0x613   : > { %2893 = vadd.xlane.f32.xlu0 %v2892_v13 }
 0x693   : > { %v2888_v57 = vpop.xlane.xlu0 %2887 }
 0x694   : > { %v2896_v59 = vmul.f32 0.03125, %v2888_v57 }
 0x696   : > { %v2900_v51 = vadd.f32 1e-05, %v2896_v59 }
 0x698   : > { %3497 = vrsqrt.f32 %v2900_v51  ;;  %v2885_v60 = vpop.xlane.xlu1 %2884 }
 0x699   : > { %v2895_v61 = vmul.f32 0.03125, %v2885_v60 }
 0x69b   : > { %v2899_v2 = vadd.f32 1e-05, %v2895_v61 }
 0x69d   : > { %3499 = vrsqrt.f32 %v2899_v2  ;;  %v2891_v6 = vpop.xlane.xlu1 %2890 }
 0x69e   : > { %v2897_v8 = vmul.f32 0.03125, %v2891_v6 }
 0x6a0   : > { %v2901_v9 = vadd.f32 1e-05, %v2897_v8  ;;  %v2894_v10 = vpop.xlane.xlu0 %2893 }
 0x6a1   : > { %v2898_v4 = vmul.f32 0.03125, %v2894_v10 }
 0x6a2   : > { %v3498_v15 = vpop.eup %3497  ;;  %3501 = vrsqrt.f32 %v2901_v9 }
 0x6a3   : > { %v2931_v16 = vrot.slane %v3498_v15, %v3637_v24  ;;  %v2938_v7 = vrot.slane %v3498_v15, %v3640_v25  ;;  %v2902_v3 = vadd.f32 1e-05, %v2898_v4 }
 0x6a5   : > { %3503 = vrsqrt.f32 %v2902_v3  ;;  %v2977_v18 = vmul.f32 %v2931_v16, %v4166_v22  ;;  %v2978_v0 = vmul.f32 %v2938_v7, %v4168_v30 }
 0x6a7   : > { %v3500_v1 = vpop.eup %3499  ;;  %v2992_v14 = vcombine.low %v2977_v18, %v2978_v0 }
 0x6a8   : > { %v2917_v26 = vrot.slane %v3500_v1, %v3637_v24  ;;  %v2924_v20 = vrot.slane %v3500_v1, %v3640_v25 }
 0x6aa   : > { %v2975_v5 = vmul.f32 %v2917_v26, %v2851_v63  ;;  %v2976_v33 = vmul.f32 %v2924_v20, %v2852_v37 }
 0x6ac   : > { %v3502_v34 = vpop.eup %3501  ;;  %v2991_v11 = vcombine.low %v2975_v5, %v2976_v33 }
 0x6ad   : > { %v2945_v31 = vrot.slane %v3502_v34, %v3637_v24  ;;  %v2952_v32 = vrot.slane %v3502_v34, %v3640_v25 }
 0x6ae   : > { %v2999_v21 = vpack.c.bf16 %v2992_v14, %v2991_v11 }
 0x6af   : > { %v3504_v19 = vpop.eup %3503  ;;  %v2979_v35 = vmul.f32 %v2945_v31, %v2855_v43  ;;  %v2980_v22 = vmul.f32 %v2952_v32, %v2856_v45 }
 0x6b0   : > { %v2959_v30 = vrot.slane %v3504_v19, %v3637_v24  ;;  %v2966_v36 = vrot.slane %v3504_v19, %v3640_v25  ;;  %3416 = vmatprep.mubr.msk.bf16.mxu0 %vm385_vm0, %v2999_v21  ;;  %v3488_v24 = vld [vmem:[%s4248_s6 + $0x8] sm:$0xff]   ;;  %v3345_v25 = vld [vmem:[%s4247_s5] ss:$0 sm:$0xff] }
 0x6b1   : > { %v2993_v37 = vcombine.low %v2979_v35, %v2980_v22  ;;  %3422 = vmatprep.subr.bf16.mxu1 %v3488_v24 }
 0x6b2   : > { %v2981_v38 = vmul.f32 %v2959_v30, %v2857_v44  ;;  %v2982_v63 = vmul.f32 %v2966_v36, %v2858_v53  ;;  %3423 = vmatpush3.bf16.msra.mxu1 %v3488_v24 }
 0x6b4   : > { %v2994_v27 = vcombine.low %v2981_v38, %v2982_v63 }
 0x6b6   : > { %v3000_v41 = vpack.c.bf16 %v2994_v27, %v2993_v37 }
 0x6b8   : > { %3417 = vmatmul.mubr.msk.bf16.vlgmr.msra.gmra.mrb[8].mxu0 %vm385_vm0, %v3000_v41 }
 0x78b   : > { %v3418_v43 = vpop.f32.mrb[8].mxu0 }
 0x78c   : > { %v3073_v45 = vadd.f32 %v3418_v43, %v3345_v25  ;;  %v3064_v46 = vpop.f32.mrb[9].mxu0 }
 0x78d   : > { %v3065_v39 = vadd.f32 %v3345_v25, %v3064_v46  ;;  %v3419_v47 = vpop.f32.mrb[10].mxu0 }
 0x78e   : > { %v3076_v48 = vadd.f32 %v3419_v47, %v3345_v25  ;;  %v3067_v29 = vpop.f32.mrb[11].mxu0  ;;  %v3081_v52 = vmax.f32 %v3073_v45, 0.0 }
 0x78f   : > { %v3068_v40 = vadd.f32 %v3345_v25, %v3067_v29  ;;  %v3079_v53 = vmax.f32 %v3065_v39, 0.0 }
 0x790   : > { %v3082_v44 = vmax.f32 %v3076_v48, 0.0 }
 0x791   : > { %v3080_v54 = vmax.f32 %v3068_v40, 0.0 }
 0x792   : > { %v3084_v55 = vpack.c.bf16 %v3082_v44, %v3081_v52 }
 0x793   : > { %v3083_v28 = vpack.c.bf16 %v3080_v54, %v3079_v53 }
 0x795   : > { %3424 = vmatprep.mubr.msk.bf16.mxu1 %vm385_vm0, %v3083_v28 }
 0x796   : > { %3425 = vmatmul.mubr.msk.bf16.vlgmr.msra.gmra.mrb[12].mxu1 %vm385_vm0, %v3084_v55 }
 0x869   : > { %v3426_v12 = vpop.f32.mrb[12].mxu1 }
 0x86a   : > { %v3157_v13 = vadd.f32 %v3426_v12, %v3350_v50  ;;  %v3148_v58 = vpop.f32.mrb[13].mxu1 }
 0x86b   : > { %v3149_v56 = vadd.f32 %v3350_v50, %v3148_v58  ;;  %v3427_v57 = vpop.f32.mrb[14].mxu1 }
 0x86c   : > { %v3165_v59 = vadd.f32 %v3157_v13, %v4156_v23  ;;  %v3160_v51 = vadd.f32 %v3427_v57, %v3350_v50  ;;  %v3151_v60 = vpop.f32.mrb[15].mxu1 }
 0x86d   : > { %v3163_v61 = vadd.f32 %v3149_v56, %v4148_v62  ;;  %v3152_v2 = vadd.f32 %v3350_v50, %v3151_v60 }
 0x86e   : > { %v3173_v6 = vcombine.high %v3165_v59, %v3165_v59  ;;  %3184 = vst.msk [vmem:[%s359_s26 + $0x10] sm:$0xf] %vm3179_vm6, %v3165_v59  ;;  %v3166_v8 = vadd.f32 %v3160_v51, %v4160_v17 }
 0x86f   : > { %v3171_v9 = vcombine.high %v3163_v61, %v3163_v61  ;;  %3180 = vst.msk [vmem:[%s359_s26] sm:$0xf] %vm3179_vm6, %v3163_v61  ;;  %v3164_v10 = vadd.f32 %v3152_v2, %v4139_v49 }
 0x870   : > { %3185 = vst.msk [vmem:[%s359_s26 + $0x14] sm:$0xf] %vm3179_vm6, %v3173_v6  ;;  %v3174_v4 = vcombine.high %v3166_v8, %v3166_v8  ;;  %3186 = vst.msk [vmem:[%s359_s26 + $0x18] sm:$0xf] %vm3179_vm6, %v3166_v8 }
 0x871   : > { %3181 = vst.msk [vmem:[%s359_s26 + $0x4] sm:$0xf] %vm3179_vm6, %v3171_v9  ;;  %v3172_v23 = vcombine.high %v3164_v10, %v3164_v10  ;;  %3182 = vst.msk [vmem:[%s359_s26 + $0x8] sm:$0xf] %vm3179_vm6, %v3164_v10 }
 0x872   : > { %3187 = vst.msk [vmem:[%s359_s26 + $0x1c] sm:$0xf] %vm3179_vm6, %v3174_v4 }
 0x873   : > { %3183 = vst.msk [vmem:[%s359_s26 + $0xc] sm:$0xf] %vm3179_vm6, %v3172_v23 }
 0x874 PF: > { %s18_s29 = sadd.s32 1, %s3535_s29   ;;  %s4251_s27 = smov %s3531_s28 }
 0x875   : > { %p15_p5 = scmp.ge.s32.totalorder %s18_s29, 4   ;;  %s4252_s28 = smov %s4254_s30 }
 0x877   :  { %17 = sbr.rel (!%p15_p5) target bundleno = 2 (0x2), region = 85 }

</bundles_post_ra>
